<compile_context>
chip_gen: v6e
topology: v6e:2x2x1
jax: 0.10.0
libtpu: 0.0.40
codegen_flags: <defaults>
</compile_context>

<pallas_src>
import functools

import jax
import jax.numpy as jnp
from jax.experimental import pallas as pl
from jax.experimental.pallas import tpu as pltpu

# --------------------------------------------------------------------------
# model hyper-parameters (scaled-down SAM2)
# --------------------------------------------------------------------------
IMG_SIZE = 64                 # scaled from 1024
EMBED_DIM = 64                # transformer_dim, scaled from 256
MLP_DIM = 128                 # two-way transformer MLP dim, scaled from 2048
NUM_HEADS = 2
NUM_MASK_TOKENS = 4
BB_FEAT_SIZES = [(16, 16), (8, 8), (4, 4)]   # scaled from (256,256),(128,128),(64,64)

LN_EPS = 1e-5                 # torch.nn.LayerNorm default


# --------------------------------------------------------------------------
# Pallas kernels
# --------------------------------------------------------------------------
def _linear_kernel(x_ref, w_ref, b_ref, o_ref, *, act):
    # x: (M, K) bf16, w: (K, N) bf16, b: (1, N) f32  -> o: (M, N) f32
    y = jnp.dot(x_ref[...], w_ref[...], preferred_element_type=jnp.float32)
    y = y + b_ref[...]
    if act == "relu":
        y = jnp.maximum(y, 0.0)
    o_ref[...] = y


def fused_linear(x, w, b=None, act="none"):
    """Fused (matmul + bias + optional relu) on full-array VMEM blocks."""
    shp = x.shape
    x2 = x.reshape(-1, shp[-1])
    M = x2.shape[0]
    N = w.shape[-1]
    if b is None:
        b = jnp.zeros((N,), jnp.float32)
    out = pl.pallas_call(
        functools.partial(_linear_kernel, act=act),
        out_shape=jax.ShapeDtypeStruct((M, N), jnp.float32),
    )(x2.astype(jnp.bfloat16),
      w.astype(jnp.bfloat16),
      b.reshape(1, N).astype(jnp.float32))
    return out.reshape(*shp[:-1], N)


def _mlp2_res_ln_kernel(x_ref, w1_ref, b1_ref, w2_ref, b2_ref,
                        lnw_ref, lnb_ref, o_ref, *, eps):
    # Fused: LN( x + relu(x @ w1 + b1) @ w2 + b2 )
    x = x_ref[...]                                               # (M, C) f32
    h = jnp.dot(x.astype(jnp.bfloat16), w1_ref[...],
                preferred_element_type=jnp.float32) + b1_ref[...]
    h = jnp.maximum(h, 0.0)
    y = jnp.dot(h.astype(jnp.bfloat16), w2_ref[...],
                preferred_element_type=jnp.float32) + b2_ref[...]
    y = x + y                                                    # residual
    mu = jnp.mean(y, axis=-1, keepdims=True)
    var = jnp.mean((y - mu) ** 2, axis=-1, keepdims=True)
    o_ref[...] = (y - mu) * jax.lax.rsqrt(var + eps) * lnw_ref[...] + lnb_ref[...]


def fused_mlp2_res_ln(x, w1, b1, w2, b2, ln_w, ln_b):
    """LN(x + MLP(x)); x last dim must equal w2 output dim."""
    shp = x.shape
    C = shp[-1]
    x2 = x.reshape(-1, C).astype(jnp.float32)
    out = pl.pallas_call(
        functools.partial(_mlp2_res_ln_kernel, eps=LN_EPS),
        out_shape=jax.ShapeDtypeStruct((x2.shape[0], C), jnp.float32),
    )(x2,
      w1.astype(jnp.bfloat16), b1.reshape(1, -1).astype(jnp.float32),
      w2.astype(jnp.bfloat16), b2.reshape(1, -1).astype(jnp.float32),
      ln_w.reshape(1, C).astype(jnp.float32),
      ln_b.reshape(1, C).astype(jnp.float32))
    return out.reshape(*shp)


def _attn_kernel(xq_ref, xk_ref, xv_ref, res_ref,
                 wq_ref, bq_ref, wk_ref, bk_ref, wv_ref, bv_ref,
                 wo_ref, bo_ref, lnw_ref, lnb_ref, o_ref, *, num_heads, eps):
    """Whole SAM attention module (+ residual + LayerNorm) for one batch elem."""
    xq = xq_ref[0]                       # (Lq, C)  bf16
    xk = xk_ref[0]                       # (Lk, C)  bf16
    xv = xv_ref[0]                       # (Lk, C)  bf16

    q = jnp.dot(xq, wq_ref[...], preferred_element_type=jnp.float32) + bq_ref[...]
    k = jnp.dot(xk, wk_ref[...], preferred_element_type=jnp.float32) + bk_ref[...]
    v = jnp.dot(xv, wv_ref[...], preferred_element_type=jnp.float32) + bv_ref[...]

    internal = q.shape[-1]
    dh = internal // num_heads
    scale = 1.0 / (float(dh) ** 0.5)
    lq = o_ref.shape[1]
    c_out = o_ref.shape[2]

    acc = jnp.zeros((lq, c_out), jnp.float32)
    for h in range(num_heads):
        sl = slice(h * dh, (h + 1) * dh)
        qh = q[:, sl]
        kh = k[:, sl]
        vh = v[:, sl]
        # scores = qh @ kh^T  (contract last dims; no explicit transpose)
        s = jax.lax.dot_general(qh, kh, (((1,), (1,)), ((), ())),
                                preferred_element_type=jnp.float32) * scale
        p = jax.nn.softmax(s, axis=-1)
        oh = jnp.dot(p.astype(jnp.bfloat16), vh.astype(jnp.bfloat16),
                     preferred_element_type=jnp.float32)          # (Lq, dh)
        # fold the output projection per head: out @ wo == sum_h oh @ wo[rows_h]
        acc = acc + jnp.dot(oh.astype(jnp.bfloat16), wo_ref[sl, :],
                            preferred_element_type=jnp.float32)

    y = res_ref[0] + acc + bo_ref[...]                            # residual
    mu = jnp.mean(y, axis=-1, keepdims=True)
    var = jnp.mean((y - mu) ** 2, axis=-1, keepdims=True)
    o_ref[0] = (y - mu) * jax.lax.rsqrt(var + eps) * lnw_ref[...] + lnb_ref[...]


def pallas_attention_ln(x_q, x_k, x_v, residual, ln_w, ln_b, p, num_heads):
    """SAM-style Attention + residual + LayerNorm fused in one pallas_call."""
    B, Lq, C = x_q.shape
    Lk = x_k.shape[1]
    Ci = p["q_w"].shape[1]

    wq = p["q_w"].astype(jnp.bfloat16)
    wk = p["k_w"].astype(jnp.bfloat16)
    wv = p["v_w"].astype(jnp.bfloat16)
    wo = p["o_w"].astype(jnp.bfloat16)
    bq = p["q_b"].reshape(1, Ci).astype(jnp.float32)
    bk = p["k_b"].reshape(1, Ci).astype(jnp.float32)
    bv = p["v_b"].reshape(1, Ci).astype(jnp.float32)
    bo = p["o_b"].reshape(1, C).astype(jnp.float32)

    return pl.pallas_call(
        functools.partial(_attn_kernel, num_heads=num_heads, eps=LN_EPS),
        out_shape=jax.ShapeDtypeStruct((B, Lq, C), jnp.float32),
        grid_spec=pltpu.PrefetchScalarGridSpec(
            num_scalar_prefetch=0,
            grid=(B,),
            in_specs=[
                pl.BlockSpec((1, Lq, C), lambda i: (i, 0, 0)),   # xq
                pl.BlockSpec((1, Lk, C), lambda i: (i, 0, 0)),   # xk
                pl.BlockSpec((1, Lk, C), lambda i: (i, 0, 0)),   # xv
                pl.BlockSpec((1, Lq, C), lambda i: (i, 0, 0)),   # residual
                pl.BlockSpec((C, Ci), lambda i: (0, 0)),         # wq
                pl.BlockSpec((1, Ci), lambda i: (0, 0)),         # bq
                pl.BlockSpec((C, Ci), lambda i: (0, 0)),         # wk
                pl.BlockSpec((1, Ci), lambda i: (0, 0)),         # bk
                pl.BlockSpec((C, Ci), lambda i: (0, 0)),         # wv
                pl.BlockSpec((1, Ci), lambda i: (0, 0)),         # bv
                pl.BlockSpec((Ci, C), lambda i: (0, 0)),         # wo
                pl.BlockSpec((1, C), lambda i: (0, 0)),          # bo
                pl.BlockSpec((1, C), lambda i: (0, 0)),          # ln_w
                pl.BlockSpec((1, C), lambda i: (0, 0)),          # ln_b
            ],
            out_specs=pl.BlockSpec((1, Lq, C), lambda i: (i, 0, 0)),
        ),
        compiler_params=pltpu.CompilerParams(
            dimension_semantics=("parallel",)),
    )(x_q.astype(jnp.bfloat16), x_k.astype(jnp.bfloat16),
      x_v.astype(jnp.bfloat16), residual.astype(jnp.float32),
      wq, bq, wk, bk, wv, bv, wo, bo,
      ln_w.reshape(1, C).astype(jnp.float32),
      ln_b.reshape(1, C).astype(jnp.float32))


def _hyper_mlp_kernel(x_ref, w0_ref, b0_ref, w1_ref, b1_ref, w2_ref, b2_ref,
                      o_ref):
    # One of NUM_MASK_TOKENS hyper-MLPs per grid step: 3 linears + 2 relus.
    x = x_ref[0]                                                    # (B, C) bf16
    h = jnp.dot(x, w0_ref[0], preferred_element_type=jnp.float32) + b0_ref[0]
    h = jnp.maximum(h, 0.0)
    h = jnp.dot(h.astype(jnp.bfloat16), w1_ref[0],
                preferred_element_type=jnp.float32) + b1_ref[0]
    h = jnp.maximum(h, 0.0)
    o_ref[0] = jnp.dot(h.astype(jnp.bfloat16), w2_ref[0],
                       preferred_element_type=jnp.float32) + b2_ref[0]


def hyper_mlps_batched(x_stacked, p):
    """x_stacked: (T, B, C) -> (T, B, C_out); one pallas_call for all T MLPs."""
    T, B, C = x_stacked.shape
    C_out = p["hyper_w2"].shape[-1]
    return pl.pallas_call(
        _hyper_mlp_kernel,
        out_shape=jax.ShapeDtypeStruct((T, B, C_out), jnp.float32),
        grid_spec=pltpu.PrefetchScalarGridSpec(
            num_scalar_prefetch=0,
            grid=(T,),
            in_specs=[
                pl.BlockSpec((1, B, C), lambda i: (i, 0, 0)),
                pl.BlockSpec((1, C, C), lambda i: (i, 0, 0)),
                pl.BlockSpec((1, 1, C), lambda i: (i, 0, 0)),
                pl.BlockSpec((1, C, C), lambda i: (i, 0, 0)),
                pl.BlockSpec((1, 1, C), lambda i: (i, 0, 0)),
                pl.BlockSpec((1, C, C_out), lambda i: (i, 0, 0)),
                pl.BlockSpec((1, 1, C_out), lambda i: (i, 0, 0)),
            ],
            out_specs=pl.BlockSpec((1, B, C_out), lambda i: (i, 0, 0)),
        ),
        compiler_params=pltpu.CompilerParams(
            dimension_semantics=("parallel",)),
    )(x_stacked.astype(jnp.bfloat16),
      p["hyper_w0"].astype(jnp.bfloat16),
      p["hyper_b0"].reshape(T, 1, C).astype(jnp.float32),
      p["hyper_w1"].astype(jnp.bfloat16),
      p["hyper_b1"].reshape(T, 1, C).astype(jnp.float32),
      p["hyper_w2"].astype(jnp.bfloat16),
      p["hyper_b2"].reshape(T, 1, C_out).astype(jnp.float32))


def _bmm_kernel(a_ref, b_ref, o_ref):
    o_ref[0] = jnp.dot(a_ref[0], b_ref[0], preferred_element_type=jnp.float32)


def pallas_bmm(a, b):
    """Batched matmul with full-array blocks, batch axis sharded across cores."""
    B, M, K = a.shape
    N = b.shape[-1]
    return pl.pallas_call(
        _bmm_kernel,
        out_shape=jax.ShapeDtypeStruct((B, M, N), jnp.float32),
        grid_spec=pltpu.PrefetchScalarGridSpec(
            num_scalar_prefetch=0,
            grid=(B,),
            in_specs=[pl.BlockSpec((1, M, K), lambda i: (i, 0, 0)),
                      pl.BlockSpec((1, K, N), lambda i: (i, 0, 0))],
            out_specs=pl.BlockSpec((1, M, N), lambda i: (i, 0, 0)),
        ),
        compiler_params=pltpu.CompilerParams(
            dimension_semantics=("parallel",)),
    )(a.astype(jnp.bfloat16), b.astype(jnp.bfloat16))


# --------------------------------------------------------------------------
# small building blocks (glue in JAX, matmul hot paths in Pallas)
# --------------------------------------------------------------------------
def xla_linear(x, w, b=None):
    """Tiny/degenerate matmuls (N=1, N=4, K=2) stay in plain XLA."""
    y = jnp.matmul(x, w)
    if b is not None:
        y = y + b
    return y


def xla_mlp3(x, p):
    x = jax.nn.relu(xla_linear(x, p["w0"], p["b0"]))
    x = jax.nn.relu(xla_linear(x, p["w1"], p["b1"]))
    return xla_linear(x, p["w2"], p["b2"])


def layer_norm_2d(x, w, b, eps=1e-6):
    # SAM2 LayerNorm2d: normalize over the channel dim of an NCHW tensor
    u = x.mean(1, keepdims=True)
    s = ((x - u) ** 2).mean(1, keepdims=True)
    x = (x - u) / jnp.sqrt(s + eps)
    return x * w[None, :, None, None] + b[None, :, None, None]


def gelu(x):
    return jax.nn.gelu(x, approximate=False)   # matches torch.nn.GELU()


def conv_patchify(x, w, b, k):
    """Conv2d with stride == kernel (non-overlapping patches) as fused matmul."""
    B, Cin, H, W = x.shape
    Ho, Wo = H // k, W // k
    patches = (x.reshape(B, Cin, Ho, k, Wo, k)
                 .transpose(0, 2, 4, 1, 3, 5)
                 .reshape(B * Ho * Wo, Cin * k * k))
    wm = w.reshape(w.shape[0], -1).T            # (Cin*k*k, Cout)
    y = fused_linear(patches, wm, b)            # bias fused in the kernel
    return y.reshape(B, Ho, Wo, -1).transpose(0, 3, 1, 2)


def conv_transpose_2x2(x, w, b):
    """ConvTranspose2d(kernel=2, stride=2) as a fused matmul. w: (Cin,Cout,2,2)."""
    B, Cin, H, W = x.shape
    Cout = w.shape[1]
    xm = x.transpose(0, 2, 3, 1).reshape(B * H * W, Cin)
    wm = w.reshape(Cin, Cout * 4)
    bm = jnp.repeat(b, 4)                       # per output column bias
    y = fused_linear(xm, wm, bm)
    y = y.reshape(B, H, W, Cout, 2, 2)
    return y.transpose(0, 3, 1, 4, 2, 5).reshape(B, Cout, 2 * H, 2 * W)


# --------------------------------------------------------------------------
# positional encoding (PositionEmbeddingRandom)
# --------------------------------------------------------------------------
def pe_encoding(coords01, gauss):
    c = 2.0 * coords01 - 1.0
    c = jnp.matmul(c, gauss)            # K=2 degenerate matmul -> plain XLA
    c = 2.0 * jnp.pi * c
    return jnp.concatenate([jnp.sin(c), jnp.cos(c)], axis=-1)


def dense_pe(h, w, gauss):
    ys = (jnp.arange(h, dtype=jnp.float32) + 0.5) / h
    xs = (jnp.arange(w, dtype=jnp.float32) + 0.5) / w
    xg, yg = jnp.meshgrid(xs, ys)                       # (h, w) each
    coords = jnp.stack([xg, yg], axis=-1)               # (h, w, 2)
    pe = pe_encoding(coords, gauss)                     # (h, w, C)
    return pe.transpose(2, 0, 1)[None]                  # (1, C, h, w)


# --------------------------------------------------------------------------
# image encoder (synthetic strided-conv pyramid standing in for Hiera+FPN)
# --------------------------------------------------------------------------
def image_encoder(image, p):
    f0 = conv_patchify(image, p['conv1_w'], p['conv1_b'], 4)   # (B, C/8, 16, 16)
    f1 = conv_patchify(f0, p['conv2_w'], p['conv2_b'], 2)      # (B, C/4,  8,  8)
    f2 = conv_patchify(f1, p['conv3_w'], p['conv3_b'], 2)      # (B, C,    4,  4)
    # directly_add_no_mem_embed: add no_mem_embed to lowest-res feat in (HW, B, C)
    B, C, h, w = f2.shape
    v = f2.reshape(B, C, h * w).transpose(2, 0, 1) + p['no_mem_embed']  # (HW, B, C)
    f2 = v.transpose(1, 2, 0).reshape(B, C, h, w)
    return {'image_embed': f2, 'high_res_feats': [f0, f1]}


# --------------------------------------------------------------------------
# prompt encoder (box -> two corner points with labels 2, 3; pad point label -1)
# --------------------------------------------------------------------------
def prompt_encoder(box, p, img_size, embed_dim, grid_hw):
    B = box.shape[0]
    coords = box.reshape(-1, 2, 2).astype(jnp.float32)             # (B, 2, 2)
    labels = jnp.tile(jnp.array([[2, 3]], jnp.int32), (B, 1))       # (B, 2)

    pts = coords + 0.5                                              # pixel centers
    pts = jnp.concatenate([pts, jnp.zeros((B, 1, 2), jnp.float32)], axis=1)
    lbl = jnp.concatenate([labels, -jnp.ones((B, 1), jnp.int32)], axis=1)

    norm = pts / jnp.array([img_size, img_size], jnp.float32)       # x/W, y/H
    pe = pe_encoding(norm, p['pe_gauss'])                           # (B, 3, C)

    emb = jnp.where(lbl[..., None] == -1, 0.0, pe)
    emb = jnp.where(lbl[..., None] == -1, emb + p['not_a_point'], emb)
    for i in range(4):
        emb = jnp.where(lbl[..., None] == i, emb + p['point_embed'][i], emb)
    sparse = emb                                                    # (B, 3, C)

    h, w = grid_hw
    dense = jnp.broadcast_to(p['no_mask_embed'].reshape(1, embed_dim, 1, 1),
                             (B, embed_dim, h, w))
    return sparse, dense


# --------------------------------------------------------------------------
# mask decoder (two-way transformer + upscaling + hypernetwork mask dot)
# --------------------------------------------------------------------------
def twoway_block(queries, keys, query_pe, key_pe, p, num_heads, skip_first_layer_pe):
    # self attention (+ residual + norm1) -- first layer has no pe / residual
    if skip_first_layer_pe:
        res = jnp.zeros_like(queries)
        queries = pallas_attention_ln(queries, queries, queries, res,
                                      p['norm1_w'], p['norm1_b'],
                                      p['self_attn'], num_heads)
    else:
        q = queries + query_pe
        queries = pallas_attention_ln(q, q, queries, queries,
                                      p['norm1_w'], p['norm1_b'],
                                      p['self_attn'], num_heads)

    # cross attention token -> image (+ residual + norm2)
    q = queries + query_pe
    k = keys + key_pe
    queries = pallas_attention_ln(q, k, keys, queries,
                                  p['norm2_w'], p['norm2_b'],
                                  p['cross_t2i'], num_heads)

    # MLP (+ residual + norm3) fused in one kernel
    queries = fused_mlp2_res_ln(queries, p['mlp_w1'], p['mlp_b1'],
                                p['mlp_w2'], p['mlp_b2'],
                                p['norm3_w'], p['norm3_b'])

    # cross attention image -> token (+ residual + norm4)
    q = queries + query_pe
    k = keys + key_pe
    keys = pallas_attention_ln(k, q, queries, keys,
                               p['norm4_w'], p['norm4_b'],
                               p['cross_i2t'], num_heads)
    return queries, keys


def mask_decoder(image_embed, image_pe, sparse, dense, high_res_feats, p):
    B = sparse.shape[0]

    output_tokens = jnp.concatenate(
        [p['obj_score_token'], p['iou_token'], p['mask_tokens']], axis=0)   # (6, C)
    tokens = jnp.concatenate(
        [jnp.broadcast_to(output_tokens[None], (B,) + output_tokens.shape), sparse],
        axis=1)                                                             # (B, 9, C)

    src = image_embed + dense                                               # (B, C, 4, 4)
    pos_src = jnp.broadcast_to(image_pe, src.shape)
    b, c, h, w = src.shape

    img = src.reshape(b, c, h * w).transpose(0, 2, 1)                       # (B, 16, C)
    img_pe = pos_src.reshape(b, c, h * w).transpose(0, 2, 1)

    queries, keys = tokens, img
    for li, layer in enumerate(p['twoway_layers']):
        queries, keys = twoway_block(queries, keys, tokens, img_pe, layer,
                                     NUM_HEADS, skip_first_layer_pe=(li == 0))
    # final attention token -> image (+ residual + norm_final) fused
    q = queries + tokens
    k = keys + img_pe
    queries = pallas_attention_ln(q, k, keys, queries,
                                  p['norm_final_w'], p['norm_final_b'],
                                  p['final_attn'], NUM_HEADS)
    hs, src_out = queries, keys

    s = 1                                   # obj_score token at index 0
    iou_token_out = hs[:, s, :]
    mask_tokens_out = hs[:, s + 1: s + 1 + NUM_MASK_TOKENS, :]

    src2 = src_out.transpose(0, 2, 1).reshape(b, c, h, w)
    feat_s0, feat_s1 = high_res_feats
    up1 = conv_transpose_2x2(src2, p['dc1_w'], p['dc1_b']) + feat_s1        # (B, C/4, 8, 8)
    up1 = gelu(layer_norm_2d(up1, p['ln1_w'], p['ln1_b']))
    up2 = gelu(conv_transpose_2x2(up1, p['dc2_w'], p['dc2_b']) + feat_s0)   # (B, C/8, 16, 16)

    # 4 hyper-network MLPs -> one batched Pallas kernel (grid over mask tokens)
    hyper_in = hyper_mlps_batched(
        mask_tokens_out.transpose(1, 0, 2), p)                              # (4, B, C/8)
    hyper_in = hyper_in.transpose(1, 0, 2)                                  # (B, 4, C/8)

    bsz, c8, hh, ww = up2.shape
    masks = pallas_bmm(hyper_in, up2.reshape(bsz, c8, hh * ww)).reshape(bsz, -1, hh, ww)

    # degenerate heads (N=4, N=1) -> plain XLA, not standalone pallas_calls
    iou_pred = xla_mlp3(iou_token_out, p['iou_mlp'])                        # (B, 4)
    object_score_logits = xla_linear(hs[:, 0, :], p['obj_w'], p['obj_b'])   # (B, 1)

    # multimask_output=False
    masks = masks[:, 0:1]
    iou_pred = iou_pred[:, 0:1]
    sam_tokens_out = mask_tokens_out[:, 0:1]
    return masks, iou_pred, sam_tokens_out, object_score_logits


# --------------------------------------------------------------------------
# full forward
# --------------------------------------------------------------------------
@jax.jit
def finetuned_sam2_forward(params, image, box):
    """image: (B, 3, IMG_SIZE, IMG_SIZE);  box: (B, 4) in pixel coords."""
    B = image.shape[0]
    feats = image_encoder(image, params['enc'])
    img_embed, high_res = feats['image_embed'], feats['high_res_feats']

    sparse, dense = prompt_encoder(box, params['prompt'],
                                   IMG_SIZE, EMBED_DIM, BB_FEAT_SIZES[-1])
    image_pe = dense_pe(*BB_FEAT_SIZES[-1], params['prompt']['pe_gauss'])

    low_res_masks, _iou, _tok, _obj = mask_decoder(
        img_embed, image_pe, sparse, dense, high_res, params['dec'])

    # SAM2Transforms.postprocess_masks (max_hole_area == 0): bilinear resize
    resized = jax.image.resize(
        low_res_masks,
        (B, low_res_masks.shape[1], image.shape[2], image.shape[3]),
        method='bilinear')
    return resized


# --------------------------------------------------------------------------
# deterministic parameter initialization
# --------------------------------------------------------------------------
def init_params(key):
    it = iter(jax.random.split(key, 256))

    def nrm(shape, scale=0.02):
        return (scale * jax.random.normal(next(it), shape)).astype(jnp.float32)

    def zeros(shape):
        return jnp.zeros(shape, jnp.float32)

    def ones(shape):
        return jnp.ones(shape, jnp.float32)

    def attn_p(dim, internal):
        return dict(q_w=nrm((dim, internal)), q_b=zeros((internal,)),
                    k_w=nrm((dim, internal)), k_b=zeros((internal,)),
                    v_w=nrm((dim, internal)), v_b=zeros((internal,)),
                    o_w=nrm((internal, dim)), o_b=zeros((dim,)))

    def mlp3_p(din, dh, dout):
        return dict(w0=nrm((din, dh)), b0=zeros((dh,)),
                    w1=nrm((dh, dh)), b1=zeros((dh,)),
                    w2=nrm((dh, dout)), b2=zeros((dout,)))

    C = EMBED_DIM
    enc = dict(conv1_w=nrm((C // 8, 3, 4, 4)), conv1_b=zeros((C // 8,)),
               conv2_w=nrm((C // 4, C // 8, 2, 2)), conv2_b=zeros((C // 4,)),
               conv3_w=nrm((C, C // 4, 2, 2)), conv3_b=zeros((C,)),
               no_mem_embed=nrm((1, 1, C)))

    prompt = dict(pe_gauss=nrm((2, C // 2), scale=1.0),
                  point_embed=nrm((4, C)),
                  not_a_point=nrm((C,)),
                  no_mask_embed=nrm((C,)))

    def twoway_layer():
        return dict(self_attn=attn_p(C, C),
                    cross_t2i=attn_p(C, C // 2),
                    mlp_w1=nrm((C, MLP_DIM)), mlp_b1=zeros((MLP_DIM,)),
                    mlp_w2=nrm((MLP_DIM, C)), mlp_b2=zeros((C,)),
                    cross_i2t=attn_p(C, C // 2),
                    norm1_w=ones((C,)), norm1_b=zeros((C,)),
                    norm2_w=ones((C,)), norm2_b=zeros((C,)),
                    norm3_w=ones((C,)), norm3_b=zeros((C,)),
                    norm4_w=ones((C,)), norm4_b=zeros((C,)))

    dec = dict(obj_score_token=nrm((1, C)),
               iou_token=nrm((1, C)),
               mask_tokens=nrm((NUM_MASK_TOKENS, C)),
               twoway_layers=[twoway_layer(), twoway_layer()],
               final_attn=attn_p(C, C // 2),
               norm_final_w=ones((C,)), norm_final_b=zeros((C,)),
               dc1_w=nrm((C, C // 4, 2, 2)), dc1_b=zeros((C // 4,)),
               ln1_w=ones((C // 4,)), ln1_b=zeros((C // 4,)),
               dc2_w=nrm((C // 4, C // 8, 2, 2)), dc2_b=zeros((C // 8,)),
               # hyper-network MLPs, stacked so all 4 run in one kernel
               hyper_w0=nrm((NUM_MASK_TOKENS, C, C)),
               hyper_b0=zeros((NUM_MASK_TOKENS, C)),
               hyper_w1=nrm((NUM_MASK_TOKENS, C, C)),
               hyper_b1=zeros((NUM_MASK_TOKENS, C)),
               hyper_w2=nrm((NUM_MASK_TOKENS, C, C // 8)),
               hyper_b2=zeros((NUM_MASK_TOKENS, C // 8)),
               iou_mlp=mlp3_p(C, C, NUM_MASK_TOKENS),
               obj_w=nrm((C, 1)), obj_b=zeros((1,)))

    return dict(enc=enc, prompt=prompt, dec=dec)


# --------------------------------------------------------------------------
if __name__ == "__main__":
    key = jax.random.PRNGKey(0)
    k_param, k_img = jax.random.split(key)

    params = init_params(k_param)

    B = 2
    image = jax.random.normal(k_img, (B, 3, IMG_SIZE, IMG_SIZE), jnp.float32)
    # box given as (B, 4) = (x0, y0, x1, y1) in pixel coords (the ndim==2 branch
    # of the reference forward), reshaped internally to (B, 2, 2).
    box = jnp.array([[8.0, 8.0, 48.0, 48.0],
                     [4.0, 16.0, 40.0, 56.0]], jnp.float32)

    out = finetuned_sam2_forward(params, image, box)
    out = jax.block_until_ready(out)

    assert out.shape == (B, 1, IMG_SIZE, IMG_SIZE), out.shape
    assert jnp.all(jnp.isfinite(out))
    print("KERNEL_OK")
</pallas_src>

<mosaic_0001>
module attributes {stable_mosaic.version = 11 : i64} {
  func.func @_attn_kernel(%arg0: i32, %arg1: memref<1x9x64xbf16, #tpu.memory_space<vmem>>, %arg2: memref<1x9x64xbf16, #tpu.memory_space<vmem>>, %arg3: memref<1x9x64xbf16, #tpu.memory_space<vmem>>, %arg4: memref<1x9x64xf32, #tpu.memory_space<vmem>>, %arg5: memref<64x64xbf16, #tpu.memory_space<vmem>>, %arg6: memref<1x64xf32, #tpu.memory_space<vmem>>, %arg7: memref<64x64xbf16, #tpu.memory_space<vmem>>, %arg8: memref<1x64xf32, #tpu.memory_space<vmem>>, %arg9: memref<64x64xbf16, #tpu.memory_space<vmem>>, %arg10: memref<1x64xf32, #tpu.memory_space<vmem>>, %arg11: memref<64x64xbf16, #tpu.memory_space<vmem>>, %arg12: memref<1x64xf32, #tpu.memory_space<vmem>>, %arg13: memref<1x64xf32, #tpu.memory_space<vmem>>, %arg14: memref<1x64xf32, #tpu.memory_space<vmem>>, %arg15: memref<1x9x64xf32, #tpu.memory_space<vmem>>) attributes {dimension_semantics = [#tpu.dimension_semantics<parallel>], iteration_bounds = array<i64: 2>, scalar_prefetch = 0 : i64, scratch_operands = 0 : i64, tpu.core_type = #tpu.core_type<tc>, window_params = [{transform_indices = @transform_0, window_bounds = array<i64: 1, 9, 64>}, {transform_indices = @transform_1, window_bounds = array<i64: 1, 9, 64>}, {transform_indices = @transform_2, window_bounds = array<i64: 1, 9, 64>}, {transform_indices = @transform_3, window_bounds = array<i64: 1, 9, 64>}, {pipeline_mode = #tpu.pipeline_mode<synchronous>, transform_indices = @transform_4, window_bounds = array<i64: 64, 64>}, {pipeline_mode = #tpu.pipeline_mode<synchronous>, transform_indices = @transform_5, window_bounds = array<i64: 1, 64>}, {pipeline_mode = #tpu.pipeline_mode<synchronous>, transform_indices = @transform_6, window_bounds = array<i64: 64, 64>}, {pipeline_mode = #tpu.pipeline_mode<synchronous>, transform_indices = @transform_7, window_bounds = array<i64: 1, 64>}, {pipeline_mode = #tpu.pipeline_mode<synchronous>, transform_indices = @transform_8, window_bounds = array<i64: 64, 64>}, {pipeline_mode = #tpu.pipeline_mode<synchronous>, transform_indices = @transform_9, window_bounds = array<i64: 1, 64>}, {pipeline_mode = #tpu.pipeline_mode<synchronous>, transform_indices = @transform_10, window_bounds = array<i64: 64, 64>}, {pipeline_mode = #tpu.pipeline_mode<synchronous>, transform_indices = @transform_11, window_bounds = array<i64: 1, 64>}, {pipeline_mode = #tpu.pipeline_mode<synchronous>, transform_indices = @transform_12, window_bounds = array<i64: 1, 64>}, {pipeline_mode = #tpu.pipeline_mode<synchronous>, transform_indices = @transform_13, window_bounds = array<i64: 1, 64>}, {transform_indices = @transform_14, window_bounds = array<i64: 1, 9, 64>}]} {
    %c0 = arith.constant 0 : index
    %c0_0 = arith.constant 0 : index
    %c0_1 = arith.constant 0 : index
    %0 = vector.load %arg1[%c0, %c0_0, %c0_1] : memref<1x9x64xbf16, #tpu.memory_space<vmem>>, vector<1x9x64xbf16>
    %1 = vector.shape_cast %0 : vector<1x9x64xbf16> to vector<9x64xbf16>
    %c0_2 = arith.constant 0 : index
    %c0_3 = arith.constant 0 : index
    %c0_4 = arith.constant 0 : index
    %2 = vector.load %arg2[%c0_2, %c0_3, %c0_4] : memref<1x9x64xbf16, #tpu.memory_space<vmem>>, vector<1x9x64xbf16>
    %3 = vector.shape_cast %2 : vector<1x9x64xbf16> to vector<9x64xbf16>
    %c0_5 = arith.constant 0 : index
    %c0_6 = arith.constant 0 : index
    %c0_7 = arith.constant 0 : index
    %4 = vector.load %arg3[%c0_5, %c0_6, %c0_7] : memref<1x9x64xbf16, #tpu.memory_space<vmem>>, vector<1x9x64xbf16>
    %5 = vector.shape_cast %4 : vector<1x9x64xbf16> to vector<9x64xbf16>
    %c0_8 = arith.constant 0 : index
    %c0_9 = arith.constant 0 : index
    %6 = vector.load %arg5[%c0_8, %c0_9] : memref<64x64xbf16, #tpu.memory_space<vmem>>, vector<64x64xbf16>
    %cst = arith.constant dense<0.000000e+00> : vector<9x64xf32>
    %7 = tpu.matmul %1, %6, %cst {dimension_numbers = #tpu.dot_dimension_numbers<[1], [0], [0], [1], [0, 0, 1, 1], [], []>} : vector<9x64xbf16>, vector<64x64xbf16>, vector<9x64xf32> -> vector<9x64xf32>
    %c0_10 = arith.constant 0 : index
    %c0_11 = arith.constant 0 : index
    %8 = vector.load %arg6[%c0_10, %c0_11] : memref<1x64xf32, #tpu.memory_space<vmem>>, vector<1x64xf32>
    %9 = vector.broadcast %8 : vector<1x64xf32> to vector<9x64xf32>
    %10 = arith.addf %7, %9 : vector<9x64xf32>
    %c0_12 = arith.constant 0 : index
    %c0_13 = arith.constant 0 : index
    %11 = vector.load %arg7[%c0_12, %c0_13] : memref<64x64xbf16, #tpu.memory_space<vmem>>, vector<64x64xbf16>
    %cst_14 = arith.constant dense<0.000000e+00> : vector<9x64xf32>
    %12 = tpu.matmul %3, %11, %cst_14 {dimension_numbers = #tpu.dot_dimension_numbers<[1], [0], [0], [1], [0, 0, 1, 1], [], []>} : vector<9x64xbf16>, vector<64x64xbf16>, vector<9x64xf32> -> vector<9x64xf32>
    %c0_15 = arith.constant 0 : index
    %c0_16 = arith.constant 0 : index
    %13 = vector.load %arg8[%c0_15, %c0_16] : memref<1x64xf32, #tpu.memory_space<vmem>>, vector<1x64xf32>
    %14 = vector.broadcast %13 : vector<1x64xf32> to vector<9x64xf32>
    %15 = arith.addf %12, %14 : vector<9x64xf32>
    %c0_17 = arith.constant 0 : index
    %c0_18 = arith.constant 0 : index
    %16 = vector.load %arg9[%c0_17, %c0_18] : memref<64x64xbf16, #tpu.memory_space<vmem>>, vector<64x64xbf16>
    %cst_19 = arith.constant dense<0.000000e+00> : vector<9x64xf32>
    %17 = tpu.matmul %5, %16, %cst_19 {dimension_numbers = #tpu.dot_dimension_numbers<[1], [0], [0], [1], [0, 0, 1, 1], [], []>} : vector<9x64xbf16>, vector<64x64xbf16>, vector<9x64xf32> -> vector<9x64xf32>
    %c0_20 = arith.constant 0 : index
    %c0_21 = arith.constant 0 : index
    %18 = vector.load %arg10[%c0_20, %c0_21] : memref<1x64xf32, #tpu.memory_space<vmem>>, vector<1x64xf32>
    %19 = vector.broadcast %18 : vector<1x64xf32> to vector<9x64xf32>
    %20 = arith.addf %17, %19 : vector<9x64xf32>
    %cst_22 = arith.constant 0.000000e+00 : f32
    %21 = vector.broadcast %cst_22 : f32 to vector<9x64xf32>
    %22 = vector.extract_strided_slice %10 {offsets = [0, 0], sizes = [9, 32], strides = [1, 1]} : vector<9x64xf32> to vector<9x32xf32>
    %23 = vector.extract_strided_slice %15 {offsets = [0, 0], sizes = [9, 32], strides = [1, 1]} : vector<9x64xf32> to vector<9x32xf32>
    %24 = vector.extract_strided_slice %20 {offsets = [0, 0], sizes = [9, 32], strides = [1, 1]} : vector<9x64xf32> to vector<9x32xf32>
    %cst_23 = arith.constant dense<0.000000e+00> : vector<9x9xf32>
    %25 = tpu.matmul %22, %23, %cst_23 {dimension_numbers = #tpu.dot_dimension_numbers<[1], [1], [0], [0], [0, 0, 1, 0], [], []>} : vector<9x32xf32>, vector<9x32xf32>, vector<9x9xf32> -> vector<9x9xf32>
    %cst_24 = arith.constant 0.176776692 : f32
    %26 = vector.broadcast %cst_24 : f32 to vector<9x9xf32>
    %27 = arith.mulf %25, %26 : vector<9x9xf32>
    %cst_25 = arith.constant dense<0xFF800000> : vector<9xf32>
    %28 = vector.multi_reduction <maximumf>, %27, %cst_25 [1] : vector<9x9xf32> to vector<9xf32>
    %cst_26 = arith.constant 0xFF800000 : f32
    %29 = vector.broadcast %cst_26 : f32 to vector<9xf32>
    %30 = arith.maximumf %29, %28 : vector<9xf32>
    %31 = vector.shape_cast %30 : vector<9xf32> to vector<9x1xf32>
    %32 = vector.broadcast %31 : vector<9x1xf32> to vector<9x9xf32>
    %33 = arith.subf %27, %32 : vector<9x9xf32>
    %34 = math.exp %33 : vector<9x9xf32>
    %cst_27 = arith.constant dense<0.000000e+00> : vector<9xf32>
    %35 = vector.multi_reduction <add>, %34, %cst_27 [1] : vector<9x9xf32> to vector<9xf32>
    %36 = vector.shape_cast %35 : vector<9xf32> to vector<9x1xf32>
    %37 = vector.broadcast %36 : vector<9x1xf32> to vector<9x9xf32>
    %38 = arith.divf %34, %37 : vector<9x9xf32>
    %39 = arith.truncf %38 : vector<9x9xf32> to vector<9x9xbf16>
    %40 = arith.truncf %24 : vector<9x32xf32> to vector<9x32xbf16>
    %cst_28 = arith.constant dense<0.000000e+00> : vector<9x32xf32>
    %41 = tpu.matmul %39, %40, %cst_28 {dimension_numbers = #tpu.dot_dimension_numbers<[1], [0], [0], [1], [0, 0, 1, 1], [], []>} : vector<9x9xbf16>, vector<9x32xbf16>, vector<9x32xf32> -> vector<9x32xf32>
    %42 = arith.truncf %41 : vector<9x32xf32> to vector<9x32xbf16>
    %c0_29 = arith.constant 0 : index
    %c0_30 = arith.constant 0 : index
    %43 = vector.load %arg11[%c0_29, %c0_30] : memref<64x64xbf16, #tpu.memory_space<vmem>>, vector<32x64xbf16>
    %cst_31 = arith.constant dense<0.000000e+00> : vector<9x64xf32>
    %44 = tpu.matmul %42, %43, %cst_31 {dimension_numbers = #tpu.dot_dimension_numbers<[1], [0], [0], [1], [0, 0, 1, 1], [], []>} : vector<9x32xbf16>, vector<32x64xbf16>, vector<9x64xf32> -> vector<9x64xf32>
    %45 = arith.addf %21, %44 : vector<9x64xf32>
    %46 = vector.extract_strided_slice %10 {offsets = [0, 32], sizes = [9, 32], strides = [1, 1]} : vector<9x64xf32> to vector<9x32xf32>
    %47 = vector.extract_strided_slice %15 {offsets = [0, 32], sizes = [9, 32], strides = [1, 1]} : vector<9x64xf32> to vector<9x32xf32>
    %48 = vector.extract_strided_slice %20 {offsets = [0, 32], sizes = [9, 32], strides = [1, 1]} : vector<9x64xf32> to vector<9x32xf32>
    %cst_32 = arith.constant dense<0.000000e+00> : vector<9x9xf32>
    %49 = tpu.matmul %46, %47, %cst_32 {dimension_numbers = #tpu.dot_dimension_numbers<[1], [1], [0], [0], [0, 0, 1, 0], [], []>} : vector<9x32xf32>, vector<9x32xf32>, vector<9x9xf32> -> vector<9x9xf32>
    %cst_33 = arith.constant 0.176776692 : f32
    %50 = vector.broadcast %cst_33 : f32 to vector<9x9xf32>
    %51 = arith.mulf %49, %50 : vector<9x9xf32>
    %cst_34 = arith.constant dense<0xFF800000> : vector<9xf32>
    %52 = vector.multi_reduction <maximumf>, %51, %cst_34 [1] : vector<9x9xf32> to vector<9xf32>
    %cst_35 = arith.constant 0xFF800000 : f32
    %53 = vector.broadcast %cst_35 : f32 to vector<9xf32>
    %54 = arith.maximumf %53, %52 : vector<9xf32>
    %55 = vector.shape_cast %54 : vector<9xf32> to vector<9x1xf32>
    %56 = vector.broadcast %55 : vector<9x1xf32> to vector<9x9xf32>
    %57 = arith.subf %51, %56 : vector<9x9xf32>
    %58 = math.exp %57 : vector<9x9xf32>
    %cst_36 = arith.constant dense<0.000000e+00> : vector<9xf32>
    %59 = vector.multi_reduction <add>, %58, %cst_36 [1] : vector<9x9xf32> to vector<9xf32>
    %60 = vector.shape_cast %59 : vector<9xf32> to vector<9x1xf32>
    %61 = vector.broadcast %60 : vector<9x1xf32> to vector<9x9xf32>
    %62 = arith.divf %58, %61 : vector<9x9xf32>
    %63 = arith.truncf %62 : vector<9x9xf32> to vector<9x9xbf16>
    %64 = arith.truncf %48 : vector<9x32xf32> to vector<9x32xbf16>
    %cst_37 = arith.constant dense<0.000000e+00> : vector<9x32xf32>
    %65 = tpu.matmul %63, %64, %cst_37 {dimension_numbers = #tpu.dot_dimension_numbers<[1], [0], [0], [1], [0, 0, 1, 1], [], []>} : vector<9x9xbf16>, vector<9x32xbf16>, vector<9x32xf32> -> vector<9x32xf32>
    %66 = arith.truncf %65 : vector<9x32xf32> to vector<9x32xbf16>
    %c32 = arith.constant 32 : index
    %c0_38 = arith.constant 0 : index
    %67 = vector.load %arg11[%c32, %c0_38] : memref<64x64xbf16, #tpu.memory_space<vmem>>, vector<32x64xbf16>
    %cst_39 = arith.constant dense<0.000000e+00> : vector<9x64xf32>
    %68 = tpu.matmul %66, %67, %cst_39 {dimension_numbers = #tpu.dot_dimension_numbers<[1], [0], [0], [1], [0, 0, 1, 1], [], []>} : vector<9x32xbf16>, vector<32x64xbf16>, vector<9x64xf32> -> vector<9x64xf32>
    %69 = arith.addf %45, %68 : vector<9x64xf32>
    %c0_40 = arith.constant 0 : index
    %c0_41 = arith.constant 0 : index
    %c0_42 = arith.constant 0 : index
    %70 = vector.load %arg4[%c0_40, %c0_41, %c0_42] : memref<1x9x64xf32, #tpu.memory_space<vmem>>, vector<1x9x64xf32>
    %71 = vector.shape_cast %70 : vector<1x9x64xf32> to vector<9x64xf32>
    %72 = arith.addf %71, %69 : vector<9x64xf32>
    %c0_43 = arith.constant 0 : index
    %c0_44 = arith.constant 0 : index
    %73 = vector.load %arg12[%c0_43, %c0_44] : memref<1x64xf32, #tpu.memory_space<vmem>>, vector<1x64xf32>
    %74 = vector.broadcast %73 : vector<1x64xf32> to vector<9x64xf32>
    %75 = arith.addf %72, %74 : vector<9x64xf32>
    %cst_45 = arith.constant dense<0.000000e+00> : vector<9xf32>
    %76 = vector.multi_reduction <add>, %75, %cst_45 [1] : vector<9x64xf32> to vector<9xf32>
    %77 = vector.shape_cast %76 : vector<9xf32> to vector<9x1xf32>
    %cst_46 = arith.constant 6.400000e+01 : f32
    %78 = vector.broadcast %cst_46 : f32 to vector<9x1xf32>
    %79 = arith.divf %77, %78 : vector<9x1xf32>
    %80 = vector.broadcast %79 : vector<9x1xf32> to vector<9x64xf32>
    %81 = arith.subf %75, %80 : vector<9x64xf32>
    %82 = arith.mulf %81, %81 : vector<9x64xf32>
    %cst_47 = arith.constant dense<0.000000e+00> : vector<9xf32>
    %83 = vector.multi_reduction <add>, %82, %cst_47 [1] : vector<9x64xf32> to vector<9xf32>
    %84 = vector.shape_cast %83 : vector<9xf32> to vector<9x1xf32>
    %cst_48 = arith.constant 6.400000e+01 : f32
    %85 = vector.broadcast %cst_48 : f32 to vector<9x1xf32>
    %86 = arith.divf %84, %85 : vector<9x1xf32>
    %87 = vector.broadcast %79 : vector<9x1xf32> to vector<9x64xf32>
    %88 = arith.subf %75, %87 : vector<9x64xf32>
    %cst_49 = arith.constant 9.99999974E-6 : f32
    %89 = vector.broadcast %cst_49 : f32 to vector<9x1xf32>
    %90 = arith.addf %86, %89 : vector<9x1xf32>
    %91 = math.rsqrt %90 : vector<9x1xf32>
    %92 = vector.broadcast %91 : vector<9x1xf32> to vector<9x64xf32>
    %93 = arith.mulf %88, %92 : vector<9x64xf32>
    %c0_50 = arith.constant 0 : index
    %c0_51 = arith.constant 0 : index
    %94 = vector.load %arg13[%c0_50, %c0_51] : memref<1x64xf32, #tpu.memory_space<vmem>>, vector<1x64xf32>
    %95 = vector.broadcast %94 : vector<1x64xf32> to vector<9x64xf32>
    %96 = arith.mulf %93, %95 : vector<9x64xf32>
    %c0_52 = arith.constant 0 : index
    %c0_53 = arith.constant 0 : index
    %97 = vector.load %arg14[%c0_52, %c0_53] : memref<1x64xf32, #tpu.memory_space<vmem>>, vector<1x64xf32>
    %98 = vector.broadcast %97 : vector<1x64xf32> to vector<9x64xf32>
    %99 = arith.addf %96, %98 : vector<9x64xf32>
    %c0_54 = arith.constant 0 : index
    %c0_55 = arith.constant 0 : index
    %c0_56 = arith.constant 0 : index
    %100 = vector.load %arg15[%c0_54, %c0_55, %c0_56] : memref<1x9x64xf32, #tpu.memory_space<vmem>>, vector<1x9x64xf32>
    %101 = vector.shape_cast %100 : vector<1x9x64xf32> to vector<9x64xf32>
    %102 = vector.shape_cast %99 : vector<9x64xf32> to vector<1x9x64xf32>
    tpu.vector_store %arg15[%c0_54, %c0_55, %c0_56], %102 {strides = array<i32>} : memref<1x9x64xf32, #tpu.memory_space<vmem>>, vector<1x9x64xf32>,
    return
  }
  func.func @transform_0(%arg0: i32) -> (i32, i32, i32) {
    %c0_i32 = arith.constant 0 : i32
    %c0_i32_0 = arith.constant 0 : i32
    %c0_i32_1 = arith.constant 0 : i32
    return %arg0, %c0_i32, %c0_i32_0 : i32, i32, i32
  }
  func.func @transform_1(%arg0: i32) -> (i32, i32, i32) {
    %c0_i32 = arith.constant 0 : i32
    %c0_i32_0 = arith.constant 0 : i32
    %c0_i32_1 = arith.constant 0 : i32
    return %arg0, %c0_i32, %c0_i32_0 : i32, i32, i32
  }
  func.func @transform_2(%arg0: i32) -> (i32, i32, i32) {
    %c0_i32 = arith.constant 0 : i32
    %c0_i32_0 = arith.constant 0 : i32
    %c0_i32_1 = arith.constant 0 : i32
    return %arg0, %c0_i32, %c0_i32_0 : i32, i32, i32
  }
  func.func @transform_3(%arg0: i32) -> (i32, i32, i32) {
    %c0_i32 = arith.constant 0 : i32
    %c0_i32_0 = arith.constant 0 : i32
    %c0_i32_1 = arith.constant 0 : i32
    return %arg0, %c0_i32, %c0_i32_0 : i32, i32, i32
  }
  func.func @transform_4(%arg0: i32) -> (i32, i32) {
    %c0_i32 = arith.constant 0 : i32
    %c0_i32_0 = arith.constant 0 : i32
    %c0_i32_1 = arith.constant 0 : i32
    return %c0_i32, %c0_i32_0 : i32, i32
  }
  func.func @transform_5(%arg0: i32) -> (i32, i32) {
    %c0_i32 = arith.constant 0 : i32
    %c0_i32_0 = arith.constant 0 : i32
    %c0_i32_1 = arith.constant 0 : i32
    return %c0_i32, %c0_i32_0 : i32, i32
  }
  func.func @transform_6(%arg0: i32) -> (i32, i32) {
    %c0_i32 = arith.constant 0 : i32
    %c0_i32_0 = arith.constant 0 : i32
    %c0_i32_1 = arith.constant 0 : i32
    return %c0_i32, %c0_i32_0 : i32, i32
  }
  func.func @transform_7(%arg0: i32) -> (i32, i32) {
    %c0_i32 = arith.constant 0 : i32
    %c0_i32_0 = arith.constant 0 : i32
    %c0_i32_1 = arith.constant 0 : i32
    return %c0_i32, %c0_i32_0 : i32, i32
  }
  func.func @transform_8(%arg0: i32) -> (i32, i32) {
    %c0_i32 = arith.constant 0 : i32
    %c0_i32_0 = arith.constant 0 : i32
    %c0_i32_1 = arith.constant 0 : i32
    return %c0_i32, %c0_i32_0 : i32, i32
  }
  func.func @transform_9(%arg0: i32) -> (i32, i32) {
    %c0_i32 = arith.constant 0 : i32
    %c0_i32_0 = arith.constant 0 : i32
    %c0_i32_1 = arith.constant 0 : i32
    return %c0_i32, %c0_i32_0 : i32, i32
  }
  func.func @transform_10(%arg0: i32) -> (i32, i32) {
    %c0_i32 = arith.constant 0 : i32
    %c0_i32_0 = arith.constant 0 : i32
    %c0_i32_1 = arith.constant 0 : i32
    return %c0_i32, %c0_i32_0 : i32, i32
  }
  func.func @transform_11(%arg0: i32) -> (i32, i32) {
    %c0_i32 = arith.constant 0 : i32
    %c0_i32_0 = arith.constant 0 : i32
    %c0_i32_1 = arith.constant 0 : i32
    return %c0_i32, %c0_i32_0 : i32, i32
  }
  func.func @transform_12(%arg0: i32) -> (i32, i32) {
    %c0_i32 = arith.constant 0 : i32
    %c0_i32_0 = arith.constant 0 : i32
    %c0_i32_1 = arith.constant 0 : i32
    return %c0_i32, %c0_i32_0 : i32, i32
  }
  func.func @transform_13(%arg0: i32) -> (i32, i32) {
    %c0_i32 = arith.constant 0 : i32
    %c0_i32_0 = arith.constant 0 : i32
    %c0_i32_1 = arith.constant 0 : i32
    return %c0_i32, %c0_i32_0 : i32, i32
  }
  func.func @transform_14(%arg0: i32) -> (i32, i32, i32) {
    %c0_i32 = arith.constant 0 : i32
    %c0_i32_0 = arith.constant 0 : i32
    %c0_i32_1 = arith.constant 0 : i32
    return %arg0, %c0_i32, %c0_i32_0 : i32, i32, i32
  }
}

module attributes {stable_mosaic.version = 11 : i64} {
  func.func @_linear_kernel(%arg0: memref<512x48xbf16, #tpu.memory_space<vmem>>, %arg1: memref<48x8xbf16, #tpu.memory_space<vmem>>, %arg2: memref<1x8xf32, #tpu.memory_space<vmem>>, %arg3: memref<512x8xf32, #tpu.memory_space<vmem>>) attributes {dimension_semantics = [], scalar_prefetch = 0 : i64, scratch_operands = 0 : i64, tpu.core_type = #tpu.core_type<tc>} {
    %c0 = arith.constant 0 : index
    %c0_0 = arith.constant 0 : index
    %0 = vector.load %arg0[%c0, %c0_0] : memref<512x48xbf16, #tpu.memory_space<vmem>>, vector<512x48xbf16>
    %c0_1 = arith.constant 0 : index
    %c0_2 = arith.constant 0 : index
    %1 = vector.load %arg1[%c0_1, %c0_2] : memref<48x8xbf16, #tpu.memory_space<vmem>>, vector<48x8xbf16>
    %cst = arith.constant dense<0.000000e+00> : vector<512x8xf32>
    %2 = tpu.matmul %0, %1, %cst {dimension_numbers = #tpu.dot_dimension_numbers<[1], [0], [0], [1], [0, 0, 1, 1], [], []>} : vector<512x48xbf16>, vector<48x8xbf16>, vector<512x8xf32> -> vector<512x8xf32>
    %c0_3 = arith.constant 0 : index
    %c0_4 = arith.constant 0 : index
    %3 = vector.load %arg2[%c0_3, %c0_4] : memref<1x8xf32, #tpu.memory_space<vmem>>, vector<1x8xf32>
    %4 = vector.broadcast %3 : vector<1x8xf32> to vector<512x8xf32>
    %5 = arith.addf %2, %4 : vector<512x8xf32>
    %c0_5 = arith.constant 0 : index
    %c0_6 = arith.constant 0 : index
    %6 = vector.load %arg3[%c0_5, %c0_6] : memref<512x8xf32, #tpu.memory_space<vmem>>, vector<512x8xf32>
    tpu.vector_store %arg3[%c0_5, %c0_6], %5 {strides = array<i32>} : memref<512x8xf32, #tpu.memory_space<vmem>>, vector<512x8xf32>,
    return
  }
}

module attributes {stable_mosaic.version = 11 : i64} {
  func.func @_linear_kernel(%arg0: memref<128x32xbf16, #tpu.memory_space<vmem>>, %arg1: memref<32x16xbf16, #tpu.memory_space<vmem>>, %arg2: memref<1x16xf32, #tpu.memory_space<vmem>>, %arg3: memref<128x16xf32, #tpu.memory_space<vmem>>) attributes {dimension_semantics = [], scalar_prefetch = 0 : i64, scratch_operands = 0 : i64, tpu.core_type = #tpu.core_type<tc>} {
    %c0 = arith.constant 0 : index
    %c0_0 = arith.constant 0 : index
    %0 = vector.load %arg0[%c0, %c0_0] : memref<128x32xbf16, #tpu.memory_space<vmem>>, vector<128x32xbf16>
    %c0_1 = arith.constant 0 : index
    %c0_2 = arith.constant 0 : index
    %1 = vector.load %arg1[%c0_1, %c0_2] : memref<32x16xbf16, #tpu.memory_space<vmem>>, vector<32x16xbf16>
    %cst = arith.constant dense<0.000000e+00> : vector<128x16xf32>
    %2 = tpu.matmul %0, %1, %cst {dimension_numbers = #tpu.dot_dimension_numbers<[1], [0], [0], [1], [0, 0, 1, 1], [], []>} : vector<128x32xbf16>, vector<32x16xbf16>, vector<128x16xf32> -> vector<128x16xf32>
    %c0_3 = arith.constant 0 : index
    %c0_4 = arith.constant 0 : index
    %3 = vector.load %arg2[%c0_3, %c0_4] : memref<1x16xf32, #tpu.memory_space<vmem>>, vector<1x16xf32>
    %4 = vector.broadcast %3 : vector<1x16xf32> to vector<128x16xf32>
    %5 = arith.addf %2, %4 : vector<128x16xf32>
    %c0_5 = arith.constant 0 : index
    %c0_6 = arith.constant 0 : index
    %6 = vector.load %arg3[%c0_5, %c0_6] : memref<128x16xf32, #tpu.memory_space<vmem>>, vector<128x16xf32>
    tpu.vector_store %arg3[%c0_5, %c0_6], %5 {strides = array<i32>} : memref<128x16xf32, #tpu.memory_space<vmem>>, vector<128x16xf32>,
    return
  }
}

module attributes {stable_mosaic.version = 11 : i64} {
  func.func @_linear_kernel(%arg0: memref<32x64xbf16, #tpu.memory_space<vmem>>, %arg1: memref<64x64xbf16, #tpu.memory_space<vmem>>, %arg2: memref<1x64xf32, #tpu.memory_space<vmem>>, %arg3: memref<32x64xf32, #tpu.memory_space<vmem>>) attributes {dimension_semantics = [], scalar_prefetch = 0 : i64, scratch_operands = 0 : i64, tpu.core_type = #tpu.core_type<tc>} {
    %c0 = arith.constant 0 : index
    %c0_0 = arith.constant 0 : index
    %0 = vector.load %arg0[%c0, %c0_0] : memref<32x64xbf16, #tpu.memory_space<vmem>>, vector<32x64xbf16>
    %c0_1 = arith.constant 0 : index
    %c0_2 = arith.constant 0 : index
    %1 = vector.load %arg1[%c0_1, %c0_2] : memref<64x64xbf16, #tpu.memory_space<vmem>>, vector<64x64xbf16>
    %cst = arith.constant dense<0.000000e+00> : vector<32x64xf32>
    %2 = tpu.matmul %0, %1, %cst {dimension_numbers = #tpu.dot_dimension_numbers<[1], [0], [0], [1], [0, 0, 1, 1], [], []>} : vector<32x64xbf16>, vector<64x64xbf16>, vector<32x64xf32> -> vector<32x64xf32>
    %c0_3 = arith.constant 0 : index
    %c0_4 = arith.constant 0 : index
    %3 = vector.load %arg2[%c0_3, %c0_4] : memref<1x64xf32, #tpu.memory_space<vmem>>, vector<1x64xf32>
    %4 = vector.broadcast %3 : vector<1x64xf32> to vector<32x64xf32>
    %5 = arith.addf %2, %4 : vector<32x64xf32>
    %c0_5 = arith.constant 0 : index
    %c0_6 = arith.constant 0 : index
    %6 = vector.load %arg3[%c0_5, %c0_6] : memref<32x64xf32, #tpu.memory_space<vmem>>, vector<32x64xf32>
    tpu.vector_store %arg3[%c0_5, %c0_6], %5 {strides = array<i32>} : memref<32x64xf32, #tpu.memory_space<vmem>>, vector<32x64xf32>,
    return
  }
}

module attributes {stable_mosaic.version = 11 : i64} {
  func.func @_attn_kernel(%arg0: i32, %arg1: memref<1x9x64xbf16, #tpu.memory_space<vmem>>, %arg2: memref<1x16x64xbf16, #tpu.memory_space<vmem>>, %arg3: memref<1x16x64xbf16, #tpu.memory_space<vmem>>, %arg4: memref<1x9x64xf32, #tpu.memory_space<vmem>>, %arg5: memref<64x32xbf16, #tpu.memory_space<vmem>>, %arg6: memref<1x32xf32, #tpu.memory_space<vmem>>, %arg7: memref<64x32xbf16, #tpu.memory_space<vmem>>, %arg8: memref<1x32xf32, #tpu.memory_space<vmem>>, %arg9: memref<64x32xbf16, #tpu.memory_space<vmem>>, %arg10: memref<1x32xf32, #tpu.memory_space<vmem>>, %arg11: memref<32x64xbf16, #tpu.memory_space<vmem>>, %arg12: memref<1x64xf32, #tpu.memory_space<vmem>>, %arg13: memref<1x64xf32, #tpu.memory_space<vmem>>, %arg14: memref<1x64xf32, #tpu.memory_space<vmem>>, %arg15: memref<1x9x64xf32, #tpu.memory_space<vmem>>) attributes {dimension_semantics = [#tpu.dimension_semantics<parallel>], iteration_bounds = array<i64: 2>, scalar_prefetch = 0 : i64, scratch_operands = 0 : i64, tpu.core_type = #tpu.core_type<tc>, window_params = [{transform_indices = @transform_0, window_bounds = array<i64: 1, 9, 64>}, {transform_indices = @transform_1, window_bounds = array<i64: 1, 16, 64>}, {transform_indices = @transform_2, window_bounds = array<i64: 1, 16, 64>}, {transform_indices = @transform_3, window_bounds = array<i64: 1, 9, 64>}, {pipeline_mode = #tpu.pipeline_mode<synchronous>, transform_indices = @transform_4, window_bounds = array<i64: 64, 32>}, {pipeline_mode = #tpu.pipeline_mode<synchronous>, transform_indices = @transform_5, window_bounds = array<i64: 1, 32>}, {pipeline_mode = #tpu.pipeline_mode<synchronous>, transform_indices = @transform_6, window_bounds = array<i64: 64, 32>}, {pipeline_mode = #tpu.pipeline_mode<synchronous>, transform_indices = @transform_7, window_bounds = array<i64: 1, 32>}, {pipeline_mode = #tpu.pipeline_mode<synchronous>, transform_indices = @transform_8, window_bounds = array<i64: 64, 32>}, {pipeline_mode = #tpu.pipeline_mode<synchronous>, transform_indices = @transform_9, window_bounds = array<i64: 1, 32>}, {pipeline_mode = #tpu.pipeline_mode<synchronous>, transform_indices = @transform_10, window_bounds = array<i64: 32, 64>}, {pipeline_mode = #tpu.pipeline_mode<synchronous>, transform_indices = @transform_11, window_bounds = array<i64: 1, 64>}, {pipeline_mode = #tpu.pipeline_mode<synchronous>, transform_indices = @transform_12, window_bounds = array<i64: 1, 64>}, {pipeline_mode = #tpu.pipeline_mode<synchronous>, transform_indices = @transform_13, window_bounds = array<i64: 1, 64>}, {transform_indices = @transform_14, window_bounds = array<i64: 1, 9, 64>}]} {
    %c0 = arith.constant 0 : index
    %c0_0 = arith.constant 0 : index
    %c0_1 = arith.constant 0 : index
    %0 = vector.load %arg1[%c0, %c0_0, %c0_1] : memref<1x9x64xbf16, #tpu.memory_space<vmem>>, vector<1x9x64xbf16>
    %1 = vector.shape_cast %0 : vector<1x9x64xbf16> to vector<9x64xbf16>
    %c0_2 = arith.constant 0 : index
    %c0_3 = arith.constant 0 : index
    %c0_4 = arith.constant 0 : index
    %2 = vector.load %arg2[%c0_2, %c0_3, %c0_4] : memref<1x16x64xbf16, #tpu.memory_space<vmem>>, vector<1x16x64xbf16>
    %3 = vector.shape_cast %2 : vector<1x16x64xbf16> to vector<16x64xbf16>
    %c0_5 = arith.constant 0 : index
    %c0_6 = arith.constant 0 : index
    %c0_7 = arith.constant 0 : index
    %4 = vector.load %arg3[%c0_5, %c0_6, %c0_7] : memref<1x16x64xbf16, #tpu.memory_space<vmem>>, vector<1x16x64xbf16>
    %5 = vector.shape_cast %4 : vector<1x16x64xbf16> to vector<16x64xbf16>
    %c0_8 = arith.constant 0 : index
    %c0_9 = arith.constant 0 : index
    %6 = vector.load %arg5[%c0_8, %c0_9] : memref<64x32xbf16, #tpu.memory_space<vmem>>, vector<64x32xbf16>
    %cst = arith.constant dense<0.000000e+00> : vector<9x32xf32>
    %7 = tpu.matmul %1, %6, %cst {dimension_numbers = #tpu.dot_dimension_numbers<[1], [0], [0], [1], [0, 0, 1, 1], [], []>} : vector<9x64xbf16>, vector<64x32xbf16>, vector<9x32xf32> -> vector<9x32xf32>
    %c0_10 = arith.constant 0 : index
    %c0_11 = arith.constant 0 : index
    %8 = vector.load %arg6[%c0_10, %c0_11] : memref<1x32xf32, #tpu.memory_space<vmem>>, vector<1x32xf32>
    %9 = vector.broadcast %8 : vector<1x32xf32> to vector<9x32xf32>
    %10 = arith.addf %7, %9 : vector<9x32xf32>
    %c0_12 = arith.constant 0 : index
    %c0_13 = arith.constant 0 : index
    %11 = vector.load %arg7[%c0_12, %c0_13] : memref<64x32xbf16, #tpu.memory_space<vmem>>, vector<64x32xbf16>
    %cst_14 = arith.constant dense<0.000000e+00> : vector<16x32xf32>
    %12 = tpu.matmul %3, %11, %cst_14 {dimension_numbers = #tpu.dot_dimension_numbers<[1], [0], [0], [1], [0, 0, 1, 1], [], []>} : vector<16x64xbf16>, vector<64x32xbf16>, vector<16x32xf32> -> vector<16x32xf32>
    %c0_15 = arith.constant 0 : index
    %c0_16 = arith.constant 0 : index
    %13 = vector.load %arg8[%c0_15, %c0_16] : memref<1x32xf32, #tpu.memory_space<vmem>>, vector<1x32xf32>
    %14 = vector.broadcast %13 : vector<1x32xf32> to vector<16x32xf32>
    %15 = arith.addf %12, %14 : vector<16x32xf32>
    %c0_17 = arith.constant 0 : index
    %c0_18 = arith.constant 0 : index
    %16 = vector.load %arg9[%c0_17, %c0_18] : memref<64x32xbf16, #tpu.memory_space<vmem>>, vector<64x32xbf16>
    %cst_19 = arith.constant dense<0.000000e+00> : vector<16x32xf32>
    %17 = tpu.matmul %5, %16, %cst_19 {dimension_numbers = #tpu.dot_dimension_numbers<[1], [0], [0], [1], [0, 0, 1, 1], [], []>} : vector<16x64xbf16>, vector<64x32xbf16>, vector<16x32xf32> -> vector<16x32xf32>
    %c0_20 = arith.constant 0 : index
    %c0_21 = arith.constant 0 : index
    %18 = vector.load %arg10[%c0_20, %c0_21] : memref<1x32xf32, #tpu.memory_space<vmem>>, vector<1x32xf32>
    %19 = vector.broadcast %18 : vector<1x32xf32> to vector<16x32xf32>
    %20 = arith.addf %17, %19 : vector<16x32xf32>
    %cst_22 = arith.constant 0.000000e+00 : f32
    %21 = vector.broadcast %cst_22 : f32 to vector<9x64xf32>
    %22 = vector.extract_strided_slice %10 {offsets = [0, 0], sizes = [9, 16], strides = [1, 1]} : vector<9x32xf32> to vector<9x16xf32>
    %23 = vector.extract_strided_slice %15 {offsets = [0, 0], sizes = [16, 16], strides = [1, 1]} : vector<16x32xf32> to vector<16x16xf32>
    %24 = vector.extract_strided_slice %20 {offsets = [0, 0], sizes = [16, 16], strides = [1, 1]} : vector<16x32xf32> to vector<16x16xf32>
    %cst_23 = arith.constant dense<0.000000e+00> : vector<9x16xf32>
    %25 = tpu.matmul %22, %23, %cst_23 {dimension_numbers = #tpu.dot_dimension_numbers<[1], [1], [0], [0], [0, 0, 1, 0], [], []>} : vector<9x16xf32>, vector<16x16xf32>, vector<9x16xf32> -> vector<9x16xf32>
    %cst_24 = arith.constant 2.500000e-01 : f32
    %26 = vector.broadcast %cst_24 : f32 to vector<9x16xf32>
    %27 = arith.mulf %25, %26 : vector<9x16xf32>
    %cst_25 = arith.constant dense<0xFF800000> : vector<9xf32>
    %28 = vector.multi_reduction <maximumf>, %27, %cst_25 [1] : vector<9x16xf32> to vector<9xf32>
    %cst_26 = arith.constant 0xFF800000 : f32
    %29 = vector.broadcast %cst_26 : f32 to vector<9xf32>
    %30 = arith.maximumf %29, %28 : vector<9xf32>
    %31 = vector.shape_cast %30 : vector<9xf32> to vector<9x1xf32>
    %32 = vector.broadcast %31 : vector<9x1xf32> to vector<9x16xf32>
    %33 = arith.subf %27, %32 : vector<9x16xf32>
    %34 = math.exp %33 : vector<9x16xf32>
    %cst_27 = arith.constant dense<0.000000e+00> : vector<9xf32>
    %35 = vector.multi_reduction <add>, %34, %cst_27 [1] : vector<9x16xf32> to vector<9xf32>
    %36 = vector.shape_cast %35 : vector<9xf32> to vector<9x1xf32>
    %37 = vector.broadcast %36 : vector<9x1xf32> to vector<9x16xf32>
    %38 = arith.divf %34, %37 : vector<9x16xf32>
    %39 = arith.truncf %38 : vector<9x16xf32> to vector<9x16xbf16>
    %40 = arith.truncf %24 : vector<16x16xf32> to vector<16x16xbf16>
    %cst_28 = arith.constant dense<0.000000e+00> : vector<9x16xf32>
    %41 = tpu.matmul %39, %40, %cst_28 {dimension_numbers = #tpu.dot_dimension_numbers<[1], [0], [0], [1], [0, 0, 1, 1], [], []>} : vector<9x16xbf16>, vector<16x16xbf16>, vector<9x16xf32> -> vector<9x16xf32>
    %42 = arith.truncf %41 : vector<9x16xf32> to vector<9x16xbf16>
    %c0_29 = arith.constant 0 : index
    %c0_30 = arith.constant 0 : index
    %43 = vector.load %arg11[%c0_29, %c0_30] : memref<32x64xbf16, #tpu.memory_space<vmem>>, vector<16x64xbf16>
    %cst_31 = arith.constant dense<0.000000e+00> : vector<9x64xf32>
    %44 = tpu.matmul %42, %43, %cst_31 {dimension_numbers = #tpu.dot_dimension_numbers<[1], [0], [0], [1], [0, 0, 1, 1], [], []>} : vector<9x16xbf16>, vector<16x64xbf16>, vector<9x64xf32> -> vector<9x64xf32>
    %45 = arith.addf %21, %44 : vector<9x64xf32>
    %46 = vector.extract_strided_slice %10 {offsets = [0, 16], sizes = [9, 16], strides = [1, 1]} : vector<9x32xf32> to vector<9x16xf32>
    %47 = vector.extract_strided_slice %15 {offsets = [0, 16], sizes = [16, 16], strides = [1, 1]} : vector<16x32xf32> to vector<16x16xf32>
    %48 = vector.extract_strided_slice %20 {offsets = [0, 16], sizes = [16, 16], strides = [1, 1]} : vector<16x32xf32> to vector<16x16xf32>
    %cst_32 = arith.constant dense<0.000000e+00> : vector<9x16xf32>
    %49 = tpu.matmul %46, %47, %cst_32 {dimension_numbers = #tpu.dot_dimension_numbers<[1], [1], [0], [0], [0, 0, 1, 0], [], []>} : vector<9x16xf32>, vector<16x16xf32>, vector<9x16xf32> -> vector<9x16xf32>
    %cst_33 = arith.constant 2.500000e-01 : f32
    %50 = vector.broadcast %cst_33 : f32 to vector<9x16xf32>
    %51 = arith.mulf %49, %50 : vector<9x16xf32>
    %cst_34 = arith.constant dense<0xFF800000> : vector<9xf32>
    %52 = vector.multi_reduction <maximumf>, %51, %cst_34 [1] : vector<9x16xf32> to vector<9xf32>
    %cst_35 = arith.constant 0xFF800000 : f32
    %53 = vector.broadcast %cst_35 : f32 to vector<9xf32>
    %54 = arith.maximumf %53, %52 : vector<9xf32>
    %55 = vector.shape_cast %54 : vector<9xf32> to vector<9x1xf32>
    %56 = vector.broadcast %55 : vector<9x1xf32> to vector<9x16xf32>
    %57 = arith.subf %51, %56 : vector<9x16xf32>
    %58 = math.exp %57 : vector<9x16xf32>
    %cst_36 = arith.constant dense<0.000000e+00> : vector<9xf32>
    %59 = vector.multi_reduction <add>, %58, %cst_36 [1] : vector<9x16xf32> to vector<9xf32>
    %60 = vector.shape_cast %59 : vector<9xf32> to vector<9x1xf32>
    %61 = vector.broadcast %60 : vector<9x1xf32> to vector<9x16xf32>
    %62 = arith.divf %58, %61 : vector<9x16xf32>
    %63 = arith.truncf %62 : vector<9x16xf32> to vector<9x16xbf16>
    %64 = arith.truncf %48 : vector<16x16xf32> to vector<16x16xbf16>
    %cst_37 = arith.constant dense<0.000000e+00> : vector<9x16xf32>
    %65 = tpu.matmul %63, %64, %cst_37 {dimension_numbers = #tpu.dot_dimension_numbers<[1], [0], [0], [1], [0, 0, 1, 1], [], []>} : vector<9x16xbf16>, vector<16x16xbf16>, vector<9x16xf32> -> vector<9x16xf32>
    %66 = arith.truncf %65 : vector<9x16xf32> to vector<9x16xbf16>
    %c16 = arith.constant 16 : index
    %c0_38 = arith.constant 0 : index
    %67 = vector.load %arg11[%c16, %c0_38] : memref<32x64xbf16, #tpu.memory_space<vmem>>, vector<16x64xbf16>
    %cst_39 = arith.constant dense<0.000000e+00> : vector<9x64xf32>
    %68 = tpu.matmul %66, %67, %cst_39 {dimension_numbers = #tpu.dot_dimension_numbers<[1], [0], [0], [1], [0, 0, 1, 1], [], []>} : vector<9x16xbf16>, vector<16x64xbf16>, vector<9x64xf32> -> vector<9x64xf32>
    %69 = arith.addf %45, %68 : vector<9x64xf32>
    %c0_40 = arith.constant 0 : index
    %c0_41 = arith.constant 0 : index
    %c0_42 = arith.constant 0 : index
    %70 = vector.load %arg4[%c0_40, %c0_41, %c0_42] : memref<1x9x64xf32, #tpu.memory_space<vmem>>, vector<1x9x64xf32>
    %71 = vector.shape_cast %70 : vector<1x9x64xf32> to vector<9x64xf32>
    %72 = arith.addf %71, %69 : vector<9x64xf32>
    %c0_43 = arith.constant 0 : index
    %c0_44 = arith.constant 0 : index
    %73 = vector.load %arg12[%c0_43, %c0_44] : memref<1x64xf32, #tpu.memory_space<vmem>>, vector<1x64xf32>
    %74 = vector.broadcast %73 : vector<1x64xf32> to vector<9x64xf32>
    %75 = arith.addf %72, %74 : vector<9x64xf32>
    %cst_45 = arith.constant dense<0.000000e+00> : vector<9xf32>
    %76 = vector.multi_reduction <add>, %75, %cst_45 [1] : vector<9x64xf32> to vector<9xf32>
    %77 = vector.shape_cast %76 : vector<9xf32> to vector<9x1xf32>
    %cst_46 = arith.constant 6.400000e+01 : f32
    %78 = vector.broadcast %cst_46 : f32 to vector<9x1xf32>
    %79 = arith.divf %77, %78 : vector<9x1xf32>
    %80 = vector.broadcast %79 : vector<9x1xf32> to vector<9x64xf32>
    %81 = arith.subf %75, %80 : vector<9x64xf32>
    %82 = arith.mulf %81, %81 : vector<9x64xf32>
    %cst_47 = arith.constant dense<0.000000e+00> : vector<9xf32>
    %83 = vector.multi_reduction <add>, %82, %cst_47 [1] : vector<9x64xf32> to vector<9xf32>
    %84 = vector.shape_cast %83 : vector<9xf32> to vector<9x1xf32>
    %cst_48 = arith.constant 6.400000e+01 : f32
    %85 = vector.broadcast %cst_48 : f32 to vector<9x1xf32>
    %86 = arith.divf %84, %85 : vector<9x1xf32>
    %87 = vector.broadcast %79 : vector<9x1xf32> to vector<9x64xf32>
    %88 = arith.subf %75, %87 : vector<9x64xf32>
    %cst_49 = arith.constant 9.99999974E-6 : f32
    %89 = vector.broadcast %cst_49 : f32 to vector<9x1xf32>
    %90 = arith.addf %86, %89 : vector<9x1xf32>
    %91 = math.rsqrt %90 : vector<9x1xf32>
    %92 = vector.broadcast %91 : vector<9x1xf32> to vector<9x64xf32>
    %93 = arith.mulf %88, %92 : vector<9x64xf32>
    %c0_50 = arith.constant 0 : index
    %c0_51 = arith.constant 0 : index
    %94 = vector.load %arg13[%c0_50, %c0_51] : memref<1x64xf32, #tpu.memory_space<vmem>>, vector<1x64xf32>
    %95 = vector.broadcast %94 : vector<1x64xf32> to vector<9x64xf32>
    %96 = arith.mulf %93, %95 : vector<9x64xf32>
    %c0_52 = arith.constant 0 : index
    %c0_53 = arith.constant 0 : index
    %97 = vector.load %arg14[%c0_52, %c0_53] : memref<1x64xf32, #tpu.memory_space<vmem>>, vector<1x64xf32>
    %98 = vector.broadcast %97 : vector<1x64xf32> to vector<9x64xf32>
    %99 = arith.addf %96, %98 : vector<9x64xf32>
    %c0_54 = arith.constant 0 : index
    %c0_55 = arith.constant 0 : index
    %c0_56 = arith.constant 0 : index
    %100 = vector.load %arg15[%c0_54, %c0_55, %c0_56] : memref<1x9x64xf32, #tpu.memory_space<vmem>>, vector<1x9x64xf32>
    %101 = vector.shape_cast %100 : vector<1x9x64xf32> to vector<9x64xf32>
    %102 = vector.shape_cast %99 : vector<9x64xf32> to vector<1x9x64xf32>
    tpu.vector_store %arg15[%c0_54, %c0_55, %c0_56], %102 {strides = array<i32>} : memref<1x9x64xf32, #tpu.memory_space<vmem>>, vector<1x9x64xf32>,
    return
  }
  func.func @transform_0(%arg0: i32) -> (i32, i32, i32) {
    %c0_i32 = arith.constant 0 : i32
    %c0_i32_0 = arith.constant 0 : i32
    %c0_i32_1 = arith.constant 0 : i32
    return %arg0, %c0_i32, %c0_i32_0 : i32, i32, i32
  }
  func.func @transform_1(%arg0: i32) -> (i32, i32, i32) {
    %c0_i32 = arith.constant 0 : i32
    %c0_i32_0 = arith.constant 0 : i32
    %c0_i32_1 = arith.constant 0 : i32
    return %arg0, %c0_i32, %c0_i32_0 : i32, i32, i32
  }
  func.func @transform_2(%arg0: i32) -> (i32, i32, i32) {
    %c0_i32 = arith.constant 0 : i32
    %c0_i32_0 = arith.constant 0 : i32
    %c0_i32_1 = arith.constant 0 : i32
    return %arg0, %c0_i32, %c0_i32_0 : i32, i32, i32
  }
  func.func @transform_3(%arg0: i32) -> (i32, i32, i32) {
    %c0_i32 = arith.constant 0 : i32
    %c0_i32_0 = arith.constant 0 : i32
    %c0_i32_1 = arith.constant 0 : i32
    return %arg0, %c0_i32, %c0_i32_0 : i32, i32, i32
  }
  func.func @transform_4(%arg0: i32) -> (i32, i32) {
    %c0_i32 = arith.constant 0 : i32
    %c0_i32_0 = arith.constant 0 : i32
    %c0_i32_1 = arith.constant 0 : i32
    return %c0_i32, %c0_i32_0 : i32, i32
  }
  func.func @transform_5(%arg0: i32) -> (i32, i32) {
    %c0_i32 = arith.constant 0 : i32
    %c0_i32_0 = arith.constant 0 : i32
    %c0_i32_1 = arith.constant 0 : i32
    return %c0_i32, %c0_i32_0 : i32, i32
  }
  func.func @transform_6(%arg0: i32) -> (i32, i32) {
    %c0_i32 = arith.constant 0 : i32
    %c0_i32_0 = arith.constant 0 : i32
    %c0_i32_1 = arith.constant 0 : i32
    return %c0_i32, %c0_i32_0 : i32, i32
  }
  func.func @transform_7(%arg0: i32) -> (i32, i32) {
    %c0_i32 = arith.constant 0 : i32
    %c0_i32_0 = arith.constant 0 : i32
    %c0_i32_1 = arith.constant 0 : i32
    return %c0_i32, %c0_i32_0 : i32, i32
  }
  func.func @transform_8(%arg0: i32) -> (i32, i32) {
    %c0_i32 = arith.constant 0 : i32
    %c0_i32_0 = arith.constant 0 : i32
    %c0_i32_1 = arith.constant 0 : i32
    return %c0_i32, %c0_i32_0 : i32, i32
  }
  func.func @transform_9(%arg0: i32) -> (i32, i32) {
    %c0_i32 = arith.constant 0 : i32
    %c0_i32_0 = arith.constant 0 : i32
    %c0_i32_1 = arith.constant 0 : i32
    return %c0_i32, %c0_i32_0 : i32, i32
  }
  func.func @transform_10(%arg0: i32) -> (i32, i32) {
    %c0_i32 = arith.constant 0 : i32
    %c0_i32_0 = arith.constant 0 : i32
    %c0_i32_1 = arith.constant 0 : i32
    return %c0_i32, %c0_i32_0 : i32, i32
  }
  func.func @transform_11(%arg0: i32) -> (i32, i32) {
    %c0_i32 = arith.constant 0 : i32
    %c0_i32_0 = arith.constant 0 : i32
    %c0_i32_1 = arith.constant 0 : i32
    return %c0_i32, %c0_i32_0 : i32, i32
  }
  func.func @transform_12(%arg0: i32) -> (i32, i32) {
    %c0_i32 = arith.constant 0 : i32
    %c0_i32_0 = arith.constant 0 : i32
    %c0_i32_1 = arith.constant 0 : i32
    return %c0_i32, %c0_i32_0 : i32, i32
  }
  func.func @transform_13(%arg0: i32) -> (i32, i32) {
    %c0_i32 = arith.constant 0 : i32
    %c0_i32_0 = arith.constant 0 : i32
    %c0_i32_1 = arith.constant 0 : i32
    return %c0_i32, %c0_i32_0 : i32, i32
  }
  func.func @transform_14(%arg0: i32) -> (i32, i32, i32) {
    %c0_i32 = arith.constant 0 : i32
    %c0_i32_0 = arith.constant 0 : i32
    %c0_i32_1 = arith.constant 0 : i32
    return %arg0, %c0_i32, %c0_i32_0 : i32, i32, i32
  }
}

module attributes {stable_mosaic.version = 11 : i64} {
  func.func @_mlp2_res_ln_kernel(%arg0: memref<18x64xf32, #tpu.memory_space<vmem>>, %arg1: memref<64x128xbf16, #tpu.memory_space<vmem>>, %arg2: memref<1x128xf32, #tpu.memory_space<vmem>>, %arg3: memref<128x64xbf16, #tpu.memory_space<vmem>>, %arg4: memref<1x64xf32, #tpu.memory_space<vmem>>, %arg5: memref<1x64xf32, #tpu.memory_space<vmem>>, %arg6: memref<1x64xf32, #tpu.memory_space<vmem>>, %arg7: memref<18x64xf32, #tpu.memory_space<vmem>>) attributes {dimension_semantics = [], scalar_prefetch = 0 : i64, scratch_operands = 0 : i64, tpu.core_type = #tpu.core_type<tc>} {
    %c0 = arith.constant 0 : index
    %c0_0 = arith.constant 0 : index
    %0 = vector.load %arg0[%c0, %c0_0] : memref<18x64xf32, #tpu.memory_space<vmem>>, vector<18x64xf32>
    %1 = arith.truncf %0 : vector<18x64xf32> to vector<18x64xbf16>
    %c0_1 = arith.constant 0 : index
    %c0_2 = arith.constant 0 : index
    %2 = vector.load %arg1[%c0_1, %c0_2] : memref<64x128xbf16, #tpu.memory_space<vmem>>, vector<64x128xbf16>
    %cst = arith.constant dense<0.000000e+00> : vector<18x128xf32>
    %3 = tpu.matmul %1, %2, %cst {dimension_numbers = #tpu.dot_dimension_numbers<[1], [0], [0], [1], [0, 0, 1, 1], [], []>} : vector<18x64xbf16>, vector<64x128xbf16>, vector<18x128xf32> -> vector<18x128xf32>
    %c0_3 = arith.constant 0 : index
    %c0_4 = arith.constant 0 : index
    %4 = vector.load %arg2[%c0_3, %c0_4] : memref<1x128xf32, #tpu.memory_space<vmem>>, vector<1x128xf32>
    %5 = vector.broadcast %4 : vector<1x128xf32> to vector<18x128xf32>
    %6 = arith.addf %3, %5 : vector<18x128xf32>
    %cst_5 = arith.constant 0.000000e+00 : f32
    %7 = vector.broadcast %cst_5 : f32 to vector<18x128xf32>
    %8 = arith.maximumf %6, %7 : vector<18x128xf32>
    %9 = arith.truncf %8 : vector<18x128xf32> to vector<18x128xbf16>
    %c0_6 = arith.constant 0 : index
    %c0_7 = arith.constant 0 : index
    %10 = vector.load %arg3[%c0_6, %c0_7] : memref<128x64xbf16, #tpu.memory_space<vmem>>, vector<128x64xbf16>
    %cst_8 = arith.constant dense<0.000000e+00> : vector<18x64xf32>
    %11 = tpu.matmul %9, %10, %cst_8 {dimension_numbers = #tpu.dot_dimension_numbers<[1], [0], [0], [1], [0, 0, 1, 1], [], []>} : vector<18x128xbf16>, vector<128x64xbf16>, vector<18x64xf32> -> vector<18x64xf32>
    %c0_9 = arith.constant 0 : index
    %c0_10 = arith.constant 0 : index
    %12 = vector.load %arg4[%c0_9, %c0_10] : memref<1x64xf32, #tpu.memory_space<vmem>>, vector<1x64xf32>
    %13 = vector.broadcast %12 : vector<1x64xf32> to vector<18x64xf32>
    %14 = arith.addf %11, %13 : vector<18x64xf32>
    %15 = arith.addf %0, %14 : vector<18x64xf32>
    %cst_11 = arith.constant dense<0.000000e+00> : vector<18xf32>
    %16 = vector.multi_reduction <add>, %15, %cst_11 [1] : vector<18x64xf32> to vector<18xf32>
    %17 = vector.shape_cast %16 : vector<18xf32> to vector<18x1xf32>
    %cst_12 = arith.constant 6.400000e+01 : f32
    %18 = vector.broadcast %cst_12 : f32 to vector<18x1xf32>
    %19 = arith.divf %17, %18 : vector<18x1xf32>
    %20 = vector.broadcast %19 : vector<18x1xf32> to vector<18x64xf32>
    %21 = arith.subf %15, %20 : vector<18x64xf32>
    %22 = arith.mulf %21, %21 : vector<18x64xf32>
    %cst_13 = arith.constant dense<0.000000e+00> : vector<18xf32>
    %23 = vector.multi_reduction <add>, %22, %cst_13 [1] : vector<18x64xf32> to vector<18xf32>
    %24 = vector.shape_cast %23 : vector<18xf32> to vector<18x1xf32>
    %cst_14 = arith.constant 6.400000e+01 : f32
    %25 = vector.broadcast %cst_14 : f32 to vector<18x1xf32>
    %26 = arith.divf %24, %25 : vector<18x1xf32>
    %27 = vector.broadcast %19 : vector<18x1xf32> to vector<18x64xf32>
    %28 = arith.subf %15, %27 : vector<18x64xf32>
    %cst_15 = arith.constant 9.99999974E-6 : f32
    %29 = vector.broadcast %cst_15 : f32 to vector<18x1xf32>
    %30 = arith.addf %26, %29 : vector<18x1xf32>
    %31 = math.rsqrt %30 : vector<18x1xf32>
    %32 = vector.broadcast %31 : vector<18x1xf32> to vector<18x64xf32>
    %33 = arith.mulf %28, %32 : vector<18x64xf32>
    %c0_16 = arith.constant 0 : index
    %c0_17 = arith.constant 0 : index
    %34 = vector.load %arg5[%c0_16, %c0_17] : memref<1x64xf32, #tpu.memory_space<vmem>>, vector<1x64xf32>
    %35 = vector.broadcast %34 : vector<1x64xf32> to vector<18x64xf32>
    %36 = arith.mulf %33, %35 : vector<18x64xf32>
    %c0_18 = arith.constant 0 : index
    %c0_19 = arith.constant 0 : index
    %37 = vector.load %arg6[%c0_18, %c0_19] : memref<1x64xf32, #tpu.memory_space<vmem>>, vector<1x64xf32>
    %38 = vector.broadcast %37 : vector<1x64xf32> to vector<18x64xf32>
    %39 = arith.addf %36, %38 : vector<18x64xf32>
    %c0_20 = arith.constant 0 : index
    %c0_21 = arith.constant 0 : index
    %40 = vector.load %arg7[%c0_20, %c0_21] : memref<18x64xf32, #tpu.memory_space<vmem>>, vector<18x64xf32>
    tpu.vector_store %arg7[%c0_20, %c0_21], %39 {strides = array<i32>} : memref<18x64xf32, #tpu.memory_space<vmem>>, vector<18x64xf32>,
    return
  }
}

module attributes {stable_mosaic.version = 11 : i64} {
  func.func @_attn_kernel(%arg0: i32, %arg1: memref<1x16x64xbf16, #tpu.memory_space<vmem>>, %arg2: memref<1x9x64xbf16, #tpu.memory_space<vmem>>, %arg3: memref<1x9x64xbf16, #tpu.memory_space<vmem>>, %arg4: memref<1x16x64xf32, #tpu.memory_space<vmem>>, %arg5: memref<64x32xbf16, #tpu.memory_space<vmem>>, %arg6: memref<1x32xf32, #tpu.memory_space<vmem>>, %arg7: memref<64x32xbf16, #tpu.memory_space<vmem>>, %arg8: memref<1x32xf32, #tpu.memory_space<vmem>>, %arg9: memref<64x32xbf16, #tpu.memory_space<vmem>>, %arg10: memref<1x32xf32, #tpu.memory_space<vmem>>, %arg11: memref<32x64xbf16, #tpu.memory_space<vmem>>, %arg12: memref<1x64xf32, #tpu.memory_space<vmem>>, %arg13: memref<1x64xf32, #tpu.memory_space<vmem>>, %arg14: memref<1x64xf32, #tpu.memory_space<vmem>>, %arg15: memref<1x16x64xf32, #tpu.memory_space<vmem>>) attributes {dimension_semantics = [#tpu.dimension_semantics<parallel>], iteration_bounds = array<i64: 2>, scalar_prefetch = 0 : i64, scratch_operands = 0 : i64, tpu.core_type = #tpu.core_type<tc>, window_params = [{transform_indices = @transform_0, window_bounds = array<i64: 1, 16, 64>}, {transform_indices = @transform_1, window_bounds = array<i64: 1, 9, 64>}, {transform_indices = @transform_2, window_bounds = array<i64: 1, 9, 64>}, {transform_indices = @transform_3, window_bounds = array<i64: 1, 16, 64>}, {pipeline_mode = #tpu.pipeline_mode<synchronous>, transform_indices = @transform_4, window_bounds = array<i64: 64, 32>}, {pipeline_mode = #tpu.pipeline_mode<synchronous>, transform_indices = @transform_5, window_bounds = array<i64: 1, 32>}, {pipeline_mode = #tpu.pipeline_mode<synchronous>, transform_indices = @transform_6, window_bounds = array<i64: 64, 32>}, {pipeline_mode = #tpu.pipeline_mode<synchronous>, transform_indices = @transform_7, window_bounds = array<i64: 1, 32>}, {pipeline_mode = #tpu.pipeline_mode<synchronous>, transform_indices = @transform_8, window_bounds = array<i64: 64, 32>}, {pipeline_mode = #tpu.pipeline_mode<synchronous>, transform_indices = @transform_9, window_bounds = array<i64: 1, 32>}, {pipeline_mode = #tpu.pipeline_mode<synchronous>, transform_indices = @transform_10, window_bounds = array<i64: 32, 64>}, {pipeline_mode = #tpu.pipeline_mode<synchronous>, transform_indices = @transform_11, window_bounds = array<i64: 1, 64>}, {pipeline_mode = #tpu.pipeline_mode<synchronous>, transform_indices = @transform_12, window_bounds = array<i64: 1, 64>}, {pipeline_mode = #tpu.pipeline_mode<synchronous>, transform_indices = @transform_13, window_bounds = array<i64: 1, 64>}, {transform_indices = @transform_14, window_bounds = array<i64: 1, 16, 64>}]} {
    %c0 = arith.constant 0 : index
    %c0_0 = arith.constant 0 : index
    %c0_1 = arith.constant 0 : index
    %0 = vector.load %arg1[%c0, %c0_0, %c0_1] : memref<1x16x64xbf16, #tpu.memory_space<vmem>>, vector<1x16x64xbf16>
    %1 = vector.shape_cast %0 : vector<1x16x64xbf16> to vector<16x64xbf16>
    %c0_2 = arith.constant 0 : index
    %c0_3 = arith.constant 0 : index
    %c0_4 = arith.constant 0 : index
    %2 = vector.load %arg2[%c0_2, %c0_3, %c0_4] : memref<1x9x64xbf16, #tpu.memory_space<vmem>>, vector<1x9x64xbf16>
    %3 = vector.shape_cast %2 : vector<1x9x64xbf16> to vector<9x64xbf16>
    %c0_5 = arith.constant 0 : index
    %c0_6 = arith.constant 0 : index
    %c0_7 = arith.constant 0 : index
    %4 = vector.load %arg3[%c0_5, %c0_6, %c0_7] : memref<1x9x64xbf16, #tpu.memory_space<vmem>>, vector<1x9x64xbf16>
    %5 = vector.shape_cast %4 : vector<1x9x64xbf16> to vector<9x64xbf16>
    %c0_8 = arith.constant 0 : index
    %c0_9 = arith.constant 0 : index
    %6 = vector.load %arg5[%c0_8, %c0_9] : memref<64x32xbf16, #tpu.memory_space<vmem>>, vector<64x32xbf16>
    %cst = arith.constant dense<0.000000e+00> : vector<16x32xf32>
    %7 = tpu.matmul %1, %6, %cst {dimension_numbers = #tpu.dot_dimension_numbers<[1], [0], [0], [1], [0, 0, 1, 1], [], []>} : vector<16x64xbf16>, vector<64x32xbf16>, vector<16x32xf32> -> vector<16x32xf32>
    %c0_10 = arith.constant 0 : index
    %c0_11 = arith.constant 0 : index
    %8 = vector.load %arg6[%c0_10, %c0_11] : memref<1x32xf32, #tpu.memory_space<vmem>>, vector<1x32xf32>
    %9 = vector.broadcast %8 : vector<1x32xf32> to vector<16x32xf32>
    %10 = arith.addf %7, %9 : vector<16x32xf32>
    %c0_12 = arith.constant 0 : index
    %c0_13 = arith.constant 0 : index
    %11 = vector.load %arg7[%c0_12, %c0_13] : memref<64x32xbf16, #tpu.memory_space<vmem>>, vector<64x32xbf16>
    %cst_14 = arith.constant dense<0.000000e+00> : vector<9x32xf32>
    %12 = tpu.matmul %3, %11, %cst_14 {dimension_numbers = #tpu.dot_dimension_numbers<[1], [0], [0], [1], [0, 0, 1, 1], [], []>} : vector<9x64xbf16>, vector<64x32xbf16>, vector<9x32xf32> -> vector<9x32xf32>
    %c0_15 = arith.constant 0 : index
    %c0_16 = arith.constant 0 : index
    %13 = vector.load %arg8[%c0_15, %c0_16] : memref<1x32xf32, #tpu.memory_space<vmem>>, vector<1x32xf32>
    %14 = vector.broadcast %13 : vector<1x32xf32> to vector<9x32xf32>
    %15 = arith.addf %12, %14 : vector<9x32xf32>
    %c0_17 = arith.constant 0 : index
    %c0_18 = arith.constant 0 : index
    %16 = vector.load %arg9[%c0_17, %c0_18] : memref<64x32xbf16, #tpu.memory_space<vmem>>, vector<64x32xbf16>
    %cst_19 = arith.constant dense<0.000000e+00> : vector<9x32xf32>
    %17 = tpu.matmul %5, %16, %cst_19 {dimension_numbers = #tpu.dot_dimension_numbers<[1], [0], [0], [1], [0, 0, 1, 1], [], []>} : vector<9x64xbf16>, vector<64x32xbf16>, vector<9x32xf32> -> vector<9x32xf32>
    %c0_20 = arith.constant 0 : index
    %c0_21 = arith.constant 0 : index
    %18 = vector.load %arg10[%c0_20, %c0_21] : memref<1x32xf32, #tpu.memory_space<vmem>>, vector<1x32xf32>
    %19 = vector.broadcast %18 : vector<1x32xf32> to vector<9x32xf32>
    %20 = arith.addf %17, %19 : vector<9x32xf32>
    %cst_22 = arith.constant 0.000000e+00 : f32
    %21 = vector.broadcast %cst_22 : f32 to vector<16x64xf32>
    %22 = vector.extract_strided_slice %10 {offsets = [0, 0], sizes = [16, 16], strides = [1, 1]} : vector<16x32xf32> to vector<16x16xf32>
    %23 = vector.extract_strided_slice %15 {offsets = [0, 0], sizes = [9, 16], strides = [1, 1]} : vector<9x32xf32> to vector<9x16xf32>
    %24 = vector.extract_strided_slice %20 {offsets = [0, 0], sizes = [9, 16], strides = [1, 1]} : vector<9x32xf32> to vector<9x16xf32>
    %cst_23 = arith.constant dense<0.000000e+00> : vector<16x9xf32>
    %25 = tpu.matmul %22, %23, %cst_23 {dimension_numbers = #tpu.dot_dimension_numbers<[1], [1], [0], [0], [0, 0, 1, 0], [], []>} : vector<16x16xf32>, vector<9x16xf32>, vector<16x9xf32> -> vector<16x9xf32>
    %cst_24 = arith.constant 2.500000e-01 : f32
    %26 = vector.broadcast %cst_24 : f32 to vector<16x9xf32>
    %27 = arith.mulf %25, %26 : vector<16x9xf32>
    %cst_25 = arith.constant dense<0xFF800000> : vector<16xf32>
    %28 = vector.multi_reduction <maximumf>, %27, %cst_25 [1] : vector<16x9xf32> to vector<16xf32>
    %cst_26 = arith.constant 0xFF800000 : f32
    %29 = vector.broadcast %cst_26 : f32 to vector<16xf32>
    %30 = arith.maximumf %29, %28 : vector<16xf32>
    %31 = vector.shape_cast %30 : vector<16xf32> to vector<16x1xf32>
    %32 = vector.broadcast %31 : vector<16x1xf32> to vector<16x9xf32>
    %33 = arith.subf %27, %32 : vector<16x9xf32>
    %34 = math.exp %33 : vector<16x9xf32>
    %cst_27 = arith.constant dense<0.000000e+00> : vector<16xf32>
    %35 = vector.multi_reduction <add>, %34, %cst_27 [1] : vector<16x9xf32> to vector<16xf32>
    %36 = vector.shape_cast %35 : vector<16xf32> to vector<16x1xf32>
    %37 = vector.broadcast %36 : vector<16x1xf32> to vector<16x9xf32>
    %38 = arith.divf %34, %37 : vector<16x9xf32>
    %39 = arith.truncf %38 : vector<16x9xf32> to vector<16x9xbf16>
    %40 = arith.truncf %24 : vector<9x16xf32> to vector<9x16xbf16>
    %cst_28 = arith.constant dense<0.000000e+00> : vector<16x16xf32>
    %41 = tpu.matmul %39, %40, %cst_28 {dimension_numbers = #tpu.dot_dimension_numbers<[1], [0], [0], [1], [0, 0, 1, 1], [], []>} : vector<16x9xbf16>, vector<9x16xbf16>, vector<16x16xf32> -> vector<16x16xf32>
    %42 = arith.truncf %41 : vector<16x16xf32> to vector<16x16xbf16>
    %c0_29 = arith.constant 0 : index
    %c0_30 = arith.constant 0 : index
    %43 = vector.load %arg11[%c0_29, %c0_30] : memref<32x64xbf16, #tpu.memory_space<vmem>>, vector<16x64xbf16>
    %cst_31 = arith.constant dense<0.000000e+00> : vector<16x64xf32>
    %44 = tpu.matmul %42, %43, %cst_31 {dimension_numbers = #tpu.dot_dimension_numbers<[1], [0], [0], [1], [0, 0, 1, 1], [], []>} : vector<16x16xbf16>, vector<16x64xbf16>, vector<16x64xf32> -> vector<16x64xf32>
    %45 = arith.addf %21, %44 : vector<16x64xf32>
    %46 = vector.extract_strided_slice %10 {offsets = [0, 16], sizes = [16, 16], strides = [1, 1]} : vector<16x32xf32> to vector<16x16xf32>
    %47 = vector.extract_strided_slice %15 {offsets = [0, 16], sizes = [9, 16], strides = [1, 1]} : vector<9x32xf32> to vector<9x16xf32>
    %48 = vector.extract_strided_slice %20 {offsets = [0, 16], sizes = [9, 16], strides = [1, 1]} : vector<9x32xf32> to vector<9x16xf32>
    %cst_32 = arith.constant dense<0.000000e+00> : vector<16x9xf32>
    %49 = tpu.matmul %46, %47, %cst_32 {dimension_numbers = #tpu.dot_dimension_numbers<[1], [1], [0], [0], [0, 0, 1, 0], [], []>} : vector<16x16xf32>, vector<9x16xf32>, vector<16x9xf32> -> vector<16x9xf32>
    %cst_33 = arith.constant 2.500000e-01 : f32
    %50 = vector.broadcast %cst_33 : f32 to vector<16x9xf32>
    %51 = arith.mulf %49, %50 : vector<16x9xf32>
    %cst_34 = arith.constant dense<0xFF800000> : vector<16xf32>
    %52 = vector.multi_reduction <maximumf>, %51, %cst_34 [1] : vector<16x9xf32> to vector<16xf32>
    %cst_35 = arith.constant 0xFF800000 : f32
    %53 = vector.broadcast %cst_35 : f32 to vector<16xf32>
    %54 = arith.maximumf %53, %52 : vector<16xf32>
    %55 = vector.shape_cast %54 : vector<16xf32> to vector<16x1xf32>
    %56 = vector.broadcast %55 : vector<16x1xf32> to vector<16x9xf32>
    %57 = arith.subf %51, %56 : vector<16x9xf32>
    %58 = math.exp %57 : vector<16x9xf32>
    %cst_36 = arith.constant dense<0.000000e+00> : vector<16xf32>
    %59 = vector.multi_reduction <add>, %58, %cst_36 [1] : vector<16x9xf32> to vector<16xf32>
    %60 = vector.shape_cast %59 : vector<16xf32> to vector<16x1xf32>
    %61 = vector.broadcast %60 : vector<16x1xf32> to vector<16x9xf32>
    %62 = arith.divf %58, %61 : vector<16x9xf32>
    %63 = arith.truncf %62 : vector<16x9xf32> to vector<16x9xbf16>
    %64 = arith.truncf %48 : vector<9x16xf32> to vector<9x16xbf16>
    %cst_37 = arith.constant dense<0.000000e+00> : vector<16x16xf32>
    %65 = tpu.matmul %63, %64, %cst_37 {dimension_numbers = #tpu.dot_dimension_numbers<[1], [0], [0], [1], [0, 0, 1, 1], [], []>} : vector<16x9xbf16>, vector<9x16xbf16>, vector<16x16xf32> -> vector<16x16xf32>
    %66 = arith.truncf %65 : vector<16x16xf32> to vector<16x16xbf16>
    %c16 = arith.constant 16 : index
    %c0_38 = arith.constant 0 : index
    %67 = vector.load %arg11[%c16, %c0_38] : memref<32x64xbf16, #tpu.memory_space<vmem>>, vector<16x64xbf16>
    %cst_39 = arith.constant dense<0.000000e+00> : vector<16x64xf32>
    %68 = tpu.matmul %66, %67, %cst_39 {dimension_numbers = #tpu.dot_dimension_numbers<[1], [0], [0], [1], [0, 0, 1, 1], [], []>} : vector<16x16xbf16>, vector<16x64xbf16>, vector<16x64xf32> -> vector<16x64xf32>
    %69 = arith.addf %45, %68 : vector<16x64xf32>
    %c0_40 = arith.constant 0 : index
    %c0_41 = arith.constant 0 : index
    %c0_42 = arith.constant 0 : index
    %70 = vector.load %arg4[%c0_40, %c0_41, %c0_42] : memref<1x16x64xf32, #tpu.memory_space<vmem>>, vector<1x16x64xf32>
    %71 = vector.shape_cast %70 : vector<1x16x64xf32> to vector<16x64xf32>
    %72 = arith.addf %71, %69 : vector<16x64xf32>
    %c0_43 = arith.constant 0 : index
    %c0_44 = arith.constant 0 : index
    %73 = vector.load %arg12[%c0_43, %c0_44] : memref<1x64xf32, #tpu.memory_space<vmem>>, vector<1x64xf32>
    %74 = vector.broadcast %73 : vector<1x64xf32> to vector<16x64xf32>
    %75 = arith.addf %72, %74 : vector<16x64xf32>
    %cst_45 = arith.constant dense<0.000000e+00> : vector<16xf32>
    %76 = vector.multi_reduction <add>, %75, %cst_45 [1] : vector<16x64xf32> to vector<16xf32>
    %77 = vector.shape_cast %76 : vector<16xf32> to vector<16x1xf32>
    %cst_46 = arith.constant 6.400000e+01 : f32
    %78 = vector.broadcast %cst_46 : f32 to vector<16x1xf32>
    %79 = arith.divf %77, %78 : vector<16x1xf32>
    %80 = vector.broadcast %79 : vector<16x1xf32> to vector<16x64xf32>
    %81 = arith.subf %75, %80 : vector<16x64xf32>
    %82 = arith.mulf %81, %81 : vector<16x64xf32>
    %cst_47 = arith.constant dense<0.000000e+00> : vector<16xf32>
    %83 = vector.multi_reduction <add>, %82, %cst_47 [1] : vector<16x64xf32> to vector<16xf32>
    %84 = vector.shape_cast %83 : vector<16xf32> to vector<16x1xf32>
    %cst_48 = arith.constant 6.400000e+01 : f32
    %85 = vector.broadcast %cst_48 : f32 to vector<16x1xf32>
    %86 = arith.divf %84, %85 : vector<16x1xf32>
    %87 = vector.broadcast %79 : vector<16x1xf32> to vector<16x64xf32>
    %88 = arith.subf %75, %87 : vector<16x64xf32>
    %cst_49 = arith.constant 9.99999974E-6 : f32
    %89 = vector.broadcast %cst_49 : f32 to vector<16x1xf32>
    %90 = arith.addf %86, %89 : vector<16x1xf32>
    %91 = math.rsqrt %90 : vector<16x1xf32>
    %92 = vector.broadcast %91 : vector<16x1xf32> to vector<16x64xf32>
    %93 = arith.mulf %88, %92 : vector<16x64xf32>
    %c0_50 = arith.constant 0 : index
    %c0_51 = arith.constant 0 : index
    %94 = vector.load %arg13[%c0_50, %c0_51] : memref<1x64xf32, #tpu.memory_space<vmem>>, vector<1x64xf32>
    %95 = vector.broadcast %94 : vector<1x64xf32> to vector<16x64xf32>
    %96 = arith.mulf %93, %95 : vector<16x64xf32>
    %c0_52 = arith.constant 0 : index
    %c0_53 = arith.constant 0 : index
    %97 = vector.load %arg14[%c0_52, %c0_53] : memref<1x64xf32, #tpu.memory_space<vmem>>, vector<1x64xf32>
    %98 = vector.broadcast %97 : vector<1x64xf32> to vector<16x64xf32>
    %99 = arith.addf %96, %98 : vector<16x64xf32>
    %c0_54 = arith.constant 0 : index
    %c0_55 = arith.constant 0 : index
    %c0_56 = arith.constant 0 : index
    %100 = vector.load %arg15[%c0_54, %c0_55, %c0_56] : memref<1x16x64xf32, #tpu.memory_space<vmem>>, vector<1x16x64xf32>
    %101 = vector.shape_cast %100 : vector<1x16x64xf32> to vector<16x64xf32>
    %102 = vector.shape_cast %99 : vector<16x64xf32> to vector<1x16x64xf32>
    tpu.vector_store %arg15[%c0_54, %c0_55, %c0_56], %102 {strides = array<i32>} : memref<1x16x64xf32, #tpu.memory_space<vmem>>, vector<1x16x64xf32>,
    return
  }
  func.func @transform_0(%arg0: i32) -> (i32, i32, i32) {
    %c0_i32 = arith.constant 0 : i32
    %c0_i32_0 = arith.constant 0 : i32
    %c0_i32_1 = arith.constant 0 : i32
    return %arg0, %c0_i32, %c0_i32_0 : i32, i32, i32
  }
  func.func @transform_1(%arg0: i32) -> (i32, i32, i32) {
    %c0_i32 = arith.constant 0 : i32
    %c0_i32_0 = arith.constant 0 : i32
    %c0_i32_1 = arith.constant 0 : i32
    return %arg0, %c0_i32, %c0_i32_0 : i32, i32, i32
  }
  func.func @transform_2(%arg0: i32) -> (i32, i32, i32) {
    %c0_i32 = arith.constant 0 : i32
    %c0_i32_0 = arith.constant 0 : i32
    %c0_i32_1 = arith.constant 0 : i32
    return %arg0, %c0_i32, %c0_i32_0 : i32, i32, i32
  }
  func.func @transform_3(%arg0: i32) -> (i32, i32, i32) {
    %c0_i32 = arith.constant 0 : i32
    %c0_i32_0 = arith.constant 0 : i32
    %c0_i32_1 = arith.constant 0 : i32
    return %arg0, %c0_i32, %c0_i32_0 : i32, i32, i32
  }
  func.func @transform_4(%arg0: i32) -> (i32, i32) {
    %c0_i32 = arith.constant 0 : i32
    %c0_i32_0 = arith.constant 0 : i32
    %c0_i32_1 = arith.constant 0 : i32
    return %c0_i32, %c0_i32_0 : i32, i32
  }
  func.func @transform_5(%arg0: i32) -> (i32, i32) {
    %c0_i32 = arith.constant 0 : i32
    %c0_i32_0 = arith.constant 0 : i32
    %c0_i32_1 = arith.constant 0 : i32
    return %c0_i32, %c0_i32_0 : i32, i32
  }
  func.func @transform_6(%arg0: i32) -> (i32, i32) {
    %c0_i32 = arith.constant 0 : i32
    %c0_i32_0 = arith.constant 0 : i32
    %c0_i32_1 = arith.constant 0 : i32
    return %c0_i32, %c0_i32_0 : i32, i32
  }
  func.func @transform_7(%arg0: i32) -> (i32, i32) {
    %c0_i32 = arith.constant 0 : i32
    %c0_i32_0 = arith.constant 0 : i32
    %c0_i32_1 = arith.constant 0 : i32
    return %c0_i32, %c0_i32_0 : i32, i32
  }
  func.func @transform_8(%arg0: i32) -> (i32, i32) {
    %c0_i32 = arith.constant 0 : i32
    %c0_i32_0 = arith.constant 0 : i32
    %c0_i32_1 = arith.constant 0 : i32
    return %c0_i32, %c0_i32_0 : i32, i32
  }
  func.func @transform_9(%arg0: i32) -> (i32, i32) {
    %c0_i32 = arith.constant 0 : i32
    %c0_i32_0 = arith.constant 0 : i32
    %c0_i32_1 = arith.constant 0 : i32
    return %c0_i32, %c0_i32_0 : i32, i32
  }
  func.func @transform_10(%arg0: i32) -> (i32, i32) {
    %c0_i32 = arith.constant 0 : i32
    %c0_i32_0 = arith.constant 0 : i32
    %c0_i32_1 = arith.constant 0 : i32
    return %c0_i32, %c0_i32_0 : i32, i32
  }
  func.func @transform_11(%arg0: i32) -> (i32, i32) {
    %c0_i32 = arith.constant 0 : i32
    %c0_i32_0 = arith.constant 0 : i32
    %c0_i32_1 = arith.constant 0 : i32
    return %c0_i32, %c0_i32_0 : i32, i32
  }
  func.func @transform_12(%arg0: i32) -> (i32, i32) {
    %c0_i32 = arith.constant 0 : i32
    %c0_i32_0 = arith.constant 0 : i32
    %c0_i32_1 = arith.constant 0 : i32
    return %c0_i32, %c0_i32_0 : i32, i32
  }
  func.func @transform_13(%arg0: i32) -> (i32, i32) {
    %c0_i32 = arith.constant 0 : i32
    %c0_i32_0 = arith.constant 0 : i32
    %c0_i32_1 = arith.constant 0 : i32
    return %c0_i32, %c0_i32_0 : i32, i32
  }
  func.func @transform_14(%arg0: i32) -> (i32, i32, i32) {
    %c0_i32 = arith.constant 0 : i32
    %c0_i32_0 = arith.constant 0 : i32
    %c0_i32_1 = arith.constant 0 : i32
    return %arg0, %c0_i32, %c0_i32_0 : i32, i32, i32
  }
}

module attributes {stable_mosaic.version = 11 : i64} {
  func.func @_mlp2_res_ln_kernel(%arg0: memref<18x64xf32, #tpu.memory_space<vmem>>, %arg1: memref<64x128xbf16, #tpu.memory_space<vmem>>, %arg2: memref<1x128xf32, #tpu.memory_space<vmem>>, %arg3: memref<128x64xbf16, #tpu.memory_space<vmem>>, %arg4: memref<1x64xf32, #tpu.memory_space<vmem>>, %arg5: memref<1x64xf32, #tpu.memory_space<vmem>>, %arg6: memref<1x64xf32, #tpu.memory_space<vmem>>, %arg7: memref<18x64xf32, #tpu.memory_space<vmem>>) attributes {dimension_semantics = [], scalar_prefetch = 0 : i64, scratch_operands = 0 : i64, tpu.core_type = #tpu.core_type<tc>} {
    %c0 = arith.constant 0 : index
    %c0_0 = arith.constant 0 : index
    %0 = vector.load %arg0[%c0, %c0_0] : memref<18x64xf32, #tpu.memory_space<vmem>>, vector<18x64xf32>
    %1 = arith.truncf %0 : vector<18x64xf32> to vector<18x64xbf16>
    %c0_1 = arith.constant 0 : index
    %c0_2 = arith.constant 0 : index
    %2 = vector.load %arg1[%c0_1, %c0_2] : memref<64x128xbf16, #tpu.memory_space<vmem>>, vector<64x128xbf16>
    %cst = arith.constant dense<0.000000e+00> : vector<18x128xf32>
    %3 = tpu.matmul %1, %2, %cst {dimension_numbers = #tpu.dot_dimension_numbers<[1], [0], [0], [1], [0, 0, 1, 1], [], []>} : vector<18x64xbf16>, vector<64x128xbf16>, vector<18x128xf32> -> vector<18x128xf32>
    %c0_3 = arith.constant 0 : index
    %c0_4 = arith.constant 0 : index
    %4 = vector.load %arg2[%c0_3, %c0_4] : memref<1x128xf32, #tpu.memory_space<vmem>>, vector<1x128xf32>
    %5 = vector.broadcast %4 : vector<1x128xf32> to vector<18x128xf32>
    %6 = arith.addf %3, %5 : vector<18x128xf32>
    %cst_5 = arith.constant 0.000000e+00 : f32
    %7 = vector.broadcast %cst_5 : f32 to vector<18x128xf32>
    %8 = arith.maximumf %6, %7 : vector<18x128xf32>
    %9 = arith.truncf %8 : vector<18x128xf32> to vector<18x128xbf16>
    %c0_6 = arith.constant 0 : index
    %c0_7 = arith.constant 0 : index
    %10 = vector.load %arg3[%c0_6, %c0_7] : memref<128x64xbf16, #tpu.memory_space<vmem>>, vector<128x64xbf16>
    %cst_8 = arith.constant dense<0.000000e+00> : vector<18x64xf32>
    %11 = tpu.matmul %9, %10, %cst_8 {dimension_numbers = #tpu.dot_dimension_numbers<[1], [0], [0], [1], [0, 0, 1, 1], [], []>} : vector<18x128xbf16>, vector<128x64xbf16>, vector<18x64xf32> -> vector<18x64xf32>
    %c0_9 = arith.constant 0 : index
    %c0_10 = arith.constant 0 : index
    %12 = vector.load %arg4[%c0_9, %c0_10] : memref<1x64xf32, #tpu.memory_space<vmem>>, vector<1x64xf32>
    %13 = vector.broadcast %12 : vector<1x64xf32> to vector<18x64xf32>
    %14 = arith.addf %11, %13 : vector<18x64xf32>
    %15 = arith.addf %0, %14 : vector<18x64xf32>
    %cst_11 = arith.constant dense<0.000000e+00> : vector<18xf32>
    %16 = vector.multi_reduction <add>, %15, %cst_11 [1] : vector<18x64xf32> to vector<18xf32>
    %17 = vector.shape_cast %16 : vector<18xf32> to vector<18x1xf32>
    %cst_12 = arith.constant 6.400000e+01 : f32
    %18 = vector.broadcast %cst_12 : f32 to vector<18x1xf32>
    %19 = arith.divf %17, %18 : vector<18x1xf32>
    %20 = vector.broadcast %19 : vector<18x1xf32> to vector<18x64xf32>
    %21 = arith.subf %15, %20 : vector<18x64xf32>
    %22 = arith.mulf %21, %21 : vector<18x64xf32>
    %cst_13 = arith.constant dense<0.000000e+00> : vector<18xf32>
    %23 = vector.multi_reduction <add>, %22, %cst_13 [1] : vector<18x64xf32> to vector<18xf32>
    %24 = vector.shape_cast %23 : vector<18xf32> to vector<18x1xf32>
    %cst_14 = arith.constant 6.400000e+01 : f32
    %25 = vector.broadcast %cst_14 : f32 to vector<18x1xf32>
    %26 = arith.divf %24, %25 : vector<18x1xf32>
    %27 = vector.broadcast %19 : vector<18x1xf32> to vector<18x64xf32>
    %28 = arith.subf %15, %27 : vector<18x64xf32>
    %cst_15 = arith.constant 9.99999974E-6 : f32
    %29 = vector.broadcast %cst_15 : f32 to vector<18x1xf32>
    %30 = arith.addf %26, %29 : vector<18x1xf32>
    %31 = math.rsqrt %30 : vector<18x1xf32>
    %32 = vector.broadcast %31 : vector<18x1xf32> to vector<18x64xf32>
    %33 = arith.mulf %28, %32 : vector<18x64xf32>
    %c0_16 = arith.constant 0 : index
    %c0_17 = arith.constant 0 : index
    %34 = vector.load %arg5[%c0_16, %c0_17] : memref<1x64xf32, #tpu.memory_space<vmem>>, vector<1x64xf32>
    %35 = vector.broadcast %34 : vector<1x64xf32> to vector<18x64xf32>
    %36 = arith.mulf %33, %35 : vector<18x64xf32>
    %c0_18 = arith.constant 0 : index
    %c0_19 = arith.constant 0 : index
    %37 = vector.load %arg6[%c0_18, %c0_19] : memref<1x64xf32, #tpu.memory_space<vmem>>, vector<1x64xf32>
    %38 = vector.broadcast %37 : vector<1x64xf32> to vector<18x64xf32>
    %39 = arith.addf %36, %38 : vector<18x64xf32>
    %c0_20 = arith.constant 0 : index
    %c0_21 = arith.constant 0 : index
    %40 = vector.load %arg7[%c0_20, %c0_21] : memref<18x64xf32, #tpu.memory_space<vmem>>, vector<18x64xf32>
    tpu.vector_store %arg7[%c0_20, %c0_21], %39 {strides = array<i32>} : memref<18x64xf32, #tpu.memory_space<vmem>>, vector<18x64xf32>,
    return
  }
}

module attributes {stable_mosaic.version = 11 : i64} {
  func.func @_attn_kernel(%arg0: i32, %arg1: memref<1x16x64xbf16, #tpu.memory_space<vmem>>, %arg2: memref<1x9x64xbf16, #tpu.memory_space<vmem>>, %arg3: memref<1x9x64xbf16, #tpu.memory_space<vmem>>, %arg4: memref<1x16x64xf32, #tpu.memory_space<vmem>>, %arg5: memref<64x32xbf16, #tpu.memory_space<vmem>>, %arg6: memref<1x32xf32, #tpu.memory_space<vmem>>, %arg7: memref<64x32xbf16, #tpu.memory_space<vmem>>, %arg8: memref<1x32xf32, #tpu.memory_space<vmem>>, %arg9: memref<64x32xbf16, #tpu.memory_space<vmem>>, %arg10: memref<1x32xf32, #tpu.memory_space<vmem>>, %arg11: memref<32x64xbf16, #tpu.memory_space<vmem>>, %arg12: memref<1x64xf32, #tpu.memory_space<vmem>>, %arg13: memref<1x64xf32, #tpu.memory_space<vmem>>, %arg14: memref<1x64xf32, #tpu.memory_space<vmem>>, %arg15: memref<1x16x64xf32, #tpu.memory_space<vmem>>) attributes {dimension_semantics = [#tpu.dimension_semantics<parallel>], iteration_bounds = array<i64: 2>, scalar_prefetch = 0 : i64, scratch_operands = 0 : i64, tpu.core_type = #tpu.core_type<tc>, window_params = [{transform_indices = @transform_0, window_bounds = array<i64: 1, 16, 64>}, {transform_indices = @transform_1, window_bounds = array<i64: 1, 9, 64>}, {transform_indices = @transform_2, window_bounds = array<i64: 1, 9, 64>}, {transform_indices = @transform_3, window_bounds = array<i64: 1, 16, 64>}, {pipeline_mode = #tpu.pipeline_mode<synchronous>, transform_indices = @transform_4, window_bounds = array<i64: 64, 32>}, {pipeline_mode = #tpu.pipeline_mode<synchronous>, transform_indices = @transform_5, window_bounds = array<i64: 1, 32>}, {pipeline_mode = #tpu.pipeline_mode<synchronous>, transform_indices = @transform_6, window_bounds = array<i64: 64, 32>}, {pipeline_mode = #tpu.pipeline_mode<synchronous>, transform_indices = @transform_7, window_bounds = array<i64: 1, 32>}, {pipeline_mode = #tpu.pipeline_mode<synchronous>, transform_indices = @transform_8, window_bounds = array<i64: 64, 32>}, {pipeline_mode = #tpu.pipeline_mode<synchronous>, transform_indices = @transform_9, window_bounds = array<i64: 1, 32>}, {pipeline_mode = #tpu.pipeline_mode<synchronous>, transform_indices = @transform_10, window_bounds = array<i64: 32, 64>}, {pipeline_mode = #tpu.pipeline_mode<synchronous>, transform_indices = @transform_11, window_bounds = array<i64: 1, 64>}, {pipeline_mode = #tpu.pipeline_mode<synchronous>, transform_indices = @transform_12, window_bounds = array<i64: 1, 64>}, {pipeline_mode = #tpu.pipeline_mode<synchronous>, transform_indices = @transform_13, window_bounds = array<i64: 1, 64>}, {transform_indices = @transform_14, window_bounds = array<i64: 1, 16, 64>}]} {
    %c0 = arith.constant 0 : index
    %c0_0 = arith.constant 0 : index
    %c0_1 = arith.constant 0 : index
    %0 = vector.load %arg1[%c0, %c0_0, %c0_1] : memref<1x16x64xbf16, #tpu.memory_space<vmem>>, vector<1x16x64xbf16>
    %1 = vector.shape_cast %0 : vector<1x16x64xbf16> to vector<16x64xbf16>
    %c0_2 = arith.constant 0 : index
    %c0_3 = arith.constant 0 : index
    %c0_4 = arith.constant 0 : index
    %2 = vector.load %arg2[%c0_2, %c0_3, %c0_4] : memref<1x9x64xbf16, #tpu.memory_space<vmem>>, vector<1x9x64xbf16>
    %3 = vector.shape_cast %2 : vector<1x9x64xbf16> to vector<9x64xbf16>
    %c0_5 = arith.constant 0 : index
    %c0_6 = arith.constant 0 : index
    %c0_7 = arith.constant 0 : index
    %4 = vector.load %arg3[%c0_5, %c0_6, %c0_7] : memref<1x9x64xbf16, #tpu.memory_space<vmem>>, vector<1x9x64xbf16>
    %5 = vector.shape_cast %4 : vector<1x9x64xbf16> to vector<9x64xbf16>
    %c0_8 = arith.constant 0 : index
    %c0_9 = arith.constant 0 : index
    %6 = vector.load %arg5[%c0_8, %c0_9] : memref<64x32xbf16, #tpu.memory_space<vmem>>, vector<64x32xbf16>
    %cst = arith.constant dense<0.000000e+00> : vector<16x32xf32>
    %7 = tpu.matmul %1, %6, %cst {dimension_numbers = #tpu.dot_dimension_numbers<[1], [0], [0], [1], [0, 0, 1, 1], [], []>} : vector<16x64xbf16>, vector<64x32xbf16>, vector<16x32xf32> -> vector<16x32xf32>
    %c0_10 = arith.constant 0 : index
    %c0_11 = arith.constant 0 : index
    %8 = vector.load %arg6[%c0_10, %c0_11] : memref<1x32xf32, #tpu.memory_space<vmem>>, vector<1x32xf32>
    %9 = vector.broadcast %8 : vector<1x32xf32> to vector<16x32xf32>
    %10 = arith.addf %7, %9 : vector<16x32xf32>
    %c0_12 = arith.constant 0 : index
    %c0_13 = arith.constant 0 : index
    %11 = vector.load %arg7[%c0_12, %c0_13] : memref<64x32xbf16, #tpu.memory_space<vmem>>, vector<64x32xbf16>
    %cst_14 = arith.constant dense<0.000000e+00> : vector<9x32xf32>
    %12 = tpu.matmul %3, %11, %cst_14 {dimension_numbers = #tpu.dot_dimension_numbers<[1], [0], [0], [1], [0, 0, 1, 1], [], []>} : vector<9x64xbf16>, vector<64x32xbf16>, vector<9x32xf32> -> vector<9x32xf32>
    %c0_15 = arith.constant 0 : index
    %c0_16 = arith.constant 0 : index
    %13 = vector.load %arg8[%c0_15, %c0_16] : memref<1x32xf32, #tpu.memory_space<vmem>>, vector<1x32xf32>
    %14 = vector.broadcast %13 : vector<1x32xf32> to vector<9x32xf32>
    %15 = arith.addf %12, %14 : vector<9x32xf32>
    %c0_17 = arith.constant 0 : index
    %c0_18 = arith.constant 0 : index
    %16 = vector.load %arg9[%c0_17, %c0_18] : memref<64x32xbf16, #tpu.memory_space<vmem>>, vector<64x32xbf16>
    %cst_19 = arith.constant dense<0.000000e+00> : vector<9x32xf32>
    %17 = tpu.matmul %5, %16, %cst_19 {dimension_numbers = #tpu.dot_dimension_numbers<[1], [0], [0], [1], [0, 0, 1, 1], [], []>} : vector<9x64xbf16>, vector<64x32xbf16>, vector<9x32xf32> -> vector<9x32xf32>
    %c0_20 = arith.constant 0 : index
    %c0_21 = arith.constant 0 : index
    %18 = vector.load %arg10[%c0_20, %c0_21] : memref<1x32xf32, #tpu.memory_space<vmem>>, vector<1x32xf32>
    %19 = vector.broadcast %18 : vector<1x32xf32> to vector<9x32xf32>
    %20 = arith.addf %17, %19 : vector<9x32xf32>
    %cst_22 = arith.constant 0.000000e+00 : f32
    %21 = vector.broadcast %cst_22 : f32 to vector<16x64xf32>
    %22 = vector.extract_strided_slice %10 {offsets = [0, 0], sizes = [16, 16], strides = [1, 1]} : vector<16x32xf32> to vector<16x16xf32>
    %23 = vector.extract_strided_slice %15 {offsets = [0, 0], sizes = [9, 16], strides = [1, 1]} : vector<9x32xf32> to vector<9x16xf32>
    %24 = vector.extract_strided_slice %20 {offsets = [0, 0], sizes = [9, 16], strides = [1, 1]} : vector<9x32xf32> to vector<9x16xf32>
    %cst_23 = arith.constant dense<0.000000e+00> : vector<16x9xf32>
    %25 = tpu.matmul %22, %23, %cst_23 {dimension_numbers = #tpu.dot_dimension_numbers<[1], [1], [0], [0], [0, 0, 1, 0], [], []>} : vector<16x16xf32>, vector<9x16xf32>, vector<16x9xf32> -> vector<16x9xf32>
    %cst_24 = arith.constant 2.500000e-01 : f32
    %26 = vector.broadcast %cst_24 : f32 to vector<16x9xf32>
    %27 = arith.mulf %25, %26 : vector<16x9xf32>
    %cst_25 = arith.constant dense<0xFF800000> : vector<16xf32>
    %28 = vector.multi_reduction <maximumf>, %27, %cst_25 [1] : vector<16x9xf32> to vector<16xf32>
    %cst_26 = arith.constant 0xFF800000 : f32
    %29 = vector.broadcast %cst_26 : f32 to vector<16xf32>
    %30 = arith.maximumf %29, %28 : vector<16xf32>
    %31 = vector.shape_cast %30 : vector<16xf32> to vector<16x1xf32>
    %32 = vector.broadcast %31 : vector<16x1xf32> to vector<16x9xf32>
    %33 = arith.subf %27, %32 : vector<16x9xf32>
    %34 = math.exp %33 : vector<16x9xf32>
    %cst_27 = arith.constant dense<0.000000e+00> : vector<16xf32>
    %35 = vector.multi_reduction <add>, %34, %cst_27 [1] : vector<16x9xf32> to vector<16xf32>
    %36 = vector.shape_cast %35 : vector<16xf32> to vector<16x1xf32>
    %37 = vector.broadcast %36 : vector<16x1xf32> to vector<16x9xf32>
    %38 = arith.divf %34, %37 : vector<16x9xf32>
    %39 = arith.truncf %38 : vector<16x9xf32> to vector<16x9xbf16>
    %40 = arith.truncf %24 : vector<9x16xf32> to vector<9x16xbf16>
    %cst_28 = arith.constant dense<0.000000e+00> : vector<16x16xf32>
    %41 = tpu.matmul %39, %40, %cst_28 {dimension_numbers = #tpu.dot_dimension_numbers<[1], [0], [0], [1], [0, 0, 1, 1], [], []>} : vector<16x9xbf16>, vector<9x16xbf16>, vector<16x16xf32> -> vector<16x16xf32>
    %42 = arith.truncf %41 : vector<16x16xf32> to vector<16x16xbf16>
    %c0_29 = arith.constant 0 : index
    %c0_30 = arith.constant 0 : index
    %43 = vector.load %arg11[%c0_29, %c0_30] : memref<32x64xbf16, #tpu.memory_space<vmem>>, vector<16x64xbf16>
    %cst_31 = arith.constant dense<0.000000e+00> : vector<16x64xf32>
    %44 = tpu.matmul %42, %43, %cst_31 {dimension_numbers = #tpu.dot_dimension_numbers<[1], [0], [0], [1], [0, 0, 1, 1], [], []>} : vector<16x16xbf16>, vector<16x64xbf16>, vector<16x64xf32> -> vector<16x64xf32>
    %45 = arith.addf %21, %44 : vector<16x64xf32>
    %46 = vector.extract_strided_slice %10 {offsets = [0, 16], sizes = [16, 16], strides = [1, 1]} : vector<16x32xf32> to vector<16x16xf32>
    %47 = vector.extract_strided_slice %15 {offsets = [0, 16], sizes = [9, 16], strides = [1, 1]} : vector<9x32xf32> to vector<9x16xf32>
    %48 = vector.extract_strided_slice %20 {offsets = [0, 16], sizes = [9, 16], strides = [1, 1]} : vector<9x32xf32> to vector<9x16xf32>
    %cst_32 = arith.constant dense<0.000000e+00> : vector<16x9xf32>
    %49 = tpu.matmul %46, %47, %cst_32 {dimension_numbers = #tpu.dot_dimension_numbers<[1], [1], [0], [0], [0, 0, 1, 0], [], []>} : vector<16x16xf32>, vector<9x16xf32>, vector<16x9xf32> -> vector<16x9xf32>
    %cst_33 = arith.constant 2.500000e-01 : f32
    %50 = vector.broadcast %cst_33 : f32 to vector<16x9xf32>
    %51 = arith.mulf %49, %50 : vector<16x9xf32>
    %cst_34 = arith.constant dense<0xFF800000> : vector<16xf32>
    %52 = vector.multi_reduction <maximumf>, %51, %cst_34 [1] : vector<16x9xf32> to vector<16xf32>
    %cst_35 = arith.constant 0xFF800000 : f32
    %53 = vector.broadcast %cst_35 : f32 to vector<16xf32>
    %54 = arith.maximumf %53, %52 : vector<16xf32>
    %55 = vector.shape_cast %54 : vector<16xf32> to vector<16x1xf32>
    %56 = vector.broadcast %55 : vector<16x1xf32> to vector<16x9xf32>
    %57 = arith.subf %51, %56 : vector<16x9xf32>
    %58 = math.exp %57 : vector<16x9xf32>
    %cst_36 = arith.constant dense<0.000000e+00> : vector<16xf32>
    %59 = vector.multi_reduction <add>, %58, %cst_36 [1] : vector<16x9xf32> to vector<16xf32>
    %60 = vector.shape_cast %59 : vector<16xf32> to vector<16x1xf32>
    %61 = vector.broadcast %60 : vector<16x1xf32> to vector<16x9xf32>
    %62 = arith.divf %58, %61 : vector<16x9xf32>
    %63 = arith.truncf %62 : vector<16x9xf32> to vector<16x9xbf16>
    %64 = arith.truncf %48 : vector<9x16xf32> to vector<9x16xbf16>
    %cst_37 = arith.constant dense<0.000000e+00> : vector<16x16xf32>
    %65 = tpu.matmul %63, %64, %cst_37 {dimension_numbers = #tpu.dot_dimension_numbers<[1], [0], [0], [1], [0, 0, 1, 1], [], []>} : vector<16x9xbf16>, vector<9x16xbf16>, vector<16x16xf32> -> vector<16x16xf32>
    %66 = arith.truncf %65 : vector<16x16xf32> to vector<16x16xbf16>
    %c16 = arith.constant 16 : index
    %c0_38 = arith.constant 0 : index
    %67 = vector.load %arg11[%c16, %c0_38] : memref<32x64xbf16, #tpu.memory_space<vmem>>, vector<16x64xbf16>
    %cst_39 = arith.constant dense<0.000000e+00> : vector<16x64xf32>
    %68 = tpu.matmul %66, %67, %cst_39 {dimension_numbers = #tpu.dot_dimension_numbers<[1], [0], [0], [1], [0, 0, 1, 1], [], []>} : vector<16x16xbf16>, vector<16x64xbf16>, vector<16x64xf32> -> vector<16x64xf32>
    %69 = arith.addf %45, %68 : vector<16x64xf32>
    %c0_40 = arith.constant 0 : index
    %c0_41 = arith.constant 0 : index
    %c0_42 = arith.constant 0 : index
    %70 = vector.load %arg4[%c0_40, %c0_41, %c0_42] : memref<1x16x64xf32, #tpu.memory_space<vmem>>, vector<1x16x64xf32>
    %71 = vector.shape_cast %70 : vector<1x16x64xf32> to vector<16x64xf32>
    %72 = arith.addf %71, %69 : vector<16x64xf32>
    %c0_43 = arith.constant 0 : index
    %c0_44 = arith.constant 0 : index
    %73 = vector.load %arg12[%c0_43, %c0_44] : memref<1x64xf32, #tpu.memory_space<vmem>>, vector<1x64xf32>
    %74 = vector.broadcast %73 : vector<1x64xf32> to vector<16x64xf32>
    %75 = arith.addf %72, %74 : vector<16x64xf32>
    %cst_45 = arith.constant dense<0.000000e+00> : vector<16xf32>
    %76 = vector.multi_reduction <add>, %75, %cst_45 [1] : vector<16x64xf32> to vector<16xf32>
    %77 = vector.shape_cast %76 : vector<16xf32> to vector<16x1xf32>
    %cst_46 = arith.constant 6.400000e+01 : f32
    %78 = vector.broadcast %cst_46 : f32 to vector<16x1xf32>
    %79 = arith.divf %77, %78 : vector<16x1xf32>
    %80 = vector.broadcast %79 : vector<16x1xf32> to vector<16x64xf32>
    %81 = arith.subf %75, %80 : vector<16x64xf32>
    %82 = arith.mulf %81, %81 : vector<16x64xf32>
    %cst_47 = arith.constant dense<0.000000e+00> : vector<16xf32>
    %83 = vector.multi_reduction <add>, %82, %cst_47 [1] : vector<16x64xf32> to vector<16xf32>
    %84 = vector.shape_cast %83 : vector<16xf32> to vector<16x1xf32>
    %cst_48 = arith.constant 6.400000e+01 : f32
    %85 = vector.broadcast %cst_48 : f32 to vector<16x1xf32>
    %86 = arith.divf %84, %85 : vector<16x1xf32>
    %87 = vector.broadcast %79 : vector<16x1xf32> to vector<16x64xf32>
    %88 = arith.subf %75, %87 : vector<16x64xf32>
    %cst_49 = arith.constant 9.99999974E-6 : f32
    %89 = vector.broadcast %cst_49 : f32 to vector<16x1xf32>
    %90 = arith.addf %86, %89 : vector<16x1xf32>
    %91 = math.rsqrt %90 : vector<16x1xf32>
    %92 = vector.broadcast %91 : vector<16x1xf32> to vector<16x64xf32>
    %93 = arith.mulf %88, %92 : vector<16x64xf32>
    %c0_50 = arith.constant 0 : index
    %c0_51 = arith.constant 0 : index
    %94 = vector.load %arg13[%c0_50, %c0_51] : memref<1x64xf32, #tpu.memory_space<vmem>>, vector<1x64xf32>
    %95 = vector.broadcast %94 : vector<1x64xf32> to vector<16x64xf32>
    %96 = arith.mulf %93, %95 : vector<16x64xf32>
    %c0_52 = arith.constant 0 : index
    %c0_53 = arith.constant 0 : index
    %97 = vector.load %arg14[%c0_52, %c0_53] : memref<1x64xf32, #tpu.memory_space<vmem>>, vector<1x64xf32>
    %98 = vector.broadcast %97 : vector<1x64xf32> to vector<16x64xf32>
    %99 = arith.addf %96, %98 : vector<16x64xf32>
    %c0_54 = arith.constant 0 : index
    %c0_55 = arith.constant 0 : index
    %c0_56 = arith.constant 0 : index
    %100 = vector.load %arg15[%c0_54, %c0_55, %c0_56] : memref<1x16x64xf32, #tpu.memory_space<vmem>>, vector<1x16x64xf32>
    %101 = vector.shape_cast %100 : vector<1x16x64xf32> to vector<16x64xf32>
    %102 = vector.shape_cast %99 : vector<16x64xf32> to vector<1x16x64xf32>
    tpu.vector_store %arg15[%c0_54, %c0_55, %c0_56], %102 {strides = array<i32>} : memref<1x16x64xf32, #tpu.memory_space<vmem>>, vector<1x16x64xf32>,
    return
  }
  func.func @transform_0(%arg0: i32) -> (i32, i32, i32) {
    %c0_i32 = arith.constant 0 : i32
    %c0_i32_0 = arith.constant 0 : i32
    %c0_i32_1 = arith.constant 0 : i32
    return %arg0, %c0_i32, %c0_i32_0 : i32, i32, i32
  }
  func.func @transform_1(%arg0: i32) -> (i32, i32, i32) {
    %c0_i32 = arith.constant 0 : i32
    %c0_i32_0 = arith.constant 0 : i32
    %c0_i32_1 = arith.constant 0 : i32
    return %arg0, %c0_i32, %c0_i32_0 : i32, i32, i32
  }
  func.func @transform_2(%arg0: i32) -> (i32, i32, i32) {
    %c0_i32 = arith.constant 0 : i32
    %c0_i32_0 = arith.constant 0 : i32
    %c0_i32_1 = arith.constant 0 : i32
    return %arg0, %c0_i32, %c0_i32_0 : i32, i32, i32
  }
  func.func @transform_3(%arg0: i32) -> (i32, i32, i32) {
    %c0_i32 = arith.constant 0 : i32
    %c0_i32_0 = arith.constant 0 : i32
    %c0_i32_1 = arith.constant 0 : i32
    return %arg0, %c0_i32, %c0_i32_0 : i32, i32, i32
  }
  func.func @transform_4(%arg0: i32) -> (i32, i32) {
    %c0_i32 = arith.constant 0 : i32
    %c0_i32_0 = arith.constant 0 : i32
    %c0_i32_1 = arith.constant 0 : i32
    return %c0_i32, %c0_i32_0 : i32, i32
  }
  func.func @transform_5(%arg0: i32) -> (i32, i32) {
    %c0_i32 = arith.constant 0 : i32
    %c0_i32_0 = arith.constant 0 : i32
    %c0_i32_1 = arith.constant 0 : i32
    return %c0_i32, %c0_i32_0 : i32, i32
  }
  func.func @transform_6(%arg0: i32) -> (i32, i32) {
    %c0_i32 = arith.constant 0 : i32
    %c0_i32_0 = arith.constant 0 : i32
    %c0_i32_1 = arith.constant 0 : i32
    return %c0_i32, %c0_i32_0 : i32, i32
  }
  func.func @transform_7(%arg0: i32) -> (i32, i32) {
    %c0_i32 = arith.constant 0 : i32
    %c0_i32_0 = arith.constant 0 : i32
    %c0_i32_1 = arith.constant 0 : i32
    return %c0_i32, %c0_i32_0 : i32, i32
  }
  func.func @transform_8(%arg0: i32) -> (i32, i32) {
    %c0_i32 = arith.constant 0 : i32
    %c0_i32_0 = arith.constant 0 : i32
    %c0_i32_1 = arith.constant 0 : i32
    return %c0_i32, %c0_i32_0 : i32, i32
  }
  func.func @transform_9(%arg0: i32) -> (i32, i32) {
    %c0_i32 = arith.constant 0 : i32
    %c0_i32_0 = arith.constant 0 : i32
    %c0_i32_1 = arith.constant 0 : i32
    return %c0_i32, %c0_i32_0 : i32, i32
  }
  func.func @transform_10(%arg0: i32) -> (i32, i32) {
    %c0_i32 = arith.constant 0 : i32
    %c0_i32_0 = arith.constant 0 : i32
    %c0_i32_1 = arith.constant 0 : i32
    return %c0_i32, %c0_i32_0 : i32, i32
  }
  func.func @transform_11(%arg0: i32) -> (i32, i32) {
    %c0_i32 = arith.constant 0 : i32
    %c0_i32_0 = arith.constant 0 : i32
    %c0_i32_1 = arith.constant 0 : i32
    return %c0_i32, %c0_i32_0 : i32, i32
  }
  func.func @transform_12(%arg0: i32) -> (i32, i32) {
    %c0_i32 = arith.constant 0 : i32
    %c0_i32_0 = arith.constant 0 : i32
    %c0_i32_1 = arith.constant 0 : i32
    return %c0_i32, %c0_i32_0 : i32, i32
  }
  func.func @transform_13(%arg0: i32) -> (i32, i32) {
    %c0_i32 = arith.constant 0 : i32
    %c0_i32_0 = arith.constant 0 : i32
    %c0_i32_1 = arith.constant 0 : i32
    return %c0_i32, %c0_i32_0 : i32, i32
  }
  func.func @transform_14(%arg0: i32) -> (i32, i32, i32) {
    %c0_i32 = arith.constant 0 : i32
    %c0_i32_0 = arith.constant 0 : i32
    %c0_i32_1 = arith.constant 0 : i32
    return %arg0, %c0_i32, %c0_i32_0 : i32, i32, i32
  }
}

module attributes {stable_mosaic.version = 11 : i64} {
  func.func @_attn_kernel(%arg0: i32, %arg1: memref<1x9x64xbf16, #tpu.memory_space<vmem>>, %arg2: memref<1x16x64xbf16, #tpu.memory_space<vmem>>, %arg3: memref<1x16x64xbf16, #tpu.memory_space<vmem>>, %arg4: memref<1x9x64xf32, #tpu.memory_space<vmem>>, %arg5: memref<64x32xbf16, #tpu.memory_space<vmem>>, %arg6: memref<1x32xf32, #tpu.memory_space<vmem>>, %arg7: memref<64x32xbf16, #tpu.memory_space<vmem>>, %arg8: memref<1x32xf32, #tpu.memory_space<vmem>>, %arg9: memref<64x32xbf16, #tpu.memory_space<vmem>>, %arg10: memref<1x32xf32, #tpu.memory_space<vmem>>, %arg11: memref<32x64xbf16, #tpu.memory_space<vmem>>, %arg12: memref<1x64xf32, #tpu.memory_space<vmem>>, %arg13: memref<1x64xf32, #tpu.memory_space<vmem>>, %arg14: memref<1x64xf32, #tpu.memory_space<vmem>>, %arg15: memref<1x9x64xf32, #tpu.memory_space<vmem>>) attributes {dimension_semantics = [#tpu.dimension_semantics<parallel>], iteration_bounds = array<i64: 2>, scalar_prefetch = 0 : i64, scratch_operands = 0 : i64, tpu.core_type = #tpu.core_type<tc>, window_params = [{transform_indices = @transform_0, window_bounds = array<i64: 1, 9, 64>}, {transform_indices = @transform_1, window_bounds = array<i64: 1, 16, 64>}, {transform_indices = @transform_2, window_bounds = array<i64: 1, 16, 64>}, {transform_indices = @transform_3, window_bounds = array<i64: 1, 9, 64>}, {pipeline_mode = #tpu.pipeline_mode<synchronous>, transform_indices = @transform_4, window_bounds = array<i64: 64, 32>}, {pipeline_mode = #tpu.pipeline_mode<synchronous>, transform_indices = @transform_5, window_bounds = array<i64: 1, 32>}, {pipeline_mode = #tpu.pipeline_mode<synchronous>, transform_indices = @transform_6, window_bounds = array<i64: 64, 32>}, {pipeline_mode = #tpu.pipeline_mode<synchronous>, transform_indices = @transform_7, window_bounds = array<i64: 1, 32>}, {pipeline_mode = #tpu.pipeline_mode<synchronous>, transform_indices = @transform_8, window_bounds = array<i64: 64, 32>}, {pipeline_mode = #tpu.pipeline_mode<synchronous>, transform_indices = @transform_9, window_bounds = array<i64: 1, 32>}, {pipeline_mode = #tpu.pipeline_mode<synchronous>, transform_indices = @transform_10, window_bounds = array<i64: 32, 64>}, {pipeline_mode = #tpu.pipeline_mode<synchronous>, transform_indices = @transform_11, window_bounds = array<i64: 1, 64>}, {pipeline_mode = #tpu.pipeline_mode<synchronous>, transform_indices = @transform_12, window_bounds = array<i64: 1, 64>}, {pipeline_mode = #tpu.pipeline_mode<synchronous>, transform_indices = @transform_13, window_bounds = array<i64: 1, 64>}, {transform_indices = @transform_14, window_bounds = array<i64: 1, 9, 64>}]} {
    %c0 = arith.constant 0 : index
    %c0_0 = arith.constant 0 : index
    %c0_1 = arith.constant 0 : index
    %0 = vector.load %arg1[%c0, %c0_0, %c0_1] : memref<1x9x64xbf16, #tpu.memory_space<vmem>>, vector<1x9x64xbf16>
    %1 = vector.shape_cast %0 : vector<1x9x64xbf16> to vector<9x64xbf16>
    %c0_2 = arith.constant 0 : index
    %c0_3 = arith.constant 0 : index
    %c0_4 = arith.constant 0 : index
    %2 = vector.load %arg2[%c0_2, %c0_3, %c0_4] : memref<1x16x64xbf16, #tpu.memory_space<vmem>>, vector<1x16x64xbf16>
    %3 = vector.shape_cast %2 : vector<1x16x64xbf16> to vector<16x64xbf16>
    %c0_5 = arith.constant 0 : index
    %c0_6 = arith.constant 0 : index
    %c0_7 = arith.constant 0 : index
    %4 = vector.load %arg3[%c0_5, %c0_6, %c0_7] : memref<1x16x64xbf16, #tpu.memory_space<vmem>>, vector<1x16x64xbf16>
    %5 = vector.shape_cast %4 : vector<1x16x64xbf16> to vector<16x64xbf16>
    %c0_8 = arith.constant 0 : index
    %c0_9 = arith.constant 0 : index
    %6 = vector.load %arg5[%c0_8, %c0_9] : memref<64x32xbf16, #tpu.memory_space<vmem>>, vector<64x32xbf16>
    %cst = arith.constant dense<0.000000e+00> : vector<9x32xf32>
    %7 = tpu.matmul %1, %6, %cst {dimension_numbers = #tpu.dot_dimension_numbers<[1], [0], [0], [1], [0, 0, 1, 1], [], []>} : vector<9x64xbf16>, vector<64x32xbf16>, vector<9x32xf32> -> vector<9x32xf32>
    %c0_10 = arith.constant 0 : index
    %c0_11 = arith.constant 0 : index
    %8 = vector.load %arg6[%c0_10, %c0_11] : memref<1x32xf32, #tpu.memory_space<vmem>>, vector<1x32xf32>
    %9 = vector.broadcast %8 : vector<1x32xf32> to vector<9x32xf32>
    %10 = arith.addf %7, %9 : vector<9x32xf32>
    %c0_12 = arith.constant 0 : index
    %c0_13 = arith.constant 0 : index
    %11 = vector.load %arg7[%c0_12, %c0_13] : memref<64x32xbf16, #tpu.memory_space<vmem>>, vector<64x32xbf16>
    %cst_14 = arith.constant dense<0.000000e+00> : vector<16x32xf32>
    %12 = tpu.matmul %3, %11, %cst_14 {dimension_numbers = #tpu.dot_dimension_numbers<[1], [0], [0], [1], [0, 0, 1, 1], [], []>} : vector<16x64xbf16>, vector<64x32xbf16>, vector<16x32xf32> -> vector<16x32xf32>
    %c0_15 = arith.constant 0 : index
    %c0_16 = arith.constant 0 : index
    %13 = vector.load %arg8[%c0_15, %c0_16] : memref<1x32xf32, #tpu.memory_space<vmem>>, vector<1x32xf32>
    %14 = vector.broadcast %13 : vector<1x32xf32> to vector<16x32xf32>
    %15 = arith.addf %12, %14 : vector<16x32xf32>
    %c0_17 = arith.constant 0 : index
    %c0_18 = arith.constant 0 : index
    %16 = vector.load %arg9[%c0_17, %c0_18] : memref<64x32xbf16, #tpu.memory_space<vmem>>, vector<64x32xbf16>
    %cst_19 = arith.constant dense<0.000000e+00> : vector<16x32xf32>
    %17 = tpu.matmul %5, %16, %cst_19 {dimension_numbers = #tpu.dot_dimension_numbers<[1], [0], [0], [1], [0, 0, 1, 1], [], []>} : vector<16x64xbf16>, vector<64x32xbf16>, vector<16x32xf32> -> vector<16x32xf32>
    %c0_20 = arith.constant 0 : index
    %c0_21 = arith.constant 0 : index
    %18 = vector.load %arg10[%c0_20, %c0_21] : memref<1x32xf32, #tpu.memory_space<vmem>>, vector<1x32xf32>
    %19 = vector.broadcast %18 : vector<1x32xf32> to vector<16x32xf32>
    %20 = arith.addf %17, %19 : vector<16x32xf32>
    %cst_22 = arith.constant 0.000000e+00 : f32
    %21 = vector.broadcast %cst_22 : f32 to vector<9x64xf32>
    %22 = vector.extract_strided_slice %10 {offsets = [0, 0], sizes = [9, 16], strides = [1, 1]} : vector<9x32xf32> to vector<9x16xf32>
    %23 = vector.extract_strided_slice %15 {offsets = [0, 0], sizes = [16, 16], strides = [1, 1]} : vector<16x32xf32> to vector<16x16xf32>
    %24 = vector.extract_strided_slice %20 {offsets = [0, 0], sizes = [16, 16], strides = [1, 1]} : vector<16x32xf32> to vector<16x16xf32>
    %cst_23 = arith.constant dense<0.000000e+00> : vector<9x16xf32>
    %25 = tpu.matmul %22, %23, %cst_23 {dimension_numbers = #tpu.dot_dimension_numbers<[1], [1], [0], [0], [0, 0, 1, 0], [], []>} : vector<9x16xf32>, vector<16x16xf32>, vector<9x16xf32> -> vector<9x16xf32>
    %cst_24 = arith.constant 2.500000e-01 : f32
    %26 = vector.broadcast %cst_24 : f32 to vector<9x16xf32>
    %27 = arith.mulf %25, %26 : vector<9x16xf32>
    %cst_25 = arith.constant dense<0xFF800000> : vector<9xf32>
    %28 = vector.multi_reduction <maximumf>, %27, %cst_25 [1] : vector<9x16xf32> to vector<9xf32>
    %cst_26 = arith.constant 0xFF800000 : f32
    %29 = vector.broadcast %cst_26 : f32 to vector<9xf32>
    %30 = arith.maximumf %29, %28 : vector<9xf32>
    %31 = vector.shape_cast %30 : vector<9xf32> to vector<9x1xf32>
    %32 = vector.broadcast %31 : vector<9x1xf32> to vector<9x16xf32>
    %33 = arith.subf %27, %32 : vector<9x16xf32>
    %34 = math.exp %33 : vector<9x16xf32>
    %cst_27 = arith.constant dense<0.000000e+00> : vector<9xf32>
    %35 = vector.multi_reduction <add>, %34, %cst_27 [1] : vector<9x16xf32> to vector<9xf32>
    %36 = vector.shape_cast %35 : vector<9xf32> to vector<9x1xf32>
    %37 = vector.broadcast %36 : vector<9x1xf32> to vector<9x16xf32>
    %38 = arith.divf %34, %37 : vector<9x16xf32>
    %39 = arith.truncf %38 : vector<9x16xf32> to vector<9x16xbf16>
    %40 = arith.truncf %24 : vector<16x16xf32> to vector<16x16xbf16>
    %cst_28 = arith.constant dense<0.000000e+00> : vector<9x16xf32>
    %41 = tpu.matmul %39, %40, %cst_28 {dimension_numbers = #tpu.dot_dimension_numbers<[1], [0], [0], [1], [0, 0, 1, 1], [], []>} : vector<9x16xbf16>, vector<16x16xbf16>, vector<9x16xf32> -> vector<9x16xf32>
    %42 = arith.truncf %41 : vector<9x16xf32> to vector<9x16xbf16>
    %c0_29 = arith.constant 0 : index
    %c0_30 = arith.constant 0 : index
    %43 = vector.load %arg11[%c0_29, %c0_30] : memref<32x64xbf16, #tpu.memory_space<vmem>>, vector<16x64xbf16>
    %cst_31 = arith.constant dense<0.000000e+00> : vector<9x64xf32>
    %44 = tpu.matmul %42, %43, %cst_31 {dimension_numbers = #tpu.dot_dimension_numbers<[1], [0], [0], [1], [0, 0, 1, 1], [], []>} : vector<9x16xbf16>, vector<16x64xbf16>, vector<9x64xf32> -> vector<9x64xf32>
    %45 = arith.addf %21, %44 : vector<9x64xf32>
    %46 = vector.extract_strided_slice %10 {offsets = [0, 16], sizes = [9, 16], strides = [1, 1]} : vector<9x32xf32> to vector<9x16xf32>
    %47 = vector.extract_strided_slice %15 {offsets = [0, 16], sizes = [16, 16], strides = [1, 1]} : vector<16x32xf32> to vector<16x16xf32>
    %48 = vector.extract_strided_slice %20 {offsets = [0, 16], sizes = [16, 16], strides = [1, 1]} : vector<16x32xf32> to vector<16x16xf32>
    %cst_32 = arith.constant dense<0.000000e+00> : vector<9x16xf32>
    %49 = tpu.matmul %46, %47, %cst_32 {dimension_numbers = #tpu.dot_dimension_numbers<[1], [1], [0], [0], [0, 0, 1, 0], [], []>} : vector<9x16xf32>, vector<16x16xf32>, vector<9x16xf32> -> vector<9x16xf32>
    %cst_33 = arith.constant 2.500000e-01 : f32
    %50 = vector.broadcast %cst_33 : f32 to vector<9x16xf32>
    %51 = arith.mulf %49, %50 : vector<9x16xf32>
    %cst_34 = arith.constant dense<0xFF800000> : vector<9xf32>
    %52 = vector.multi_reduction <maximumf>, %51, %cst_34 [1] : vector<9x16xf32> to vector<9xf32>
    %cst_35 = arith.constant 0xFF800000 : f32
    %53 = vector.broadcast %cst_35 : f32 to vector<9xf32>
    %54 = arith.maximumf %53, %52 : vector<9xf32>
    %55 = vector.shape_cast %54 : vector<9xf32> to vector<9x1xf32>
    %56 = vector.broadcast %55 : vector<9x1xf32> to vector<9x16xf32>
    %57 = arith.subf %51, %56 : vector<9x16xf32>
    %58 = math.exp %57 : vector<9x16xf32>
    %cst_36 = arith.constant dense<0.000000e+00> : vector<9xf32>
    %59 = vector.multi_reduction <add>, %58, %cst_36 [1] : vector<9x16xf32> to vector<9xf32>
    %60 = vector.shape_cast %59 : vector<9xf32> to vector<9x1xf32>
    %61 = vector.broadcast %60 : vector<9x1xf32> to vector<9x16xf32>
    %62 = arith.divf %58, %61 : vector<9x16xf32>
    %63 = arith.truncf %62 : vector<9x16xf32> to vector<9x16xbf16>
    %64 = arith.truncf %48 : vector<16x16xf32> to vector<16x16xbf16>
    %cst_37 = arith.constant dense<0.000000e+00> : vector<9x16xf32>
    %65 = tpu.matmul %63, %64, %cst_37 {dimension_numbers = #tpu.dot_dimension_numbers<[1], [0], [0], [1], [0, 0, 1, 1], [], []>} : vector<9x16xbf16>, vector<16x16xbf16>, vector<9x16xf32> -> vector<9x16xf32>
    %66 = arith.truncf %65 : vector<9x16xf32> to vector<9x16xbf16>
    %c16 = arith.constant 16 : index
    %c0_38 = arith.constant 0 : index
    %67 = vector.load %arg11[%c16, %c0_38] : memref<32x64xbf16, #tpu.memory_space<vmem>>, vector<16x64xbf16>
    %cst_39 = arith.constant dense<0.000000e+00> : vector<9x64xf32>
    %68 = tpu.matmul %66, %67, %cst_39 {dimension_numbers = #tpu.dot_dimension_numbers<[1], [0], [0], [1], [0, 0, 1, 1], [], []>} : vector<9x16xbf16>, vector<16x64xbf16>, vector<9x64xf32> -> vector<9x64xf32>
    %69 = arith.addf %45, %68 : vector<9x64xf32>
    %c0_40 = arith.constant 0 : index
    %c0_41 = arith.constant 0 : index
    %c0_42 = arith.constant 0 : index
    %70 = vector.load %arg4[%c0_40, %c0_41, %c0_42] : memref<1x9x64xf32, #tpu.memory_space<vmem>>, vector<1x9x64xf32>
    %71 = vector.shape_cast %70 : vector<1x9x64xf32> to vector<9x64xf32>
    %72 = arith.addf %71, %69 : vector<9x64xf32>
    %c0_43 = arith.constant 0 : index
    %c0_44 = arith.constant 0 : index
    %73 = vector.load %arg12[%c0_43, %c0_44] : memref<1x64xf32, #tpu.memory_space<vmem>>, vector<1x64xf32>
    %74 = vector.broadcast %73 : vector<1x64xf32> to vector<9x64xf32>
    %75 = arith.addf %72, %74 : vector<9x64xf32>
    %cst_45 = arith.constant dense<0.000000e+00> : vector<9xf32>
    %76 = vector.multi_reduction <add>, %75, %cst_45 [1] : vector<9x64xf32> to vector<9xf32>
    %77 = vector.shape_cast %76 : vector<9xf32> to vector<9x1xf32>
    %cst_46 = arith.constant 6.400000e+01 : f32
    %78 = vector.broadcast %cst_46 : f32 to vector<9x1xf32>
    %79 = arith.divf %77, %78 : vector<9x1xf32>
    %80 = vector.broadcast %79 : vector<9x1xf32> to vector<9x64xf32>
    %81 = arith.subf %75, %80 : vector<9x64xf32>
    %82 = arith.mulf %81, %81 : vector<9x64xf32>
    %cst_47 = arith.constant dense<0.000000e+00> : vector<9xf32>
    %83 = vector.multi_reduction <add>, %82, %cst_47 [1] : vector<9x64xf32> to vector<9xf32>
    %84 = vector.shape_cast %83 : vector<9xf32> to vector<9x1xf32>
    %cst_48 = arith.constant 6.400000e+01 : f32
    %85 = vector.broadcast %cst_48 : f32 to vector<9x1xf32>
    %86 = arith.divf %84, %85 : vector<9x1xf32>
    %87 = vector.broadcast %79 : vector<9x1xf32> to vector<9x64xf32>
    %88 = arith.subf %75, %87 : vector<9x64xf32>
    %cst_49 = arith.constant 9.99999974E-6 : f32
    %89 = vector.broadcast %cst_49 : f32 to vector<9x1xf32>
    %90 = arith.addf %86, %89 : vector<9x1xf32>
    %91 = math.rsqrt %90 : vector<9x1xf32>
    %92 = vector.broadcast %91 : vector<9x1xf32> to vector<9x64xf32>
    %93 = arith.mulf %88, %92 : vector<9x64xf32>
    %c0_50 = arith.constant 0 : index
    %c0_51 = arith.constant 0 : index
    %94 = vector.load %arg13[%c0_50, %c0_51] : memref<1x64xf32, #tpu.memory_space<vmem>>, vector<1x64xf32>
    %95 = vector.broadcast %94 : vector<1x64xf32> to vector<9x64xf32>
    %96 = arith.mulf %93, %95 : vector<9x64xf32>
    %c0_52 = arith.constant 0 : index
    %c0_53 = arith.constant 0 : index
    %97 = vector.load %arg14[%c0_52, %c0_53] : memref<1x64xf32, #tpu.memory_space<vmem>>, vector<1x64xf32>
    %98 = vector.broadcast %97 : vector<1x64xf32> to vector<9x64xf32>
    %99 = arith.addf %96, %98 : vector<9x64xf32>
    %c0_54 = arith.constant 0 : index
    %c0_55 = arith.constant 0 : index
    %c0_56 = arith.constant 0 : index
    %100 = vector.load %arg15[%c0_54, %c0_55, %c0_56] : memref<1x9x64xf32, #tpu.memory_space<vmem>>, vector<1x9x64xf32>
    %101 = vector.shape_cast %100 : vector<1x9x64xf32> to vector<9x64xf32>
    %102 = vector.shape_cast %99 : vector<9x64xf32> to vector<1x9x64xf32>
    tpu.vector_store %arg15[%c0_54, %c0_55, %c0_56], %102 {strides = array<i32>} : memref<1x9x64xf32, #tpu.memory_space<vmem>>, vector<1x9x64xf32>,
    return
  }
  func.func @transform_0(%arg0: i32) -> (i32, i32, i32) {
    %c0_i32 = arith.constant 0 : i32
    %c0_i32_0 = arith.constant 0 : i32
    %c0_i32_1 = arith.constant 0 : i32
    return %arg0, %c0_i32, %c0_i32_0 : i32, i32, i32
  }
  func.func @transform_1(%arg0: i32) -> (i32, i32, i32) {
    %c0_i32 = arith.constant 0 : i32
    %c0_i32_0 = arith.constant 0 : i32
    %c0_i32_1 = arith.constant 0 : i32
    return %arg0, %c0_i32, %c0_i32_0 : i32, i32, i32
  }
  func.func @transform_2(%arg0: i32) -> (i32, i32, i32) {
    %c0_i32 = arith.constant 0 : i32
    %c0_i32_0 = arith.constant 0 : i32
    %c0_i32_1 = arith.constant 0 : i32
    return %arg0, %c0_i32, %c0_i32_0 : i32, i32, i32
  }
  func.func @transform_3(%arg0: i32) -> (i32, i32, i32) {
    %c0_i32 = arith.constant 0 : i32
    %c0_i32_0 = arith.constant 0 : i32
    %c0_i32_1 = arith.constant 0 : i32
    return %arg0, %c0_i32, %c0_i32_0 : i32, i32, i32
  }
  func.func @transform_4(%arg0: i32) -> (i32, i32) {
    %c0_i32 = arith.constant 0 : i32
    %c0_i32_0 = arith.constant 0 : i32
    %c0_i32_1 = arith.constant 0 : i32
    return %c0_i32, %c0_i32_0 : i32, i32
  }
  func.func @transform_5(%arg0: i32) -> (i32, i32) {
    %c0_i32 = arith.constant 0 : i32
    %c0_i32_0 = arith.constant 0 : i32
    %c0_i32_1 = arith.constant 0 : i32
    return %c0_i32, %c0_i32_0 : i32, i32
  }
  func.func @transform_6(%arg0: i32) -> (i32, i32) {
    %c0_i32 = arith.constant 0 : i32
    %c0_i32_0 = arith.constant 0 : i32
    %c0_i32_1 = arith.constant 0 : i32
    return %c0_i32, %c0_i32_0 : i32, i32
  }
  func.func @transform_7(%arg0: i32) -> (i32, i32) {
    %c0_i32 = arith.constant 0 : i32
    %c0_i32_0 = arith.constant 0 : i32
    %c0_i32_1 = arith.constant 0 : i32
    return %c0_i32, %c0_i32_0 : i32, i32
  }
  func.func @transform_8(%arg0: i32) -> (i32, i32) {
    %c0_i32 = arith.constant 0 : i32
    %c0_i32_0 = arith.constant 0 : i32
    %c0_i32_1 = arith.constant 0 : i32
    return %c0_i32, %c0_i32_0 : i32, i32
  }
  func.func @transform_9(%arg0: i32) -> (i32, i32) {
    %c0_i32 = arith.constant 0 : i32
    %c0_i32_0 = arith.constant 0 : i32
    %c0_i32_1 = arith.constant 0 : i32
    return %c0_i32, %c0_i32_0 : i32, i32
  }
  func.func @transform_10(%arg0: i32) -> (i32, i32) {
    %c0_i32 = arith.constant 0 : i32
    %c0_i32_0 = arith.constant 0 : i32
    %c0_i32_1 = arith.constant 0 : i32
    return %c0_i32, %c0_i32_0 : i32, i32
  }
  func.func @transform_11(%arg0: i32) -> (i32, i32) {
    %c0_i32 = arith.constant 0 : i32
    %c0_i32_0 = arith.constant 0 : i32
    %c0_i32_1 = arith.constant 0 : i32
    return %c0_i32, %c0_i32_0 : i32, i32
  }
  func.func @transform_12(%arg0: i32) -> (i32, i32) {
    %c0_i32 = arith.constant 0 : i32
    %c0_i32_0 = arith.constant 0 : i32
    %c0_i32_1 = arith.constant 0 : i32
    return %c0_i32, %c0_i32_0 : i32, i32
  }
  func.func @transform_13(%arg0: i32) -> (i32, i32) {
    %c0_i32 = arith.constant 0 : i32
    %c0_i32_0 = arith.constant 0 : i32
    %c0_i32_1 = arith.constant 0 : i32
    return %c0_i32, %c0_i32_0 : i32, i32
  }
  func.func @transform_14(%arg0: i32) -> (i32, i32, i32) {
    %c0_i32 = arith.constant 0 : i32
    %c0_i32_0 = arith.constant 0 : i32
    %c0_i32_1 = arith.constant 0 : i32
    return %arg0, %c0_i32, %c0_i32_0 : i32, i32, i32
  }
}

module attributes {stable_mosaic.version = 11 : i64} {
  func.func @_hyper_mlp_kernel(%arg0: i32, %arg1: memref<1x2x64xbf16, #tpu.memory_space<vmem>>, %arg2: memref<1x64x64xbf16, #tpu.memory_space<vmem>>, %arg3: memref<1x1x64xf32, #tpu.memory_space<vmem>>, %arg4: memref<1x64x64xbf16, #tpu.memory_space<vmem>>, %arg5: memref<1x1x64xf32, #tpu.memory_space<vmem>>, %arg6: memref<1x64x8xbf16, #tpu.memory_space<vmem>>, %arg7: memref<1x1x8xf32, #tpu.memory_space<vmem>>, %arg8: memref<1x2x8xf32, #tpu.memory_space<vmem>>) attributes {dimension_semantics = [#tpu.dimension_semantics<parallel>], iteration_bounds = array<i64: 4>, scalar_prefetch = 0 : i64, scratch_operands = 0 : i64, tpu.core_type = #tpu.core_type<tc>, window_params = [{transform_indices = @transform_0, window_bounds = array<i64: 1, 2, 64>}, {transform_indices = @transform_1, window_bounds = array<i64: 1, 64, 64>}, {transform_indices = @transform_2, window_bounds = array<i64: 1, 1, 64>}, {transform_indices = @transform_3, window_bounds = array<i64: 1, 64, 64>}, {transform_indices = @transform_4, window_bounds = array<i64: 1, 1, 64>}, {transform_indices = @transform_5, window_bounds = array<i64: 1, 64, 8>}, {transform_indices = @transform_6, window_bounds = array<i64: 1, 1, 8>}, {transform_indices = @transform_7, window_bounds = array<i64: 1, 2, 8>}]} {
    %c0 = arith.constant 0 : index
    %c0_0 = arith.constant 0 : index
    %c0_1 = arith.constant 0 : index
    %0 = vector.load %arg1[%c0, %c0_0, %c0_1] : memref<1x2x64xbf16, #tpu.memory_space<vmem>>, vector<1x2x64xbf16>
    %1 = vector.shape_cast %0 : vector<1x2x64xbf16> to vector<2x64xbf16>
    %c0_2 = arith.constant 0 : index
    %c0_3 = arith.constant 0 : index
    %c0_4 = arith.constant 0 : index
    %2 = vector.load %arg2[%c0_2, %c0_3, %c0_4] : memref<1x64x64xbf16, #tpu.memory_space<vmem>>, vector<1x64x64xbf16>
    %3 = vector.shape_cast %2 : vector<1x64x64xbf16> to vector<64x64xbf16>
    %cst = arith.constant dense<0.000000e+00> : vector<2x64xf32>
    %4 = tpu.matmul %1, %3, %cst {dimension_numbers = #tpu.dot_dimension_numbers<[1], [0], [0], [1], [0, 0, 1, 1], [], []>} : vector<2x64xbf16>, vector<64x64xbf16>, vector<2x64xf32> -> vector<2x64xf32>
    %c0_5 = arith.constant 0 : index
    %c0_6 = arith.constant 0 : index
    %c0_7 = arith.constant 0 : index
    %5 = vector.load %arg3[%c0_5, %c0_6, %c0_7] : memref<1x1x64xf32, #tpu.memory_space<vmem>>, vector<1x1x64xf32>
    %6 = vector.shape_cast %5 : vector<1x1x64xf32> to vector<1x64xf32>
    %7 = vector.broadcast %6 : vector<1x64xf32> to vector<2x64xf32>
    %8 = arith.addf %4, %7 : vector<2x64xf32>
    %cst_8 = arith.constant 0.000000e+00 : f32
    %9 = vector.broadcast %cst_8 : f32 to vector<2x64xf32>
    %10 = arith.maximumf %8, %9 : vector<2x64xf32>
    %11 = arith.truncf %10 : vector<2x64xf32> to vector<2x64xbf16>
    %c0_9 = arith.constant 0 : index
    %c0_10 = arith.constant 0 : index
    %c0_11 = arith.constant 0 : index
    %12 = vector.load %arg4[%c0_9, %c0_10, %c0_11] : memref<1x64x64xbf16, #tpu.memory_space<vmem>>, vector<1x64x64xbf16>
    %13 = vector.shape_cast %12 : vector<1x64x64xbf16> to vector<64x64xbf16>
    %cst_12 = arith.constant dense<0.000000e+00> : vector<2x64xf32>
    %14 = tpu.matmul %11, %13, %cst_12 {dimension_numbers = #tpu.dot_dimension_numbers<[1], [0], [0], [1], [0, 0, 1, 1], [], []>} : vector<2x64xbf16>, vector<64x64xbf16>, vector<2x64xf32> -> vector<2x64xf32>
    %c0_13 = arith.constant 0 : index
    %c0_14 = arith.constant 0 : index
    %c0_15 = arith.constant 0 : index
    %15 = vector.load %arg5[%c0_13, %c0_14, %c0_15] : memref<1x1x64xf32, #tpu.memory_space<vmem>>, vector<1x1x64xf32>
    %16 = vector.shape_cast %15 : vector<1x1x64xf32> to vector<1x64xf32>
    %17 = vector.broadcast %16 : vector<1x64xf32> to vector<2x64xf32>
    %18 = arith.addf %14, %17 : vector<2x64xf32>
    %cst_16 = arith.constant 0.000000e+00 : f32
    %19 = vector.broadcast %cst_16 : f32 to vector<2x64xf32>
    %20 = arith.maximumf %18, %19 : vector<2x64xf32>
    %21 = arith.truncf %20 : vector<2x64xf32> to vector<2x64xbf16>
    %c0_17 = arith.constant 0 : index
    %c0_18 = arith.constant 0 : index
    %c0_19 = arith.constant 0 : index
    %22 = vector.load %arg6[%c0_17, %c0_18, %c0_19] : memref<1x64x8xbf16, #tpu.memory_space<vmem>>, vector<1x64x8xbf16>
    %23 = vector.shape_cast %22 : vector<1x64x8xbf16> to vector<64x8xbf16>
    %cst_20 = arith.constant dense<0.000000e+00> : vector<2x8xf32>
    %24 = tpu.matmul %21, %23, %cst_20 {dimension_numbers = #tpu.dot_dimension_numbers<[1], [0], [0], [1], [0, 0, 1, 1], [], []>} : vector<2x64xbf16>, vector<64x8xbf16>, vector<2x8xf32> -> vector<2x8xf32>
    %c0_21 = arith.constant 0 : index
    %c0_22 = arith.constant 0 : index
    %c0_23 = arith.constant 0 : index
    %25 = vector.load %arg7[%c0_21, %c0_22, %c0_23] : memref<1x1x8xf32, #tpu.memory_space<vmem>>, vector<1x1x8xf32>
    %26 = vector.shape_cast %25 : vector<1x1x8xf32> to vector<1x8xf32>
    %27 = vector.broadcast %26 : vector<1x8xf32> to vector<2x8xf32>
    %28 = arith.addf %24, %27 : vector<2x8xf32>
    %c0_24 = arith.constant 0 : index
    %c0_25 = arith.constant 0 : index
    %c0_26 = arith.constant 0 : index
    %29 = vector.load %arg8[%c0_24, %c0_25, %c0_26] : memref<1x2x8xf32, #tpu.memory_space<vmem>>, vector<1x2x8xf32>
    %30 = vector.shape_cast %29 : vector<1x2x8xf32> to vector<2x8xf32>
    %31 = vector.shape_cast %28 : vector<2x8xf32> to vector<1x2x8xf32>
    tpu.vector_store %arg8[%c0_24, %c0_25, %c0_26], %31 {strides = array<i32>} : memref<1x2x8xf32, #tpu.memory_space<vmem>>, vector<1x2x8xf32>,
    return
  }
  func.func @transform_0(%arg0: i32) -> (i32, i32, i32) {
    %c0_i32 = arith.constant 0 : i32
    %c0_i32_0 = arith.constant 0 : i32
    %c0_i32_1 = arith.constant 0 : i32
    return %arg0, %c0_i32, %c0_i32_0 : i32, i32, i32
  }
  func.func @transform_1(%arg0: i32) -> (i32, i32, i32) {
    %c0_i32 = arith.constant 0 : i32
    %c0_i32_0 = arith.constant 0 : i32
    %c0_i32_1 = arith.constant 0 : i32
    return %arg0, %c0_i32, %c0_i32_0 : i32, i32, i32
  }
  func.func @transform_2(%arg0: i32) -> (i32, i32, i32) {
    %c0_i32 = arith.constant 0 : i32
    %c0_i32_0 = arith.constant 0 : i32
    %c0_i32_1 = arith.constant 0 : i32
    return %arg0, %c0_i32, %c0_i32_0 : i32, i32, i32
  }
  func.func @transform_3(%arg0: i32) -> (i32, i32, i32) {
    %c0_i32 = arith.constant 0 : i32
    %c0_i32_0 = arith.constant 0 : i32
    %c0_i32_1 = arith.constant 0 : i32
    return %arg0, %c0_i32, %c0_i32_0 : i32, i32, i32
  }
  func.func @transform_4(%arg0: i32) -> (i32, i32, i32) {
    %c0_i32 = arith.constant 0 : i32
    %c0_i32_0 = arith.constant 0 : i32
    %c0_i32_1 = arith.constant 0 : i32
    return %arg0, %c0_i32, %c0_i32_0 : i32, i32, i32
  }
  func.func @transform_5(%arg0: i32) -> (i32, i32, i32) {
    %c0_i32 = arith.constant 0 : i32
    %c0_i32_0 = arith.constant 0 : i32
    %c0_i32_1 = arith.constant 0 : i32
    return %arg0, %c0_i32, %c0_i32_0 : i32, i32, i32
  }
  func.func @transform_6(%arg0: i32) -> (i32, i32, i32) {
    %c0_i32 = arith.constant 0 : i32
    %c0_i32_0 = arith.constant 0 : i32
    %c0_i32_1 = arith.constant 0 : i32
    return %arg0, %c0_i32, %c0_i32_0 : i32, i32, i32
  }
  func.func @transform_7(%arg0: i32) -> (i32, i32, i32) {
    %c0_i32 = arith.constant 0 : i32
    %c0_i32_0 = arith.constant 0 : i32
    %c0_i32_1 = arith.constant 0 : i32
    return %arg0, %c0_i32, %c0_i32_0 : i32, i32, i32
  }
}

module attributes {stable_mosaic.version = 11 : i64} {
  func.func @_linear_kernel(%arg0: memref<128x16xbf16, #tpu.memory_space<vmem>>, %arg1: memref<16x32xbf16, #tpu.memory_space<vmem>>, %arg2: memref<1x32xf32, #tpu.memory_space<vmem>>, %arg3: memref<128x32xf32, #tpu.memory_space<vmem>>) attributes {dimension_semantics = [], scalar_prefetch = 0 : i64, scratch_operands = 0 : i64, tpu.core_type = #tpu.core_type<tc>} {
    %c0 = arith.constant 0 : index
    %c0_0 = arith.constant 0 : index
    %0 = vector.load %arg0[%c0, %c0_0] : memref<128x16xbf16, #tpu.memory_space<vmem>>, vector<128x16xbf16>
    %c0_1 = arith.constant 0 : index
    %c0_2 = arith.constant 0 : index
    %1 = vector.load %arg1[%c0_1, %c0_2] : memref<16x32xbf16, #tpu.memory_space<vmem>>, vector<16x32xbf16>
    %cst = arith.constant dense<0.000000e+00> : vector<128x32xf32>
    %2 = tpu.matmul %0, %1, %cst {dimension_numbers = #tpu.dot_dimension_numbers<[1], [0], [0], [1], [0, 0, 1, 1], [], []>} : vector<128x16xbf16>, vector<16x32xbf16>, vector<128x32xf32> -> vector<128x32xf32>
    %c0_3 = arith.constant 0 : index
    %c0_4 = arith.constant 0 : index
    %3 = vector.load %arg2[%c0_3, %c0_4] : memref<1x32xf32, #tpu.memory_space<vmem>>, vector<1x32xf32>
    %4 = vector.broadcast %3 : vector<1x32xf32> to vector<128x32xf32>
    %5 = arith.addf %2, %4 : vector<128x32xf32>
    %c0_5 = arith.constant 0 : index
    %c0_6 = arith.constant 0 : index
    %6 = vector.load %arg3[%c0_5, %c0_6] : memref<128x32xf32, #tpu.memory_space<vmem>>, vector<128x32xf32>
    tpu.vector_store %arg3[%c0_5, %c0_6], %5 {strides = array<i32>} : memref<128x32xf32, #tpu.memory_space<vmem>>, vector<128x32xf32>,
    return
  }
}

module attributes {stable_mosaic.version = 11 : i64} {
  func.func @_bmm_kernel(%arg0: i32, %arg1: memref<1x4x8xbf16, #tpu.memory_space<vmem>>, %arg2: memref<1x8x256xbf16, #tpu.memory_space<vmem>>, %arg3: memref<1x4x256xf32, #tpu.memory_space<vmem>>) attributes {dimension_semantics = [#tpu.dimension_semantics<parallel>], iteration_bounds = array<i64: 2>, scalar_prefetch = 0 : i64, scratch_operands = 0 : i64, tpu.core_type = #tpu.core_type<tc>, window_params = [{transform_indices = @transform_0, window_bounds = array<i64: 1, 4, 8>}, {transform_indices = @transform_1, window_bounds = array<i64: 1, 8, 256>}, {transform_indices = @transform_2, window_bounds = array<i64: 1, 4, 256>}]} {
    %c0 = arith.constant 0 : index
    %c0_0 = arith.constant 0 : index
    %c0_1 = arith.constant 0 : index
    %0 = vector.load %arg1[%c0, %c0_0, %c0_1] : memref<1x4x8xbf16, #tpu.memory_space<vmem>>, vector<1x4x8xbf16>
    %1 = vector.shape_cast %0 : vector<1x4x8xbf16> to vector<4x8xbf16>
    %c0_2 = arith.constant 0 : index
    %c0_3 = arith.constant 0 : index
    %c0_4 = arith.constant 0 : index
    %2 = vector.load %arg2[%c0_2, %c0_3, %c0_4] : memref<1x8x256xbf16, #tpu.memory_space<vmem>>, vector<1x8x256xbf16>
    %3 = vector.shape_cast %2 : vector<1x8x256xbf16> to vector<8x256xbf16>
    %cst = arith.constant dense<0.000000e+00> : vector<4x256xf32>
    %4 = tpu.matmul %1, %3, %cst {dimension_numbers = #tpu.dot_dimension_numbers<[1], [0], [0], [1], [0, 0, 1, 1], [], []>} : vector<4x8xbf16>, vector<8x256xbf16>, vector<4x256xf32> -> vector<4x256xf32>
    %c0_5 = arith.constant 0 : index
    %c0_6 = arith.constant 0 : index
    %c0_7 = arith.constant 0 : index
    %5 = vector.load %arg3[%c0_5, %c0_6, %c0_7] : memref<1x4x256xf32, #tpu.memory_space<vmem>>, vector<1x4x256xf32>
    %6 = vector.shape_cast %5 : vector<1x4x256xf32> to vector<4x256xf32>
    %7 = vector.shape_cast %4 : vector<4x256xf32> to vector<1x4x256xf32>
    tpu.vector_store %arg3[%c0_5, %c0_6, %c0_7], %7 {strides = array<i32>} : memref<1x4x256xf32, #tpu.memory_space<vmem>>, vector<1x4x256xf32>,
    return
  }
  func.func @transform_0(%arg0: i32) -> (i32, i32, i32) {
    %c0_i32 = arith.constant 0 : i32
    %c0_i32_0 = arith.constant 0 : i32
    %c0_i32_1 = arith.constant 0 : i32
    return %arg0, %c0_i32, %c0_i32_0 : i32, i32, i32
  }
  func.func @transform_1(%arg0: i32) -> (i32, i32, i32) {
    %c0_i32 = arith.constant 0 : i32
    %c0_i32_0 = arith.constant 0 : i32
    %c0_i32_1 = arith.constant 0 : i32
    return %arg0, %c0_i32, %c0_i32_0 : i32, i32, i32
  }
  func.func @transform_2(%arg0: i32) -> (i32, i32, i32) {
    %c0_i32 = arith.constant 0 : i32
    %c0_i32_0 = arith.constant 0 : i32
    %c0_i32_1 = arith.constant 0 : i32
    return %arg0, %c0_i32, %c0_i32_0 : i32, i32, i32
  }
}

</mosaic_0001>

<bundles_post_ra>
// kernel: finetuned_sam2_forward.19
= control target key start
LH: loop header
LB: loop body
LE: loop exit
PB: predicated region body
PF: predicated region fallthrough
CT: control target
= control target key end

     0   :  { %19 = vsyncpa [#allocation3], 0  ;;  %s2381_s0 = inlined_call_operand.vmem [shape: bf16[2,9,64], index: 0, kind: input, shape index: {}, may-alias: {0,1,2}]   ;;  %s2382_s1 = inlined_call_operand.vmem [shape: bf16[2,9,64], index: 1, kind: input, shape index: {}, may-alias: {0,1,2}]   ;;  %s2383_s2 = inlined_call_operand.vmem [shape: bf16[2,9,64], index: 2, kind: input, shape index: {}, may-alias: {0,1,2}]   ;;  %s2384_s3 = inlined_call_operand.vmem [shape: f32[2,9,64], index: 3, kind: input, shape index: {}]   ;;  %s2385_s4 = inlined_call_operand.vmem [shape: bf16[64,64], index: 4, kind: input, shape index: {}]   ;;  %s2386_s5 = inlined_call_operand.hbm [shape: f32[1,64], index: 5, kind: input, shape index: {}]   ;;  %s2387_s6 = inlined_call_operand.vmem [shape: bf16[64,64], index: 6, kind: input, shape index: {}]   ;;  %s2388_s7 = inlined_call_operand.hbm [shape: f32[1,64], index: 7, kind: input, shape index: {}]   ;;  %s2389_s8 = inlined_call_operand.vmem [shape: bf16[64,64], index: 8, kind: input, shape index: {}]   ;;  %s2390_s9 = inlined_call_operand.hbm [shape: f32[1,64], index: 9, kind: input, shape index: {}]   ;;  %s2391_s10 = inlined_call_operand.vmem [shape: bf16[64,64], index: 10, kind: input, shape index: {}]   ;;  %s2392_s11 = inlined_call_operand.hbm [shape: f32[1,64], index: 11, kind: input, shape index: {}]   ;;  %s2393_s12 = inlined_call_operand.hbm [shape: f32[1,64], index: 12, kind: input, shape index: {}]   ;;  %s2394_s13 = inlined_call_operand.hbm [shape: f32[1,64], index: 13, kind: input, shape index: {}]   ;;  %s2395_s14 = inlined_call_operand.vmem [shape: f32[2,9,64], index: 14, kind: output, shape index: {}]  }
   0x1   :  { %20 = vsyncpa [#allocation5], 0 }
   0x2   :  { %21 = vsyncpa [#allocation8], 0 }
   0x3   :  { %22 = vsyncpa [#allocation11], 0  ;;  %s2105_s29 = smov 0  }
   0x4 LB: > { %s2020_s30 = smov [#allocation4]   ;;  %s2111_s16 = sadd.s32 4294967295, %s2018_s29   ;;  %s2018_s29 = sphi %s2105_s29, %s28_s29  }
   0x5   : > { %s403_s15 = sshll.u32 %s2020_s30, 4  ;;  %p1545_p0 = scmp.ge.s32.totalorder %s2018_s29, 1  ;;  %s404_s15 = int_to_ptr.vmem [resolvable:$true] %s403_s15 }
   0x6   : > { %p373_p1 = scmp.lt.s32.totalorder %s2018_s29, 3  ;;  %p2396_p2 = scmp.eq.s32.totalorder %s2111_s16, 0 }
   0x7   : > { %s2021_s18 = smov [#allocation7]   ;;  %s2022_s20 = smov [#allocation2]  }
   0x8   : > { %p2116_p3 = pnand %p1545_p0, %p373_p1  ;;  %s431_s19 = sshll.u32 %s2021_s18, 4  ;;  %s2122_s19 = int_to_ptr.vmem [resolvable:$true] %s431_s19 }
   0x9   : > { %s389_s21 = sshll.u32 %s2022_s20, 4  ;;  %s2023_s23 = smov [#allocation6]   ;;  %s2130_s21 = int_to_ptr.vmem [resolvable:$true] %s389_s21 }
   0xa   : > { %p1752_p4 = pneg %p2116_p3  ;;  %s417_s24 = sshll.u32 %s2023_s23, 4  ;;  %s2132_s24 = int_to_ptr.vmem [resolvable:$true] %s417_s24 }
   0xb   : > { %s1851_s26 = scalar_lea.vmem %s404_s15, 16  ;;  %s1858_s27 = scalar_lea.vmem %s404_s15, 32 }
   0xc   : > { %p2126_p5 = pnand %p2396_p2, %p1752_p4  ;;  %p1852_p7 = scmp.ne.s32.totalorder %s404_s15, %s1851_s26 }
   0xd   : > { %p1859_p10 = scmp.lt.s32.totalorder %s404_s15, %s404_s15  ;;  %p1860_p11 = scmp.lt.s32.totalorder %s1858_s27, %s1851_s26 }
   0xe   : > { %p2136_p6 = pneg %p2126_p5 }
   0xf   : > { %p1861_p12 = por %p1860_p11, %p1859_p10 }
  0x10   : > { %p1854_p8 = pnand %p1852_p7, %p2136_p6 }
  0x12   : > { %p1855_p9 = pneg %p1854_p8 }
  0x14   : > { %p1862_p13 = pnand %p1861_p12, %p1855_p9 }
  0x16   : > { %1865 = shalt.err (!%p1862_p13)
}
  0x17   : > { %1758 = dma.hbm_to_vmem [thread:$0]  (!%p2126_p5), %s2388_s7, 16, %s404_s15, [#allocation5]  }
  0x18   : > { %s1877_s18 = scalar_lea.vmem %s2122_s19, 16  ;;  %s1884_s20 = scalar_lea.vmem %s2122_s19, 32 }
  0x19   : > { %p1878_p0 = scmp.ne.s32.totalorder %s2122_s19, %s1877_s18  ;;  %p1885_p7 = scmp.lt.s32.totalorder %s2122_s19, %s2122_s19 }
  0x1a   : > { %p1886_p8 = scmp.lt.s32.totalorder %s1884_s20, %s1877_s18 }
  0x1b   : > { %p1880_p1 = pnand %p1878_p0, %p2136_p6 }
  0x1c   : > { %p1887_p9 = por %p1886_p8, %p1885_p7 }
  0x1d   : > { %p1881_p4 = pneg %p1880_p1 }
  0x1f   : > { %p1888_p10 = pnand %p1887_p9, %p1881_p4 }
  0x21   : > { %1891 = shalt.err (!%p1888_p10)
}
  0x22   : > { %1764 = dma.hbm_to_vmem [thread:$0]  (!%p2126_p5), %s2392_s11, 16, %s2122_s19, [#allocation8]  }
  0x23   : > { %s1903_s15 = scalar_lea.vmem %s2130_s21, 16  ;;  %s1910_s27 = scalar_lea.vmem %s2130_s21, 32 }
  0x24   : > { %p1904_p11 = scmp.ne.s32.totalorder %s2130_s21, %s1903_s15  ;;  %p1911_p0 = scmp.lt.s32.totalorder %s2130_s21, %s2130_s21 }
  0x25   : > { %p1912_p1 = scmp.lt.s32.totalorder %s1910_s27, %s1903_s15 }
  0x26   : > { %p1906_p12 = pnand %p1904_p11, %p2136_p6 }
  0x27   : > { %p1913_p4 = por %p1912_p1, %p1911_p0 }
  0x28   : > { %p1907_p13 = pneg %p1906_p12 }
  0x2a   : > { %p1914_p7 = pnand %p1913_p4, %p1907_p13 }
  0x2c   : > { %1917 = shalt.err (!%p1914_p7)
}
  0x2d   : > { %1755 = dma.hbm_to_vmem [thread:$0]  (!%p2126_p5), %s2386_s5, 16, %s2130_s21, [#allocation3]  }
  0x2e   : > { %s1929_s19 = scalar_lea.vmem %s2132_s24, 16  ;;  %s1936_s18 = scalar_lea.vmem %s2132_s24, 32 }
  0x2f   : > { %p1930_p8 = scmp.ne.s32.totalorder %s2132_s24, %s1929_s19  ;;  %p1937_p11 = scmp.lt.s32.totalorder %s2132_s24, %s2132_s24 }
  0x30   : > { %p1938_p12 = scmp.lt.s32.totalorder %s1936_s18, %s1929_s19 }
  0x31   : > { %p1932_p9 = pnand %p1930_p8, %p2136_p6 }
  0x32   : > { %p1939_p13 = por %p1938_p12, %p1937_p11 }
  0x33   : > { %p1933_p10 = pneg %p1932_p9 }
  0x35   : > { %p1940_p0 = pnand %p1939_p13, %p1933_p10 }
  0x37   : > { %1943 = shalt.err (!%p1940_p0)
}
  0x38   : > { %1761 = dma.hbm_to_vmem [thread:$0]  (!%p2126_p5), %s2390_s9, 16, %s2132_s24, [#allocation5]  }
  0x39   : > { %s2024_s21 = smov [#allocation9]   ;;  %s2025_s15 = smov [#allocation10]  }
  0x3a   : > { %s442_s26 = sshll.u32 %s2024_s21, 4  ;;  %s453_s27 = sshll.u32 %s2025_s15, 4  ;;  %s443_s26 = int_to_ptr.vmem [resolvable:$true] %s442_s26  ;;  %s454_s27 = int_to_ptr.vmem [resolvable:$true] %s453_s27 }
  0x3b   : > { %s1955_s28 = scalar_lea.vmem %s443_s26, 16  ;;  %s1962_s30 = scalar_lea.vmem %s443_s26, 32 }
  0x3c   : > { %p1956_p1 = scmp.ne.s32.totalorder %s443_s26, %s1955_s28  ;;  %p1963_p8 = scmp.lt.s32.totalorder %s443_s26, %s443_s26 }
  0x3d   : > { %p1964_p9 = scmp.lt.s32.totalorder %s1962_s30, %s1955_s28 }
  0x3e   : > { %p1958_p4 = pnand %p1956_p1, %p2136_p6 }
  0x3f   : > { %p1965_p10 = por %p1964_p9, %p1963_p8 }
  0x40   : > { %p1959_p7 = pneg %p1958_p4 }
  0x42   : > { %p1966_p11 = pnand %p1965_p10, %p1959_p7 }
  0x44   : > { %1969 = shalt.err (!%p1966_p11)
}
  0x45   : > { %1767 = dma.hbm_to_vmem [thread:$0]  (!%p2126_p5), %s2393_s12, 16, %s443_s26, [#allocation8]  }
  0x46   : > { %s1981_s18 = scalar_lea.vmem %s454_s27, 16  ;;  %s1988_s20 = scalar_lea.vmem %s454_s27, 32 }
  0x47   : > { %p1982_p12 = scmp.ne.s32.totalorder %s454_s27, %s1981_s18  ;;  %p1989_p1 = scmp.lt.s32.totalorder %s454_s27, %s454_s27 }
  0x48   : > { %p1990_p4 = scmp.lt.s32.totalorder %s1988_s20, %s1981_s18 }
  0x49   : > { %p1984_p13 = pnand %p1982_p12, %p2136_p6 }
  0x4a   : > { %p1991_p2 = por %p1990_p4, %p1989_p1 }
  0x4b   : > { %p1985_p0 = pneg %p1984_p13 }
  0x4d   : > { %p1992_p8 = pnand %p1991_p2, %p1985_p0 }
  0x4f   : > { %1995 = shalt.err (!%p1992_p8)
}
  0x50   : > { %1770 = dma.hbm_to_vmem [thread:$0]  (!%p2126_p5), %s2394_s13, 16, %s454_s27, [#allocation11]  }
  0x51   : > { %498 = sbr.rel (%p2116_p3) target bundleno = 2073 (0x819), region = 76  ;;  %p2400_p7 = scmp.eq.s32.totalorder (!%p2116_p3), %s2111_s16, 0 }
  0x56   : > { %2001 = dma.done.wait (%p2400_p7), [#allocation3], 16   ;;  %p2401_p6 = pmov %p2400_p7 }
  0x58   : > { %2003 = vsyncadd (%p2401_p6), [#allocation3], 4294967280  ;;  %p2402_p9 = pmov %p2401_p6 }
  0x59   : > { %p2403_p2 = pmov %p2401_p6 }
  0x5a   : > { %2005 = dma.done.wait (%p2402_p9), [#allocation5], 32  }
  0x5b   : > { %2007 = vsyncadd (%p2403_p2), [#allocation5], 4294967264  ;;  %p2404_p10 = pmov %p2403_p2 }
  0x5c   : > { %p2405_p5 = pmov %p2403_p2 }
  0x5d   : > { %2009 = dma.done.wait (%p2404_p10), [#allocation8], 32  }
  0x5e   : > { %2011 = vsyncadd (%p2405_p5), [#allocation8], 4294967264  ;;  %p2406_p3 = pmov %p2403_p2 }
  0x5f   : > { %p2407_p11 = pmov %p2403_p2 }
  0x60   : > { %2013 = dma.done.wait (%p2406_p3), [#allocation11], 16  }
  0x61   : > { %2015 = vsyncadd (%p2407_p11), [#allocation11], 4294967280  ;;  %v2026_v0 = vmov 0.0   ;;  %vm2027_vm0 = vmmov 0   ;;  %p579_p12 = scmp.lt.s32.totalorder %s2111_s16, 1  ;;  %v1801_v1 = vld [vmem:[%s2387_s6 + $0x18] sm:$0xff]  }
  0x62   : > { %1662 = vmatprep.subr.bf16.mxu1 %v2026_v0  ;;  %1650 = vmatprep.subr.bf16.mxu0 %v2026_v0  ;;  %v1802_v2 = vld [vmem:[%s2385_s4 + $0x18] sm:$0xff]   ;;  %v1803_v3 = vld [vmem:[%s2387_s6 + $0x10] sm:$0xff]   ;;  %v1805_v5 = vld [vmem:[%s2387_s6 + $0x8] sm:$0xff]   ;;  %vm655_vm1 = vcmask 523264   ;;  %vm876_vm2 = vcmask 261120   ;;  %vm966_vm3 = vcmask 72704  }
  0x63   : > { %1670 = vmatprep.mubr.msk.bf16.mxu1 %vm2027_vm0, %v2026_v0  ;;  %1658 = vmatprep.mubr.msk.bf16.mxu0 %vm2027_vm0, %v2026_v0  ;;  %s2409_s16 = smov (!%p579_p12, %s2111_s16), 1  ;;  %v1804_v4 = vld [vmem:[%s2385_s4 + $0x10] sm:$0xff]   ;;  %v1806_v6 = vld [vmem:[%s2385_s4 + $0x8] sm:$0xff]   ;;  %v1807_v7 = vld [vmem:[%s2387_s6] sm:$0xff]   ;;  %vm970_vm4 = vcmask 65536   ;;  %vm995_vm5 = vcmask 1043456  }
  0x64   : > { %1663 = vmatpush3.bf16.msra.mxu1 %v1801_v1  ;;  %1651 = vmatpush3.bf16.msra.mxu0 %v1802_v2  ;;  %s2243_s19 = sshll.u32 %s2409_s16, 3  ;;  %v1808_v8 = vld [vmem:[%s2385_s4] sm:$0xff]   ;;  %v1811_v11 = vld [vmem:[%s2389_s8 + $0x18] sm:$0xff]   ;;  %v1812_v12 = vld [vmem:[%s2389_s8 + $0x10] sm:$0xff]   ;;  %vm996_vm6 = vcmask 1044480   ;;  %v2029_v44 = vmov 65535  }
  0x65   : > { %1664 = vmatprep.subr.bf16.mxu1 %v2026_v0  ;;  %1652 = vmatprep.subr.bf16.mxu0 %v2026_v0  ;;  %s588_s22 = scalar_lea.vmem %s2382_s1, %s2243_s19  ;;  %s583_s15 = scalar_lea.vmem %s2381_s0, %s2243_s19  ;;  %v1813_v13 = vld [vmem:[%s2389_s8 + $0x8] sm:$0xff]   ;;  %v1577_v14 = vld [vmem:[#allocation4] ss:$0 sm:$0xff]  ;;  %v1570_v15 = vld [vmem:[#allocation2] ss:$0 sm:$0xff]  ;;  %v997_v45 = vsel %vm995_vm5, 4294967295, %v2029_v44 }
  0x66   : > { %v1809_v9 = vld [vmem:[%s588_s22] sm:$0x1f]   ;;  %s593_s17 = scalar_lea.vmem %s2383_s2, %s2243_s19  ;;  %s2028_s19 = smov 96   ;;  %v2314_v46 = vsel %vm996_vm6, %v997_v45, 0  ;;  %vm1347_vm7 = vcmask 516096  }
  0x67   : > { %v1810_v10 = vld [vmem:[%s583_s15] sm:$0x1f]   ;;  %s1615_s25 = sshll.u32 %s2409_s16, 4 }
  0x68   : > { %1665 = vmatpush3.bf16.msra.mxu1 %v1803_v3  ;;  %1653 = vmatpush3.bf16.msra.mxu0 %v1804_v4  ;;  %v1814_v16 = vld [vmem:[%s2389_s8] sm:$0xff]   ;;  %s598_s27 = scalar_lea.vmem %s2384_s3, %s1615_s25  ;;  %s603_s30 = scalar_lea.vmem %s2395_s14, %s1615_s25 }
  0x69   : > { %1666 = vmatprep.subr.bf16.mxu1 %v2026_v0  ;;  %1654 = vmatprep.subr.bf16.mxu0 %v2026_v0  ;;  %v1815_v22 = vld [vmem:[%s593_s17] sm:$0x1f]  }
  0x6a   : > { %v1584_v38 = vld [vmem:[#allocation6] ss:$0 sm:$0xff] }
  0x6c   : > { %1667 = vmatpush3.bf16.msra.mxu1 %v1805_v5  ;;  %1655 = vmatpush3.bf16.msra.mxu0 %v1806_v6 }
  0x6d   : > { %1668 = vmatprep.subr.bf16.mxu1 %v2026_v0  ;;  %1656 = vmatprep.subr.bf16.mxu0 %v2026_v0 }
  0x70   : > { %1669 = vmatpush3.bf16.msra.mxu1 %v1807_v7  ;;  %1657 = vmatpush3.bf16.msra.mxu0 %v1808_v8 }
  0x71   : > { %1674 = vmatprep.subr.bf16.mxu0 %v2026_v0 }
  0x73   : > { %1671 = vmatmul.mubr.msk.bf16.vlgmr.msra.gmra.mxu1 %vm655_vm1, %v1809_v9  ;;  %1659 = vmatmul.mubr.msk.bf16.vlgmr.msra.gmra.mxu0 %vm655_vm1, %v1810_v10 }
  0x74   : > { %1682 = vmatprep.mubr.msk.bf16.mxu0 %vm2027_vm0, %v2026_v0  ;;  %1675 = vmatpush3.bf16.msra.mxu0 %v1811_v11 }
  0x75   : > { %1676 = vmatprep.subr.bf16.mxu0 %v2026_v0 }
  0x78   : > { %1677 = vmatpush3.bf16.msra.mxu0 %v1812_v12 }
  0x79   : > { %1678 = vmatprep.subr.bf16.mxu0 %v2026_v0 }
  0x7c   : > { %1679 = vmatpush3.bf16.msra.mxu0 %v1813_v13 }
  0x7d   : > { %1680 = vmatprep.subr.bf16.mxu0 %v2026_v0 }
  0x80   : > { %1681 = vmatpush3.bf16.msra.mxu0 %v1814_v16 }
  0x81   : > { %1706 = vmatprep.subr.bf16.mxu0 %v2026_v0 }
  0x83   : > { %1683 = vmatmul.mubr.msk.bf16.vlgmr.msra.gmra.mxu0 %vm655_vm1, %v1815_v22 }
  0x84   : > { %1708 = vmatprep.mubr.msk.bf16.mxu0 %vm2027_vm0, %v2026_v0 }
 0x133   : > { %v781_v17 = vpop.f32.mrf.mxu1  ;;  %v693_v19 = vpop.f32.mrf.mxu0 }
 0x134   : > { %v782_v18 = vadd.f32 %v1577_v14, %v781_v17  ;;  %v2293_v21 = vadd.f32 %v1570_v15, %v693_v19 }
 0x135   : > { %v1672_v20 = vpop.f32.mrf.mxu1  ;;  %v1660_v23 = vpop.f32.mrf.mxu0 }
 0x136   : > { %1052 = vrot.lane.b32.xlu1 %v782_v18, %s2028_s19  ;;  %1690 = vmatprep.mubr.msk.f32.mxu1 %vm876_vm2, %v2293_v21 }
 0x137   : > { %v784_v24 = vpop.f32.mrf.mxu1  ;;  %v696_v26 = vpop.f32.mrf.mxu0 }
 0x138   : > { %v785_v25 = vadd.f32 %v1577_v14, %v784_v24  ;;  %v697_v29 = vadd.f32 %v1570_v15, %v696_v26 }
 0x139   : > { %v1673_v27 = vpop.f32.mrf.mxu1  ;;  %v1661_v28 = vpop.f32.mrf.mxu0 }
 0x13a   : > { %1686 = vmatprep.subr.msk.mxu1 %vm876_vm2, %v785_v25 }
 0x13b   : > { %1687 = vmatpush3.xpose.msk.msra.mxu1 %vm876_vm2, %v785_v25 }
 0x13c   : > { %1688 = vmatprep.subr.msk.mxu1 %vm876_vm2, %v782_v18 }
 0x13f   : > { %1689 = vmatpush3.xpose.msk.msra.mxu1 %vm876_vm2, %v782_v18 }
 0x140   : > { %1693 = vmatprep.subr.bf16.mxu1 %v2026_v0 }
 0x142   : > { %1691 = vmatmul.mubr.msk.f32.vlgmr.msra.gmra.mxu1 %vm876_vm2, %v697_v29 }
 0x143   : > { %1695 = vmatprep.mubr.msk.bf16.mxu1 %vm2027_vm0, %v2026_v0  ;;  %v869_v30 = vpop.f32.mrf.mxu0 }
 0x144   : > { %v870_v39 = vadd.f32 %v1584_v38, %v869_v30 }
 0x145   : > { %v1684_v31 = vpop.f32.mrf.mxu0 }
 0x147   : > { %v872_v40 = vpop.f32.mrf.mxu0 }
 0x148   : > { %v873_v41 = vadd.f32 %v1584_v38, %v872_v40  ;;  %v1818_v38 = vld [vmem:[%s2391_s10 + $0x18] sm:$0xff]  }
 0x149   : > { %v1685_v42 = vpop.f32.mrf.mxu0 }
 0x14a   : > { %v2312_v43 = vpack.c.bf16 %v873_v41, %v870_v39  ;;  %v1819_v39 = vld [vmem:[%s2391_s10 + $0x10] sm:$0xff]  }
 0x14c   : > { %v1000_v47 = vand.u32 %v2314_v46, %v2312_v43 }
 0x14e   : > { %1694 = vmatpush3.bf16.msra.mxu1 %v1000_v47 }
 0x1a8   : > { %v1053_v59 = vpop.permute.xlu1 %1052 }
 0x202   : > { %v1692_v32 = vpop.f32.mrf.mxu1 }
 0x203   : > { %v965_v35 = vmul.f32 0.17677669, %v1692_v32 }
 0x204   : > { %v955_v33 = vpop.f32.mrf.mxu1 }
 0x205   : > { %v964_v34 = vmul.f32 0.17677669, %v955_v33  ;;  %v971_v37 = vsel %vm970_vm4, %v965_v35, -inf }
 0x207   : > { %v967_v36 = vsel %vm966_vm3, %v964_v34, -inf }
 0x208   : > { %968 = vmax.xlane.f32.xlu0 %v967_v36 }
 0x20c   : > { %972 = vmax.xlane.f32.xlu0 %v971_v37  ;;  %v1817_v37 = vld [vmem:[%s2391_s10] sm:$0xff]  }
 0x222   : > { %1054 = vrot.lane.b32.xlu0 %v785_v25, %s2028_s19 }
 0x291   : > { %v969_v48 = vpop.xlane.xlu0 %968 }
 0x292   : > { %v974_v49 = vsub.f32 %v964_v34, %v969_v48 }
 0x294   : > { %v976_v52 = vmul.f32 1.442695, %v974_v49  ;;  %v1331_v49 = vld [vmem:[%s598_s27] sm:$0xff] }
 0x295   : > { %v973_v50 = vpop.xlane.xlu0 %972 }
 0x296   : > { %v975_v51 = vsub.f32 %v965_v35, %v973_v50  ;;  %v1816_v35 = vld [vmem:[%s2391_s10 + $0x8] sm:$0xff]  }
 0x298   : > { %v978_v53 = vmul.f32 1.442695, %v975_v51 }
 0x299   : > { %v1055_v54 = vpop.permute.xlu0 %1054 }
 0x29a   : > { %1820 = vpow2.f32 %v978_v53  ;;  %1699 = vmatprep.subr.msk.mxu1 %vm876_vm2, %v1055_v54 }
 0x29b   : > { %1822 = vpow2.f32 %v976_v52  ;;  %v1607_v52 = vld [vmem:[#allocation7] ss:$0 sm:$0xff] }
 0x2a7   : > { %v1821_v55 = vpop.eup %1820 }
 0x2a8   : > { %v983_v56 = vsel %vm970_vm4, %v1821_v55, 0.0  ;;  %v1823_v57 = vpop.eup %1822 }
 0x2a9   : > { %984 = vadd.xlane.f32.xlu1 %v983_v56  ;;  %v980_v58 = vsel %vm966_vm3, %v1823_v57, 0.0 }
 0x2ad   : > { %981 = vadd.xlane.f32.xlu1 %v980_v58 }
 0x2be   : > { %1048 = vrot.lane.b32.xlu1 %v2293_v21, %s2028_s19 }
 0x2c2   : > { %1050 = vrot.lane.b32.xlu1 %v697_v29, %s2028_s19 }
 0x332   : > { %v985_v60 = vpop.xlane.xlu1 %984 }
 0x333   : > { %1824 = vrcp.f32 %v985_v60 }
 0x336   : > { %v982_v61 = vpop.xlane.xlu1 %981 }
 0x337   : > { %1826 = vrcp.f32 %v982_v61 }
 0x33a   : > { %v1049_v4 = vpop.permute.xlu1 %1048 }
 0x33e   : > { %v1051_v5 = vpop.permute.xlu1 %1050 }
 0x340   : > { %v1825_v62 = vpop.eup %1824 }
 0x341   : > { %v989_v2 = vmul.f32 %v1825_v62, %v1821_v55  ;;  %v1332_v55 = vld [vmem:[%s598_s27 + $0x8] sm:$0x1] }
 0x344   : > { %v1827_v63 = vpop.eup %1826 }
 0x345   : > { %v987_v1 = vmul.f32 %v1827_v63, %v1823_v57 }
 0x347   : > { %v990_v3 = vpack.c.bf16 %v989_v2, %v987_v1 }
 0x349   : > { %1696 = vmatmul.mubr.msk.bf16.vlgmr.msra.gmra.mxu1 %vm966_vm3, %v990_v3 }
 0x34a   : > { %1700 = vmatpush3.xpose.msk.msra.mxu1 %vm876_vm2, %v1055_v54  ;;  %1703 = vmatprep.mubr.msk.f32.mxu1 %vm876_vm2, %v1049_v4 }
 0x34b   : > { %1701 = vmatprep.subr.msk.mxu1 %vm876_vm2, %v1053_v59 }
 0x34e   : > { %1702 = vmatpush3.xpose.msk.msra.mxu1 %vm876_vm2, %v1053_v59 }
 0x34f   : > { %1712 = vmatprep.subr.bf16.mxu1 %v2026_v0 }
 0x351   : > { %1704 = vmatmul.mubr.msk.f32.vlgmr.msra.gmra.mxu1 %vm876_vm2, %v1051_v5 }
 0x352   : > { %1716 = vmatprep.mubr.msk.bf16.mxu1 %vm2027_vm0, %v2026_v0  ;;  %1713 = vmatpush3.bf16.msra.mxu1 %v1818_v38 }
 0x353   : > { %1714 = vmatprep.subr.bf16.mxu1 %v2026_v0 }
 0x356   : > { %1715 = vmatpush3.bf16.msra.mxu1 %v1819_v39 }
 0x409   : > { %v1036_v6 = vpop.f32.mrf.mxu1 }
 0x40b   : > { %v1697_v7 = vpop.f32.mrf.mxu1 }
 0x40d   : > { %v1039_v8 = vpop.f32.mrf.mxu1 }
 0x40e   : > { %v1043_v9 = vpack.c.bf16 %v1039_v8, %v1036_v6 }
 0x40f   : > { %v1698_v10 = vpop.f32.mrf.mxu1 }
 0x411   : > { %v1705_v11 = vpop.f32.mrf.mxu1 }
 0x412   : > { %v1140_v12 = vmul.f32 0.17677669, %v1705_v11 }
 0x413   : > { %v1130_v13 = vpop.f32.mrf.mxu1 }
 0x414   : > { %v1139_v14 = vmul.f32 0.17677669, %v1130_v13  ;;  %v1144_v15 = vsel %vm970_vm4, %v1140_v12, -inf }
 0x415   : > { %1145 = vmax.xlane.f32.xlu1 %v1144_v15 }
 0x416   : > { %v1141_v16 = vsel %vm966_vm3, %v1139_v14, -inf }
 0x417   : > { %1142 = vmax.xlane.f32.xlu0 %v1141_v16 }
 0x49e   : > { %v1146_v17 = vpop.xlane.xlu1 %1145 }
 0x49f   : > { %v1148_v18 = vsub.f32 %v1140_v12, %v1146_v17  ;;  %v1608_v17 = vld [vmem:[#allocation9] ss:$0 sm:$0xff] }
 0x4a0   : > { %v1143_v19 = vpop.xlane.xlu0 %1142 }
 0x4a1   : > { %v1151_v20 = vmul.f32 1.442695, %v1148_v18  ;;  %v1147_v21 = vsub.f32 %v1139_v14, %v1143_v19  ;;  %v1609_v19 = vld [vmem:[#allocation10] ss:$0 sm:$0xff] }
 0x4a3   : > { %1828 = vpow2.f32 %v1151_v20  ;;  %v1149_v22 = vmul.f32 1.442695, %v1147_v21 }
 0x4a5   : > { %1830 = vpow2.f32 %v1149_v22 }
 0x4b0   : > { %v1829_v23 = vpop.eup %1828 }
 0x4b1   : > { %v1156_v24 = vsel %vm970_vm4, %v1829_v23, 0.0 }
 0x4b2   : > { %v1831_v25 = vpop.eup %1830  ;;  %1157 = vadd.xlane.f32.xlu0 %v1156_v24 }
 0x4b3   : > { %v1153_v26 = vsel %vm966_vm3, %v1831_v25, 0.0 }
 0x4b6   : > { %1154 = vadd.xlane.f32.xlu0 %v1153_v26 }
 0x4cc   : > { %1165 = vrot.lane.b32.xlu0 %v2312_v43, %s2028_s19 }
 0x53b   : > { %v1158_v27 = vpop.xlane.xlu0 %1157 }
 0x53c   : > { %1832 = vrcp.f32 %v1158_v27 }
 0x53f   : > { %v1155_v28 = vpop.xlane.xlu0 %1154 }
 0x540   : > { %1834 = vrcp.f32 %v1155_v28 }
 0x543   : > { %v1166_v29 = vpop.permute.xlu0 %1165 }
 0x544   : > { %v1171_v30 = vand.u32 %v1166_v29, %v2314_v46 }
 0x546   : > { %1707 = vmatpush3.bf16.msra.mxu0 %v1171_v30 }
 0x547   : > { %1720 = vmatprep.subr.bf16.mxu0 %v2026_v0 }
 0x549   : > { %v1833_v31 = vpop.eup %1832 }
 0x54a   : > { %v1162_v34 = vmul.f32 %v1833_v31, %v1829_v23 }
 0x54d   : > { %v1835_v32 = vpop.eup %1834 }
 0x54e   : > { %v1160_v33 = vmul.f32 %v1835_v32, %v1831_v25 }
 0x550   : > { %v1163_v36 = vpack.c.bf16 %v1162_v34, %v1160_v33 }
 0x552   : > { %1709 = vmatmul.mubr.msk.bf16.vlgmr.msra.gmra.mxu0 %vm966_vm3, %v1163_v36 }
 0x553   : > { %1721 = vmatpush3.bf16.msra.mxu0 %v1816_v35  ;;  %1724 = vmatprep.mubr.msk.bf16.mxu0 %vm2027_vm0, %v2026_v0 }
 0x554   : > { %1722 = vmatprep.subr.bf16.mxu0 %v2026_v0 }
 0x557   : > { %1723 = vmatpush3.bf16.msra.mxu0 %v1817_v37 }
 0x55a   : > { %1725 = vmatmul.mubr.msk.bf16.vlgmr.msra.gmra.mxu0 %vm876_vm2, %v1043_v9 }
 0x612   : > { %v1207_v40 = vpop.f32.mrf.mxu0 }
 0x614   : > { %v1710_v41 = vpop.f32.mrf.mxu0 }
 0x616   : > { %v1210_v42 = vpop.f32.mrf.mxu0 }
 0x617   : > { %v1214_v43 = vpack.c.bf16 %v1210_v42, %v1207_v40 }
 0x618   : > { %v1711_v44 = vpop.f32.mrf.mxu0 }
 0x619   : > { %1717 = vmatmul.mubr.msk.bf16.vlgmr.msra.gmra.mxu1 %vm876_vm2, %v1214_v43 }
 0x61a   : > { %v1324_v45 = vpop.f32.mrf.mxu0 }
 0x61c   : > { %v1726_v46 = vpop.f32.mrf.mxu0 }
 0x61e   : > { %v1327_v47 = vpop.f32.mrf.mxu0 }
 0x620   : > { %v1727_v48 = vpop.f32.mrf.mxu0 }
 0x6d9   : > { %v1268_v0 = vpop.f32.mrf.mxu1 }
 0x6da   : > { %v1325_v50 = vadd.f32 %v1324_v45, %v1268_v0 }
 0x6db   : > { %v1718_v51 = vpop.f32.mrf.mxu1 }
 0x6dc   : > { %v1333_v53 = vadd.f32 %v1331_v49, %v1325_v50 }
 0x6dd   : > { %v1271_v54 = vpop.f32.mrf.mxu1 }
 0x6de   : > { %v1328_v56 = vadd.f32 %v1327_v47, %v1271_v54  ;;  %v1342_v57 = vadd.f32 %v1607_v52, %v1333_v53 }
 0x6df   : > { %v1719_v58 = vpop.f32.mrf.mxu1 }
 0x6e0   : > { %v1334_v59 = vadd.f32 %v1332_v55, %v1328_v56  ;;  %v1344_v60 = vsel %vm655_vm1, %v1342_v57, 0.0 }
 0x6e1   : > { %1345 = vadd.xlane.f32.xlu1 %v1344_v60 }
 0x6e2   : > { %v1343_v61 = vadd.f32 %v1607_v52, %v1334_v59 }
 0x6e4   : > { %v1348_v62 = vsel %vm1347_vm7, %v1343_v61, 0.0 }
 0x6e5   : > { %1349 = vadd.xlane.f32.xlu1 %v1348_v62 }
 0x76a   : > { %v1346_v63 = vpop.xlane.xlu1 %1345 }
 0x76b   : > { %v1352_v1 = vmul.f32 0.015625, %v1346_v63 }
 0x76d   : > { %v1354_v2 = vsub.f32 %v1342_v57, %v1352_v1 }
 0x76e   : > { %v1350_v3 = vpop.xlane.xlu1 %1349 }
 0x76f   : > { %v1353_v4 = vmul.f32 0.015625, %v1350_v3  ;;  %v1356_v5 = vmul.f32 %v1354_v2, %v1354_v2 }
 0x771   : > { %v1355_v6 = vsub.f32 %v1343_v61, %v1353_v4  ;;  %v1358_v7 = vsel %vm655_vm1, %v1356_v5, 0.0 }
 0x772   : > { %1359 = vadd.xlane.f32.xlu1 %v1358_v7 }
 0x773   : > { %v1357_v8 = vmul.f32 %v1355_v6, %v1355_v6 }
 0x775   : > { %v1361_v9 = vsel %vm1347_vm7, %v1357_v8, 0.0 }
 0x776   : > { %1362 = vadd.xlane.f32.xlu1 %v1361_v9 }
 0x7fb   : > { %v1360_v10 = vpop.xlane.xlu1 %1359 }
 0x7fc   : > { %v1364_v11 = vmul.f32 0.015625, %v1360_v10 }
 0x7fe   : > { %v1366_v12 = vadd.f32 1e-05, %v1364_v11 }
 0x7ff   : > { %v1363_v13 = vpop.xlane.xlu1 %1362 }
 0x800   : > { %1836 = vrsqrt.f32 %v1366_v12  ;;  %v1365_v14 = vmul.f32 0.015625, %v1363_v13 }
 0x802   : > { %v1367_v15 = vadd.f32 1e-05, %v1365_v14 }
 0x804   : > { %1838 = vrsqrt.f32 %v1367_v15 }
 0x80d   : > { %v1837_v16 = vpop.eup %1836 }
 0x80e   : > { %v1370_v18 = vmul.f32 %v1837_v16, %v1354_v2 }
 0x810   : > { %v1379_v20 = vmul.f32 %v1608_v17, %v1370_v18 }
 0x811   : > { %v1839_v21 = vpop.eup %1838 }
 0x812   : > { %v1388_v22 = vadd.f32 %v1609_v19, %v1379_v20  ;;  %v1371_v23 = vmul.f32 %v1839_v21, %v1355_v6 }
 0x814   : > { %1390 = vst.msk [vmem:[%s603_s30] sm:$0xff] %vm655_vm1, %v1388_v22  ;;  %v1380_v24 = vmul.f32 %v1608_v17, %v1371_v23 }
 0x816   : > { %v1389_v25 = vadd.f32 %v1609_v19, %v1380_v24 }
 0x818   : > { %1391 = vst.msk [vmem:[%s603_s30 + $0x8] sm:$0x1] %vm1347_vm7, %v1389_v25 }
 0x819 PF: > { %s28_s29 = sadd.s32 1, %s2018_s29  }
 0x81a   : > { %p25_p13 = scmp.ge.s32.totalorder %s28_s29, 4  }
 0x81c   :  { %27 = sbr.rel (!%p25_p13) target bundleno = 4 (0x4), region = 140 }
 0x821   :  { %1413 = vsyncpa [#allocation3], 1 }
 0x822   :  { %1415 = vsyncpa [#allocation3 + $0x1], 1 }
 0x823   :  { %1416 = vsyncpa [#allocation5], 1 }
 0x824   :  { %1417 = vsyncpa [#allocation8], 1 }
 0x825   :  { %1418 = vsyncpa [#allocation11], 1 }

// kernel: finetuned_sam2_forward.16
= control target key start
LH: loop header
LB: loop body
LE: loop exit
PB: predicated region body
PF: predicated region fallthrough
CT: control target
= control target key end

     0   :  { %vm270_vm0 = vcmask 392192   ;;  %vm656_vm1 = vcmask 64512   ;;  %s1421_s1 = inlined_call_operand.vmem [shape: bf16[48,8], index: 1, kind: input, shape index: {}]   ;;  %s1422_s0 = inlined_call_operand.vmem [shape: bf16[512,48], index: 0, kind: input, shape index: {}]   ;;  %s1423_s2 = inlined_call_operand.vmem [shape: f32[1,8], index: 2, kind: input, shape index: {}]   ;;  %s1424_s3 = inlined_call_operand.vmem [shape: f32[512,8], index: 3, kind: output, shape index: {}]  }
   0x1   :  { %v904_v0 = vld [vmem:[%s1421_s1 + $0x10] sm:$0xff]   ;;  %v905_v1 = vld [vmem:[%s1421_s1 + $0x8] sm:$0xff]   ;;  %v906_v2 = vld [vmem:[%s1421_s1] sm:$0xff]  }
   0x2   :  { %828 = vmatprep.subr.bf16.mxu0 %v904_v0  ;;  %898 = vmatprep.subr.bf16.mxu1 %v904_v0  ;;  %v907_v3 = vld [vmem:[%s1422_s0] sm:$0xff]   ;;  %v909_v5 = vld [vmem:[%s1422_s0 + $0x8] sm:$0xff]   ;;  %v911_v7 = vld [vmem:[%s1422_s0 + $0x10] sm:$0xff]  }
   0x3   :  { %829 = vmatpush3.bf16.msra.mxu0 %v904_v0  ;;  %901 = vmatpush3.bf16.msra.mxu1 %v904_v0  ;;  %v908_v4 = vld [vmem:[%s1422_s0 + $0x80] sm:$0xff]   ;;  %v910_v6 = vld [vmem:[%s1422_s0 + $0x88] sm:$0xff]   ;;  %v912_v8 = vld [vmem:[%s1422_s0 + $0x90] sm:$0xff]  }
   0x4   :  { %830 = vmatprep.subr.bf16.mxu0 %v905_v1  ;;  %899 = vmatprep.subr.bf16.mxu1 %v905_v1  ;;  %v913_v9 = vld [vmem:[%s1422_s0 + $0x18] sm:$0xff]   ;;  %v915_v11 = vld [vmem:[%s1422_s0 + $0x20] sm:$0xff]   ;;  %v917_v13 = vld [vmem:[%s1422_s0 + $0x28] sm:$0xff]  }
   0x5   :  { %834 = vmatprep.mubr.msk.bf16.mxu0 %vm270_vm0, %v907_v3  ;;  %866 = vmatprep.mubr.msk.bf16.mxu1 %vm270_vm0, %v908_v4  ;;  %v914_v10 = vld [vmem:[%s1422_s0 + $0x98] sm:$0xff]   ;;  %v916_v12 = vld [vmem:[%s1422_s0 + $0xa0] sm:$0xff]   ;;  %v918_v14 = vld [vmem:[%s1422_s0 + $0xa8] sm:$0xff]  }
   0x6   :  { %v919_v15 = vld [vmem:[%s1422_s0 + $0x30] sm:$0xff]   ;;  %v921_v17 = vld [vmem:[%s1422_s0 + $0x38] sm:$0xff]   ;;  %v923_v19 = vld [vmem:[%s1422_s0 + $0x40] sm:$0xff]  }
   0x7   :  { %831 = vmatpush3.bf16.msra.mxu0 %v905_v1  ;;  %902 = vmatpush3.bf16.msra.mxu1 %v905_v1  ;;  %v920_v16 = vld [vmem:[%s1422_s0 + $0xb0] sm:$0xff]   ;;  %v922_v18 = vld [vmem:[%s1422_s0 + $0xb8] sm:$0xff]   ;;  %v924_v20 = vld [vmem:[%s1422_s0 + $0xc0] sm:$0xff]  }
   0x8   :  { %832 = vmatprep.subr.bf16.mxu0 %v906_v2  ;;  %900 = vmatprep.subr.bf16.mxu1 %v906_v2  ;;  %v925_v21 = vld [vmem:[%s1422_s0 + $0x48] sm:$0xff]   ;;  %v927_v23 = vld [vmem:[%s1422_s0 + $0x50] sm:$0xff]   ;;  %v929_v25 = vld [vmem:[%s1422_s0 + $0x58] sm:$0xff]  }
   0x9   :  { %v926_v22 = vld [vmem:[%s1422_s0 + $0xc8] sm:$0xff]   ;;  %v928_v24 = vld [vmem:[%s1422_s0 + $0xd0] sm:$0xff]   ;;  %v930_v26 = vld [vmem:[%s1422_s0 + $0xd8] sm:$0xff]  }
   0xa   :  { %v931_v27 = vld [vmem:[%s1422_s0 + $0x60] sm:$0xff]   ;;  %v933_v29 = vld [vmem:[%s1422_s0 + $0x68] sm:$0xff]   ;;  %v935_v31 = vld [vmem:[%s1422_s0 + $0x70] sm:$0xff]  }
   0xb   :  { %833 = vmatpush3.bf16.msra.mxu0 %v906_v2  ;;  %903 = vmatpush3.bf16.msra.mxu1 %v906_v2  ;;  %v932_v28 = vld [vmem:[%s1422_s0 + $0xe0] sm:$0xff]   ;;  %v934_v30 = vld [vmem:[%s1422_s0 + $0xe8] sm:$0xff]   ;;  %v936_v32 = vld [vmem:[%s1422_s0 + $0xf0] sm:$0xff]  }
   0xc   :  { %v937_v33 = vld [vmem:[%s1422_s0 + $0x78] sm:$0xff]   ;;  %v1099_v35 = vld [vmem:[%s1423_s2] ss:$0 sm:$0xff] }
   0xd   :  { %v938_v34 = vld [vmem:[%s1422_s0 + $0xf8] sm:$0xff]  }
   0xe   :  { %835 = vmatmul.mubr.msk.bf16.vlgmr.msra.gmra.mxu0 %vm270_vm0, %v909_v5  ;;  %867 = vmatmul.mubr.msk.bf16.vlgmr.msra.gmra.mxu1 %vm270_vm0, %v910_v6 }
   0xf   :  { %838 = vmatprep.mubr.msk.bf16.mxu0 %vm270_vm0, %v911_v7  ;;  %870 = vmatprep.mubr.msk.bf16.mxu1 %vm270_vm0, %v912_v8 }
  0x16   :  { %839 = vmatmul.mubr.msk.bf16.gmra.mxu0 %vm270_vm0, %v913_v9  ;;  %871 = vmatmul.mubr.msk.bf16.gmra.mxu1 %vm270_vm0, %v914_v10 }
  0x17   :  { %842 = vmatprep.mubr.msk.bf16.mxu0 %vm270_vm0, %v915_v11  ;;  %874 = vmatprep.mubr.msk.bf16.mxu1 %vm270_vm0, %v916_v12 }
  0x1e   :  { %843 = vmatmul.mubr.msk.bf16.gmra.mxu0 %vm270_vm0, %v917_v13  ;;  %875 = vmatmul.mubr.msk.bf16.gmra.mxu1 %vm270_vm0, %v918_v14 }
  0x1f   :  { %846 = vmatprep.mubr.msk.bf16.mxu0 %vm270_vm0, %v919_v15  ;;  %878 = vmatprep.mubr.msk.bf16.mxu1 %vm270_vm0, %v920_v16 }
  0x26   :  { %847 = vmatmul.mubr.msk.bf16.gmra.mxu0 %vm270_vm0, %v921_v17  ;;  %879 = vmatmul.mubr.msk.bf16.gmra.mxu1 %vm270_vm0, %v922_v18 }
  0x27   :  { %850 = vmatprep.mubr.msk.bf16.mxu0 %vm270_vm0, %v923_v19  ;;  %882 = vmatprep.mubr.msk.bf16.mxu1 %vm270_vm0, %v924_v20 }
  0x2e   :  { %851 = vmatmul.mubr.msk.bf16.gmra.mxu0 %vm270_vm0, %v925_v21  ;;  %883 = vmatmul.mubr.msk.bf16.gmra.mxu1 %vm270_vm0, %v926_v22 }
  0x2f   :  { %854 = vmatprep.mubr.msk.bf16.mxu0 %vm270_vm0, %v927_v23  ;;  %886 = vmatprep.mubr.msk.bf16.mxu1 %vm270_vm0, %v928_v24 }
  0x36   :  { %855 = vmatmul.mubr.msk.bf16.gmra.mxu0 %vm270_vm0, %v929_v25  ;;  %887 = vmatmul.mubr.msk.bf16.gmra.mxu1 %vm270_vm0, %v930_v26 }
  0x37   :  { %858 = vmatprep.mubr.msk.bf16.mxu0 %vm270_vm0, %v931_v27  ;;  %890 = vmatprep.mubr.msk.bf16.mxu1 %vm270_vm0, %v932_v28 }
  0x3e   :  { %859 = vmatmul.mubr.msk.bf16.gmra.mxu0 %vm270_vm0, %v933_v29  ;;  %891 = vmatmul.mubr.msk.bf16.gmra.mxu1 %vm270_vm0, %v934_v30 }
  0x3f   :  { %862 = vmatprep.mubr.msk.bf16.mxu0 %vm270_vm0, %v935_v31  ;;  %894 = vmatprep.mubr.msk.bf16.mxu1 %vm270_vm0, %v936_v32 }
  0x46   :  { %863 = vmatmul.mubr.msk.bf16.gmra.mxu0 %vm270_vm0, %v937_v33  ;;  %895 = vmatmul.mubr.msk.bf16.gmra.mxu1 %vm270_vm0, %v938_v34 }
  0xce   :  { %v836_v36 = vpop.f32.mrf.mxu0  ;;  %v868_v37 = vpop.f32.mrf.mxu1 }
  0xcf   :  { %v410_v38 = vadd.f32 %v836_v36, %v1099_v35  ;;  %v538_v39 = vadd.f32 %v868_v37, %v1099_v35 }
  0xd0   :  { %v401_v40 = vpop.f32.mrf.mxu0  ;;  %v529_v41 = vpop.f32.mrf.mxu1 }
  0xd1   :  { %659 = vst.msk [vmem:[%s1424_s3 + $0x10] sm:$0xff] %vm656_vm1, %v410_v38  ;;  %691 = vst.msk [vmem:[%s1424_s3 + $0x110] sm:$0xff] %vm656_vm1, %v538_v39  ;;  %v402_v42 = vadd.f32 %v1099_v35, %v401_v40  ;;  %v530_v43 = vadd.f32 %v1099_v35, %v529_v41 }
  0xd2   :  { %v837_v44 = vpop.f32.mrf.mxu0  ;;  %v869_v45 = vpop.f32.mrf.mxu1 }
  0xd3   :  { %657 = vst.msk [vmem:[%s1424_s3] sm:$0xff] %vm656_vm1, %v402_v42  ;;  %689 = vst.msk [vmem:[%s1424_s3 + $0x100] sm:$0xff] %vm656_vm1, %v530_v43  ;;  %v413_v46 = vadd.f32 %v837_v44, %v1099_v35  ;;  %v541_v47 = vadd.f32 %v869_v45, %v1099_v35 }
  0xd4   :  { %v404_v48 = vpop.f32.mrf.mxu0  ;;  %v532_v49 = vpop.f32.mrf.mxu1 }
  0xd5   :  { %660 = vst.msk [vmem:[%s1424_s3 + $0x18] sm:$0xff] %vm656_vm1, %v413_v46  ;;  %692 = vst.msk [vmem:[%s1424_s3 + $0x118] sm:$0xff] %vm656_vm1, %v541_v47  ;;  %v405_v50 = vadd.f32 %v1099_v35, %v404_v48  ;;  %v533_v51 = vadd.f32 %v1099_v35, %v532_v49 }
  0xd6   :  { %v840_v52 = vpop.f32.mrf.mxu0  ;;  %v872_v53 = vpop.f32.mrf.mxu1 }
  0xd7   :  { %658 = vst.msk [vmem:[%s1424_s3 + $0x8] sm:$0xff] %vm656_vm1, %v405_v50  ;;  %690 = vst.msk [vmem:[%s1424_s3 + $0x108] sm:$0xff] %vm656_vm1, %v533_v51  ;;  %v426_v54 = vadd.f32 %v840_v52, %v1099_v35  ;;  %v554_v55 = vadd.f32 %v872_v53, %v1099_v35 }
  0xd8   :  { %v417_v56 = vpop.f32.mrf.mxu0  ;;  %v545_v57 = vpop.f32.mrf.mxu1 }
  0xd9   :  { %663 = vst.msk [vmem:[%s1424_s3 + $0x30] sm:$0xff] %vm656_vm1, %v426_v54  ;;  %695 = vst.msk [vmem:[%s1424_s3 + $0x130] sm:$0xff] %vm656_vm1, %v554_v55  ;;  %v418_v58 = vadd.f32 %v1099_v35, %v417_v56  ;;  %v546_v59 = vadd.f32 %v1099_v35, %v545_v57 }
  0xda   :  { %v841_v60 = vpop.f32.mrf.mxu0  ;;  %v873_v61 = vpop.f32.mrf.mxu1 }
  0xdb   :  { %661 = vst.msk [vmem:[%s1424_s3 + $0x20] sm:$0xff] %vm656_vm1, %v418_v58  ;;  %693 = vst.msk [vmem:[%s1424_s3 + $0x120] sm:$0xff] %vm656_vm1, %v546_v59  ;;  %v429_v62 = vadd.f32 %v841_v60, %v1099_v35  ;;  %v557_v63 = vadd.f32 %v873_v61, %v1099_v35 }
  0xdc   :  { %v420_v0 = vpop.f32.mrf.mxu0  ;;  %v548_v1 = vpop.f32.mrf.mxu1 }
  0xdd   :  { %664 = vst.msk [vmem:[%s1424_s3 + $0x38] sm:$0xff] %vm656_vm1, %v429_v62  ;;  %696 = vst.msk [vmem:[%s1424_s3 + $0x138] sm:$0xff] %vm656_vm1, %v557_v63  ;;  %v421_v2 = vadd.f32 %v1099_v35, %v420_v0  ;;  %v549_v3 = vadd.f32 %v1099_v35, %v548_v1 }
  0xde   :  { %v844_v4 = vpop.f32.mrf.mxu0  ;;  %v876_v5 = vpop.f32.mrf.mxu1 }
  0xdf   :  { %662 = vst.msk [vmem:[%s1424_s3 + $0x28] sm:$0xff] %vm656_vm1, %v421_v2  ;;  %694 = vst.msk [vmem:[%s1424_s3 + $0x128] sm:$0xff] %vm656_vm1, %v549_v3  ;;  %v442_v6 = vadd.f32 %v844_v4, %v1099_v35  ;;  %v570_v7 = vadd.f32 %v876_v5, %v1099_v35 }
  0xe0   :  { %v433_v8 = vpop.f32.mrf.mxu0  ;;  %v561_v9 = vpop.f32.mrf.mxu1 }
  0xe1   :  { %667 = vst.msk [vmem:[%s1424_s3 + $0x50] sm:$0xff] %vm656_vm1, %v442_v6  ;;  %699 = vst.msk [vmem:[%s1424_s3 + $0x150] sm:$0xff] %vm656_vm1, %v570_v7  ;;  %v434_v10 = vadd.f32 %v1099_v35, %v433_v8  ;;  %v562_v11 = vadd.f32 %v1099_v35, %v561_v9 }
  0xe2   :  { %v845_v12 = vpop.f32.mrf.mxu0  ;;  %v877_v13 = vpop.f32.mrf.mxu1 }
  0xe3   :  { %665 = vst.msk [vmem:[%s1424_s3 + $0x40] sm:$0xff] %vm656_vm1, %v434_v10  ;;  %697 = vst.msk [vmem:[%s1424_s3 + $0x140] sm:$0xff] %vm656_vm1, %v562_v11  ;;  %v445_v14 = vadd.f32 %v845_v12, %v1099_v35  ;;  %v573_v15 = vadd.f32 %v877_v13, %v1099_v35 }
  0xe4   :  { %v436_v16 = vpop.f32.mrf.mxu0  ;;  %v564_v17 = vpop.f32.mrf.mxu1 }
  0xe5   :  { %668 = vst.msk [vmem:[%s1424_s3 + $0x58] sm:$0xff] %vm656_vm1, %v445_v14  ;;  %700 = vst.msk [vmem:[%s1424_s3 + $0x158] sm:$0xff] %vm656_vm1, %v573_v15  ;;  %v437_v18 = vadd.f32 %v1099_v35, %v436_v16  ;;  %v565_v19 = vadd.f32 %v1099_v35, %v564_v17 }
  0xe6   :  { %v848_v20 = vpop.f32.mrf.mxu0  ;;  %v880_v21 = vpop.f32.mrf.mxu1 }
  0xe7   :  { %666 = vst.msk [vmem:[%s1424_s3 + $0x48] sm:$0xff] %vm656_vm1, %v437_v18  ;;  %698 = vst.msk [vmem:[%s1424_s3 + $0x148] sm:$0xff] %vm656_vm1, %v565_v19  ;;  %v458_v22 = vadd.f32 %v848_v20, %v1099_v35  ;;  %v586_v23 = vadd.f32 %v880_v21, %v1099_v35 }
  0xe8   :  { %v449_v24 = vpop.f32.mrf.mxu0  ;;  %v577_v25 = vpop.f32.mrf.mxu1 }
  0xe9   :  { %671 = vst.msk [vmem:[%s1424_s3 + $0x70] sm:$0xff] %vm656_vm1, %v458_v22  ;;  %703 = vst.msk [vmem:[%s1424_s3 + $0x170] sm:$0xff] %vm656_vm1, %v586_v23  ;;  %v450_v26 = vadd.f32 %v1099_v35, %v449_v24  ;;  %v578_v27 = vadd.f32 %v1099_v35, %v577_v25 }
  0xea   :  { %v849_v28 = vpop.f32.mrf.mxu0  ;;  %v881_v29 = vpop.f32.mrf.mxu1 }
  0xeb   :  { %669 = vst.msk [vmem:[%s1424_s3 + $0x60] sm:$0xff] %vm656_vm1, %v450_v26  ;;  %701 = vst.msk [vmem:[%s1424_s3 + $0x160] sm:$0xff] %vm656_vm1, %v578_v27  ;;  %v461_v30 = vadd.f32 %v849_v28, %v1099_v35  ;;  %v589_v31 = vadd.f32 %v881_v29, %v1099_v35 }
  0xec   :  { %v452_v32 = vpop.f32.mrf.mxu0  ;;  %v580_v33 = vpop.f32.mrf.mxu1 }
  0xed   :  { %672 = vst.msk [vmem:[%s1424_s3 + $0x78] sm:$0xff] %vm656_vm1, %v461_v30  ;;  %704 = vst.msk [vmem:[%s1424_s3 + $0x178] sm:$0xff] %vm656_vm1, %v589_v31  ;;  %v453_v34 = vadd.f32 %v1099_v35, %v452_v32  ;;  %v581_v36 = vadd.f32 %v1099_v35, %v580_v33 }
  0xee   :  { %v852_v37 = vpop.f32.mrf.mxu0  ;;  %v884_v38 = vpop.f32.mrf.mxu1 }
  0xef   :  { %670 = vst.msk [vmem:[%s1424_s3 + $0x68] sm:$0xff] %vm656_vm1, %v453_v34  ;;  %702 = vst.msk [vmem:[%s1424_s3 + $0x168] sm:$0xff] %vm656_vm1, %v581_v36  ;;  %v474_v39 = vadd.f32 %v852_v37, %v1099_v35  ;;  %v602_v40 = vadd.f32 %v884_v38, %v1099_v35 }
  0xf0   :  { %v465_v41 = vpop.f32.mrf.mxu0  ;;  %v593_v42 = vpop.f32.mrf.mxu1 }
  0xf1   :  { %675 = vst.msk [vmem:[%s1424_s3 + $0x90] sm:$0xff] %vm656_vm1, %v474_v39  ;;  %707 = vst.msk [vmem:[%s1424_s3 + $0x190] sm:$0xff] %vm656_vm1, %v602_v40  ;;  %v466_v43 = vadd.f32 %v1099_v35, %v465_v41  ;;  %v594_v44 = vadd.f32 %v1099_v35, %v593_v42 }
  0xf2   :  { %v853_v45 = vpop.f32.mrf.mxu0  ;;  %v885_v46 = vpop.f32.mrf.mxu1 }
  0xf3   :  { %673 = vst.msk [vmem:[%s1424_s3 + $0x80] sm:$0xff] %vm656_vm1, %v466_v43  ;;  %705 = vst.msk [vmem:[%s1424_s3 + $0x180] sm:$0xff] %vm656_vm1, %v594_v44  ;;  %v477_v47 = vadd.f32 %v853_v45, %v1099_v35  ;;  %v605_v48 = vadd.f32 %v885_v46, %v1099_v35 }
  0xf4   :  { %v468_v49 = vpop.f32.mrf.mxu0  ;;  %v596_v50 = vpop.f32.mrf.mxu1 }
  0xf5   :  { %676 = vst.msk [vmem:[%s1424_s3 + $0x98] sm:$0xff] %vm656_vm1, %v477_v47  ;;  %708 = vst.msk [vmem:[%s1424_s3 + $0x198] sm:$0xff] %vm656_vm1, %v605_v48  ;;  %v469_v51 = vadd.f32 %v1099_v35, %v468_v49  ;;  %v597_v52 = vadd.f32 %v1099_v35, %v596_v50 }
  0xf6   :  { %v856_v53 = vpop.f32.mrf.mxu0  ;;  %v888_v54 = vpop.f32.mrf.mxu1 }
  0xf7   :  { %674 = vst.msk [vmem:[%s1424_s3 + $0x88] sm:$0xff] %vm656_vm1, %v469_v51  ;;  %706 = vst.msk [vmem:[%s1424_s3 + $0x188] sm:$0xff] %vm656_vm1, %v597_v52  ;;  %v490_v55 = vadd.f32 %v856_v53, %v1099_v35  ;;  %v618_v56 = vadd.f32 %v888_v54, %v1099_v35 }
  0xf8   :  { %v481_v57 = vpop.f32.mrf.mxu0  ;;  %v609_v58 = vpop.f32.mrf.mxu1 }
  0xf9   :  { %679 = vst.msk [vmem:[%s1424_s3 + $0xb0] sm:$0xff] %vm656_vm1, %v490_v55  ;;  %711 = vst.msk [vmem:[%s1424_s3 + $0x1b0] sm:$0xff] %vm656_vm1, %v618_v56  ;;  %v482_v59 = vadd.f32 %v1099_v35, %v481_v57  ;;  %v610_v60 = vadd.f32 %v1099_v35, %v609_v58 }
  0xfa   :  { %v857_v61 = vpop.f32.mrf.mxu0  ;;  %v889_v62 = vpop.f32.mrf.mxu1 }
  0xfb   :  { %677 = vst.msk [vmem:[%s1424_s3 + $0xa0] sm:$0xff] %vm656_vm1, %v482_v59  ;;  %709 = vst.msk [vmem:[%s1424_s3 + $0x1a0] sm:$0xff] %vm656_vm1, %v610_v60  ;;  %v493_v63 = vadd.f32 %v857_v61, %v1099_v35  ;;  %v621_v0 = vadd.f32 %v889_v62, %v1099_v35 }
  0xfc   :  { %v484_v1 = vpop.f32.mrf.mxu0  ;;  %v612_v2 = vpop.f32.mrf.mxu1 }
  0xfd   :  { %680 = vst.msk [vmem:[%s1424_s3 + $0xb8] sm:$0xff] %vm656_vm1, %v493_v63  ;;  %712 = vst.msk [vmem:[%s1424_s3 + $0x1b8] sm:$0xff] %vm656_vm1, %v621_v0  ;;  %v485_v3 = vadd.f32 %v1099_v35, %v484_v1  ;;  %v613_v4 = vadd.f32 %v1099_v35, %v612_v2 }
  0xfe   :  { %v860_v5 = vpop.f32.mrf.mxu0  ;;  %v892_v6 = vpop.f32.mrf.mxu1 }
  0xff   :  { %678 = vst.msk [vmem:[%s1424_s3 + $0xa8] sm:$0xff] %vm656_vm1, %v485_v3  ;;  %710 = vst.msk [vmem:[%s1424_s3 + $0x1a8] sm:$0xff] %vm656_vm1, %v613_v4  ;;  %v506_v7 = vadd.f32 %v860_v5, %v1099_v35  ;;  %v634_v8 = vadd.f32 %v892_v6, %v1099_v35 }
 0x100   :  { %v497_v9 = vpop.f32.mrf.mxu0  ;;  %v625_v10 = vpop.f32.mrf.mxu1 }
 0x101   :  { %683 = vst.msk [vmem:[%s1424_s3 + $0xd0] sm:$0xff] %vm656_vm1, %v506_v7  ;;  %715 = vst.msk [vmem:[%s1424_s3 + $0x1d0] sm:$0xff] %vm656_vm1, %v634_v8  ;;  %v498_v11 = vadd.f32 %v1099_v35, %v497_v9  ;;  %v626_v12 = vadd.f32 %v1099_v35, %v625_v10 }
 0x102   :  { %v861_v13 = vpop.f32.mrf.mxu0  ;;  %v893_v14 = vpop.f32.mrf.mxu1 }
 0x103   :  { %681 = vst.msk [vmem:[%s1424_s3 + $0xc0] sm:$0xff] %vm656_vm1, %v498_v11  ;;  %713 = vst.msk [vmem:[%s1424_s3 + $0x1c0] sm:$0xff] %vm656_vm1, %v626_v12  ;;  %v509_v15 = vadd.f32 %v861_v13, %v1099_v35  ;;  %v637_v16 = vadd.f32 %v893_v14, %v1099_v35 }
 0x104   :  { %v500_v17 = vpop.f32.mrf.mxu0  ;;  %v628_v18 = vpop.f32.mrf.mxu1 }
 0x105   :  { %684 = vst.msk [vmem:[%s1424_s3 + $0xd8] sm:$0xff] %vm656_vm1, %v509_v15  ;;  %716 = vst.msk [vmem:[%s1424_s3 + $0x1d8] sm:$0xff] %vm656_vm1, %v637_v16  ;;  %v501_v19 = vadd.f32 %v1099_v35, %v500_v17  ;;  %v629_v20 = vadd.f32 %v1099_v35, %v628_v18 }
 0x106   :  { %v864_v21 = vpop.f32.mrf.mxu0  ;;  %v896_v22 = vpop.f32.mrf.mxu1 }
 0x107   :  { %682 = vst.msk [vmem:[%s1424_s3 + $0xc8] sm:$0xff] %vm656_vm1, %v501_v19  ;;  %714 = vst.msk [vmem:[%s1424_s3 + $0x1c8] sm:$0xff] %vm656_vm1, %v629_v20  ;;  %v522_v23 = vadd.f32 %v864_v21, %v1099_v35  ;;  %v650_v24 = vadd.f32 %v896_v22, %v1099_v35 }
 0x108   :  { %v513_v25 = vpop.f32.mrf.mxu0  ;;  %v641_v26 = vpop.f32.mrf.mxu1 }
 0x109   :  { %687 = vst.msk [vmem:[%s1424_s3 + $0xf0] sm:$0xff] %vm656_vm1, %v522_v23  ;;  %719 = vst.msk [vmem:[%s1424_s3 + $0x1f0] sm:$0xff] %vm656_vm1, %v650_v24  ;;  %v514_v27 = vadd.f32 %v1099_v35, %v513_v25  ;;  %v642_v28 = vadd.f32 %v1099_v35, %v641_v26 }
 0x10a   :  { %v865_v29 = vpop.f32.mrf.mxu0  ;;  %v897_v30 = vpop.f32.mrf.mxu1 }
 0x10b   :  { %685 = vst.msk [vmem:[%s1424_s3 + $0xe0] sm:$0xff] %vm656_vm1, %v514_v27  ;;  %717 = vst.msk [vmem:[%s1424_s3 + $0x1e0] sm:$0xff] %vm656_vm1, %v642_v28  ;;  %v525_v31 = vadd.f32 %v865_v29, %v1099_v35  ;;  %v653_v32 = vadd.f32 %v897_v30, %v1099_v35 }
 0x10c   :  { %v516_v33 = vpop.f32.mrf.mxu0  ;;  %v644_v34 = vpop.f32.mrf.mxu1 }
 0x10d   :  { %688 = vst.msk [vmem:[%s1424_s3 + $0xf8] sm:$0xff] %vm656_vm1, %v525_v31  ;;  %720 = vst.msk [vmem:[%s1424_s3 + $0x1f8] sm:$0xff] %vm656_vm1, %v653_v32  ;;  %v517_v36 = vadd.f32 %v1099_v35, %v516_v33  ;;  %v645_v37 = vadd.f32 %v1099_v35, %v644_v34 }
 0x10f   :  { %686 = vst.msk [vmem:[%s1424_s3 + $0xe8] sm:$0xff] %vm656_vm1, %v517_v36  ;;  %718 = vst.msk [vmem:[%s1424_s3 + $0x1e8] sm:$0xff] %vm656_vm1, %v645_v37 }

// kernel: finetuned_sam2_forward.17
= control target key start
LH: loop header
LB: loop body
LE: loop exit
PB: predicated region body
PF: predicated region fallthrough
CT: control target
= control target key end

     0   :  { %vm94_vm0 = vcmask 261120   ;;  %vm216_vm1 = vcmask 130048   ;;  %s425_s1 = inlined_call_operand.vmem [shape: bf16[32,16], index: 1, kind: input, shape index: {}]   ;;  %s426_s0 = inlined_call_operand.vmem [shape: bf16[128,32], index: 0, kind: input, shape index: {}]   ;;  %s427_s2 = inlined_call_operand.vmem [shape: f32[1,16], index: 2, kind: input, shape index: {}]   ;;  %s428_s3 = inlined_call_operand.vmem [shape: f32[128,16], index: 3, kind: output, shape index: {}]  }
   0x1   :  { %v290_v0 = vld [vmem:[%s425_s1 + $0x8] sm:$0xff]   ;;  %v291_v1 = vld [vmem:[%s425_s1] sm:$0xff]   ;;  %v296_v6 = vld [vmem:[%s426_s0 + $0x10] sm:$0xff]  }
   0x2   :  { %266 = vmatprep.subr.bf16.mxu0 %v290_v0  ;;  %286 = vmatprep.subr.bf16.mxu1 %v290_v0  ;;  %v292_v2 = vld [vmem:[%s426_s0] sm:$0xff]   ;;  %v294_v4 = vld [vmem:[%s426_s0 + $0x8] sm:$0xff]   ;;  %v297_v7 = vld [vmem:[%s426_s0 + $0x30] sm:$0xff]  }
   0x3   :  { %267 = vmatpush3.bf16.msra.mxu0 %v290_v0  ;;  %288 = vmatpush3.bf16.msra.mxu1 %v290_v0  ;;  %v293_v3 = vld [vmem:[%s426_s0 + $0x20] sm:$0xff]   ;;  %v295_v5 = vld [vmem:[%s426_s0 + $0x28] sm:$0xff]   ;;  %v298_v8 = vld [vmem:[%s426_s0 + $0x18] sm:$0xff]  }
   0x4   :  { %268 = vmatprep.subr.bf16.mxu0 %v291_v1  ;;  %287 = vmatprep.subr.bf16.mxu1 %v291_v1  ;;  %v299_v9 = vld [vmem:[%s426_s0 + $0x38] sm:$0xff]   ;;  %v237_v10 = vld [vmem:[%s427_s2] ss:$0 sm:$0xff] }
   0x5   :  { %270 = vmatprep.mubr.msk.bf16.mxu0 %vm94_vm0, %v292_v2  ;;  %278 = vmatprep.mubr.msk.bf16.mxu1 %vm94_vm0, %v293_v3 }
   0x7   :  { %269 = vmatpush3.bf16.msra.mxu0 %v291_v1  ;;  %289 = vmatpush3.bf16.msra.mxu1 %v291_v1 }
   0xa   :  { %271 = vmatmul.mubr.msk.bf16.vlgmr.msra.gmra.mxu0 %vm94_vm0, %v294_v4  ;;  %279 = vmatmul.mubr.msk.bf16.vlgmr.msra.gmra.mxu1 %vm94_vm0, %v295_v5 }
   0xb   :  { %274 = vmatprep.mubr.msk.bf16.mxu0 %vm94_vm0, %v296_v6  ;;  %282 = vmatprep.mubr.msk.bf16.mxu1 %vm94_vm0, %v297_v7 }
  0x12   :  { %275 = vmatmul.mubr.msk.bf16.gmra.mxu0 %vm94_vm0, %v298_v8  ;;  %283 = vmatmul.mubr.msk.bf16.gmra.mxu1 %vm94_vm0, %v299_v9 }
  0xca   :  { %v272_v11 = vpop.f32.mrf.mxu0  ;;  %v280_v12 = vpop.f32.mrf.mxu1 }
  0xcb   :  { %v162_v13 = vadd.f32 %v272_v11, %v237_v10  ;;  %v194_v14 = vadd.f32 %v280_v12, %v237_v10 }
  0xcc   :  { %v153_v15 = vpop.f32.mrf.mxu0  ;;  %v185_v16 = vpop.f32.mrf.mxu1 }
  0xcd   :  { %219 = vst.msk [vmem:[%s428_s3 + $0x10] sm:$0xff] %vm216_vm1, %v162_v13  ;;  %227 = vst.msk [vmem:[%s428_s3 + $0x50] sm:$0xff] %vm216_vm1, %v194_v14  ;;  %v154_v17 = vadd.f32 %v237_v10, %v153_v15  ;;  %v186_v18 = vadd.f32 %v237_v10, %v185_v16 }
  0xce   :  { %v273_v19 = vpop.f32.mrf.mxu0  ;;  %v281_v20 = vpop.f32.mrf.mxu1 }
  0xcf   :  { %217 = vst.msk [vmem:[%s428_s3] sm:$0xff] %vm216_vm1, %v154_v17  ;;  %225 = vst.msk [vmem:[%s428_s3 + $0x40] sm:$0xff] %vm216_vm1, %v186_v18  ;;  %v165_v21 = vadd.f32 %v273_v19, %v237_v10  ;;  %v197_v22 = vadd.f32 %v281_v20, %v237_v10 }
  0xd0   :  { %v156_v23 = vpop.f32.mrf.mxu0  ;;  %v188_v24 = vpop.f32.mrf.mxu1 }
  0xd1   :  { %220 = vst.msk [vmem:[%s428_s3 + $0x18] sm:$0xff] %vm216_vm1, %v165_v21  ;;  %228 = vst.msk [vmem:[%s428_s3 + $0x58] sm:$0xff] %vm216_vm1, %v197_v22  ;;  %v157_v25 = vadd.f32 %v237_v10, %v156_v23  ;;  %v189_v26 = vadd.f32 %v237_v10, %v188_v24 }
  0xd2   :  { %v276_v27 = vpop.f32.mrf.mxu0  ;;  %v284_v28 = vpop.f32.mrf.mxu1 }
  0xd3   :  { %218 = vst.msk [vmem:[%s428_s3 + $0x8] sm:$0xff] %vm216_vm1, %v157_v25  ;;  %226 = vst.msk [vmem:[%s428_s3 + $0x48] sm:$0xff] %vm216_vm1, %v189_v26  ;;  %v178_v29 = vadd.f32 %v276_v27, %v237_v10  ;;  %v210_v30 = vadd.f32 %v284_v28, %v237_v10 }
  0xd4   :  { %v169_v31 = vpop.f32.mrf.mxu0  ;;  %v201_v32 = vpop.f32.mrf.mxu1 }
  0xd5   :  { %223 = vst.msk [vmem:[%s428_s3 + $0x30] sm:$0xff] %vm216_vm1, %v178_v29  ;;  %231 = vst.msk [vmem:[%s428_s3 + $0x70] sm:$0xff] %vm216_vm1, %v210_v30  ;;  %v170_v33 = vadd.f32 %v237_v10, %v169_v31  ;;  %v202_v34 = vadd.f32 %v237_v10, %v201_v32 }
  0xd6   :  { %v277_v35 = vpop.f32.mrf.mxu0  ;;  %v285_v36 = vpop.f32.mrf.mxu1 }
  0xd7   :  { %221 = vst.msk [vmem:[%s428_s3 + $0x20] sm:$0xff] %vm216_vm1, %v170_v33  ;;  %229 = vst.msk [vmem:[%s428_s3 + $0x60] sm:$0xff] %vm216_vm1, %v202_v34  ;;  %v181_v37 = vadd.f32 %v277_v35, %v237_v10  ;;  %v213_v38 = vadd.f32 %v285_v36, %v237_v10 }
  0xd8   :  { %v172_v39 = vpop.f32.mrf.mxu0  ;;  %v204_v40 = vpop.f32.mrf.mxu1 }
  0xd9   :  { %224 = vst.msk [vmem:[%s428_s3 + $0x38] sm:$0xff] %vm216_vm1, %v181_v37  ;;  %232 = vst.msk [vmem:[%s428_s3 + $0x78] sm:$0xff] %vm216_vm1, %v213_v38  ;;  %v173_v41 = vadd.f32 %v237_v10, %v172_v39  ;;  %v205_v42 = vadd.f32 %v237_v10, %v204_v40 }
  0xdb   :  { %222 = vst.msk [vmem:[%s428_s3 + $0x28] sm:$0xff] %vm216_vm1, %v173_v41  ;;  %230 = vst.msk [vmem:[%s428_s3 + $0x68] sm:$0xff] %vm216_vm1, %v205_v42 }

// kernel: finetuned_sam2_forward.18
= control target key start
LH: loop header
LB: loop body
LE: loop exit
PB: predicated region body
PF: predicated region fallthrough
CT: control target
= control target key end

     0   :  { %vm68_vm0 = vcmask 523264   ;;  %s224_s1 = inlined_call_operand.vmem [shape: bf16[64,64], index: 1, kind: input, shape index: {}]   ;;  %s225_s0 = inlined_call_operand.vmem [shape: bf16[32,64], index: 0, kind: input, shape index: {}]   ;;  %s226_s2 = inlined_call_operand.vmem [shape: f32[1,64], index: 2, kind: input, shape index: {}]   ;;  %s227_s3 = inlined_call_operand.vmem [shape: f32[32,64], index: 3, kind: output, shape index: {}]  }
   0x1   :  { %v159_v0 = vld [vmem:[%s224_s1 + $0x18] sm:$0xff]   ;;  %v160_v1 = vld [vmem:[%s224_s1 + $0x10] sm:$0xff]   ;;  %v161_v2 = vld [vmem:[%s224_s1 + $0x8] sm:$0xff]  }
   0x2   :  { %147 = vmatprep.subr.bf16.mxu0 %v159_v0  ;;  %v163_v3 = vld [vmem:[%s225_s0] sm:$0xff]   ;;  %v164_v5 = vld [vmem:[%s225_s0 + $0x8] sm:$0xff]  }
   0x3   :  { %148 = vmatpush3.bf16.msra.mxu0 %v159_v0  ;;  %155 = vmatprep.mubr.msk.bf16.mxu0 %vm68_vm0, %v163_v3  ;;  %v162_v4 = vld [vmem:[%s224_s1] sm:$0xff]  }
   0x4   :  { %149 = vmatprep.subr.bf16.mxu0 %v160_v1  ;;  %v132_v6 = vld [vmem:[%s226_s2] ss:$0 sm:$0xff] }
   0x7   :  { %150 = vmatpush3.bf16.msra.mxu0 %v160_v1 }
   0x8   :  { %151 = vmatprep.subr.bf16.mxu0 %v161_v2 }
   0xb   :  { %152 = vmatpush3.bf16.msra.mxu0 %v161_v2 }
   0xc   :  { %153 = vmatprep.subr.bf16.mxu0 %v162_v4 }
   0xf   :  { %154 = vmatpush3.bf16.msra.mxu0 %v162_v4 }
  0x12   :  { %156 = vmatmul.mubr.msk.bf16.vlgmr.msra.gmra.mxu0 %vm68_vm0, %v164_v5 }
  0xd2   :  { %v157_v7 = vpop.f32.mrf.mxu0 }
  0xd3   :  { %v118_v8 = vadd.f32 %v157_v7, %v132_v6 }
  0xd4   :  { %v109_v9 = vpop.f32.mrf.mxu0 }
  0xd5   :  { %126 = vst.msk [vmem:[%s227_s3 + $0x10] sm:$0xff] %vm68_vm0, %v118_v8  ;;  %v110_v10 = vadd.f32 %v132_v6, %v109_v9 }
  0xd6   :  { %v158_v11 = vpop.f32.mrf.mxu0 }
  0xd7   :  { %124 = vst.msk [vmem:[%s227_s3] sm:$0xff] %vm68_vm0, %v110_v10  ;;  %v121_v12 = vadd.f32 %v158_v11, %v132_v6 }
  0xd8   :  { %v112_v13 = vpop.f32.mrf.mxu0 }
  0xd9   :  { %127 = vst.msk [vmem:[%s227_s3 + $0x18] sm:$0xff] %vm68_vm0, %v121_v12  ;;  %v113_v14 = vadd.f32 %v132_v6, %v112_v13 }
  0xdb   :  { %125 = vst.msk [vmem:[%s227_s3 + $0x8] sm:$0xff] %vm68_vm0, %v113_v14 }

// kernel: finetuned_sam2_forward.21
= control target key start
LH: loop header
LB: loop body
LE: loop exit
PB: predicated region body
PF: predicated region fallthrough
CT: control target
= control target key end

     0   :  { %12 = vsyncpa [#allocation3], 0  ;;  %s441_s24 = smov [#allocation2]   ;;  %s563_s0 = inlined_call_operand.vmem [shape: f32[18,64], index: 0, kind: input, shape index: {}]   ;;  %s564_s1 = inlined_call_operand.vmem [shape: bf16[64,128], index: 1, kind: input, shape index: {}]   ;;  %s565_s2 = inlined_call_operand.vmem [shape: f32[1,128], index: 2, kind: input, shape index: {}]   ;;  %s566_s3 = inlined_call_operand.vmem [shape: bf16[128,64], index: 3, kind: input, shape index: {}]   ;;  %s567_s4 = inlined_call_operand.vmem [shape: f32[1,64], index: 4, kind: input, shape index: {}]   ;;  %s568_s5 = inlined_call_operand.vmem [shape: f32[1,64], index: 5, kind: input, shape index: {}]   ;;  %s569_s6 = inlined_call_operand.hbm [shape: f32[1,64], index: 6, kind: input, shape index: {}]   ;;  %s570_s7 = inlined_call_operand.vmem [shape: f32[18,64], index: 7, kind: output, shape index: {}]  }
   0x1   :  { %s31_s25 = sshll.u32 %s441_s24, 4  ;;  %s32_s25 = int_to_ptr.vmem [resolvable:$true] %s31_s25 }
   0x2   :  { %s427_s26 = scalar_lea.vmem %s32_s25, 16  ;;  %s431_s27 = scalar_lea.vmem %s32_s25, 32 }
   0x3   :  { %p428_p0 = scmp.ne.s32.totalorder %s32_s25, %s427_s26  ;;  %p432_p1 = scmp.lt.s32.totalorder %s32_s25, %s32_s25 }
   0x4   :  { %p433_p2 = scmp.lt.s32.totalorder %s431_s27, %s427_s26 }
   0x6   :  { %p434_p3 = por %p433_p2, %p432_p1 }
   0x8   :  { %p435_p4 = pnand %p434_p3, %p428_p0 }
   0xa   :  { %438 = shalt.err (!%p435_p4)
}
   0xb   :  { %34 = dma.hbm_to_vmem [thread:$0]  %s569_s6, 16, %s32_s25, [#allocation3]  }
   0xc   :  { %439 = dma.done.wait [#allocation3], 16  }
   0xd   :  { %440 = vsyncadd [#allocation3], 4294967280  ;;  %v401_v0 = vld [vmem:[%s564_s1 + $0x18] sm:$0xff]   ;;  %v402_v1 = vld [vmem:[%s564_s1 + $0x10] sm:$0xff]   ;;  %vm83_vm0 = vcmask 523264   ;;  %vm271_vm1 = vcmask 517120  }
   0xe   :  { %368 = vmatprep.subr.bf16.mxu0 %v401_v0  ;;  %v403_v2 = vld [vmem:[%s564_s1 + $0x8] sm:$0xff]   ;;  %v39_v3 = vld [vmem:[%s563_s0] sm:$0xff]  ;;  %v405_v6 = vld [vmem:[%s566_s3 + $0x38] sm:$0xff]  }
   0xf   :  { %369 = vmatpush3.bf16.msra.mxu0 %v401_v0  ;;  %v500_v4 = vld [vmem:[%s563_s0 + $0x8] sm:$0xff]  ;;  %v406_v7 = vld [vmem:[%s566_s3 + $0x30] sm:$0xff]   ;;  %v404_v8 = vld [vmem:[%s564_s1] sm:$0xff]   ;;  %380 = vmatprep.subr.bf16.mxu1 %v405_v6 }
  0x10   :  { %370 = vmatprep.subr.bf16.mxu0 %v402_v1  ;;  %v42_v5 = vpack.c.bf16 %v500_v4, %v39_v3  ;;  %v41_v9 = vld [vmem:[%s563_s0 + $0x10] sm:$0x3]  ;;  %381 = vmatpush3.bf16.msra.mxu1 %v405_v6  ;;  %v407_v10 = vld [vmem:[%s566_s3 + $0x28] sm:$0xff]   ;;  %v408_v12 = vld [vmem:[%s566_s3 + $0x20] sm:$0xff]  }
  0x11   :  { %382 = vmatprep.subr.bf16.mxu1 %v406_v7  ;;  %v43_v11 = vpack.c.bf16 %v41_v9, %v41_v9  ;;  %v409_v13 = vld [vmem:[%s566_s3 + $0x18] sm:$0xff]   ;;  %v410_v14 = vld [vmem:[%s566_s3 + $0x10] sm:$0xff]   ;;  %v411_v15 = vld [vmem:[%s566_s3 + $0x8] sm:$0xff]  }
  0x12   :  { %376 = vmatprep.mubr.msk.bf16.mxu0 %vm83_vm0, %v42_v5  ;;  %v412_v16 = vld [vmem:[%s566_s3] sm:$0xff]  }
  0x13   :  { %371 = vmatpush3.bf16.msra.mxu0 %v402_v1  ;;  %v334_v18 = vld [vmem:[%s565_s2] ss:$0 sm:$0xff] }
  0x14   :  { %372 = vmatprep.subr.bf16.mxu0 %v403_v2  ;;  %383 = vmatpush3.bf16.msra.mxu1 %v406_v7  ;;  %v341_v30 = vld [vmem:[%s567_s4] ss:$0 sm:$0xff] }
  0x15   :  { %384 = vmatprep.subr.bf16.mxu1 %v407_v10  ;;  %v350_v5 = vld [vmem:[%s568_s5] ss:$0 sm:$0xff] }
  0x16   :  { %v351_v7 = vld [vmem:[#allocation2] ss:$0 sm:$0xff] }
  0x17   :  { %373 = vmatpush3.bf16.msra.mxu0 %v403_v2 }
  0x18   :  { %374 = vmatprep.subr.bf16.mxu0 %v404_v8  ;;  %385 = vmatpush3.bf16.msra.mxu1 %v407_v10 }
  0x19   :  { %386 = vmatprep.subr.bf16.mxu1 %v408_v12 }
  0x1b   :  { %375 = vmatpush3.bf16.msra.mxu0 %v404_v8 }
  0x1c   :  { %387 = vmatpush3.bf16.msra.mxu1 %v408_v12 }
  0x1d   :  { %388 = vmatprep.subr.bf16.mxu1 %v409_v13 }
  0x1e   :  { %377 = vmatmul.mubr.msk.bf16.vlgmr.msra.gmra.mxu0 %vm83_vm0, %v43_v11 }
  0x20   :  { %389 = vmatpush3.bf16.msra.mxu1 %v409_v13 }
  0x21   :  { %390 = vmatprep.subr.bf16.mxu1 %v410_v14 }
  0x24   :  { %391 = vmatpush3.bf16.msra.mxu1 %v410_v14 }
  0x25   :  { %392 = vmatprep.subr.bf16.mxu1 %v411_v15 }
  0x28   :  { %393 = vmatpush3.bf16.msra.mxu1 %v411_v15 }
  0x29   :  { %394 = vmatprep.subr.bf16.mxu1 %v412_v16 }
  0x2c   :  { %395 = vmatpush3.bf16.msra.mxu1 %v412_v16 }
  0xde   :  { %v378_v17 = vpop.f32.mrf.mxu0 }
  0xdf   :  { %v133_v20 = vadd.f32 %v378_v17, %v334_v18 }
  0xe0   :  { %v124_v19 = vpop.f32.mrf.mxu0 }
  0xe1   :  { %v125_v22 = vadd.f32 %v334_v18, %v124_v19  ;;  %v140_v25 = vmax.f32 %v133_v20, 0.0 }
  0xe2   :  { %v379_v21 = vpop.f32.mrf.mxu0 }
  0xe3   :  { %v138_v26 = vmax.f32 %v125_v22, 0.0  ;;  %v142_v29 = vpack.c.bf16 %v140_v25, %v140_v25 }
  0xe4   :  { %v127_v23 = vpop.f32.mrf.mxu0 }
  0xe5   :  { %v128_v24 = vadd.f32 %v334_v18, %v127_v23 }
  0xe7   :  { %v139_v27 = vmax.f32 %v128_v24, 0.0 }
  0xe9   :  { %v141_v28 = vpack.c.bf16 %v139_v27, %v138_v26 }
  0xeb   :  { %396 = vmatprep.mubr.bf16.mxu1 %v141_v28 }
  0xec   :  { %397 = vmatmul.mubr.bf16.vlgmr.msra.gmra.mxu1 %v142_v29 }
 0x1ac   :  { %v398_v31 = vpop.f32.mrf.mxu1 }
 0x1ad   :  { %v257_v32 = vadd.f32 %v398_v31, %v341_v30 }
 0x1ae   :  { %v248_v33 = vpop.f32.mrf.mxu1 }
 0x1af   :  { %v249_v34 = vadd.f32 %v341_v30, %v248_v33  ;;  %v264_v35 = vadd.f32 %v257_v32, %v41_v9 }
 0x1b0   :  { %v399_v36 = vpop.f32.mrf.mxu1 }
 0x1b1   :  { %v272_v37 = vsel %vm271_vm1, %v264_v35, 0.0  ;;  %v262_v38 = vadd.f32 %v249_v34, %v39_v3 }
 0x1b2   :  { %273 = vadd.xlane.f32.xlu1 %v272_v37  ;;  %v251_v39 = vpop.f32.mrf.mxu1 }
 0x1b3   :  { %v252_v40 = vadd.f32 %v341_v30, %v251_v39  ;;  %v265_v41 = vsel %vm83_vm0, %v262_v38, 0.0 }
 0x1b4   :  { %266 = vadd.xlane.f32.xlu0 %v265_v41 }
 0x1b5   :  { %v263_v42 = vadd.f32 %v252_v40, %v500_v4 }
 0x1b7   :  { %v268_v43 = vsel %vm83_vm0, %v263_v42, 0.0 }
 0x1b8   :  { %269 = vadd.xlane.f32.xlu0 %v268_v43 }
 0x23b   :  { %v274_v44 = vpop.xlane.xlu1 %273 }
 0x23c   :  { %v278_v45 = vmul.f32 0.015625, %v274_v44 }
 0x23d   :  { %v267_v46 = vpop.xlane.xlu0 %266 }
 0x23e   :  { %v276_v47 = vmul.f32 0.015625, %v267_v46  ;;  %v281_v48 = vsub.f32 %v264_v35, %v278_v45 }
 0x240   :  { %v279_v49 = vsub.f32 %v262_v38, %v276_v47  ;;  %v284_v55 = vmul.f32 %v281_v48, %v281_v48 }
 0x241   :  { %v270_v50 = vpop.xlane.xlu0 %269 }
 0x242   :  { %v277_v51 = vmul.f32 0.015625, %v270_v50  ;;  %v282_v52 = vmul.f32 %v279_v49, %v279_v49  ;;  %v291_v57 = vsel %vm271_vm1, %v284_v55, 0.0 }
 0x244   :  { %v280_v53 = vsub.f32 %v263_v42, %v277_v51  ;;  %v285_v54 = vsel %vm83_vm0, %v282_v52, 0.0 }
 0x245   :  { %286 = vadd.xlane.f32.xlu1 %v285_v54 }
 0x246   :  { %v283_v56 = vmul.f32 %v280_v53, %v280_v53 }
 0x248   :  { %v288_v58 = vsel %vm83_vm0, %v283_v56, 0.0 }
 0x249   :  { %292 = vadd.xlane.f32.xlu1 %v291_v57  ;;  %289 = vadd.xlane.f32.xlu0 %v288_v58 }
 0x2ce   :  { %v287_v59 = vpop.xlane.xlu1 %286 }
 0x2cf   :  { %v294_v60 = vmul.f32 0.015625, %v287_v59 }
 0x2d1   :  { %v297_v61 = vadd.f32 1e-05, %v294_v60 }
 0x2d2   :  { %v293_v62 = vpop.xlane.xlu1 %292  ;;  %v290_v63 = vpop.xlane.xlu0 %289 }
 0x2d3   :  { %413 = vrsqrt.f32 %v297_v61  ;;  %v296_v0 = vmul.f32 0.015625, %v293_v62  ;;  %v295_v1 = vmul.f32 0.015625, %v290_v63 }
 0x2d5   :  { %v299_v2 = vadd.f32 1e-05, %v296_v0  ;;  %v298_v3 = vadd.f32 1e-05, %v295_v1 }
 0x2d7   :  { %415 = vrsqrt.f32 %v299_v2 }
 0x2d8   :  { %417 = vrsqrt.f32 %v298_v3 }
 0x2e0   :  { %v414_v4 = vpop.eup %413 }
 0x2e1   :  { %v303_v6 = vmul.f32 %v414_v4, %v279_v49 }
 0x2e3   :  { %v313_v8 = vmul.f32 %v350_v5, %v303_v6 }
 0x2e4   :  { %v416_v9 = vpop.eup %415 }
 0x2e5   :  { %v418_v10 = vpop.eup %417  ;;  %v323_v11 = vadd.f32 %v351_v7, %v313_v8  ;;  %v305_v12 = vmul.f32 %v416_v9, %v281_v48 }
 0x2e6   :  { %v304_v13 = vmul.f32 %v418_v10, %v280_v53 }
 0x2e7   :  { %326 = vst.msk [vmem:[%s570_s7] sm:$0xff] %vm83_vm0, %v323_v11  ;;  %v315_v14 = vmul.f32 %v350_v5, %v305_v12 }
 0x2e8   :  { %v314_v15 = vmul.f32 %v350_v5, %v304_v13 }
 0x2e9   :  { %v325_v16 = vadd.f32 %v351_v7, %v315_v14 }
 0x2ea   :  { %v324_v17 = vadd.f32 %v351_v7, %v314_v15 }
 0x2eb   :  { %328 = vst.msk [vmem:[%s570_s7 + $0x10] sm:$0x3] %vm271_vm1, %v325_v16 }
 0x2ec   :  { %327 = vst.msk [vmem:[%s570_s7 + $0x8] sm:$0xff] %vm83_vm0, %v324_v17 }
 0x2ed   :  { %333 = vsyncpa [#allocation3], 1 }

// kernel: finetuned_sam2_forward.20
= control target key start
LH: loop header
LB: loop body
LE: loop exit
PB: predicated region body
PF: predicated region fallthrough
CT: control target
= control target key end

     0   :  { %19 = vsyncpa [#allocation3], 0  ;;  %s2327_s0 = inlined_call_operand.vmem [shape: bf16[2,9,64], index: 0, kind: input, shape index: {}]   ;;  %s2328_s1 = inlined_call_operand.vmem [shape: bf16[2,16,64], index: 1, kind: input, shape index: {}]   ;;  %s2329_s2 = inlined_call_operand.vmem [shape: bf16[2,16,64], index: 2, kind: input, shape index: {}]   ;;  %s2330_s3 = inlined_call_operand.vmem [shape: f32[2,9,64], index: 3, kind: input, shape index: {}]   ;;  %s2331_s4 = inlined_call_operand.vmem [shape: bf16[64,32], index: 4, kind: input, shape index: {}]   ;;  %s2332_s5 = inlined_call_operand.hbm [shape: f32[1,32], index: 5, kind: input, shape index: {}]   ;;  %s2333_s6 = inlined_call_operand.vmem [shape: bf16[64,32], index: 6, kind: input, shape index: {}]   ;;  %s2334_s7 = inlined_call_operand.hbm [shape: f32[1,32], index: 7, kind: input, shape index: {}]   ;;  %s2335_s8 = inlined_call_operand.vmem [shape: bf16[64,32], index: 8, kind: input, shape index: {}]   ;;  %s2336_s9 = inlined_call_operand.hbm [shape: f32[1,32], index: 9, kind: input, shape index: {}]   ;;  %s2337_s10 = inlined_call_operand.vmem [shape: bf16[32,64], index: 10, kind: input, shape index: {}]   ;;  %s2338_s11 = inlined_call_operand.hbm [shape: f32[1,64], index: 11, kind: input, shape index: {}]   ;;  %s2339_s12 = inlined_call_operand.hbm [shape: f32[1,64], index: 12, kind: input, shape index: {}]   ;;  %s2340_s13 = inlined_call_operand.hbm [shape: f32[1,64], index: 13, kind: input, shape index: {}]   ;;  %s2341_s14 = inlined_call_operand.vmem [shape: f32[2,9,64], index: 14, kind: output, shape index: {}]  }
   0x1   :  { %20 = vsyncpa [#allocation5], 0 }
   0x2   :  { %21 = vsyncpa [#allocation8], 0 }
   0x3   :  { %22 = vsyncpa [#allocation11], 0  ;;  %s2067_s29 = smov 0  }
   0x4 LB: > { %s1983_s30 = smov [#allocation4]   ;;  %s2073_s16 = sadd.s32 4294967295, %s1981_s29   ;;  %s1981_s29 = sphi %s2067_s29, %s28_s29  }
   0x5   : > { %s403_s15 = sshll.u32 %s1983_s30, 4  ;;  %p1519_p0 = scmp.ge.s32.totalorder %s1981_s29, 1  ;;  %s404_s15 = int_to_ptr.vmem [resolvable:$true] %s403_s15 }
   0x6   : > { %p373_p1 = scmp.lt.s32.totalorder %s1981_s29, 3  ;;  %p2342_p2 = scmp.eq.s32.totalorder %s2073_s16, 0 }
   0x7   : > { %s1984_s18 = smov [#allocation7]   ;;  %s1985_s20 = smov [#allocation2]  }
   0x8   : > { %p2078_p3 = pnand %p1519_p0, %p373_p1  ;;  %s431_s19 = sshll.u32 %s1984_s18, 4  ;;  %s2084_s19 = int_to_ptr.vmem [resolvable:$true] %s431_s19 }
   0x9   : > { %s389_s21 = sshll.u32 %s1985_s20, 4  ;;  %s1986_s23 = smov [#allocation6]   ;;  %s2092_s21 = int_to_ptr.vmem [resolvable:$true] %s389_s21 }
   0xa   : > { %p1718_p4 = pneg %p2078_p3  ;;  %s417_s24 = sshll.u32 %s1986_s23, 4  ;;  %s2094_s24 = int_to_ptr.vmem [resolvable:$true] %s417_s24 }
   0xb   : > { %s1814_s26 = scalar_lea.vmem %s404_s15, 16  ;;  %s1821_s27 = scalar_lea.vmem %s404_s15, 32 }
   0xc   : > { %p2088_p5 = pnand %p2342_p2, %p1718_p4  ;;  %p1815_p7 = scmp.ne.s32.totalorder %s404_s15, %s1814_s26 }
   0xd   : > { %p1822_p10 = scmp.lt.s32.totalorder %s404_s15, %s404_s15  ;;  %p1823_p11 = scmp.lt.s32.totalorder %s1821_s27, %s1814_s26 }
   0xe   : > { %p2098_p6 = pneg %p2088_p5 }
   0xf   : > { %p1824_p12 = por %p1823_p11, %p1822_p10 }
  0x10   : > { %p1817_p8 = pnand %p1815_p7, %p2098_p6 }
  0x12   : > { %p1818_p9 = pneg %p1817_p8 }
  0x14   : > { %p1825_p13 = pnand %p1824_p12, %p1818_p9 }
  0x16   : > { %1828 = shalt.err (!%p1825_p13)
}
  0x17   : > { %1724 = dma.hbm_to_vmem [thread:$0]  (!%p2088_p5), %s2334_s7, 16, %s404_s15, [#allocation5]  }
  0x18   : > { %s1840_s18 = scalar_lea.vmem %s2084_s19, 16  ;;  %s1847_s20 = scalar_lea.vmem %s2084_s19, 32 }
  0x19   : > { %p1841_p0 = scmp.ne.s32.totalorder %s2084_s19, %s1840_s18  ;;  %p1848_p7 = scmp.lt.s32.totalorder %s2084_s19, %s2084_s19 }
  0x1a   : > { %p1849_p8 = scmp.lt.s32.totalorder %s1847_s20, %s1840_s18 }
  0x1b   : > { %p1843_p1 = pnand %p1841_p0, %p2098_p6 }
  0x1c   : > { %p1850_p9 = por %p1849_p8, %p1848_p7 }
  0x1d   : > { %p1844_p4 = pneg %p1843_p1 }
  0x1f   : > { %p1851_p10 = pnand %p1850_p9, %p1844_p4 }
  0x21   : > { %1854 = shalt.err (!%p1851_p10)
}
  0x22   : > { %1730 = dma.hbm_to_vmem [thread:$0]  (!%p2088_p5), %s2338_s11, 16, %s2084_s19, [#allocation8]  }
  0x23   : > { %s1866_s15 = scalar_lea.vmem %s2092_s21, 16  ;;  %s1873_s27 = scalar_lea.vmem %s2092_s21, 32 }
  0x24   : > { %p1867_p11 = scmp.ne.s32.totalorder %s2092_s21, %s1866_s15  ;;  %p1874_p0 = scmp.lt.s32.totalorder %s2092_s21, %s2092_s21 }
  0x25   : > { %p1875_p1 = scmp.lt.s32.totalorder %s1873_s27, %s1866_s15 }
  0x26   : > { %p1869_p12 = pnand %p1867_p11, %p2098_p6 }
  0x27   : > { %p1876_p4 = por %p1875_p1, %p1874_p0 }
  0x28   : > { %p1870_p13 = pneg %p1869_p12 }
  0x2a   : > { %p1877_p7 = pnand %p1876_p4, %p1870_p13 }
  0x2c   : > { %1880 = shalt.err (!%p1877_p7)
}
  0x2d   : > { %1721 = dma.hbm_to_vmem [thread:$0]  (!%p2088_p5), %s2332_s5, 16, %s2092_s21, [#allocation3]  }
  0x2e   : > { %s1892_s19 = scalar_lea.vmem %s2094_s24, 16  ;;  %s1899_s18 = scalar_lea.vmem %s2094_s24, 32 }
  0x2f   : > { %p1893_p8 = scmp.ne.s32.totalorder %s2094_s24, %s1892_s19  ;;  %p1900_p11 = scmp.lt.s32.totalorder %s2094_s24, %s2094_s24 }
  0x30   : > { %p1901_p12 = scmp.lt.s32.totalorder %s1899_s18, %s1892_s19 }
  0x31   : > { %p1895_p9 = pnand %p1893_p8, %p2098_p6 }
  0x32   : > { %p1902_p13 = por %p1901_p12, %p1900_p11 }
  0x33   : > { %p1896_p10 = pneg %p1895_p9 }
  0x35   : > { %p1903_p0 = pnand %p1902_p13, %p1896_p10 }
  0x37   : > { %1906 = shalt.err (!%p1903_p0)
}
  0x38   : > { %1727 = dma.hbm_to_vmem [thread:$0]  (!%p2088_p5), %s2336_s9, 16, %s2094_s24, [#allocation5]  }
  0x39   : > { %s1987_s21 = smov [#allocation9]   ;;  %s1988_s15 = smov [#allocation10]  }
  0x3a   : > { %s442_s26 = sshll.u32 %s1987_s21, 4  ;;  %s453_s27 = sshll.u32 %s1988_s15, 4  ;;  %s443_s26 = int_to_ptr.vmem [resolvable:$true] %s442_s26  ;;  %s454_s27 = int_to_ptr.vmem [resolvable:$true] %s453_s27 }
  0x3b   : > { %s1918_s28 = scalar_lea.vmem %s443_s26, 16  ;;  %s1925_s30 = scalar_lea.vmem %s443_s26, 32 }
  0x3c   : > { %p1919_p1 = scmp.ne.s32.totalorder %s443_s26, %s1918_s28  ;;  %p1926_p8 = scmp.lt.s32.totalorder %s443_s26, %s443_s26 }
  0x3d   : > { %p1927_p9 = scmp.lt.s32.totalorder %s1925_s30, %s1918_s28 }
  0x3e   : > { %p1921_p4 = pnand %p1919_p1, %p2098_p6 }
  0x3f   : > { %p1928_p10 = por %p1927_p9, %p1926_p8 }
  0x40   : > { %p1922_p7 = pneg %p1921_p4 }
  0x42   : > { %p1929_p11 = pnand %p1928_p10, %p1922_p7 }
  0x44   : > { %1932 = shalt.err (!%p1929_p11)
}
  0x45   : > { %1733 = dma.hbm_to_vmem [thread:$0]  (!%p2088_p5), %s2339_s12, 16, %s443_s26, [#allocation8]  }
  0x46   : > { %s1944_s18 = scalar_lea.vmem %s454_s27, 16  ;;  %s1951_s20 = scalar_lea.vmem %s454_s27, 32 }
  0x47   : > { %p1945_p12 = scmp.ne.s32.totalorder %s454_s27, %s1944_s18  ;;  %p1952_p1 = scmp.lt.s32.totalorder %s454_s27, %s454_s27 }
  0x48   : > { %p1953_p4 = scmp.lt.s32.totalorder %s1951_s20, %s1944_s18 }
  0x49   : > { %p1947_p13 = pnand %p1945_p12, %p2098_p6 }
  0x4a   : > { %p1954_p2 = por %p1953_p4, %p1952_p1 }
  0x4b   : > { %p1948_p0 = pneg %p1947_p13 }
  0x4d   : > { %p1955_p8 = pnand %p1954_p2, %p1948_p0 }
  0x4f   : > { %1958 = shalt.err (!%p1955_p8)
}
  0x50   : > { %1736 = dma.hbm_to_vmem [thread:$0]  (!%p2088_p5), %s2340_s13, 16, %s454_s27, [#allocation11]  }
  0x51   : > { %498 = sbr.rel (%p2078_p3) target bundleno = 2073 (0x819), region = 76  ;;  %p2346_p7 = scmp.eq.s32.totalorder (!%p2078_p3), %s2073_s16, 0 }
  0x56   : > { %1964 = dma.done.wait (%p2346_p7), [#allocation3], 16   ;;  %p2347_p6 = pmov %p2346_p7 }
  0x58   : > { %1966 = vsyncadd (%p2347_p6), [#allocation3], 4294967280  ;;  %p2348_p9 = pmov %p2347_p6 }
  0x59   : > { %p2349_p2 = pmov %p2347_p6 }
  0x5a   : > { %1968 = dma.done.wait (%p2348_p9), [#allocation5], 32  }
  0x5b   : > { %1970 = vsyncadd (%p2349_p2), [#allocation5], 4294967264  ;;  %p2350_p10 = pmov %p2349_p2 }
  0x5c   : > { %p2351_p5 = pmov %p2349_p2 }
  0x5d   : > { %1972 = dma.done.wait (%p2350_p10), [#allocation8], 32  }
  0x5e   : > { %1974 = vsyncadd (%p2351_p5), [#allocation8], 4294967264  ;;  %p2352_p3 = pmov %p2349_p2 }
  0x5f   : > { %p2353_p11 = pmov %p2349_p2 }
  0x60   : > { %1976 = dma.done.wait (%p2352_p3), [#allocation11], 16  }
  0x61   : > { %1978 = vsyncadd (%p2353_p11), [#allocation11], 4294967280  ;;  %v1989_v0 = vmov 0.0   ;;  %vm1990_vm0 = vmmov 0   ;;  %p579_p12 = scmp.lt.s32.totalorder %s2073_s16, 1  ;;  %v1766_v1 = vld [vmem:[%s2333_s6 + $0x18] sm:$0xff]  }
  0x62   : > { %1632 = vmatprep.subr.bf16.mxu1 %v1989_v0  ;;  %1620 = vmatprep.subr.bf16.mxu0 %v1989_v0  ;;  %v1767_v2 = vld [vmem:[%s2331_s4 + $0x18] sm:$0xff]   ;;  %v1768_v3 = vld [vmem:[%s2333_s6 + $0x10] sm:$0xff]   ;;  %v1770_v5 = vld [vmem:[%s2333_s6 + $0x8] sm:$0xff]   ;;  %vm655_vm1 = vcmask 523264   ;;  %vm876_vm2 = vcmask 130048   ;;  %vm969_vm3 = vcmask 122880  }
  0x63   : > { %1640 = vmatprep.mubr.msk.bf16.mxu1 %vm1990_vm0, %v1989_v0  ;;  %1628 = vmatprep.mubr.msk.bf16.mxu0 %vm1990_vm0, %v1989_v0  ;;  %s2355_s16 = smov (!%p579_p12, %s2073_s16), 1  ;;  %v1769_v4 = vld [vmem:[%s2331_s4 + $0x10] sm:$0xff]   ;;  %v1771_v6 = vld [vmem:[%s2331_s4 + $0x8] sm:$0xff]   ;;  %v1772_v7 = vld [vmem:[%s2333_s6] sm:$0xff]   ;;  %vm1321_vm4 = vcmask 516096  }
  0x64   : > { %1633 = vmatpush3.bf16.msra.mxu1 %v1766_v1  ;;  %1621 = vmatpush3.bf16.msra.mxu0 %v1767_v2  ;;  %s2205_s19 = sshll.u32 %s2355_s16, 3  ;;  %v1773_v8 = vld [vmem:[%s2331_s4] sm:$0xff]   ;;  %v1776_v11 = vld [vmem:[%s2335_s8 + $0x18] sm:$0xff]   ;;  %v1777_v12 = vld [vmem:[%s2335_s8 + $0x10] sm:$0xff]   ;;  %s1587_s23 = sshll.u32 %s2355_s16, 4 }
  0x65   : > { %1634 = vmatprep.subr.bf16.mxu1 %v1989_v0  ;;  %1622 = vmatprep.subr.bf16.mxu0 %v1989_v0  ;;  %s588_s22 = scalar_lea.vmem %s2328_s1, %s2205_s19  ;;  %s583_s15 = scalar_lea.vmem %s2327_s0, %s2205_s19  ;;  %v1778_v13 = vld [vmem:[%s2335_s8 + $0x8] sm:$0xff]   ;;  %v1551_v14 = vld [vmem:[#allocation4] ss:$0 sm:$0xff]  ;;  %v1544_v15 = vld [vmem:[#allocation2] ss:$0 sm:$0xff] }
  0x66   : > { %v1774_v9 = vld [vmem:[%s588_s22] sm:$0xff]   ;;  %s593_s17 = scalar_lea.vmem %s2329_s2, %s2205_s19  ;;  %s1991_s19 = smov 112  }
  0x67   : > { %v1775_v10 = vld [vmem:[%s583_s15] sm:$0x1f]   ;;  %s598_s22 = scalar_lea.vmem %s2330_s3, %s1587_s23  ;;  %s603_s15 = scalar_lea.vmem %s2341_s14, %s1587_s23 }
  0x68   : > { %1635 = vmatpush3.bf16.msra.mxu1 %v1768_v3  ;;  %1623 = vmatpush3.bf16.msra.mxu0 %v1769_v4  ;;  %v1779_v16 = vld [vmem:[%s2335_s8] sm:$0xff]  }
  0x69   : > { %1636 = vmatprep.subr.bf16.mxu1 %v1989_v0  ;;  %1624 = vmatprep.subr.bf16.mxu0 %v1989_v0  ;;  %v1780_v22 = vld [vmem:[%s593_s17] sm:$0xff]  }
  0x6a   : > { %v1558_v38 = vld [vmem:[#allocation6] ss:$0 sm:$0xff] }
  0x6c   : > { %1637 = vmatpush3.bf16.msra.mxu1 %v1770_v5  ;;  %1625 = vmatpush3.bf16.msra.mxu0 %v1771_v6 }
  0x6d   : > { %1638 = vmatprep.subr.bf16.mxu1 %v1989_v0  ;;  %1626 = vmatprep.subr.bf16.mxu0 %v1989_v0 }
  0x70   : > { %1639 = vmatpush3.bf16.msra.mxu1 %v1772_v7  ;;  %1627 = vmatpush3.bf16.msra.mxu0 %v1773_v8 }
  0x71   : > { %1644 = vmatprep.subr.bf16.mxu0 %v1989_v0 }
  0x73   : > { %1641 = vmatmul.mubr.msk.bf16.vlgmr.msra.gmra.mxu1 %vm655_vm1, %v1774_v9  ;;  %1629 = vmatmul.mubr.msk.bf16.vlgmr.msra.gmra.mxu0 %vm655_vm1, %v1775_v10 }
  0x74   : > { %1652 = vmatprep.mubr.msk.bf16.mxu0 %vm1990_vm0, %v1989_v0  ;;  %1645 = vmatpush3.bf16.msra.mxu0 %v1776_v11 }
  0x75   : > { %1646 = vmatprep.subr.bf16.mxu0 %v1989_v0 }
  0x78   : > { %1647 = vmatpush3.bf16.msra.mxu0 %v1777_v12 }
  0x79   : > { %1648 = vmatprep.subr.bf16.mxu0 %v1989_v0 }
  0x7c   : > { %1649 = vmatpush3.bf16.msra.mxu0 %v1778_v13 }
  0x7d   : > { %1650 = vmatprep.subr.bf16.mxu0 %v1989_v0 }
  0x80   : > { %1651 = vmatpush3.bf16.msra.mxu0 %v1779_v16 }
  0x81   : > { %1676 = vmatprep.subr.bf16.mxu0 %v1989_v0 }
  0x83   : > { %1653 = vmatmul.mubr.msk.bf16.vlgmr.msra.gmra.mxu0 %vm655_vm1, %v1780_v22 }
  0x84   : > { %1678 = vmatprep.mubr.msk.bf16.mxu0 %vm1990_vm0, %v1989_v0 }
 0x133   : > { %v781_v17 = vpop.f32.mrf.mxu1  ;;  %v693_v19 = vpop.f32.mrf.mxu0 }
 0x134   : > { %v782_v18 = vadd.f32 %v1551_v14, %v781_v17  ;;  %v694_v21 = vadd.f32 %v1544_v15, %v693_v19 }
 0x135   : > { %v1642_v20 = vpop.f32.mrf.mxu1  ;;  %v1630_v23 = vpop.f32.mrf.mxu0 }
 0x136   : > { %1042 = vrot.lane.b32.xlu1 %v782_v18, %s1991_s19  ;;  %1660 = vmatprep.mubr.msk.f32.mxu1 %vm876_vm2, %v694_v21 }
 0x137   : > { %v784_v24 = vpop.f32.mrf.mxu1  ;;  %v696_v26 = vpop.f32.mrf.mxu0 }
 0x138   : > { %v785_v25 = vadd.f32 %v1551_v14, %v784_v24  ;;  %v697_v29 = vadd.f32 %v1544_v15, %v696_v26 }
 0x139   : > { %v1643_v27 = vpop.f32.mrf.mxu1  ;;  %v1631_v28 = vpop.f32.mrf.mxu0 }
 0x13a   : > { %1656 = vmatprep.subr.msk.mxu1 %vm876_vm2, %v785_v25 }
 0x13b   : > { %1657 = vmatpush3.xpose.msk.msra.mxu1 %vm876_vm2, %v785_v25 }
 0x13c   : > { %1658 = vmatprep.subr.msk.mxu1 %vm876_vm2, %v782_v18 }
 0x13f   : > { %1659 = vmatpush3.xpose.msk.msra.mxu1 %vm876_vm2, %v782_v18 }
 0x140   : > { %1663 = vmatprep.subr.bf16.mxu1 %v1989_v0 }
 0x142   : > { %1661 = vmatmul.mubr.msk.f32.vlgmr.msra.gmra.mxu1 %vm876_vm2, %v697_v29 }
 0x143   : > { %1665 = vmatprep.mubr.msk.bf16.mxu1 %vm1990_vm0, %v1989_v0  ;;  %v869_v30 = vpop.f32.mrf.mxu0 }
 0x144   : > { %v870_v39 = vadd.f32 %v1558_v38, %v869_v30  ;;  %v1781_v30 = vld [vmem:[%s2337_s10] sm:$0xff]  }
 0x145   : > { %v1654_v31 = vpop.f32.mrf.mxu0 }
 0x147   : > { %v872_v40 = vpop.f32.mrf.mxu0 }
 0x148   : > { %v873_v41 = vadd.f32 %v1558_v38, %v872_v40 }
 0x149   : > { %v1655_v42 = vpop.f32.mrf.mxu0 }
 0x14a   : > { %v2271_v43 = vpack.c.bf16 %v873_v41, %v870_v39  ;;  %v1305_v42 = vld [vmem:[%s598_s22] sm:$0xff] }
 0x14c   : > { %1664 = vmatpush3.bf16.msra.mxu1 %v2271_v43 }
 0x1a8   : > { %v1043_v55 = vpop.permute.xlu1 %1042 }
 0x202   : > { %v1662_v32 = vpop.f32.mrf.mxu1 }
 0x203   : > { %v965_v35 = vmul.f32 0.25, %v1662_v32  ;;  %v1782_v32 = vld [vmem:[%s2337_s10 + $0x8] sm:$0xff]  }
 0x204   : > { %v955_v33 = vpop.f32.mrf.mxu1 }
 0x205   : > { %v964_v34 = vmul.f32 0.25, %v955_v33  ;;  %v970_v37 = vsel %vm969_vm3, %v965_v35, -inf }
 0x207   : > { %v966_v36 = vsel %vm876_vm2, %v964_v34, -inf }
 0x208   : > { %967 = vmax.xlane.f32.xlu0 %v966_v36 }
 0x20c   : > { %971 = vmax.xlane.f32.xlu0 %v970_v37 }
 0x222   : > { %1044 = vrot.lane.b32.xlu0 %v785_v25, %s1991_s19 }
 0x291   : > { %v968_v44 = vpop.xlane.xlu0 %967 }
 0x292   : > { %v973_v45 = vsub.f32 %v964_v34, %v968_v44 }
 0x294   : > { %v975_v48 = vmul.f32 1.442695, %v973_v45  ;;  %v1579_v45 = vld [vmem:[#allocation7] ss:$0 sm:$0xff] }
 0x295   : > { %v972_v46 = vpop.xlane.xlu0 %971 }
 0x296   : > { %v974_v47 = vsub.f32 %v965_v35, %v972_v46 }
 0x298   : > { %v977_v49 = vmul.f32 1.442695, %v974_v47 }
 0x299   : > { %v1045_v50 = vpop.permute.xlu0 %1044 }
 0x29a   : > { %1783 = vpow2.f32 %v977_v49  ;;  %1669 = vmatprep.subr.msk.mxu1 %vm876_vm2, %v1045_v50 }
 0x29b   : > { %1785 = vpow2.f32 %v975_v48  ;;  %v1306_v48 = vld [vmem:[%s598_s22 + $0x8] sm:$0x1] }
 0x2a7   : > { %v1784_v51 = vpop.eup %1783 }
 0x2a8   : > { %v982_v52 = vsel %vm969_vm3, %v1784_v51, 0.0  ;;  %v1786_v53 = vpop.eup %1785 }
 0x2a9   : > { %983 = vadd.xlane.f32.xlu1 %v982_v52  ;;  %v979_v54 = vsel %vm876_vm2, %v1786_v53, 0.0 }
 0x2ad   : > { %980 = vadd.xlane.f32.xlu1 %v979_v54 }
 0x2be   : > { %1038 = vrot.lane.b32.xlu1 %v694_v21, %s1991_s19 }
 0x2c2   : > { %1040 = vrot.lane.b32.xlu1 %v697_v29, %s1991_s19 }
 0x332   : > { %v984_v56 = vpop.xlane.xlu1 %983 }
 0x333   : > { %1787 = vrcp.f32 %v984_v56 }
 0x336   : > { %v981_v57 = vpop.xlane.xlu1 %980 }
 0x337   : > { %1789 = vrcp.f32 %v981_v57 }
 0x33a   : > { %v1039_v63 = vpop.permute.xlu1 %1038 }
 0x33e   : > { %v1041_v1 = vpop.permute.xlu1 %1040 }
 0x340   : > { %v1788_v58 = vpop.eup %1787 }
 0x341   : > { %v988_v61 = vmul.f32 %v1788_v58, %v1784_v51 }
 0x344   : > { %v1790_v59 = vpop.eup %1789 }
 0x345   : > { %v986_v60 = vmul.f32 %v1790_v59, %v1786_v53 }
 0x347   : > { %v989_v62 = vpack.c.bf16 %v988_v61, %v986_v60 }
 0x349   : > { %1666 = vmatmul.mubr.msk.bf16.vlgmr.msra.gmra.mxu1 %vm876_vm2, %v989_v62 }
 0x34a   : > { %1670 = vmatpush3.xpose.msk.msra.mxu1 %vm876_vm2, %v1045_v50  ;;  %1673 = vmatprep.mubr.msk.f32.mxu1 %vm876_vm2, %v1039_v63 }
 0x34b   : > { %1671 = vmatprep.subr.msk.mxu1 %vm876_vm2, %v1043_v55 }
 0x34e   : > { %1672 = vmatpush3.xpose.msk.msra.mxu1 %vm876_vm2, %v1043_v55 }
 0x34f   : > { %1682 = vmatprep.subr.bf16.mxu1 %v1989_v0 }
 0x351   : > { %1674 = vmatmul.mubr.msk.f32.vlgmr.msra.gmra.mxu1 %vm876_vm2, %v1041_v1 }
 0x352   : > { %1684 = vmatprep.mubr.msk.bf16.mxu1 %vm1990_vm0, %v1989_v0  ;;  %1683 = vmatpush3.bf16.msra.mxu1 %v1782_v32 }
 0x409   : > { %v1028_v2 = vpop.f32.mrf.mxu1 }
 0x40b   : > { %v1667_v3 = vpop.f32.mrf.mxu1 }
 0x40d   : > { %v1031_v4 = vpop.f32.mrf.mxu1 }
 0x40e   : > { %v1035_v5 = vpack.c.bf16 %v1031_v4, %v1028_v2 }
 0x40f   : > { %v1668_v6 = vpop.f32.mrf.mxu1 }
 0x411   : > { %v1675_v7 = vpop.f32.mrf.mxu1 }
 0x412   : > { %v1130_v8 = vmul.f32 0.25, %v1675_v7 }
 0x413   : > { %v1120_v9 = vpop.f32.mrf.mxu1 }
 0x414   : > { %v1129_v10 = vmul.f32 0.25, %v1120_v9  ;;  %v1134_v11 = vsel %vm969_vm3, %v1130_v8, -inf }
 0x415   : > { %1135 = vmax.xlane.f32.xlu1 %v1134_v11 }
 0x416   : > { %v1131_v12 = vsel %vm876_vm2, %v1129_v10, -inf }
 0x417   : > { %1132 = vmax.xlane.f32.xlu0 %v1131_v12  ;;  %v1581_v12 = vld [vmem:[#allocation10] ss:$0 sm:$0xff] }
 0x49e   : > { %v1136_v13 = vpop.xlane.xlu1 %1135 }
 0x49f   : > { %v1138_v14 = vsub.f32 %v1130_v8, %v1136_v13 }
 0x4a0   : > { %v1133_v15 = vpop.xlane.xlu0 %1132 }
 0x4a1   : > { %v1141_v16 = vmul.f32 1.442695, %v1138_v14  ;;  %v1137_v17 = vsub.f32 %v1129_v10, %v1133_v15  ;;  %v1580_v10 = vld [vmem:[#allocation9] ss:$0 sm:$0xff] }
 0x4a3   : > { %1791 = vpow2.f32 %v1141_v16  ;;  %v1139_v18 = vmul.f32 1.442695, %v1137_v17 }
 0x4a5   : > { %1793 = vpow2.f32 %v1139_v18 }
 0x4b0   : > { %v1792_v19 = vpop.eup %1791 }
 0x4b1   : > { %v1146_v20 = vsel %vm969_vm3, %v1792_v19, 0.0 }
 0x4b2   : > { %v1794_v21 = vpop.eup %1793  ;;  %1147 = vadd.xlane.f32.xlu0 %v1146_v20 }
 0x4b3   : > { %v1143_v22 = vsel %vm876_vm2, %v1794_v21, 0.0 }
 0x4b6   : > { %1144 = vadd.xlane.f32.xlu0 %v1143_v22 }
 0x4cc   : > { %1155 = vrot.lane.b32.xlu0 %v2271_v43, %s1991_s19 }
 0x53b   : > { %v1148_v23 = vpop.xlane.xlu0 %1147 }
 0x53c   : > { %1795 = vrcp.f32 %v1148_v23 }
 0x53f   : > { %v1145_v24 = vpop.xlane.xlu0 %1144 }
 0x540   : > { %1797 = vrcp.f32 %v1145_v24 }
 0x543   : > { %v1156_v25 = vpop.permute.xlu0 %1155 }
 0x544   : > { %1677 = vmatpush3.bf16.msra.mxu0 %v1156_v25 }
 0x545   : > { %1688 = vmatprep.subr.bf16.mxu0 %v1989_v0 }
 0x549   : > { %v1796_v26 = vpop.eup %1795 }
 0x54a   : > { %v1152_v29 = vmul.f32 %v1796_v26, %v1792_v19 }
 0x54d   : > { %v1798_v27 = vpop.eup %1797 }
 0x54e   : > { %v1150_v28 = vmul.f32 %v1798_v27, %v1794_v21 }
 0x550   : > { %v1153_v31 = vpack.c.bf16 %v1152_v29, %v1150_v28 }
 0x552   : > { %1679 = vmatmul.mubr.msk.bf16.vlgmr.msra.gmra.mxu0 %vm876_vm2, %v1153_v31 }
 0x553   : > { %1689 = vmatpush3.bf16.msra.mxu0 %v1781_v30  ;;  %1690 = vmatprep.mubr.msk.bf16.mxu0 %vm1990_vm0, %v1989_v0 }
 0x55a   : > { %1691 = vmatmul.mubr.msk.bf16.vlgmr.msra.gmra.mxu0 %vm876_vm2, %v1035_v5 }
 0x612   : > { %v1195_v33 = vpop.f32.mrf.mxu0 }
 0x614   : > { %v1680_v34 = vpop.f32.mrf.mxu0 }
 0x616   : > { %v1198_v35 = vpop.f32.mrf.mxu0 }
 0x617   : > { %v1202_v36 = vpack.c.bf16 %v1198_v35, %v1195_v33 }
 0x618   : > { %v1681_v37 = vpop.f32.mrf.mxu0 }
 0x619   : > { %1685 = vmatmul.mubr.msk.bf16.vlgmr.msra.gmra.mxu1 %vm876_vm2, %v1202_v36 }
 0x61a   : > { %v1298_v38 = vpop.f32.mrf.mxu0 }
 0x61c   : > { %v1692_v39 = vpop.f32.mrf.mxu0 }
 0x61e   : > { %v1301_v40 = vpop.f32.mrf.mxu0 }
 0x620   : > { %v1693_v41 = vpop.f32.mrf.mxu0 }
 0x6d9   : > { %v1248_v0 = vpop.f32.mrf.mxu1 }
 0x6da   : > { %v1299_v43 = vadd.f32 %v1298_v38, %v1248_v0 }
 0x6db   : > { %v1686_v44 = vpop.f32.mrf.mxu1 }
 0x6dc   : > { %v1307_v46 = vadd.f32 %v1305_v42, %v1299_v43 }
 0x6dd   : > { %v1251_v47 = vpop.f32.mrf.mxu1 }
 0x6de   : > { %v1302_v49 = vadd.f32 %v1301_v40, %v1251_v47  ;;  %v1316_v50 = vadd.f32 %v1579_v45, %v1307_v46 }
 0x6df   : > { %v1687_v51 = vpop.f32.mrf.mxu1 }
 0x6e0   : > { %v1308_v52 = vadd.f32 %v1306_v48, %v1302_v49  ;;  %v1318_v53 = vsel %vm655_vm1, %v1316_v50, 0.0 }
 0x6e1   : > { %1319 = vadd.xlane.f32.xlu1 %v1318_v53 }
 0x6e2   : > { %v1317_v54 = vadd.f32 %v1579_v45, %v1308_v52 }
 0x6e4   : > { %v1322_v55 = vsel %vm1321_vm4, %v1317_v54, 0.0 }
 0x6e5   : > { %1323 = vadd.xlane.f32.xlu1 %v1322_v55 }
 0x76a   : > { %v1320_v56 = vpop.xlane.xlu1 %1319 }
 0x76b   : > { %v1326_v57 = vmul.f32 0.015625, %v1320_v56 }
 0x76d   : > { %v1328_v58 = vsub.f32 %v1316_v50, %v1326_v57 }
 0x76e   : > { %v1324_v59 = vpop.xlane.xlu1 %1323 }
 0x76f   : > { %v1327_v60 = vmul.f32 0.015625, %v1324_v59  ;;  %v1330_v61 = vmul.f32 %v1328_v58, %v1328_v58 }
 0x771   : > { %v1329_v62 = vsub.f32 %v1317_v54, %v1327_v60  ;;  %v1332_v63 = vsel %vm655_vm1, %v1330_v61, 0.0 }
 0x772   : > { %1333 = vadd.xlane.f32.xlu1 %v1332_v63 }
 0x773   : > { %v1331_v1 = vmul.f32 %v1329_v62, %v1329_v62 }
 0x775   : > { %v1335_v2 = vsel %vm1321_vm4, %v1331_v1, 0.0 }
 0x776   : > { %1336 = vadd.xlane.f32.xlu1 %v1335_v2 }
 0x7fb   : > { %v1334_v3 = vpop.xlane.xlu1 %1333 }
 0x7fc   : > { %v1338_v4 = vmul.f32 0.015625, %v1334_v3 }
 0x7fe   : > { %v1340_v5 = vadd.f32 1e-05, %v1338_v4 }
 0x7ff   : > { %v1337_v6 = vpop.xlane.xlu1 %1336 }
 0x800   : > { %1799 = vrsqrt.f32 %v1340_v5  ;;  %v1339_v7 = vmul.f32 0.015625, %v1337_v6 }
 0x802   : > { %v1341_v8 = vadd.f32 1e-05, %v1339_v7 }
 0x804   : > { %1801 = vrsqrt.f32 %v1341_v8 }
 0x80d   : > { %v1800_v9 = vpop.eup %1799 }
 0x80e   : > { %v1344_v11 = vmul.f32 %v1800_v9, %v1328_v58 }
 0x810   : > { %v1353_v13 = vmul.f32 %v1580_v10, %v1344_v11 }
 0x811   : > { %v1802_v14 = vpop.eup %1801 }
 0x812   : > { %v1362_v15 = vadd.f32 %v1581_v12, %v1353_v13  ;;  %v1345_v16 = vmul.f32 %v1802_v14, %v1329_v62 }
 0x814   : > { %1364 = vst.msk [vmem:[%s603_s15] sm:$0xff] %vm655_vm1, %v1362_v15  ;;  %v1354_v17 = vmul.f32 %v1580_v10, %v1345_v16 }
 0x816   : > { %v1363_v18 = vadd.f32 %v1581_v12, %v1354_v17 }
 0x818   : > { %1365 = vst.msk [vmem:[%s603_s15 + $0x8] sm:$0x1] %vm1321_vm4, %v1363_v18 }
 0x819 PF: > { %s28_s29 = sadd.s32 1, %s1981_s29  }
 0x81a   : > { %p25_p13 = scmp.ge.s32.totalorder %s28_s29, 4  }
 0x81c   :  { %27 = sbr.rel (!%p25_p13) target bundleno = 4 (0x4), region = 140 }
 0x821   :  { %1387 = vsyncpa [#allocation3], 1 }
 0x822   :  { %1389 = vsyncpa [#allocation3 + $0x1], 1 }
 0x823   :  { %1390 = vsyncpa [#allocation5], 1 }
 0x824   :  { %1391 = vsyncpa [#allocation8], 1 }
 0x825   :  { %1392 = vsyncpa [#allocation11], 1 }

// kernel: finetuned_sam2_forward.25
= control target key start
LH: loop header
LB: loop body
LE: loop exit
PB: predicated region body
PF: predicated region fallthrough
CT: control target
= control target key end

     0   :  { %vm71_vm0 = vcmask 523264   ;;  %vm259_vm1 = vcmask 517120   ;;  %s530_s1 = inlined_call_operand.vmem [shape: bf16[64,128], index: 1, kind: input, shape index: {}]   ;;  %s531_s0 = inlined_call_operand.vmem [shape: f32[18,64], index: 0, kind: input, shape index: {}]   ;;  %s532_s3 = inlined_call_operand.vmem [shape: bf16[128,64], index: 3, kind: input, shape index: {}]   ;;  %s533_s2 = inlined_call_operand.vmem [shape: f32[1,128], index: 2, kind: input, shape index: {}]   ;;  %s534_s4 = inlined_call_operand.vmem [shape: f32[1,64], index: 4, kind: input, shape index: {}]   ;;  %s535_s5 = inlined_call_operand.vmem [shape: f32[1,64], index: 5, kind: input, shape index: {}]   ;;  %s536_s6 = inlined_call_operand.vmem [shape: f32[1,64], index: 6, kind: input, shape index: {}]   ;;  %s537_s7 = inlined_call_operand.vmem [shape: f32[18,64], index: 7, kind: output, shape index: {}]  }
   0x1   :  { %v387_v0 = vld [vmem:[%s530_s1 + $0x18] sm:$0xff]   ;;  %v388_v1 = vld [vmem:[%s530_s1 + $0x10] sm:$0xff]   ;;  %v389_v2 = vld [vmem:[%s530_s1 + $0x8] sm:$0xff]  }
   0x2   :  { %355 = vmatprep.subr.bf16.mxu0 %v387_v0  ;;  %v457_v3 = vld [vmem:[%s531_s0] sm:$0xff]  ;;  %v462_v4 = vld [vmem:[%s531_s0 + $0x8] sm:$0xff]  ;;  %v391_v6 = vld [vmem:[%s532_s3 + $0x38] sm:$0xff]  }
   0x3   :  { %356 = vmatpush3.bf16.msra.mxu0 %v387_v0  ;;  %v30_v5 = vpack.c.bf16 %v462_v4, %v457_v3  ;;  %v392_v7 = vld [vmem:[%s532_s3 + $0x30] sm:$0xff]   ;;  %v390_v8 = vld [vmem:[%s530_s1] sm:$0xff]   ;;  %367 = vmatprep.subr.bf16.mxu1 %v391_v6  ;;  %v393_v10 = vld [vmem:[%s532_s3 + $0x28] sm:$0xff]  }
   0x4   :  { %357 = vmatprep.subr.bf16.mxu0 %v388_v1  ;;  %v29_v9 = vld [vmem:[%s531_s0 + $0x10] sm:$0x3]  ;;  %368 = vmatpush3.bf16.msra.mxu1 %v391_v6  ;;  %v394_v12 = vld [vmem:[%s532_s3 + $0x20] sm:$0xff]   ;;  %v395_v13 = vld [vmem:[%s532_s3 + $0x18] sm:$0xff]  }
   0x5   :  { %363 = vmatprep.mubr.msk.bf16.mxu0 %vm71_vm0, %v30_v5  ;;  %369 = vmatprep.subr.bf16.mxu1 %v392_v7  ;;  %v31_v11 = vpack.c.bf16 %v29_v9, %v29_v9  ;;  %v396_v14 = vld [vmem:[%s532_s3 + $0x10] sm:$0xff]   ;;  %v397_v15 = vld [vmem:[%s532_s3 + $0x8] sm:$0xff]   ;;  %v398_v16 = vld [vmem:[%s532_s3] sm:$0xff]  }
   0x6   :  { %v321_v18 = vld [vmem:[%s533_s2] ss:$0 sm:$0xff] }
   0x7   :  { %358 = vmatpush3.bf16.msra.mxu0 %v388_v1  ;;  %v328_v30 = vld [vmem:[%s534_s4] ss:$0 sm:$0xff] }
   0x8   :  { %359 = vmatprep.subr.bf16.mxu0 %v389_v2  ;;  %370 = vmatpush3.bf16.msra.mxu1 %v392_v7  ;;  %v337_v5 = vld [vmem:[%s535_s5] ss:$0 sm:$0xff] }
   0x9   :  { %371 = vmatprep.subr.bf16.mxu1 %v393_v10  ;;  %v338_v7 = vld [vmem:[%s536_s6] ss:$0 sm:$0xff] }
   0xb   :  { %360 = vmatpush3.bf16.msra.mxu0 %v389_v2 }
   0xc   :  { %361 = vmatprep.subr.bf16.mxu0 %v390_v8  ;;  %372 = vmatpush3.bf16.msra.mxu1 %v393_v10 }
   0xd   :  { %373 = vmatprep.subr.bf16.mxu1 %v394_v12 }
   0xf   :  { %362 = vmatpush3.bf16.msra.mxu0 %v390_v8 }
  0x10   :  { %374 = vmatpush3.bf16.msra.mxu1 %v394_v12 }
  0x11   :  { %375 = vmatprep.subr.bf16.mxu1 %v395_v13 }
  0x12   :  { %364 = vmatmul.mubr.msk.bf16.vlgmr.msra.gmra.mxu0 %vm71_vm0, %v31_v11 }
  0x14   :  { %376 = vmatpush3.bf16.msra.mxu1 %v395_v13 }
  0x15   :  { %377 = vmatprep.subr.bf16.mxu1 %v396_v14 }
  0x18   :  { %378 = vmatpush3.bf16.msra.mxu1 %v396_v14 }
  0x19   :  { %379 = vmatprep.subr.bf16.mxu1 %v397_v15 }
  0x1c   :  { %380 = vmatpush3.bf16.msra.mxu1 %v397_v15 }
  0x1d   :  { %381 = vmatprep.subr.bf16.mxu1 %v398_v16 }
  0x20   :  { %382 = vmatpush3.bf16.msra.mxu1 %v398_v16 }
  0xd2   :  { %v365_v17 = vpop.f32.mrf.mxu0 }
  0xd3   :  { %v121_v20 = vadd.f32 %v365_v17, %v321_v18 }
  0xd4   :  { %v112_v19 = vpop.f32.mrf.mxu0 }
  0xd5   :  { %v113_v22 = vadd.f32 %v321_v18, %v112_v19  ;;  %v128_v25 = vmax.f32 %v121_v20, 0.0 }
  0xd6   :  { %v366_v21 = vpop.f32.mrf.mxu0 }
  0xd7   :  { %v126_v26 = vmax.f32 %v113_v22, 0.0  ;;  %v130_v29 = vpack.c.bf16 %v128_v25, %v128_v25 }
  0xd8   :  { %v115_v23 = vpop.f32.mrf.mxu0 }
  0xd9   :  { %v116_v24 = vadd.f32 %v321_v18, %v115_v23 }
  0xdb   :  { %v127_v27 = vmax.f32 %v116_v24, 0.0 }
  0xdd   :  { %v129_v28 = vpack.c.bf16 %v127_v27, %v126_v26 }
  0xdf   :  { %383 = vmatprep.mubr.bf16.mxu1 %v129_v28 }
  0xe0   :  { %384 = vmatmul.mubr.bf16.vlgmr.msra.gmra.mxu1 %v130_v29 }
 0x1a0   :  { %v385_v31 = vpop.f32.mrf.mxu1 }
 0x1a1   :  { %v245_v32 = vadd.f32 %v385_v31, %v328_v30 }
 0x1a2   :  { %v236_v33 = vpop.f32.mrf.mxu1 }
 0x1a3   :  { %v237_v34 = vadd.f32 %v328_v30, %v236_v33  ;;  %v252_v35 = vadd.f32 %v245_v32, %v29_v9 }
 0x1a4   :  { %v386_v36 = vpop.f32.mrf.mxu1 }
 0x1a5   :  { %v260_v37 = vsel %vm259_vm1, %v252_v35, 0.0  ;;  %v250_v38 = vadd.f32 %v237_v34, %v457_v3 }
 0x1a6   :  { %261 = vadd.xlane.f32.xlu1 %v260_v37  ;;  %v239_v39 = vpop.f32.mrf.mxu1 }
 0x1a7   :  { %v240_v40 = vadd.f32 %v328_v30, %v239_v39  ;;  %v253_v41 = vsel %vm71_vm0, %v250_v38, 0.0 }
 0x1a8   :  { %254 = vadd.xlane.f32.xlu0 %v253_v41 }
 0x1a9   :  { %v251_v42 = vadd.f32 %v240_v40, %v462_v4 }
 0x1ab   :  { %v256_v43 = vsel %vm71_vm0, %v251_v42, 0.0 }
 0x1ac   :  { %257 = vadd.xlane.f32.xlu0 %v256_v43 }
 0x22f   :  { %v262_v44 = vpop.xlane.xlu1 %261 }
 0x230   :  { %v266_v45 = vmul.f32 0.015625, %v262_v44 }
 0x231   :  { %v255_v46 = vpop.xlane.xlu0 %254 }
 0x232   :  { %v264_v47 = vmul.f32 0.015625, %v255_v46  ;;  %v269_v48 = vsub.f32 %v252_v35, %v266_v45 }
 0x234   :  { %v267_v49 = vsub.f32 %v250_v38, %v264_v47  ;;  %v272_v55 = vmul.f32 %v269_v48, %v269_v48 }
 0x235   :  { %v258_v50 = vpop.xlane.xlu0 %257 }
 0x236   :  { %v265_v51 = vmul.f32 0.015625, %v258_v50  ;;  %v270_v52 = vmul.f32 %v267_v49, %v267_v49  ;;  %v279_v57 = vsel %vm259_vm1, %v272_v55, 0.0 }
 0x238   :  { %v268_v53 = vsub.f32 %v251_v42, %v265_v51  ;;  %v273_v54 = vsel %vm71_vm0, %v270_v52, 0.0 }
 0x239   :  { %274 = vadd.xlane.f32.xlu1 %v273_v54 }
 0x23a   :  { %v271_v56 = vmul.f32 %v268_v53, %v268_v53 }
 0x23c   :  { %v276_v58 = vsel %vm71_vm0, %v271_v56, 0.0 }
 0x23d   :  { %280 = vadd.xlane.f32.xlu1 %v279_v57  ;;  %277 = vadd.xlane.f32.xlu0 %v276_v58 }
 0x2c2   :  { %v275_v59 = vpop.xlane.xlu1 %274 }
 0x2c3   :  { %v282_v60 = vmul.f32 0.015625, %v275_v59 }
 0x2c5   :  { %v285_v61 = vadd.f32 1e-05, %v282_v60 }
 0x2c6   :  { %v281_v62 = vpop.xlane.xlu1 %280  ;;  %v278_v63 = vpop.xlane.xlu0 %277 }
 0x2c7   :  { %399 = vrsqrt.f32 %v285_v61  ;;  %v284_v0 = vmul.f32 0.015625, %v281_v62  ;;  %v283_v1 = vmul.f32 0.015625, %v278_v63 }
 0x2c9   :  { %v287_v2 = vadd.f32 1e-05, %v284_v0  ;;  %v286_v3 = vadd.f32 1e-05, %v283_v1 }
 0x2cb   :  { %401 = vrsqrt.f32 %v287_v2 }
 0x2cc   :  { %403 = vrsqrt.f32 %v286_v3 }
 0x2d4   :  { %v400_v4 = vpop.eup %399 }
 0x2d5   :  { %v291_v6 = vmul.f32 %v400_v4, %v267_v49 }
 0x2d7   :  { %v301_v8 = vmul.f32 %v337_v5, %v291_v6 }
 0x2d8   :  { %v402_v9 = vpop.eup %401 }
 0x2d9   :  { %v404_v10 = vpop.eup %403  ;;  %v311_v11 = vadd.f32 %v338_v7, %v301_v8  ;;  %v293_v12 = vmul.f32 %v402_v9, %v269_v48 }
 0x2da   :  { %v292_v13 = vmul.f32 %v404_v10, %v268_v53 }
 0x2db   :  { %314 = vst.msk [vmem:[%s537_s7] sm:$0xff] %vm71_vm0, %v311_v11  ;;  %v303_v14 = vmul.f32 %v337_v5, %v293_v12 }
 0x2dc   :  { %v302_v15 = vmul.f32 %v337_v5, %v292_v13 }
 0x2dd   :  { %v313_v16 = vadd.f32 %v338_v7, %v303_v14 }
 0x2de   :  { %v312_v17 = vadd.f32 %v338_v7, %v302_v15 }
 0x2df   :  { %316 = vst.msk [vmem:[%s537_s7 + $0x10] sm:$0x3] %vm259_vm1, %v313_v16 }
 0x2e0   :  { %315 = vst.msk [vmem:[%s537_s7 + $0x8] sm:$0xff] %vm71_vm0, %v312_v17 }

// kernel: finetuned_sam2_forward.22
= control target key start
LH: loop header
LB: loop body
LE: loop exit
PB: predicated region body
PF: predicated region fallthrough
CT: control target
= control target key end

     0   :  { %19 = vsyncpa [#allocation3], 0  ;;  %s2345_s0 = inlined_call_operand.vmem [shape: bf16[2,16,64], index: 0, kind: input, shape index: {}]   ;;  %s2346_s1 = inlined_call_operand.vmem [shape: bf16[2,9,64], index: 1, kind: input, shape index: {}]   ;;  %s2347_s2 = inlined_call_operand.vmem [shape: bf16[2,9,64], index: 2, kind: input, shape index: {}]   ;;  %s2348_s3 = inlined_call_operand.vmem [shape: f32[2,16,64], index: 3, kind: input, shape index: {}]   ;;  %s2349_s4 = inlined_call_operand.vmem [shape: bf16[64,32], index: 4, kind: input, shape index: {}]   ;;  %s2350_s5 = inlined_call_operand.hbm [shape: f32[1,32], index: 5, kind: input, shape index: {}]   ;;  %s2351_s6 = inlined_call_operand.vmem [shape: bf16[64,32], index: 6, kind: input, shape index: {}]   ;;  %s2352_s7 = inlined_call_operand.hbm [shape: f32[1,32], index: 7, kind: input, shape index: {}]   ;;  %s2353_s8 = inlined_call_operand.vmem [shape: bf16[64,32], index: 8, kind: input, shape index: {}]   ;;  %s2354_s9 = inlined_call_operand.hbm [shape: f32[1,32], index: 9, kind: input, shape index: {}]   ;;  %s2355_s10 = inlined_call_operand.vmem [shape: bf16[32,64], index: 10, kind: input, shape index: {}]   ;;  %s2356_s11 = inlined_call_operand.hbm [shape: f32[1,64], index: 11, kind: input, shape index: {}]   ;;  %s2357_s12 = inlined_call_operand.hbm [shape: f32[1,64], index: 12, kind: input, shape index: {}]   ;;  %s2358_s13 = inlined_call_operand.hbm [shape: f32[1,64], index: 13, kind: input, shape index: {}]   ;;  %s2359_s14 = inlined_call_operand.vmem [shape: f32[2,16,64], index: 14, kind: output, shape index: {}]  }
   0x1   :  { %20 = vsyncpa [#allocation5], 0 }
   0x2   :  { %21 = vsyncpa [#allocation8], 0 }
   0x3   :  { %22 = vsyncpa [#allocation11], 0  ;;  %s2077_s29 = smov 0  }
   0x4 LB: > { %s1992_s30 = smov [#allocation4]   ;;  %s2083_s16 = sadd.s32 4294967295, %s1990_s29   ;;  %s1990_s29 = sphi %s2077_s29, %s28_s29  }
   0x5   : > { %s403_s15 = sshll.u32 %s1992_s30, 4  ;;  %p1527_p0 = scmp.ge.s32.totalorder %s1990_s29, 1  ;;  %s404_s15 = int_to_ptr.vmem [resolvable:$true] %s403_s15 }
   0x6   : > { %p373_p1 = scmp.lt.s32.totalorder %s1990_s29, 3  ;;  %p2360_p2 = scmp.eq.s32.totalorder %s2083_s16, 0 }
   0x7   : > { %s1993_s18 = smov [#allocation7]   ;;  %s1994_s20 = smov [#allocation2]  }
   0x8   : > { %p2088_p3 = pnand %p1527_p0, %p373_p1  ;;  %s431_s19 = sshll.u32 %s1993_s18, 4  ;;  %s2094_s19 = int_to_ptr.vmem [resolvable:$true] %s431_s19 }
   0x9   : > { %s389_s21 = sshll.u32 %s1994_s20, 4  ;;  %s1995_s23 = smov [#allocation6]   ;;  %s2102_s21 = int_to_ptr.vmem [resolvable:$true] %s389_s21 }
   0xa   : > { %p1726_p4 = pneg %p2088_p3  ;;  %s417_s24 = sshll.u32 %s1995_s23, 4  ;;  %s2104_s24 = int_to_ptr.vmem [resolvable:$true] %s417_s24 }
   0xb   : > { %s1823_s26 = scalar_lea.vmem %s404_s15, 16  ;;  %s1830_s27 = scalar_lea.vmem %s404_s15, 32 }
   0xc   : > { %p2098_p5 = pnand %p2360_p2, %p1726_p4  ;;  %p1824_p7 = scmp.ne.s32.totalorder %s404_s15, %s1823_s26 }
   0xd   : > { %p1831_p10 = scmp.lt.s32.totalorder %s404_s15, %s404_s15  ;;  %p1832_p11 = scmp.lt.s32.totalorder %s1830_s27, %s1823_s26 }
   0xe   : > { %p2108_p6 = pneg %p2098_p5 }
   0xf   : > { %p1833_p12 = por %p1832_p11, %p1831_p10 }
  0x10   : > { %p1826_p8 = pnand %p1824_p7, %p2108_p6 }
  0x12   : > { %p1827_p9 = pneg %p1826_p8 }
  0x14   : > { %p1834_p13 = pnand %p1833_p12, %p1827_p9 }
  0x16   : > { %1837 = shalt.err (!%p1834_p13)
}
  0x17   : > { %1732 = dma.hbm_to_vmem [thread:$0]  (!%p2098_p5), %s2352_s7, 16, %s404_s15, [#allocation5]  }
  0x18   : > { %s1849_s18 = scalar_lea.vmem %s2094_s19, 16  ;;  %s1856_s20 = scalar_lea.vmem %s2094_s19, 32 }
  0x19   : > { %p1850_p0 = scmp.ne.s32.totalorder %s2094_s19, %s1849_s18  ;;  %p1857_p7 = scmp.lt.s32.totalorder %s2094_s19, %s2094_s19 }
  0x1a   : > { %p1858_p8 = scmp.lt.s32.totalorder %s1856_s20, %s1849_s18 }
  0x1b   : > { %p1852_p1 = pnand %p1850_p0, %p2108_p6 }
  0x1c   : > { %p1859_p9 = por %p1858_p8, %p1857_p7 }
  0x1d   : > { %p1853_p4 = pneg %p1852_p1 }
  0x1f   : > { %p1860_p10 = pnand %p1859_p9, %p1853_p4 }
  0x21   : > { %1863 = shalt.err (!%p1860_p10)
}
  0x22   : > { %1738 = dma.hbm_to_vmem [thread:$0]  (!%p2098_p5), %s2356_s11, 16, %s2094_s19, [#allocation8]  }
  0x23   : > { %s1875_s15 = scalar_lea.vmem %s2102_s21, 16  ;;  %s1882_s27 = scalar_lea.vmem %s2102_s21, 32 }
  0x24   : > { %p1876_p11 = scmp.ne.s32.totalorder %s2102_s21, %s1875_s15  ;;  %p1883_p0 = scmp.lt.s32.totalorder %s2102_s21, %s2102_s21 }
  0x25   : > { %p1884_p1 = scmp.lt.s32.totalorder %s1882_s27, %s1875_s15 }
  0x26   : > { %p1878_p12 = pnand %p1876_p11, %p2108_p6 }
  0x27   : > { %p1885_p4 = por %p1884_p1, %p1883_p0 }
  0x28   : > { %p1879_p13 = pneg %p1878_p12 }
  0x2a   : > { %p1886_p7 = pnand %p1885_p4, %p1879_p13 }
  0x2c   : > { %1889 = shalt.err (!%p1886_p7)
}
  0x2d   : > { %1729 = dma.hbm_to_vmem [thread:$0]  (!%p2098_p5), %s2350_s5, 16, %s2102_s21, [#allocation3]  }
  0x2e   : > { %s1901_s19 = scalar_lea.vmem %s2104_s24, 16  ;;  %s1908_s18 = scalar_lea.vmem %s2104_s24, 32 }
  0x2f   : > { %p1902_p8 = scmp.ne.s32.totalorder %s2104_s24, %s1901_s19  ;;  %p1909_p11 = scmp.lt.s32.totalorder %s2104_s24, %s2104_s24 }
  0x30   : > { %p1910_p12 = scmp.lt.s32.totalorder %s1908_s18, %s1901_s19 }
  0x31   : > { %p1904_p9 = pnand %p1902_p8, %p2108_p6 }
  0x32   : > { %p1911_p13 = por %p1910_p12, %p1909_p11 }
  0x33   : > { %p1905_p10 = pneg %p1904_p9 }
  0x35   : > { %p1912_p0 = pnand %p1911_p13, %p1905_p10 }
  0x37   : > { %1915 = shalt.err (!%p1912_p0)
}
  0x38   : > { %1735 = dma.hbm_to_vmem [thread:$0]  (!%p2098_p5), %s2354_s9, 16, %s2104_s24, [#allocation5]  }
  0x39   : > { %s1996_s21 = smov [#allocation9]   ;;  %s1997_s15 = smov [#allocation10]  }
  0x3a   : > { %s442_s26 = sshll.u32 %s1996_s21, 4  ;;  %s453_s27 = sshll.u32 %s1997_s15, 4  ;;  %s443_s26 = int_to_ptr.vmem [resolvable:$true] %s442_s26  ;;  %s454_s27 = int_to_ptr.vmem [resolvable:$true] %s453_s27 }
  0x3b   : > { %s1927_s28 = scalar_lea.vmem %s443_s26, 16  ;;  %s1934_s30 = scalar_lea.vmem %s443_s26, 32 }
  0x3c   : > { %p1928_p1 = scmp.ne.s32.totalorder %s443_s26, %s1927_s28  ;;  %p1935_p8 = scmp.lt.s32.totalorder %s443_s26, %s443_s26 }
  0x3d   : > { %p1936_p9 = scmp.lt.s32.totalorder %s1934_s30, %s1927_s28 }
  0x3e   : > { %p1930_p4 = pnand %p1928_p1, %p2108_p6 }
  0x3f   : > { %p1937_p10 = por %p1936_p9, %p1935_p8 }
  0x40   : > { %p1931_p7 = pneg %p1930_p4 }
  0x42   : > { %p1938_p11 = pnand %p1937_p10, %p1931_p7 }
  0x44   : > { %1941 = shalt.err (!%p1938_p11)
}
  0x45   : > { %1741 = dma.hbm_to_vmem [thread:$0]  (!%p2098_p5), %s2357_s12, 16, %s443_s26, [#allocation8]  }
  0x46   : > { %s1953_s18 = scalar_lea.vmem %s454_s27, 16  ;;  %s1960_s20 = scalar_lea.vmem %s454_s27, 32 }
  0x47   : > { %p1954_p12 = scmp.ne.s32.totalorder %s454_s27, %s1953_s18  ;;  %p1961_p1 = scmp.lt.s32.totalorder %s454_s27, %s454_s27 }
  0x48   : > { %p1962_p4 = scmp.lt.s32.totalorder %s1960_s20, %s1953_s18 }
  0x49   : > { %p1956_p13 = pnand %p1954_p12, %p2108_p6 }
  0x4a   : > { %p1963_p2 = por %p1962_p4, %p1961_p1 }
  0x4b   : > { %p1957_p0 = pneg %p1956_p13 }
  0x4d   : > { %p1964_p8 = pnand %p1963_p2, %p1957_p0 }
  0x4f   : > { %1967 = shalt.err (!%p1964_p8)
}
  0x50   : > { %1744 = dma.hbm_to_vmem [thread:$0]  (!%p2098_p5), %s2358_s13, 16, %s454_s27, [#allocation11]  }
  0x51   : > { %498 = sbr.rel (%p2088_p3) target bundleno = 2073 (0x819), region = 76  ;;  %p2364_p7 = scmp.eq.s32.totalorder (!%p2088_p3), %s2083_s16, 0 }
  0x56   : > { %1973 = dma.done.wait (%p2364_p7), [#allocation3], 16   ;;  %p2365_p6 = pmov %p2364_p7 }
  0x58   : > { %1975 = vsyncadd (%p2365_p6), [#allocation3], 4294967280  ;;  %p2366_p9 = pmov %p2365_p6 }
  0x59   : > { %p2367_p2 = pmov %p2365_p6 }
  0x5a   : > { %1977 = dma.done.wait (%p2366_p9), [#allocation5], 32  }
  0x5b   : > { %1979 = vsyncadd (%p2367_p2), [#allocation5], 4294967264  ;;  %p2368_p10 = pmov %p2367_p2 }
  0x5c   : > { %p2369_p5 = pmov %p2367_p2 }
  0x5d   : > { %1981 = dma.done.wait (%p2368_p10), [#allocation8], 32  }
  0x5e   : > { %1983 = vsyncadd (%p2369_p5), [#allocation8], 4294967264  ;;  %p2370_p3 = pmov %p2367_p2 }
  0x5f   : > { %p2371_p11 = pmov %p2367_p2 }
  0x60   : > { %1985 = dma.done.wait (%p2370_p3), [#allocation11], 16  }
  0x61   : > { %1987 = vsyncadd (%p2371_p11), [#allocation11], 4294967280  ;;  %v1998_v0 = vmov 0.0   ;;  %vm1999_vm0 = vmmov 0   ;;  %p579_p12 = scmp.lt.s32.totalorder %s2083_s16, 1  ;;  %v1775_v1 = vld [vmem:[%s2351_s6 + $0x18] sm:$0xff]  }
  0x62   : > { %1640 = vmatprep.subr.bf16.mxu1 %v1998_v0  ;;  %1628 = vmatprep.subr.bf16.mxu0 %v1998_v0  ;;  %v1776_v2 = vld [vmem:[%s2349_s4 + $0x18] sm:$0xff]   ;;  %v1777_v3 = vld [vmem:[%s2351_s6 + $0x10] sm:$0xff]   ;;  %v1779_v5 = vld [vmem:[%s2351_s6 + $0x8] sm:$0xff]   ;;  %vm655_vm1 = vcmask 523264   ;;  %vm876_vm2 = vcmask 130048   ;;  %vm966_vm3 = vcmask 72704  }
  0x63   : > { %1648 = vmatprep.mubr.msk.bf16.mxu1 %vm1999_vm0, %v1998_v0  ;;  %1636 = vmatprep.mubr.msk.bf16.mxu0 %vm1999_vm0, %v1998_v0  ;;  %s2373_s16 = smov (!%p579_p12, %s2083_s16), 1  ;;  %v1778_v4 = vld [vmem:[%s2349_s4 + $0x10] sm:$0xff]   ;;  %v1780_v6 = vld [vmem:[%s2349_s4 + $0x8] sm:$0xff]   ;;  %v1781_v7 = vld [vmem:[%s2351_s6] sm:$0xff]   ;;  %vm994_vm4 = vcmask 1043456   ;;  %vm995_vm5 = vcmask 1044480  }
  0x64   : > { %1641 = vmatpush3.bf16.msra.mxu1 %v1775_v1  ;;  %1629 = vmatpush3.bf16.msra.mxu0 %v1776_v2  ;;  %s2215_s19 = sshll.u32 %s2373_s16, 3  ;;  %v1782_v8 = vld [vmem:[%s2349_s4] sm:$0xff]   ;;  %v1785_v11 = vld [vmem:[%s2353_s8 + $0x18] sm:$0xff]   ;;  %v1786_v12 = vld [vmem:[%s2353_s8 + $0x10] sm:$0xff]   ;;  %v2001_v44 = vmov 65535   ;;  %s1595_s23 = sshll.u32 %s2373_s16, 4 }
  0x65   : > { %1642 = vmatprep.subr.bf16.mxu1 %v1998_v0  ;;  %1630 = vmatprep.subr.bf16.mxu0 %v1998_v0  ;;  %s588_s22 = scalar_lea.vmem %s2346_s1, %s2215_s19  ;;  %s583_s15 = scalar_lea.vmem %s2345_s0, %s2215_s19  ;;  %v1787_v13 = vld [vmem:[%s2353_s8 + $0x8] sm:$0xff]   ;;  %v1559_v14 = vld [vmem:[#allocation4] ss:$0 sm:$0xff]  ;;  %v1552_v15 = vld [vmem:[#allocation2] ss:$0 sm:$0xff]  ;;  %v996_v45 = vsel %vm994_vm4, 4294967295, %v2001_v44 }
  0x66   : > { %v1783_v9 = vld [vmem:[%s588_s22] sm:$0x1f]   ;;  %s593_s17 = scalar_lea.vmem %s2347_s2, %s2215_s19  ;;  %s2000_s19 = smov 112   ;;  %v2286_v46 = vsel %vm995_vm5, %v996_v45, 0 }
  0x67   : > { %v1784_v10 = vld [vmem:[%s583_s15] sm:$0xff]   ;;  %s598_s22 = scalar_lea.vmem %s2348_s3, %s1595_s23  ;;  %s603_s15 = scalar_lea.vmem %s2359_s14, %s1595_s23 }
  0x68   : > { %1643 = vmatpush3.bf16.msra.mxu1 %v1777_v3  ;;  %1631 = vmatpush3.bf16.msra.mxu0 %v1778_v4  ;;  %v1788_v16 = vld [vmem:[%s2353_s8] sm:$0xff]  }
  0x69   : > { %1644 = vmatprep.subr.bf16.mxu1 %v1998_v0  ;;  %1632 = vmatprep.subr.bf16.mxu0 %v1998_v0  ;;  %v1789_v22 = vld [vmem:[%s593_s17] sm:$0x1f]  }
  0x6a   : > { %v1566_v38 = vld [vmem:[#allocation6] ss:$0 sm:$0xff] }
  0x6c   : > { %1645 = vmatpush3.bf16.msra.mxu1 %v1779_v5  ;;  %1633 = vmatpush3.bf16.msra.mxu0 %v1780_v6 }
  0x6d   : > { %1646 = vmatprep.subr.bf16.mxu1 %v1998_v0  ;;  %1634 = vmatprep.subr.bf16.mxu0 %v1998_v0 }
  0x70   : > { %1647 = vmatpush3.bf16.msra.mxu1 %v1781_v7  ;;  %1635 = vmatpush3.bf16.msra.mxu0 %v1782_v8 }
  0x71   : > { %1652 = vmatprep.subr.bf16.mxu0 %v1998_v0 }
  0x73   : > { %1649 = vmatmul.mubr.msk.bf16.vlgmr.msra.gmra.mxu1 %vm655_vm1, %v1783_v9  ;;  %1637 = vmatmul.mubr.msk.bf16.vlgmr.msra.gmra.mxu0 %vm655_vm1, %v1784_v10 }
  0x74   : > { %1660 = vmatprep.mubr.msk.bf16.mxu0 %vm1999_vm0, %v1998_v0  ;;  %1653 = vmatpush3.bf16.msra.mxu0 %v1785_v11 }
  0x75   : > { %1654 = vmatprep.subr.bf16.mxu0 %v1998_v0 }
  0x78   : > { %1655 = vmatpush3.bf16.msra.mxu0 %v1786_v12 }
  0x79   : > { %1656 = vmatprep.subr.bf16.mxu0 %v1998_v0 }
  0x7c   : > { %1657 = vmatpush3.bf16.msra.mxu0 %v1787_v13 }
  0x7d   : > { %1658 = vmatprep.subr.bf16.mxu0 %v1998_v0 }
  0x80   : > { %1659 = vmatpush3.bf16.msra.mxu0 %v1788_v16 }
  0x81   : > { %1684 = vmatprep.subr.bf16.mxu0 %v1998_v0 }
  0x83   : > { %1661 = vmatmul.mubr.msk.bf16.vlgmr.msra.gmra.mxu0 %vm655_vm1, %v1789_v22 }
  0x84   : > { %1686 = vmatprep.mubr.msk.bf16.mxu0 %vm1999_vm0, %v1998_v0 }
 0x133   : > { %v781_v17 = vpop.f32.mrf.mxu1  ;;  %v693_v19 = vpop.f32.mrf.mxu0 }
 0x134   : > { %v782_v18 = vadd.f32 %v1559_v14, %v781_v17  ;;  %v2265_v21 = vadd.f32 %v1552_v15, %v693_v19 }
 0x135   : > { %v1650_v20 = vpop.f32.mrf.mxu1  ;;  %v1638_v23 = vpop.f32.mrf.mxu0 }
 0x136   : > { %1049 = vrot.lane.b32.xlu1 %v782_v18, %s2000_s19  ;;  %1668 = vmatprep.mubr.msk.f32.mxu1 %vm876_vm2, %v2265_v21 }
 0x137   : > { %v784_v24 = vpop.f32.mrf.mxu1  ;;  %v696_v26 = vpop.f32.mrf.mxu0 }
 0x138   : > { %v785_v25 = vadd.f32 %v1559_v14, %v784_v24  ;;  %v697_v29 = vadd.f32 %v1552_v15, %v696_v26 }
 0x139   : > { %v1651_v27 = vpop.f32.mrf.mxu1  ;;  %v1639_v28 = vpop.f32.mrf.mxu0 }
 0x13a   : > { %1664 = vmatprep.subr.msk.mxu1 %vm876_vm2, %v785_v25 }
 0x13b   : > { %1665 = vmatpush3.xpose.msk.msra.mxu1 %vm876_vm2, %v785_v25 }
 0x13c   : > { %1666 = vmatprep.subr.msk.mxu1 %vm876_vm2, %v782_v18 }
 0x13f   : > { %1667 = vmatpush3.xpose.msk.msra.mxu1 %vm876_vm2, %v782_v18 }
 0x140   : > { %1671 = vmatprep.subr.bf16.mxu1 %v1998_v0 }
 0x142   : > { %1669 = vmatmul.mubr.msk.f32.vlgmr.msra.gmra.mxu1 %vm876_vm2, %v697_v29 }
 0x143   : > { %1673 = vmatprep.mubr.msk.bf16.mxu1 %vm1999_vm0, %v1998_v0  ;;  %v869_v30 = vpop.f32.mrf.mxu0 }
 0x144   : > { %v870_v39 = vadd.f32 %v1566_v38, %v869_v30 }
 0x145   : > { %v1662_v31 = vpop.f32.mrf.mxu0 }
 0x147   : > { %v872_v40 = vpop.f32.mrf.mxu0 }
 0x148   : > { %v873_v41 = vadd.f32 %v1566_v38, %v872_v40 }
 0x149   : > { %v1663_v42 = vpop.f32.mrf.mxu0 }
 0x14a   : > { %v2284_v43 = vpack.c.bf16 %v873_v41, %v870_v39 }
 0x14c   : > { %v999_v47 = vand.u32 %v2286_v46, %v2284_v43 }
 0x14e   : > { %1672 = vmatpush3.bf16.msra.mxu1 %v999_v47  ;;  %v1314_v47 = vld [vmem:[%s598_s22] sm:$0xff] }
 0x1a8   : > { %v1050_v59 = vpop.permute.xlu1 %1049 }
 0x202   : > { %v1670_v32 = vpop.f32.mrf.mxu1 }
 0x203   : > { %v965_v35 = vmul.f32 0.25, %v1670_v32 }
 0x204   : > { %v955_v33 = vpop.f32.mrf.mxu1 }
 0x205   : > { %v964_v34 = vmul.f32 0.25, %v955_v33  ;;  %v970_v37 = vsel %vm966_vm3, %v965_v35, -inf }
 0x207   : > { %v967_v36 = vsel %vm966_vm3, %v964_v34, -inf }
 0x208   : > { %968 = vmax.xlane.f32.xlu0 %v967_v36 }
 0x20c   : > { %971 = vmax.xlane.f32.xlu0 %v970_v37  ;;  %v1791_v37 = vld [vmem:[%s2355_s10 + $0x8] sm:$0xff]  }
 0x222   : > { %1051 = vrot.lane.b32.xlu0 %v785_v25, %s2000_s19 }
 0x291   : > { %v969_v48 = vpop.xlane.xlu0 %968 }
 0x292   : > { %v973_v49 = vsub.f32 %v964_v34, %v969_v48 }
 0x294   : > { %v975_v52 = vmul.f32 1.442695, %v973_v49 }
 0x295   : > { %v972_v50 = vpop.xlane.xlu0 %971 }
 0x296   : > { %v974_v51 = vsub.f32 %v965_v35, %v972_v50  ;;  %v1790_v35 = vld [vmem:[%s2355_s10] sm:$0xff]  }
 0x297   : > { %v1587_v50 = vld [vmem:[#allocation7] ss:$0 sm:$0xff] }
 0x298   : > { %v977_v53 = vmul.f32 1.442695, %v974_v51 }
 0x299   : > { %v1052_v54 = vpop.permute.xlu0 %1051 }
 0x29a   : > { %1792 = vpow2.f32 %v977_v53  ;;  %1677 = vmatprep.subr.msk.mxu1 %vm876_vm2, %v1052_v54  ;;  %v1315_v53 = vld [vmem:[%s598_s22 + $0x8] sm:$0xff] }
 0x29b   : > { %1794 = vpow2.f32 %v975_v52 }
 0x2a7   : > { %v1793_v55 = vpop.eup %1792 }
 0x2a8   : > { %v982_v56 = vsel %vm966_vm3, %v1793_v55, 0.0  ;;  %v1795_v57 = vpop.eup %1794 }
 0x2a9   : > { %983 = vadd.xlane.f32.xlu1 %v982_v56  ;;  %v979_v58 = vsel %vm966_vm3, %v1795_v57, 0.0 }
 0x2ad   : > { %980 = vadd.xlane.f32.xlu1 %v979_v58 }
 0x2be   : > { %1045 = vrot.lane.b32.xlu1 %v2265_v21, %s2000_s19 }
 0x2c2   : > { %1047 = vrot.lane.b32.xlu1 %v697_v29, %s2000_s19 }
 0x332   : > { %v984_v60 = vpop.xlane.xlu1 %983 }
 0x333   : > { %1796 = vrcp.f32 %v984_v60 }
 0x336   : > { %v981_v61 = vpop.xlane.xlu1 %980 }
 0x337   : > { %1798 = vrcp.f32 %v981_v61 }
 0x33a   : > { %v1046_v4 = vpop.permute.xlu1 %1045 }
 0x33e   : > { %v1048_v5 = vpop.permute.xlu1 %1047 }
 0x340   : > { %v1797_v62 = vpop.eup %1796 }
 0x341   : > { %v988_v2 = vmul.f32 %v1797_v62, %v1793_v55 }
 0x344   : > { %v1799_v63 = vpop.eup %1798 }
 0x345   : > { %v986_v1 = vmul.f32 %v1799_v63, %v1795_v57 }
 0x347   : > { %v989_v3 = vpack.c.bf16 %v988_v2, %v986_v1 }
 0x349   : > { %1674 = vmatmul.mubr.msk.bf16.vlgmr.msra.gmra.mxu1 %vm966_vm3, %v989_v3 }
 0x34a   : > { %1678 = vmatpush3.xpose.msk.msra.mxu1 %vm876_vm2, %v1052_v54  ;;  %1681 = vmatprep.mubr.msk.f32.mxu1 %vm876_vm2, %v1046_v4 }
 0x34b   : > { %1679 = vmatprep.subr.msk.mxu1 %vm876_vm2, %v1050_v59 }
 0x34e   : > { %1680 = vmatpush3.xpose.msk.msra.mxu1 %vm876_vm2, %v1050_v59 }
 0x34f   : > { %1690 = vmatprep.subr.bf16.mxu1 %v1998_v0 }
 0x351   : > { %1682 = vmatmul.mubr.msk.f32.vlgmr.msra.gmra.mxu1 %vm876_vm2, %v1048_v5 }
 0x352   : > { %1692 = vmatprep.mubr.msk.bf16.mxu1 %vm1999_vm0, %v1998_v0  ;;  %1691 = vmatpush3.bf16.msra.mxu1 %v1791_v37 }
 0x409   : > { %v1035_v6 = vpop.f32.mrf.mxu1 }
 0x40b   : > { %v1675_v7 = vpop.f32.mrf.mxu1 }
 0x40d   : > { %v1038_v8 = vpop.f32.mrf.mxu1 }
 0x40e   : > { %v1042_v9 = vpack.c.bf16 %v1038_v8, %v1035_v6 }
 0x40f   : > { %v1676_v10 = vpop.f32.mrf.mxu1 }
 0x411   : > { %v1683_v11 = vpop.f32.mrf.mxu1 }
 0x412   : > { %v1137_v12 = vmul.f32 0.25, %v1683_v11 }
 0x413   : > { %v1127_v13 = vpop.f32.mrf.mxu1 }
 0x414   : > { %v1136_v14 = vmul.f32 0.25, %v1127_v13  ;;  %v1141_v15 = vsel %vm966_vm3, %v1137_v12, -inf }
 0x415   : > { %1142 = vmax.xlane.f32.xlu1 %v1141_v15  ;;  %v1588_v15 = vld [vmem:[#allocation9] ss:$0 sm:$0xff] }
 0x416   : > { %v1138_v16 = vsel %vm966_vm3, %v1136_v14, -inf }
 0x417   : > { %1139 = vmax.xlane.f32.xlu0 %v1138_v16 }
 0x49e   : > { %v1143_v17 = vpop.xlane.xlu1 %1142 }
 0x49f   : > { %v1145_v18 = vsub.f32 %v1137_v12, %v1143_v17  ;;  %v1589_v17 = vld [vmem:[#allocation10] ss:$0 sm:$0xff] }
 0x4a0   : > { %v1140_v19 = vpop.xlane.xlu0 %1139 }
 0x4a1   : > { %v1148_v20 = vmul.f32 1.442695, %v1145_v18  ;;  %v1144_v21 = vsub.f32 %v1136_v14, %v1140_v19 }
 0x4a3   : > { %1800 = vpow2.f32 %v1148_v20  ;;  %v1146_v22 = vmul.f32 1.442695, %v1144_v21 }
 0x4a5   : > { %1802 = vpow2.f32 %v1146_v22 }
 0x4b0   : > { %v1801_v23 = vpop.eup %1800 }
 0x4b1   : > { %v1153_v24 = vsel %vm966_vm3, %v1801_v23, 0.0 }
 0x4b2   : > { %v1803_v25 = vpop.eup %1802  ;;  %1154 = vadd.xlane.f32.xlu0 %v1153_v24 }
 0x4b3   : > { %v1150_v26 = vsel %vm966_vm3, %v1803_v25, 0.0 }
 0x4b6   : > { %1151 = vadd.xlane.f32.xlu0 %v1150_v26 }
 0x4cc   : > { %1162 = vrot.lane.b32.xlu0 %v2284_v43, %s2000_s19 }
 0x53b   : > { %v1155_v27 = vpop.xlane.xlu0 %1154 }
 0x53c   : > { %1804 = vrcp.f32 %v1155_v27 }
 0x53f   : > { %v1152_v28 = vpop.xlane.xlu0 %1151 }
 0x540   : > { %1806 = vrcp.f32 %v1152_v28 }
 0x543   : > { %v1163_v29 = vpop.permute.xlu0 %1162 }
 0x544   : > { %v1168_v30 = vand.u32 %v1163_v29, %v2286_v46 }
 0x546   : > { %1685 = vmatpush3.bf16.msra.mxu0 %v1168_v30 }
 0x547   : > { %1696 = vmatprep.subr.bf16.mxu0 %v1998_v0 }
 0x549   : > { %v1805_v31 = vpop.eup %1804 }
 0x54a   : > { %v1159_v34 = vmul.f32 %v1805_v31, %v1801_v23 }
 0x54d   : > { %v1807_v32 = vpop.eup %1806 }
 0x54e   : > { %v1157_v33 = vmul.f32 %v1807_v32, %v1803_v25 }
 0x550   : > { %v1160_v36 = vpack.c.bf16 %v1159_v34, %v1157_v33 }
 0x552   : > { %1687 = vmatmul.mubr.msk.bf16.vlgmr.msra.gmra.mxu0 %vm966_vm3, %v1160_v36 }
 0x553   : > { %1697 = vmatpush3.bf16.msra.mxu0 %v1790_v35  ;;  %1698 = vmatprep.mubr.msk.bf16.mxu0 %vm1999_vm0, %v1998_v0 }
 0x55a   : > { %1699 = vmatmul.mubr.msk.bf16.vlgmr.msra.gmra.mxu0 %vm876_vm2, %v1042_v9 }
 0x612   : > { %v1204_v38 = vpop.f32.mrf.mxu0 }
 0x614   : > { %v1688_v39 = vpop.f32.mrf.mxu0 }
 0x616   : > { %v1207_v40 = vpop.f32.mrf.mxu0 }
 0x617   : > { %v1211_v41 = vpack.c.bf16 %v1207_v40, %v1204_v38 }
 0x618   : > { %v1689_v42 = vpop.f32.mrf.mxu0 }
 0x619   : > { %1693 = vmatmul.mubr.msk.bf16.vlgmr.msra.gmra.mxu1 %vm876_vm2, %v1211_v41 }
 0x61a   : > { %v1307_v43 = vpop.f32.mrf.mxu0 }
 0x61c   : > { %v1700_v44 = vpop.f32.mrf.mxu0 }
 0x61e   : > { %v1310_v45 = vpop.f32.mrf.mxu0 }
 0x620   : > { %v1701_v46 = vpop.f32.mrf.mxu0 }
 0x6d9   : > { %v1257_v0 = vpop.f32.mrf.mxu1 }
 0x6da   : > { %v1308_v48 = vadd.f32 %v1307_v43, %v1257_v0 }
 0x6db   : > { %v1694_v49 = vpop.f32.mrf.mxu1 }
 0x6dc   : > { %v1316_v51 = vadd.f32 %v1314_v47, %v1308_v48 }
 0x6dd   : > { %v1260_v52 = vpop.f32.mrf.mxu1 }
 0x6de   : > { %v1311_v54 = vadd.f32 %v1310_v45, %v1260_v52  ;;  %v1325_v55 = vadd.f32 %v1587_v50, %v1316_v51 }
 0x6df   : > { %v1695_v56 = vpop.f32.mrf.mxu1 }
 0x6e0   : > { %v1317_v57 = vadd.f32 %v1315_v53, %v1311_v54  ;;  %v1327_v58 = vsel %vm655_vm1, %v1325_v55, 0.0 }
 0x6e1   : > { %1328 = vadd.xlane.f32.xlu1 %v1327_v58 }
 0x6e2   : > { %v1326_v59 = vadd.f32 %v1587_v50, %v1317_v57 }
 0x6e4   : > { %v1330_v60 = vsel %vm655_vm1, %v1326_v59, 0.0 }
 0x6e5   : > { %1331 = vadd.xlane.f32.xlu1 %v1330_v60 }
 0x76a   : > { %v1329_v61 = vpop.xlane.xlu1 %1328 }
 0x76b   : > { %v1334_v62 = vmul.f32 0.015625, %v1329_v61 }
 0x76d   : > { %v1336_v63 = vsub.f32 %v1325_v55, %v1334_v62 }
 0x76e   : > { %v1332_v1 = vpop.xlane.xlu1 %1331 }
 0x76f   : > { %v1335_v2 = vmul.f32 0.015625, %v1332_v1  ;;  %v1338_v3 = vmul.f32 %v1336_v63, %v1336_v63 }
 0x771   : > { %v1337_v4 = vsub.f32 %v1326_v59, %v1335_v2  ;;  %v1340_v5 = vsel %vm655_vm1, %v1338_v3, 0.0 }
 0x772   : > { %1341 = vadd.xlane.f32.xlu1 %v1340_v5 }
 0x773   : > { %v1339_v6 = vmul.f32 %v1337_v4, %v1337_v4 }
 0x775   : > { %v1343_v7 = vsel %vm655_vm1, %v1339_v6, 0.0 }
 0x776   : > { %1344 = vadd.xlane.f32.xlu1 %v1343_v7 }
 0x7fb   : > { %v1342_v8 = vpop.xlane.xlu1 %1341 }
 0x7fc   : > { %v1346_v9 = vmul.f32 0.015625, %v1342_v8 }
 0x7fe   : > { %v1348_v10 = vadd.f32 1e-05, %v1346_v9 }
 0x7ff   : > { %v1345_v11 = vpop.xlane.xlu1 %1344 }
 0x800   : > { %1808 = vrsqrt.f32 %v1348_v10  ;;  %v1347_v12 = vmul.f32 0.015625, %v1345_v11 }
 0x802   : > { %v1349_v13 = vadd.f32 1e-05, %v1347_v12 }
 0x804   : > { %1810 = vrsqrt.f32 %v1349_v13 }
 0x80d   : > { %v1809_v14 = vpop.eup %1808 }
 0x80e   : > { %v1352_v16 = vmul.f32 %v1809_v14, %v1336_v63 }
 0x810   : > { %v1361_v18 = vmul.f32 %v1588_v15, %v1352_v16 }
 0x811   : > { %v1811_v19 = vpop.eup %1810 }
 0x812   : > { %v1370_v20 = vadd.f32 %v1589_v17, %v1361_v18  ;;  %v1353_v21 = vmul.f32 %v1811_v19, %v1337_v4 }
 0x814   : > { %1372 = vst.msk [vmem:[%s603_s15] sm:$0xff] %vm655_vm1, %v1370_v20  ;;  %v1362_v22 = vmul.f32 %v1588_v15, %v1353_v21 }
 0x816   : > { %v1371_v23 = vadd.f32 %v1589_v17, %v1362_v22 }
 0x818   : > { %1373 = vst.msk [vmem:[%s603_s15 + $0x8] sm:$0xff] %vm655_vm1, %v1371_v23 }
 0x819 PF: > { %s28_s29 = sadd.s32 1, %s1990_s29  }
 0x81a   : > { %p25_p13 = scmp.ge.s32.totalorder %s28_s29, 4  }
 0x81c   :  { %27 = sbr.rel (!%p25_p13) target bundleno = 4 (0x4), region = 140 }
 0x821   :  { %1395 = vsyncpa [#allocation3], 1 }
 0x822   :  { %1397 = vsyncpa [#allocation3 + $0x1], 1 }
 0x823   :  { %1398 = vsyncpa [#allocation5], 1 }
 0x824   :  { %1399 = vsyncpa [#allocation8], 1 }
 0x825   :  { %1400 = vsyncpa [#allocation11], 1 }

// kernel: finetuned_sam2_forward.26
= control target key start
LH: loop header
LB: loop body
LE: loop exit
PB: predicated region body
PF: predicated region fallthrough
CT: control target
= control target key end

     0   :  { %19 = vsyncpa [#allocation3], 0  ;;  %s2271_s0 = inlined_call_operand.vmem [shape: bf16[2,16,64], index: 0, kind: input, shape index: {}]   ;;  %s2272_s1 = inlined_call_operand.vmem [shape: bf16[2,9,64], index: 1, kind: input, shape index: {}]   ;;  %s2273_s2 = inlined_call_operand.vmem [shape: bf16[2,9,64], index: 2, kind: input, shape index: {}]   ;;  %s2274_s3 = inlined_call_operand.vmem [shape: f32[2,16,64], index: 3, kind: input, shape index: {}]   ;;  %s2275_s4 = inlined_call_operand.vmem [shape: bf16[64,32], index: 4, kind: input, shape index: {}]   ;;  %s2276_s5 = inlined_call_operand.vmem [shape: f32[1,32], index: 5, kind: input, shape index: {}]   ;;  %s2277_s6 = inlined_call_operand.vmem [shape: bf16[64,32], index: 6, kind: input, shape index: {}]   ;;  %s2278_s7 = inlined_call_operand.hbm [shape: f32[1,32], index: 7, kind: input, shape index: {}]   ;;  %s2279_s8 = inlined_call_operand.vmem [shape: bf16[64,32], index: 8, kind: input, shape index: {}]   ;;  %s2280_s9 = inlined_call_operand.hbm [shape: f32[1,32], index: 9, kind: input, shape index: {}]   ;;  %s2281_s10 = inlined_call_operand.vmem [shape: bf16[32,64], index: 10, kind: input, shape index: {}]   ;;  %s2282_s11 = inlined_call_operand.hbm [shape: f32[1,64], index: 11, kind: input, shape index: {}]   ;;  %s2283_s12 = inlined_call_operand.hbm [shape: f32[1,64], index: 12, kind: input, shape index: {}]   ;;  %s2284_s13 = inlined_call_operand.hbm [shape: f32[1,64], index: 13, kind: input, shape index: {}]   ;;  %s2285_s14 = inlined_call_operand.vmem [shape: f32[2,16,64], index: 14, kind: output, shape index: {}]  }
   0x1   :  { %20 = vsyncpa [#allocation5], 0 }
   0x2   :  { %21 = vsyncpa [#allocation8], 0  ;;  %s2011_s29 = smov 0  }
   0x3 LB: > { %s1927_s30 = smov [#allocation4]   ;;  %s2017_s16 = sadd.s32 4294967295, %s1925_s29   ;;  %s1925_s29 = sphi %s2011_s29, %s27_s29  }
   0x4   : > { %s408_s15 = sshll.u32 %s1927_s30, 4  ;;  %p1504_p0 = scmp.ge.s32.totalorder %s1925_s29, 1  ;;  %s409_s15 = int_to_ptr.vmem [resolvable:$true] %s408_s15 }
   0x5   : > { %p372_p1 = scmp.lt.s32.totalorder %s1925_s29, 3  ;;  %p1713_p2 = scmp.eq.s32.totalorder %s2017_s16, 0 }
   0x6   : > { %s1928_s18 = smov [#allocation7]   ;;  %s1929_s20 = smov [#allocation2]  }
   0x7   : > { %p2022_p3 = pnand %p1504_p0, %p372_p1  ;;  %s433_s19 = sshll.u32 %s1928_s18, 4  ;;  %s2028_s19 = int_to_ptr.vmem [resolvable:$true] %s433_s19 }
   0x8   : > { %s394_s21 = sshll.u32 %s1929_s20, 4  ;;  %s1930_s23 = smov [#allocation6]   ;;  %s2036_s21 = int_to_ptr.vmem [resolvable:$true] %s394_s21 }
   0x9   : > { %p1697_p4 = pneg %p2022_p3  ;;  %s422_s24 = sshll.u32 %s1930_s23, 4  ;;  %s2038_s24 = int_to_ptr.vmem [resolvable:$true] %s422_s24 }
   0xa   : > { %s1788_s26 = scalar_lea.vmem %s409_s15, 16  ;;  %s1795_s27 = scalar_lea.vmem %s409_s15, 32 }
   0xb   : > { %p2032_p5 = pnand %p1713_p2, %p1697_p4  ;;  %p1789_p7 = scmp.ne.s32.totalorder %s409_s15, %s1788_s26 }
   0xc   : > { %p1796_p10 = scmp.lt.s32.totalorder %s409_s15, %s409_s15  ;;  %p1797_p11 = scmp.lt.s32.totalorder %s1795_s27, %s1788_s26 }
   0xd   : > { %p2042_p6 = pneg %p2032_p5 }
   0xe   : > { %p1798_p12 = por %p1797_p11, %p1796_p10 }
   0xf   : > { %p1791_p8 = pnand %p1789_p7, %p2042_p6 }
  0x11   : > { %p1792_p9 = pneg %p1791_p8 }
  0x13   : > { %p1799_p13 = pnand %p1798_p12, %p1792_p9 }
  0x15   : > { %1802 = shalt.err (!%p1799_p13)
}
  0x16   : > { %1703 = dma.hbm_to_vmem [thread:$0]  (!%p2032_p5), %s2280_s9, 16, %s409_s15, [#allocation5]  }
  0x17   : > { %s1814_s18 = scalar_lea.vmem %s2028_s19, 16  ;;  %s1821_s20 = scalar_lea.vmem %s2028_s19, 32 }
  0x18   : > { %p1815_p0 = scmp.ne.s32.totalorder %s2028_s19, %s1814_s18  ;;  %p1822_p7 = scmp.lt.s32.totalorder %s2028_s19, %s2028_s19 }
  0x19   : > { %p1823_p8 = scmp.lt.s32.totalorder %s1821_s20, %s1814_s18 }
  0x1a   : > { %p1817_p1 = pnand %p1815_p0, %p2042_p6 }
  0x1b   : > { %p1824_p9 = por %p1823_p8, %p1822_p7 }
  0x1c   : > { %p1818_p4 = pneg %p1817_p1 }
  0x1e   : > { %p1825_p10 = pnand %p1824_p9, %p1818_p4 }
  0x20   : > { %1828 = shalt.err (!%p1825_p10)
}
  0x21   : > { %1709 = dma.hbm_to_vmem [thread:$0]  (!%p2032_p5), %s2283_s12, 16, %s2028_s19, [#allocation8]  }
  0x22   : > { %s1840_s15 = scalar_lea.vmem %s2036_s21, 16  ;;  %s1847_s27 = scalar_lea.vmem %s2036_s21, 32 }
  0x23   : > { %p1841_p11 = scmp.ne.s32.totalorder %s2036_s21, %s1840_s15  ;;  %p1848_p0 = scmp.lt.s32.totalorder %s2036_s21, %s2036_s21 }
  0x24   : > { %p1849_p1 = scmp.lt.s32.totalorder %s1847_s27, %s1840_s15 }
  0x25   : > { %p1843_p12 = pnand %p1841_p11, %p2042_p6 }
  0x26   : > { %p1850_p4 = por %p1849_p1, %p1848_p0 }
  0x27   : > { %p1844_p13 = pneg %p1843_p12 }
  0x29   : > { %p1851_p7 = pnand %p1850_p4, %p1844_p13 }
  0x2b   : > { %1854 = shalt.err (!%p1851_p7)
}
  0x2c   : > { %1700 = dma.hbm_to_vmem [thread:$0]  (!%p2032_p5), %s2278_s7, 16, %s2036_s21, [#allocation3]  }
  0x2d   : > { %s1866_s19 = scalar_lea.vmem %s2038_s24, 16  ;;  %s1873_s18 = scalar_lea.vmem %s2038_s24, 32 }
  0x2e   : > { %p1867_p8 = scmp.ne.s32.totalorder %s2038_s24, %s1866_s19  ;;  %p1874_p11 = scmp.lt.s32.totalorder %s2038_s24, %s2038_s24 }
  0x2f   : > { %p1875_p12 = scmp.lt.s32.totalorder %s1873_s18, %s1866_s19 }
  0x30   : > { %p1869_p9 = pnand %p1867_p8, %p2042_p6 }
  0x31   : > { %p1876_p13 = por %p1875_p12, %p1874_p11 }
  0x32   : > { %p1870_p10 = pneg %p1869_p9 }
  0x34   : > { %p1877_p0 = pnand %p1876_p13, %p1870_p10 }
  0x36   : > { %1880 = shalt.err (!%p1877_p0)
}
  0x37   : > { %1706 = dma.hbm_to_vmem [thread:$0]  (!%p2032_p5), %s2282_s11, 16, %s2038_s24, [#allocation5]  }
  0x38   : > { %s1931_s21 = smov [#allocation9]  }
  0x39   : > { %s444_s26 = sshll.u32 %s1931_s21, 4  ;;  %s445_s26 = int_to_ptr.vmem [resolvable:$true] %s444_s26 }
  0x3a   : > { %s1892_s15 = scalar_lea.vmem %s445_s26, 16  ;;  %s1899_s27 = scalar_lea.vmem %s445_s26, 32 }
  0x3b   : > { %p1893_p1 = scmp.ne.s32.totalorder %s445_s26, %s1892_s15  ;;  %p1900_p8 = scmp.lt.s32.totalorder %s445_s26, %s445_s26 }
  0x3c   : > { %p1901_p9 = scmp.lt.s32.totalorder %s1899_s27, %s1892_s15 }
  0x3d   : > { %p1895_p4 = pnand %p1893_p1, %p2042_p6 }
  0x3e   : > { %p1902_p10 = por %p1901_p9, %p1900_p8 }
  0x3f   : > { %p1896_p7 = pneg %p1895_p4 }
  0x41   : > { %p1903_p11 = pnand %p1902_p10, %p1896_p7 }
  0x43   : > { %1906 = shalt.err (!%p1903_p11)
}
  0x44   : > { %1712 = dma.hbm_to_vmem [thread:$0]  (!%p2032_p5), %s2284_s13, 16, %s445_s26, [#allocation8]  }
  0x45   : > { %489 = sbr.rel (%p2022_p3) target bundleno = 2055 (0x807), region = 76 }
  0x4a   : > { %1912 = dma.done.wait (%p1713_p2), [#allocation3], 16  }
  0x4b   : > { %1914 = vsyncadd (%p1713_p2), [#allocation3], 4294967280 }
  0x4c   : > { %1916 = dma.done.wait (%p1713_p2), [#allocation5], 32  }
  0x4d   : > { %1918 = vsyncadd (%p1713_p2), [#allocation5], 4294967264 }
  0x4e   : > { %1920 = dma.done.wait (%p1713_p2), [#allocation8], 32  }
  0x4f   : > { %1922 = vsyncadd (%p1713_p2), [#allocation8], 4294967264  ;;  %v1932_v0 = vmov 0.0   ;;  %vm1933_vm0 = vmmov 0   ;;  %p566_p3 = scmp.lt.s32.totalorder %s2017_s16, 1  ;;  %v1740_v1 = vld [vmem:[%s2277_s6 + $0x18] sm:$0xff]  }
  0x50   : > { %1615 = vmatprep.subr.bf16.mxu1 %v1932_v0  ;;  %1603 = vmatprep.subr.bf16.mxu0 %v1932_v0  ;;  %v1741_v2 = vld [vmem:[%s2275_s4 + $0x18] sm:$0xff]   ;;  %v1742_v3 = vld [vmem:[%s2277_s6 + $0x10] sm:$0xff]   ;;  %v1744_v5 = vld [vmem:[%s2277_s6 + $0x8] sm:$0xff]   ;;  %vm642_vm1 = vcmask 523264   ;;  %s1934_s26 = smov 112   ;;  %vm863_vm2 = vcmask 130048  }
  0x51   : > { %1623 = vmatprep.mubr.msk.bf16.mxu1 %vm1933_vm0, %v1932_v0  ;;  %1611 = vmatprep.mubr.msk.bf16.mxu0 %vm1933_vm0, %v1932_v0  ;;  %s2290_s16 = smov (!%p566_p3, %s2017_s16), 1  ;;  %v1743_v4 = vld [vmem:[%s2275_s4 + $0x10] sm:$0xff]   ;;  %v1745_v6 = vld [vmem:[%s2275_s4 + $0x8] sm:$0xff]   ;;  %v1746_v7 = vld [vmem:[%s2277_s6] sm:$0xff]   ;;  %vm953_vm3 = vcmask 72704   ;;  %vm981_vm4 = vcmask 1043456  }
  0x52   : > { %1616 = vmatpush3.bf16.msra.mxu1 %v1740_v1  ;;  %1604 = vmatpush3.bf16.msra.mxu0 %v1741_v2  ;;  %s2138_s21 = sshll.u32 %s2290_s16, 3  ;;  %v1747_v8 = vld [vmem:[%s2275_s4] sm:$0xff]   ;;  %v1750_v11 = vld [vmem:[%s2279_s8 + $0x18] sm:$0xff]   ;;  %v1751_v12 = vld [vmem:[%s2279_s8 + $0x10] sm:$0xff]   ;;  %vm982_vm5 = vcmask 1044480   ;;  %v1935_v44 = vmov 65535  }
  0x53   : > { %1617 = vmatprep.subr.bf16.mxu1 %v1932_v0  ;;  %1605 = vmatprep.subr.bf16.mxu0 %v1932_v0  ;;  %s575_s22 = scalar_lea.vmem %s2272_s1, %s2138_s21  ;;  %s570_s19 = scalar_lea.vmem %s2271_s0, %s2138_s21  ;;  %v1752_v13 = vld [vmem:[%s2279_s8 + $0x8] sm:$0xff]   ;;  %v1534_v14 = vld [vmem:[#allocation2] ss:$0 sm:$0xff]  ;;  %v1541_v38 = vld [vmem:[#allocation4] ss:$0 sm:$0xff]  ;;  %v983_v45 = vsel %vm981_vm4, 4294967295, %v1935_v44 }
  0x54   : > { %v1748_v9 = vld [vmem:[%s575_s22] sm:$0x1f]   ;;  %s580_s17 = scalar_lea.vmem %s2273_s2, %s2138_s21  ;;  %v2212_v46 = vsel %vm982_vm5, %v983_v45, 0 }
  0x55   : > { %v1749_v10 = vld [vmem:[%s570_s19] sm:$0xff]  }
  0x56   : > { %1618 = vmatpush3.bf16.msra.mxu1 %v1742_v3  ;;  %1606 = vmatpush3.bf16.msra.mxu0 %v1743_v4  ;;  %v1527_v15 = vld [vmem:[%s2276_s5] ss:$0 sm:$0xff] }
  0x57   : > { %1619 = vmatprep.subr.bf16.mxu1 %v1932_v0  ;;  %1607 = vmatprep.subr.bf16.mxu0 %v1932_v0  ;;  %v1753_v16 = vld [vmem:[%s2279_s8] sm:$0xff]  }
  0x58   : > { %v1754_v22 = vld [vmem:[%s580_s17] sm:$0x1f]   ;;  %s1570_s17 = sshll.u32 %s2290_s16, 4 }
  0x59   : > { %s585_s25 = scalar_lea.vmem %s2274_s3, %s1570_s17  ;;  %s590_s20 = scalar_lea.vmem %s2285_s14, %s1570_s17 }
  0x5a   : > { %1620 = vmatpush3.bf16.msra.mxu1 %v1744_v5  ;;  %1608 = vmatpush3.bf16.msra.mxu0 %v1745_v6 }
  0x5b   : > { %1621 = vmatprep.subr.bf16.mxu1 %v1932_v0  ;;  %1609 = vmatprep.subr.bf16.mxu0 %v1932_v0 }
  0x5e   : > { %1622 = vmatpush3.bf16.msra.mxu1 %v1746_v7  ;;  %1610 = vmatpush3.bf16.msra.mxu0 %v1747_v8 }
  0x5f   : > { %1627 = vmatprep.subr.bf16.mxu0 %v1932_v0 }
  0x61   : > { %1624 = vmatmul.mubr.msk.bf16.vlgmr.msra.gmra.mxu1 %vm642_vm1, %v1748_v9  ;;  %1612 = vmatmul.mubr.msk.bf16.vlgmr.msra.gmra.mxu0 %vm642_vm1, %v1749_v10 }
  0x62   : > { %1635 = vmatprep.mubr.msk.bf16.mxu0 %vm1933_vm0, %v1932_v0  ;;  %1628 = vmatpush3.bf16.msra.mxu0 %v1750_v11 }
  0x63   : > { %1629 = vmatprep.subr.bf16.mxu0 %v1932_v0 }
  0x66   : > { %1630 = vmatpush3.bf16.msra.mxu0 %v1751_v12 }
  0x67   : > { %1631 = vmatprep.subr.bf16.mxu0 %v1932_v0 }
  0x6a   : > { %1632 = vmatpush3.bf16.msra.mxu0 %v1752_v13 }
  0x6b   : > { %1633 = vmatprep.subr.bf16.mxu0 %v1932_v0 }
  0x6e   : > { %1634 = vmatpush3.bf16.msra.mxu0 %v1753_v16 }
  0x6f   : > { %1659 = vmatprep.subr.bf16.mxu0 %v1932_v0 }
  0x71   : > { %1636 = vmatmul.mubr.msk.bf16.vlgmr.msra.gmra.mxu0 %vm642_vm1, %v1754_v22 }
  0x72   : > { %1661 = vmatprep.mubr.msk.bf16.mxu0 %vm1933_vm0, %v1932_v0 }
 0x121   : > { %v768_v17 = vpop.f32.mrf.mxu1  ;;  %v680_v19 = vpop.f32.mrf.mxu0 }
 0x122   : > { %v769_v18 = vadd.f32 %v1534_v14, %v768_v17  ;;  %v2191_v21 = vadd.f32 %v1527_v15, %v680_v19 }
 0x123   : > { %v1625_v20 = vpop.f32.mrf.mxu1  ;;  %v1613_v23 = vpop.f32.mrf.mxu0 }
 0x124   : > { %1036 = vrot.lane.b32.xlu1 %v769_v18, %s1934_s26  ;;  %1643 = vmatprep.mubr.msk.f32.mxu1 %vm863_vm2, %v2191_v21 }
 0x125   : > { %v771_v24 = vpop.f32.mrf.mxu1  ;;  %v683_v26 = vpop.f32.mrf.mxu0 }
 0x126   : > { %v772_v25 = vadd.f32 %v1534_v14, %v771_v24  ;;  %v684_v29 = vadd.f32 %v1527_v15, %v683_v26 }
 0x127   : > { %v1626_v27 = vpop.f32.mrf.mxu1  ;;  %v1614_v28 = vpop.f32.mrf.mxu0 }
 0x128   : > { %1639 = vmatprep.subr.msk.mxu1 %vm863_vm2, %v772_v25 }
 0x129   : > { %1640 = vmatpush3.xpose.msk.msra.mxu1 %vm863_vm2, %v772_v25 }
 0x12a   : > { %1641 = vmatprep.subr.msk.mxu1 %vm863_vm2, %v769_v18 }
 0x12d   : > { %1642 = vmatpush3.xpose.msk.msra.mxu1 %vm863_vm2, %v769_v18 }
 0x12e   : > { %1646 = vmatprep.subr.bf16.mxu1 %v1932_v0 }
 0x130   : > { %1644 = vmatmul.mubr.msk.f32.vlgmr.msra.gmra.mxu1 %vm863_vm2, %v684_v29 }
 0x131   : > { %1648 = vmatprep.mubr.msk.bf16.mxu1 %vm1933_vm0, %v1932_v0  ;;  %v856_v30 = vpop.f32.mrf.mxu0 }
 0x132   : > { %v857_v39 = vadd.f32 %v1541_v38, %v856_v30 }
 0x133   : > { %v1637_v31 = vpop.f32.mrf.mxu0 }
 0x135   : > { %v859_v40 = vpop.f32.mrf.mxu0 }
 0x136   : > { %v860_v41 = vadd.f32 %v1541_v38, %v859_v40 }
 0x137   : > { %v1638_v42 = vpop.f32.mrf.mxu0 }
 0x138   : > { %v2210_v43 = vpack.c.bf16 %v860_v41, %v857_v39 }
 0x13a   : > { %v986_v47 = vand.u32 %v2212_v46, %v2210_v43 }
 0x13c   : > { %1647 = vmatpush3.bf16.msra.mxu1 %v986_v47  ;;  %v1301_v47 = vld [vmem:[%s585_s25] sm:$0xff] }
 0x196   : > { %v1037_v59 = vpop.permute.xlu1 %1036 }
 0x1f0   : > { %v1645_v32 = vpop.f32.mrf.mxu1 }
 0x1f1   : > { %v952_v35 = vmul.f32 0.25, %v1645_v32 }
 0x1f2   : > { %v942_v33 = vpop.f32.mrf.mxu1 }
 0x1f3   : > { %v951_v34 = vmul.f32 0.25, %v942_v33  ;;  %v957_v37 = vsel %vm953_vm3, %v952_v35, -inf }
 0x1f5   : > { %v954_v36 = vsel %vm953_vm3, %v951_v34, -inf }
 0x1f6   : > { %955 = vmax.xlane.f32.xlu0 %v954_v36 }
 0x1fa   : > { %958 = vmax.xlane.f32.xlu0 %v957_v37  ;;  %v1756_v37 = vld [vmem:[%s2281_s10 + $0x8] sm:$0xff]  }
 0x210   : > { %1038 = vrot.lane.b32.xlu0 %v772_v25, %s1934_s26 }
 0x27f   : > { %v956_v48 = vpop.xlane.xlu0 %955 }
 0x280   : > { %v960_v49 = vsub.f32 %v951_v34, %v956_v48 }
 0x282   : > { %v962_v52 = vmul.f32 1.442695, %v960_v49 }
 0x283   : > { %v959_v50 = vpop.xlane.xlu0 %958 }
 0x284   : > { %v961_v51 = vsub.f32 %v952_v35, %v959_v50  ;;  %v1755_v35 = vld [vmem:[%s2281_s10] sm:$0xff]  }
 0x285   : > { %v1562_v50 = vld [vmem:[#allocation6] ss:$0 sm:$0xff] }
 0x286   : > { %v964_v53 = vmul.f32 1.442695, %v961_v51 }
 0x287   : > { %v1039_v54 = vpop.permute.xlu0 %1038 }
 0x288   : > { %1757 = vpow2.f32 %v964_v53  ;;  %1652 = vmatprep.subr.msk.mxu1 %vm863_vm2, %v1039_v54  ;;  %v1302_v53 = vld [vmem:[%s585_s25 + $0x8] sm:$0xff] }
 0x289   : > { %1759 = vpow2.f32 %v962_v52 }
 0x295   : > { %v1758_v55 = vpop.eup %1757 }
 0x296   : > { %v969_v56 = vsel %vm953_vm3, %v1758_v55, 0.0  ;;  %v1760_v57 = vpop.eup %1759 }
 0x297   : > { %970 = vadd.xlane.f32.xlu1 %v969_v56  ;;  %v966_v58 = vsel %vm953_vm3, %v1760_v57, 0.0 }
 0x29b   : > { %967 = vadd.xlane.f32.xlu1 %v966_v58 }
 0x2ac   : > { %1032 = vrot.lane.b32.xlu1 %v2191_v21, %s1934_s26 }
 0x2b0   : > { %1034 = vrot.lane.b32.xlu1 %v684_v29, %s1934_s26 }
 0x320   : > { %v971_v60 = vpop.xlane.xlu1 %970 }
 0x321   : > { %1761 = vrcp.f32 %v971_v60 }
 0x324   : > { %v968_v61 = vpop.xlane.xlu1 %967 }
 0x325   : > { %1763 = vrcp.f32 %v968_v61 }
 0x328   : > { %v1033_v4 = vpop.permute.xlu1 %1032 }
 0x32c   : > { %v1035_v5 = vpop.permute.xlu1 %1034 }
 0x32e   : > { %v1762_v62 = vpop.eup %1761 }
 0x32f   : > { %v975_v2 = vmul.f32 %v1762_v62, %v1758_v55 }
 0x332   : > { %v1764_v63 = vpop.eup %1763 }
 0x333   : > { %v973_v1 = vmul.f32 %v1764_v63, %v1760_v57 }
 0x335   : > { %v976_v3 = vpack.c.bf16 %v975_v2, %v973_v1 }
 0x337   : > { %1649 = vmatmul.mubr.msk.bf16.vlgmr.msra.gmra.mxu1 %vm953_vm3, %v976_v3 }
 0x338   : > { %1653 = vmatpush3.xpose.msk.msra.mxu1 %vm863_vm2, %v1039_v54  ;;  %1656 = vmatprep.mubr.msk.f32.mxu1 %vm863_vm2, %v1033_v4 }
 0x339   : > { %1654 = vmatprep.subr.msk.mxu1 %vm863_vm2, %v1037_v59 }
 0x33c   : > { %1655 = vmatpush3.xpose.msk.msra.mxu1 %vm863_vm2, %v1037_v59 }
 0x33d   : > { %1665 = vmatprep.subr.bf16.mxu1 %v1932_v0 }
 0x33f   : > { %1657 = vmatmul.mubr.msk.f32.vlgmr.msra.gmra.mxu1 %vm863_vm2, %v1035_v5 }
 0x340   : > { %1667 = vmatprep.mubr.msk.bf16.mxu1 %vm1933_vm0, %v1932_v0  ;;  %1666 = vmatpush3.bf16.msra.mxu1 %v1756_v37 }
 0x3f7   : > { %v1022_v6 = vpop.f32.mrf.mxu1 }
 0x3f9   : > { %v1650_v7 = vpop.f32.mrf.mxu1 }
 0x3fb   : > { %v1025_v8 = vpop.f32.mrf.mxu1 }
 0x3fc   : > { %v1029_v9 = vpack.c.bf16 %v1025_v8, %v1022_v6 }
 0x3fd   : > { %v1651_v10 = vpop.f32.mrf.mxu1 }
 0x3ff   : > { %v1658_v11 = vpop.f32.mrf.mxu1 }
 0x400   : > { %v1124_v12 = vmul.f32 0.25, %v1658_v11 }
 0x401   : > { %v1114_v13 = vpop.f32.mrf.mxu1 }
 0x402   : > { %v1123_v14 = vmul.f32 0.25, %v1114_v13  ;;  %v1128_v15 = vsel %vm953_vm3, %v1124_v12, -inf }
 0x403   : > { %1129 = vmax.xlane.f32.xlu1 %v1128_v15  ;;  %v1563_v15 = vld [vmem:[#allocation7] ss:$0 sm:$0xff] }
 0x404   : > { %v1125_v16 = vsel %vm953_vm3, %v1123_v14, -inf }
 0x405   : > { %1126 = vmax.xlane.f32.xlu0 %v1125_v16 }
 0x48c   : > { %v1130_v17 = vpop.xlane.xlu1 %1129 }
 0x48d   : > { %v1132_v18 = vsub.f32 %v1124_v12, %v1130_v17  ;;  %v1564_v17 = vld [vmem:[#allocation9] ss:$0 sm:$0xff] }
 0x48e   : > { %v1127_v19 = vpop.xlane.xlu0 %1126 }
 0x48f   : > { %v1135_v20 = vmul.f32 1.442695, %v1132_v18  ;;  %v1131_v21 = vsub.f32 %v1123_v14, %v1127_v19 }
 0x491   : > { %1765 = vpow2.f32 %v1135_v20  ;;  %v1133_v22 = vmul.f32 1.442695, %v1131_v21 }
 0x493   : > { %1767 = vpow2.f32 %v1133_v22 }
 0x49e   : > { %v1766_v23 = vpop.eup %1765 }
 0x49f   : > { %v1140_v24 = vsel %vm953_vm3, %v1766_v23, 0.0 }
 0x4a0   : > { %v1768_v25 = vpop.eup %1767  ;;  %1141 = vadd.xlane.f32.xlu0 %v1140_v24 }
 0x4a1   : > { %v1137_v26 = vsel %vm953_vm3, %v1768_v25, 0.0 }
 0x4a4   : > { %1138 = vadd.xlane.f32.xlu0 %v1137_v26 }
 0x4ba   : > { %1149 = vrot.lane.b32.xlu0 %v2210_v43, %s1934_s26 }
 0x529   : > { %v1142_v27 = vpop.xlane.xlu0 %1141 }
 0x52a   : > { %1769 = vrcp.f32 %v1142_v27 }
 0x52d   : > { %v1139_v28 = vpop.xlane.xlu0 %1138 }
 0x52e   : > { %1771 = vrcp.f32 %v1139_v28 }
 0x531   : > { %v1150_v29 = vpop.permute.xlu0 %1149 }
 0x532   : > { %v1155_v30 = vand.u32 %v1150_v29, %v2212_v46 }
 0x534   : > { %1660 = vmatpush3.bf16.msra.mxu0 %v1155_v30 }
 0x535   : > { %1671 = vmatprep.subr.bf16.mxu0 %v1932_v0 }
 0x537   : > { %v1770_v31 = vpop.eup %1769 }
 0x538   : > { %v1146_v34 = vmul.f32 %v1770_v31, %v1766_v23 }
 0x53b   : > { %v1772_v32 = vpop.eup %1771 }
 0x53c   : > { %v1144_v33 = vmul.f32 %v1772_v32, %v1768_v25 }
 0x53e   : > { %v1147_v36 = vpack.c.bf16 %v1146_v34, %v1144_v33 }
 0x540   : > { %1662 = vmatmul.mubr.msk.bf16.vlgmr.msra.gmra.mxu0 %vm953_vm3, %v1147_v36 }
 0x541   : > { %1672 = vmatpush3.bf16.msra.mxu0 %v1755_v35  ;;  %1673 = vmatprep.mubr.msk.bf16.mxu0 %vm1933_vm0, %v1932_v0 }
 0x548   : > { %1674 = vmatmul.mubr.msk.bf16.vlgmr.msra.gmra.mxu0 %vm863_vm2, %v1029_v9 }
 0x600   : > { %v1191_v38 = vpop.f32.mrf.mxu0 }
 0x602   : > { %v1663_v39 = vpop.f32.mrf.mxu0 }
 0x604   : > { %v1194_v40 = vpop.f32.mrf.mxu0 }
 0x605   : > { %v1198_v41 = vpack.c.bf16 %v1194_v40, %v1191_v38 }
 0x606   : > { %v1664_v42 = vpop.f32.mrf.mxu0 }
 0x607   : > { %1668 = vmatmul.mubr.msk.bf16.vlgmr.msra.gmra.mxu1 %vm863_vm2, %v1198_v41 }
 0x608   : > { %v1294_v43 = vpop.f32.mrf.mxu0 }
 0x60a   : > { %v1675_v44 = vpop.f32.mrf.mxu0 }
 0x60c   : > { %v1297_v45 = vpop.f32.mrf.mxu0 }
 0x60e   : > { %v1676_v46 = vpop.f32.mrf.mxu0 }
 0x6c7   : > { %v1244_v0 = vpop.f32.mrf.mxu1 }
 0x6c8   : > { %v1295_v48 = vadd.f32 %v1294_v43, %v1244_v0 }
 0x6c9   : > { %v1669_v49 = vpop.f32.mrf.mxu1 }
 0x6ca   : > { %v1303_v51 = vadd.f32 %v1301_v47, %v1295_v48 }
 0x6cb   : > { %v1247_v52 = vpop.f32.mrf.mxu1 }
 0x6cc   : > { %v1298_v54 = vadd.f32 %v1297_v45, %v1247_v52  ;;  %v1312_v55 = vadd.f32 %v1562_v50, %v1303_v51 }
 0x6cd   : > { %v1670_v56 = vpop.f32.mrf.mxu1 }
 0x6ce   : > { %v1304_v57 = vadd.f32 %v1302_v53, %v1298_v54  ;;  %v1314_v58 = vsel %vm642_vm1, %v1312_v55, 0.0 }
 0x6cf   : > { %1315 = vadd.xlane.f32.xlu1 %v1314_v58 }
 0x6d0   : > { %v1313_v59 = vadd.f32 %v1562_v50, %v1304_v57 }
 0x6d2   : > { %v1317_v60 = vsel %vm642_vm1, %v1313_v59, 0.0 }
 0x6d3   : > { %1318 = vadd.xlane.f32.xlu1 %v1317_v60 }
 0x758   : > { %v1316_v61 = vpop.xlane.xlu1 %1315 }
 0x759   : > { %v1321_v62 = vmul.f32 0.015625, %v1316_v61 }
 0x75b   : > { %v1323_v63 = vsub.f32 %v1312_v55, %v1321_v62 }
 0x75c   : > { %v1319_v1 = vpop.xlane.xlu1 %1318 }
 0x75d   : > { %v1322_v2 = vmul.f32 0.015625, %v1319_v1  ;;  %v1325_v3 = vmul.f32 %v1323_v63, %v1323_v63 }
 0x75f   : > { %v1324_v4 = vsub.f32 %v1313_v59, %v1322_v2  ;;  %v1327_v5 = vsel %vm642_vm1, %v1325_v3, 0.0 }
 0x760   : > { %1328 = vadd.xlane.f32.xlu1 %v1327_v5 }
 0x761   : > { %v1326_v6 = vmul.f32 %v1324_v4, %v1324_v4 }
 0x763   : > { %v1330_v7 = vsel %vm642_vm1, %v1326_v6, 0.0 }
 0x764   : > { %1331 = vadd.xlane.f32.xlu1 %v1330_v7 }
 0x7e9   : > { %v1329_v8 = vpop.xlane.xlu1 %1328 }
 0x7ea   : > { %v1333_v9 = vmul.f32 0.015625, %v1329_v8 }
 0x7ec   : > { %v1335_v10 = vadd.f32 1e-05, %v1333_v9 }
 0x7ed   : > { %v1332_v11 = vpop.xlane.xlu1 %1331 }
 0x7ee   : > { %1773 = vrsqrt.f32 %v1335_v10  ;;  %v1334_v12 = vmul.f32 0.015625, %v1332_v11 }
 0x7f0   : > { %v1336_v13 = vadd.f32 1e-05, %v1334_v12 }
 0x7f2   : > { %1775 = vrsqrt.f32 %v1336_v13 }
 0x7fb   : > { %v1774_v14 = vpop.eup %1773 }
 0x7fc   : > { %v1339_v16 = vmul.f32 %v1774_v14, %v1323_v63 }
 0x7fe   : > { %v1348_v18 = vmul.f32 %v1563_v15, %v1339_v16 }
 0x7ff   : > { %v1776_v19 = vpop.eup %1775 }
 0x800   : > { %v1357_v20 = vadd.f32 %v1564_v17, %v1348_v18  ;;  %v1340_v21 = vmul.f32 %v1776_v19, %v1324_v4 }
 0x802   : > { %1359 = vst.msk [vmem:[%s590_s20] sm:$0xff] %vm642_vm1, %v1357_v20  ;;  %v1349_v22 = vmul.f32 %v1563_v15, %v1340_v21 }
 0x804   : > { %v1358_v23 = vadd.f32 %v1564_v17, %v1349_v22 }
 0x806   : > { %1360 = vst.msk [vmem:[%s590_s20 + $0x8] sm:$0xff] %vm642_vm1, %v1358_v23 }
 0x807 PF: > { %s27_s29 = sadd.s32 1, %s1925_s29  }
 0x808   : > { %p24_p2 = scmp.ge.s32.totalorder %s27_s29, 4  }
 0x80a   :  { %26 = sbr.rel (!%p24_p2) target bundleno = 3 (0x3), region = 136 }
 0x80f   :  { %1382 = vsyncpa [#allocation3], 1 }
 0x810   :  { %1384 = vsyncpa [#allocation3 + $0x1], 1 }
 0x811   :  { %1385 = vsyncpa [#allocation5], 1 }
 0x812   :  { %1386 = vsyncpa [#allocation8], 1 }

// kernel: finetuned_sam2_forward.27
= control target key start
LH: loop header
LB: loop body
LE: loop exit
PB: predicated region body
PF: predicated region fallthrough
CT: control target
= control target key end

     0   :  { %s1680_s29 = smov 0   ;;  %s1851_s0 = inlined_call_operand.vmem [shape: bf16[2,9,64], index: 0, kind: input, shape index: {}]   ;;  %s1852_s1 = inlined_call_operand.vmem [shape: bf16[2,16,64], index: 1, kind: input, shape index: {}]   ;;  %s1853_s2 = inlined_call_operand.vmem [shape: bf16[2,16,64], index: 2, kind: input, shape index: {}]   ;;  %s1854_s3 = inlined_call_operand.vmem [shape: f32[2,9,64], index: 3, kind: input, shape index: {}]   ;;  %s1855_s4 = inlined_call_operand.vmem [shape: bf16[64,32], index: 4, kind: input, shape index: {}]   ;;  %s1856_s5 = inlined_call_operand.vmem [shape: f32[1,32], index: 5, kind: input, shape index: {}]   ;;  %s1857_s6 = inlined_call_operand.vmem [shape: bf16[64,32], index: 6, kind: input, shape index: {}]   ;;  %s1858_s7 = inlined_call_operand.vmem [shape: f32[1,32], index: 7, kind: input, shape index: {}]   ;;  %s1859_s8 = inlined_call_operand.vmem [shape: bf16[64,32], index: 8, kind: input, shape index: {}]   ;;  %s1860_s9 = inlined_call_operand.vmem [shape: f32[1,32], index: 9, kind: input, shape index: {}]   ;;  %s1861_s10 = inlined_call_operand.vmem [shape: bf16[32,64], index: 10, kind: input, shape index: {}]   ;;  %s1862_s11 = inlined_call_operand.vmem [shape: f32[1,64], index: 11, kind: input, shape index: {}]   ;;  %s1863_s12 = inlined_call_operand.vmem [shape: f32[1,64], index: 12, kind: input, shape index: {}]   ;;  %s1864_s13 = inlined_call_operand.vmem [shape: f32[1,64], index: 13, kind: input, shape index: {}]   ;;  %s1865_s14 = inlined_call_operand.vmem [shape: f32[2,9,64], index: 14, kind: output, shape index: {}]  }
   0x1 LB: > { %s1381_s30 = sadd.s32 4294967295, %s1600_s29   ;;  %p1385_p0 = scmp.ge.s32.totalorder %s1600_s29, 1  ;;  %s1600_s29 = sphi %s1680_s29, %s24_s29  }
   0x2   : > { %p442_p1 = scmp.lt.s32.totalorder %s1600_s29, 3 }
   0x4   : > { %p443_p2 = pnand %p1385_p0, %p442_p1 }
   0x5   : > { %p503_p3 = scmp.lt.s32.totalorder (!%p443_p2), %s1381_s30, 1  ;;  %s1604_s26 = smov (!%p443_p2), 112  }
   0x6   : > { %446 = sbr.rel (%p443_p2) target bundleno = 1986 (0x7c2), region = 76 }
   0xb   : > { %v1557_v0 = vld [vmem:[%s1857_s6 + $0x18] sm:$0xff]   ;;  %v1602_v1 = vmov 0.0   ;;  %v1559_v3 = vld [vmem:[%s1857_s6 + $0x10] sm:$0xff]   ;;  %vm1603_vm0 = vmmov 0   ;;  %s1867_s30 = smov (!%p503_p3, %s1381_s30), 1  ;;  %v1561_v5 = vld [vmem:[%s1857_s6 + $0x8] sm:$0xff]  }
   0xc   : > { %1484 = vmatprep.subr.bf16.mxu1 %v1602_v1  ;;  %1472 = vmatprep.subr.bf16.mxu0 %v1602_v1  ;;  %v1558_v2 = vld [vmem:[%s1855_s4 + $0x18] sm:$0xff]   ;;  %v1560_v4 = vld [vmem:[%s1855_s4 + $0x10] sm:$0xff]   ;;  %s1714_s25 = sshll.u32 %s1867_s30, 3  ;;  %v1562_v6 = vld [vmem:[%s1855_s4 + $0x8] sm:$0xff]   ;;  %vm579_vm1 = vcmask 523264   ;;  %vm800_vm2 = vcmask 130048  }
   0xd   : > { %1485 = vmatpush3.bf16.msra.mxu1 %v1557_v0  ;;  %1492 = vmatprep.mubr.msk.bf16.mxu1 %vm1603_vm0, %v1602_v1  ;;  %s512_s16 = scalar_lea.vmem %s1852_s1, %s1714_s25  ;;  %s507_s19 = scalar_lea.vmem %s1851_s0, %s1714_s25  ;;  %v1563_v7 = vld [vmem:[%s1857_s6] sm:$0xff]   ;;  %v1567_v11 = vld [vmem:[%s1859_s8 + $0x18] sm:$0xff]   ;;  %v1568_v12 = vld [vmem:[%s1859_s8 + $0x10] sm:$0xff]   ;;  %vm893_vm3 = vcmask 122880   ;;  %vm1245_vm4 = vcmask 516096  }
   0xe   : > { %1473 = vmatpush3.bf16.msra.mxu0 %v1558_v2  ;;  %1486 = vmatprep.subr.bf16.mxu1 %v1602_v1  ;;  %v1564_v8 = vld [vmem:[%s1855_s4] sm:$0xff]   ;;  %s517_s15 = scalar_lea.vmem %s1853_s2, %s1714_s25  ;;  %v1569_v13 = vld [vmem:[%s1859_s8 + $0x8] sm:$0xff]  }
   0xf   : > { %1474 = vmatprep.subr.bf16.mxu0 %v1602_v1  ;;  %1480 = vmatprep.mubr.msk.bf16.mxu0 %vm1603_vm0, %v1602_v1  ;;  %v1565_v9 = vld [vmem:[%s512_s16] sm:$0xff]  }
  0x10   : > { %v1566_v10 = vld [vmem:[%s507_s19] sm:$0x1f]   ;;  %s1439_s19 = sshll.u32 %s1867_s30, 4 }
  0x11   : > { %1487 = vmatpush3.bf16.msra.mxu1 %v1559_v3  ;;  %v1403_v14 = vld [vmem:[%s1858_s7] ss:$0 sm:$0xff]  ;;  %s522_s22 = scalar_lea.vmem %s1854_s3, %s1439_s19  ;;  %s527_s17 = scalar_lea.vmem %s1865_s14, %s1439_s19 }
  0x12   : > { %1475 = vmatpush3.bf16.msra.mxu0 %v1560_v4  ;;  %1488 = vmatprep.subr.bf16.mxu1 %v1602_v1  ;;  %v1396_v15 = vld [vmem:[%s1856_s5] ss:$0 sm:$0xff] }
  0x13   : > { %1476 = vmatprep.subr.bf16.mxu0 %v1602_v1  ;;  %v1570_v16 = vld [vmem:[%s1859_s8] sm:$0xff]  }
  0x14   : > { %v1571_v22 = vld [vmem:[%s517_s15] sm:$0xff]  }
  0x15   : > { %1489 = vmatpush3.bf16.msra.mxu1 %v1561_v5  ;;  %v1410_v38 = vld [vmem:[%s1860_s9] ss:$0 sm:$0xff] }
  0x16   : > { %1477 = vmatpush3.bf16.msra.mxu0 %v1562_v6  ;;  %1490 = vmatprep.subr.bf16.mxu1 %v1602_v1 }
  0x17   : > { %1478 = vmatprep.subr.bf16.mxu0 %v1602_v1 }
  0x19   : > { %1491 = vmatpush3.bf16.msra.mxu1 %v1563_v7 }
  0x1a   : > { %1479 = vmatpush3.bf16.msra.mxu0 %v1564_v8 }
  0x1b   : > { %1496 = vmatprep.subr.bf16.mxu0 %v1602_v1 }
  0x1c   : > { %1493 = vmatmul.mubr.msk.bf16.vlgmr.msra.gmra.mxu1 %vm579_vm1, %v1565_v9 }
  0x1d   : > { %1481 = vmatmul.mubr.msk.bf16.vlgmr.msra.gmra.mxu0 %vm579_vm1, %v1566_v10 }
  0x1e   : > { %1504 = vmatprep.mubr.msk.bf16.mxu0 %vm1603_vm0, %v1602_v1  ;;  %1497 = vmatpush3.bf16.msra.mxu0 %v1567_v11 }
  0x1f   : > { %1498 = vmatprep.subr.bf16.mxu0 %v1602_v1 }
  0x22   : > { %1499 = vmatpush3.bf16.msra.mxu0 %v1568_v12 }
  0x23   : > { %1500 = vmatprep.subr.bf16.mxu0 %v1602_v1 }
  0x26   : > { %1501 = vmatpush3.bf16.msra.mxu0 %v1569_v13 }
  0x27   : > { %1502 = vmatprep.subr.bf16.mxu0 %v1602_v1 }
  0x2a   : > { %1503 = vmatpush3.bf16.msra.mxu0 %v1570_v16 }
  0x2b   : > { %1528 = vmatprep.subr.bf16.mxu0 %v1602_v1 }
  0x2d   : > { %1505 = vmatmul.mubr.msk.bf16.vlgmr.msra.gmra.mxu0 %vm579_vm1, %v1571_v22 }
  0x2e   : > { %1530 = vmatprep.mubr.msk.bf16.mxu0 %vm1603_vm0, %v1602_v1 }
  0xdc   : > { %v705_v17 = vpop.f32.mrf.mxu1 }
  0xdd   : > { %v706_v18 = vadd.f32 %v1403_v14, %v705_v17  ;;  %v617_v19 = vpop.f32.mrf.mxu0 }
  0xde   : > { %v1494_v20 = vpop.f32.mrf.mxu1  ;;  %v618_v21 = vadd.f32 %v1396_v15, %v617_v19 }
  0xdf   : > { %966 = vrot.lane.b32.xlu1 %v706_v18, %s1604_s26  ;;  %v1482_v23 = vpop.f32.mrf.mxu0 }
  0xe0   : > { %v708_v24 = vpop.f32.mrf.mxu1  ;;  %1512 = vmatprep.mubr.msk.f32.mxu1 %vm800_vm2, %v618_v21 }
  0xe1   : > { %v709_v25 = vadd.f32 %v1403_v14, %v708_v24  ;;  %v620_v26 = vpop.f32.mrf.mxu0 }
  0xe2   : > { %v1495_v27 = vpop.f32.mrf.mxu1  ;;  %v621_v29 = vadd.f32 %v1396_v15, %v620_v26 }
  0xe3   : > { %1508 = vmatprep.subr.msk.mxu1 %vm800_vm2, %v709_v25  ;;  %v1483_v28 = vpop.f32.mrf.mxu0 }
  0xe4   : > { %1509 = vmatpush3.xpose.msk.msra.mxu1 %vm800_vm2, %v709_v25 }
  0xe5   : > { %1510 = vmatprep.subr.msk.mxu1 %vm800_vm2, %v706_v18 }
  0xe8   : > { %1511 = vmatpush3.xpose.msk.msra.mxu1 %vm800_vm2, %v706_v18 }
  0xe9   : > { %1515 = vmatprep.subr.bf16.mxu1 %v1602_v1 }
  0xeb   : > { %1513 = vmatmul.mubr.msk.f32.vlgmr.msra.gmra.mxu1 %vm800_vm2, %v621_v29 }
  0xec   : > { %1517 = vmatprep.mubr.msk.bf16.mxu1 %vm1603_vm0, %v1602_v1 }
  0xed   : > { %v793_v30 = vpop.f32.mrf.mxu0 }
  0xee   : > { %v794_v39 = vadd.f32 %v1410_v38, %v793_v30  ;;  %v1572_v30 = vld [vmem:[%s1861_s10] sm:$0xff]  }
  0xef   : > { %v1506_v31 = vpop.f32.mrf.mxu0 }
  0xf1   : > { %v796_v40 = vpop.f32.mrf.mxu0 }
  0xf2   : > { %v797_v41 = vadd.f32 %v1410_v38, %v796_v40 }
  0xf3   : > { %v1507_v42 = vpop.f32.mrf.mxu0 }
  0xf4   : > { %v1786_v43 = vpack.c.bf16 %v797_v41, %v794_v39  ;;  %v1229_v42 = vld [vmem:[%s522_s22] sm:$0xff] }
  0xf6   : > { %1516 = vmatpush3.bf16.msra.mxu1 %v1786_v43 }
 0x151   : > { %v967_v55 = vpop.permute.xlu1 %966 }
 0x1ab   : > { %v1514_v32 = vpop.f32.mrf.mxu1 }
 0x1ac   : > { %v889_v35 = vmul.f32 0.25, %v1514_v32  ;;  %v1573_v32 = vld [vmem:[%s1861_s10 + $0x8] sm:$0xff]  }
 0x1ad   : > { %v879_v33 = vpop.f32.mrf.mxu1 }
 0x1ae   : > { %v888_v34 = vmul.f32 0.25, %v879_v33  ;;  %v894_v37 = vsel %vm893_vm3, %v889_v35, -inf }
 0x1b0   : > { %v890_v36 = vsel %vm800_vm2, %v888_v34, -inf }
 0x1b1   : > { %891 = vmax.xlane.f32.xlu0 %v890_v36 }
 0x1b5   : > { %895 = vmax.xlane.f32.xlu0 %v894_v37 }
 0x1cb   : > { %968 = vrot.lane.b32.xlu0 %v709_v25, %s1604_s26 }
 0x23a   : > { %v892_v44 = vpop.xlane.xlu0 %891 }
 0x23b   : > { %v897_v45 = vsub.f32 %v888_v34, %v892_v44 }
 0x23d   : > { %v899_v48 = vmul.f32 1.442695, %v897_v45  ;;  %v1431_v45 = vld [vmem:[%s1862_s11] ss:$0 sm:$0xff] }
 0x23e   : > { %v896_v46 = vpop.xlane.xlu0 %895 }
 0x23f   : > { %v898_v47 = vsub.f32 %v889_v35, %v896_v46 }
 0x241   : > { %v901_v49 = vmul.f32 1.442695, %v898_v47 }
 0x242   : > { %v969_v50 = vpop.permute.xlu0 %968 }
 0x243   : > { %1574 = vpow2.f32 %v901_v49  ;;  %1521 = vmatprep.subr.msk.mxu1 %vm800_vm2, %v969_v50 }
 0x244   : > { %1576 = vpow2.f32 %v899_v48  ;;  %v1230_v48 = vld [vmem:[%s522_s22 + $0x8] sm:$0x1] }
 0x250   : > { %v1575_v51 = vpop.eup %1574 }
 0x251   : > { %v906_v52 = vsel %vm893_vm3, %v1575_v51, 0.0  ;;  %v1577_v53 = vpop.eup %1576 }
 0x252   : > { %907 = vadd.xlane.f32.xlu1 %v906_v52  ;;  %v903_v54 = vsel %vm800_vm2, %v1577_v53, 0.0 }
 0x256   : > { %904 = vadd.xlane.f32.xlu1 %v903_v54 }
 0x267   : > { %962 = vrot.lane.b32.xlu1 %v618_v21, %s1604_s26 }
 0x26b   : > { %964 = vrot.lane.b32.xlu1 %v621_v29, %s1604_s26 }
 0x2db   : > { %v908_v56 = vpop.xlane.xlu1 %907 }
 0x2dc   : > { %1578 = vrcp.f32 %v908_v56 }
 0x2df   : > { %v905_v57 = vpop.xlane.xlu1 %904 }
 0x2e0   : > { %1580 = vrcp.f32 %v905_v57 }
 0x2e3   : > { %v963_v63 = vpop.permute.xlu1 %962 }
 0x2e7   : > { %v965_v0 = vpop.permute.xlu1 %964 }
 0x2e9   : > { %v1579_v58 = vpop.eup %1578 }
 0x2ea   : > { %v912_v61 = vmul.f32 %v1579_v58, %v1575_v51 }
 0x2ed   : > { %v1581_v59 = vpop.eup %1580 }
 0x2ee   : > { %v910_v60 = vmul.f32 %v1581_v59, %v1577_v53 }
 0x2f0   : > { %v913_v62 = vpack.c.bf16 %v912_v61, %v910_v60 }
 0x2f2   : > { %1518 = vmatmul.mubr.msk.bf16.vlgmr.msra.gmra.mxu1 %vm800_vm2, %v913_v62 }
 0x2f3   : > { %1522 = vmatpush3.xpose.msk.msra.mxu1 %vm800_vm2, %v969_v50  ;;  %1525 = vmatprep.mubr.msk.f32.mxu1 %vm800_vm2, %v963_v63 }
 0x2f4   : > { %1523 = vmatprep.subr.msk.mxu1 %vm800_vm2, %v967_v55 }
 0x2f7   : > { %1524 = vmatpush3.xpose.msk.msra.mxu1 %vm800_vm2, %v967_v55 }
 0x2f8   : > { %1534 = vmatprep.subr.bf16.mxu1 %v1602_v1 }
 0x2fa   : > { %1526 = vmatmul.mubr.msk.f32.vlgmr.msra.gmra.mxu1 %vm800_vm2, %v965_v0 }
 0x2fb   : > { %1536 = vmatprep.mubr.msk.bf16.mxu1 %vm1603_vm0, %v1602_v1  ;;  %1535 = vmatpush3.bf16.msra.mxu1 %v1573_v32 }
 0x3b2   : > { %v952_v2 = vpop.f32.mrf.mxu1 }
 0x3b4   : > { %v1519_v3 = vpop.f32.mrf.mxu1 }
 0x3b6   : > { %v955_v4 = vpop.f32.mrf.mxu1 }
 0x3b7   : > { %v959_v5 = vpack.c.bf16 %v955_v4, %v952_v2 }
 0x3b8   : > { %v1520_v6 = vpop.f32.mrf.mxu1 }
 0x3ba   : > { %v1527_v7 = vpop.f32.mrf.mxu1 }
 0x3bb   : > { %v1054_v8 = vmul.f32 0.25, %v1527_v7 }
 0x3bc   : > { %v1044_v9 = vpop.f32.mrf.mxu1 }
 0x3bd   : > { %v1053_v10 = vmul.f32 0.25, %v1044_v9  ;;  %v1058_v11 = vsel %vm893_vm3, %v1054_v8, -inf }
 0x3be   : > { %1059 = vmax.xlane.f32.xlu1 %v1058_v11 }
 0x3bf   : > { %v1055_v12 = vsel %vm800_vm2, %v1053_v10, -inf }
 0x3c0   : > { %1056 = vmax.xlane.f32.xlu0 %v1055_v12  ;;  %v1433_v12 = vld [vmem:[%s1864_s13] ss:$0 sm:$0xff] }
 0x447   : > { %v1060_v13 = vpop.xlane.xlu1 %1059 }
 0x448   : > { %v1062_v14 = vsub.f32 %v1054_v8, %v1060_v13 }
 0x449   : > { %v1057_v15 = vpop.xlane.xlu0 %1056 }
 0x44a   : > { %v1065_v16 = vmul.f32 1.442695, %v1062_v14  ;;  %v1061_v17 = vsub.f32 %v1053_v10, %v1057_v15  ;;  %v1432_v10 = vld [vmem:[%s1863_s12] ss:$0 sm:$0xff] }
 0x44c   : > { %1582 = vpow2.f32 %v1065_v16  ;;  %v1063_v18 = vmul.f32 1.442695, %v1061_v17 }
 0x44e   : > { %1584 = vpow2.f32 %v1063_v18 }
 0x459   : > { %v1583_v19 = vpop.eup %1582 }
 0x45a   : > { %v1070_v20 = vsel %vm893_vm3, %v1583_v19, 0.0 }
 0x45b   : > { %v1585_v21 = vpop.eup %1584  ;;  %1071 = vadd.xlane.f32.xlu0 %v1070_v20 }
 0x45c   : > { %v1067_v22 = vsel %vm800_vm2, %v1585_v21, 0.0 }
 0x45f   : > { %1068 = vadd.xlane.f32.xlu0 %v1067_v22 }
 0x475   : > { %1079 = vrot.lane.b32.xlu0 %v1786_v43, %s1604_s26 }
 0x4e4   : > { %v1072_v23 = vpop.xlane.xlu0 %1071 }
 0x4e5   : > { %1586 = vrcp.f32 %v1072_v23 }
 0x4e8   : > { %v1069_v24 = vpop.xlane.xlu0 %1068 }
 0x4e9   : > { %1588 = vrcp.f32 %v1069_v24 }
 0x4ec   : > { %v1080_v25 = vpop.permute.xlu0 %1079 }
 0x4ed   : > { %1529 = vmatpush3.bf16.msra.mxu0 %v1080_v25 }
 0x4ee   : > { %1540 = vmatprep.subr.bf16.mxu0 %v1602_v1 }
 0x4f2   : > { %v1587_v26 = vpop.eup %1586 }
 0x4f3   : > { %v1076_v29 = vmul.f32 %v1587_v26, %v1583_v19 }
 0x4f6   : > { %v1589_v27 = vpop.eup %1588 }
 0x4f7   : > { %v1074_v28 = vmul.f32 %v1589_v27, %v1585_v21 }
 0x4f9   : > { %v1077_v31 = vpack.c.bf16 %v1076_v29, %v1074_v28 }
 0x4fb   : > { %1531 = vmatmul.mubr.msk.bf16.vlgmr.msra.gmra.mxu0 %vm800_vm2, %v1077_v31 }
 0x4fc   : > { %1541 = vmatpush3.bf16.msra.mxu0 %v1572_v30  ;;  %1542 = vmatprep.mubr.msk.bf16.mxu0 %vm1603_vm0, %v1602_v1 }
 0x503   : > { %1543 = vmatmul.mubr.msk.bf16.vlgmr.msra.gmra.mxu0 %vm800_vm2, %v959_v5 }
 0x5bb   : > { %v1119_v33 = vpop.f32.mrf.mxu0 }
 0x5bd   : > { %v1532_v34 = vpop.f32.mrf.mxu0 }
 0x5bf   : > { %v1122_v35 = vpop.f32.mrf.mxu0 }
 0x5c0   : > { %v1126_v36 = vpack.c.bf16 %v1122_v35, %v1119_v33 }
 0x5c1   : > { %v1533_v37 = vpop.f32.mrf.mxu0 }
 0x5c2   : > { %1537 = vmatmul.mubr.msk.bf16.vlgmr.msra.gmra.mxu1 %vm800_vm2, %v1126_v36 }
 0x5c3   : > { %v1222_v38 = vpop.f32.mrf.mxu0 }
 0x5c5   : > { %v1544_v39 = vpop.f32.mrf.mxu0 }
 0x5c7   : > { %v1225_v40 = vpop.f32.mrf.mxu0 }
 0x5c9   : > { %v1545_v41 = vpop.f32.mrf.mxu0 }
 0x682   : > { %v1172_v1 = vpop.f32.mrf.mxu1 }
 0x683   : > { %v1223_v43 = vadd.f32 %v1222_v38, %v1172_v1 }
 0x684   : > { %v1538_v44 = vpop.f32.mrf.mxu1 }
 0x685   : > { %v1231_v46 = vadd.f32 %v1229_v42, %v1223_v43 }
 0x686   : > { %v1175_v47 = vpop.f32.mrf.mxu1 }
 0x687   : > { %v1226_v49 = vadd.f32 %v1225_v40, %v1175_v47  ;;  %v1240_v50 = vadd.f32 %v1431_v45, %v1231_v46 }
 0x688   : > { %v1539_v51 = vpop.f32.mrf.mxu1 }
 0x689   : > { %v1232_v52 = vadd.f32 %v1230_v48, %v1226_v49  ;;  %v1242_v53 = vsel %vm579_vm1, %v1240_v50, 0.0 }
 0x68a   : > { %1243 = vadd.xlane.f32.xlu1 %v1242_v53 }
 0x68b   : > { %v1241_v54 = vadd.f32 %v1431_v45, %v1232_v52 }
 0x68d   : > { %v1246_v55 = vsel %vm1245_vm4, %v1241_v54, 0.0 }
 0x68e   : > { %1247 = vadd.xlane.f32.xlu1 %v1246_v55 }
 0x713   : > { %v1244_v56 = vpop.xlane.xlu1 %1243 }
 0x714   : > { %v1250_v57 = vmul.f32 0.015625, %v1244_v56 }
 0x716   : > { %v1252_v58 = vsub.f32 %v1240_v50, %v1250_v57 }
 0x717   : > { %v1248_v59 = vpop.xlane.xlu1 %1247 }
 0x718   : > { %v1251_v60 = vmul.f32 0.015625, %v1248_v59  ;;  %v1254_v61 = vmul.f32 %v1252_v58, %v1252_v58 }
 0x71a   : > { %v1253_v62 = vsub.f32 %v1241_v54, %v1251_v60  ;;  %v1256_v63 = vsel %vm579_vm1, %v1254_v61, 0.0 }
 0x71b   : > { %1257 = vadd.xlane.f32.xlu1 %v1256_v63 }
 0x71c   : > { %v1255_v0 = vmul.f32 %v1253_v62, %v1253_v62 }
 0x71e   : > { %v1259_v2 = vsel %vm1245_vm4, %v1255_v0, 0.0 }
 0x71f   : > { %1260 = vadd.xlane.f32.xlu1 %v1259_v2 }
 0x7a4   : > { %v1258_v3 = vpop.xlane.xlu1 %1257 }
 0x7a5   : > { %v1262_v4 = vmul.f32 0.015625, %v1258_v3 }
 0x7a7   : > { %v1264_v5 = vadd.f32 1e-05, %v1262_v4 }
 0x7a8   : > { %v1261_v6 = vpop.xlane.xlu1 %1260 }
 0x7a9   : > { %1590 = vrsqrt.f32 %v1264_v5  ;;  %v1263_v7 = vmul.f32 0.015625, %v1261_v6 }
 0x7ab   : > { %v1265_v8 = vadd.f32 1e-05, %v1263_v7 }
 0x7ad   : > { %1592 = vrsqrt.f32 %v1265_v8 }
 0x7b6   : > { %v1591_v9 = vpop.eup %1590 }
 0x7b7   : > { %v1268_v11 = vmul.f32 %v1591_v9, %v1252_v58 }
 0x7b9   : > { %v1277_v13 = vmul.f32 %v1432_v10, %v1268_v11 }
 0x7ba   : > { %v1593_v14 = vpop.eup %1592 }
 0x7bb   : > { %v1286_v15 = vadd.f32 %v1433_v12, %v1277_v13  ;;  %v1269_v16 = vmul.f32 %v1593_v14, %v1253_v62 }
 0x7bd   : > { %1288 = vst.msk [vmem:[%s527_s17] sm:$0xff] %vm579_vm1, %v1286_v15  ;;  %v1278_v17 = vmul.f32 %v1432_v10, %v1269_v16 }
 0x7bf   : > { %v1287_v18 = vadd.f32 %v1433_v12, %v1278_v17 }
 0x7c1   : > { %1289 = vst.msk [vmem:[%s527_s17 + $0x8] sm:$0x1] %vm1245_vm4, %v1287_v18 }
 0x7c2 PF: > { %s24_s29 = sadd.s32 1, %s1600_s29  }
 0x7c3   : > { %p21_p4 = scmp.ge.s32.totalorder %s24_s29, 4  }
 0x7c5   :  { %23 = sbr.rel (!%p21_p4) target bundleno = 1 (0x1), region = 115 }

// kernel: finetuned_sam2_forward.30
= control target key start
LH: loop header
LB: loop body
LE: loop exit
PB: predicated region body
PF: predicated region fallthrough
CT: control target
= control target key end

     0   :  { %s899_s24 = smov 0   ;;  %s954_s0 = inlined_call_operand.vmem [shape: bf16[4,2,64], index: 0, kind: input, shape index: {}]   ;;  %s955_s1 = inlined_call_operand.vmem [shape: bf16[4,64,64], index: 1, kind: input, shape index: {}]   ;;  %s956_s2 = inlined_call_operand.vmem [shape: f32[4,1,64], index: 2, kind: input, shape index: {}]   ;;  %s957_s3 = inlined_call_operand.vmem [shape: bf16[4,64,64], index: 3, kind: input, shape index: {}]   ;;  %s958_s4 = inlined_call_operand.vmem [shape: f32[4,1,64], index: 4, kind: input, shape index: {}]   ;;  %s959_s5 = inlined_call_operand.vmem [shape: bf16[4,64,8], index: 5, kind: input, shape index: {}]   ;;  %s960_s6 = inlined_call_operand.vmem [shape: f32[4,1,8], index: 6, kind: input, shape index: {}]   ;;  %s961_s7 = inlined_call_operand.vmem [shape: f32[4,2,8], index: 7, kind: output, shape index: {}]  }
   0x1 LB: > { %s741_s25 = sadd.s32 4294967295, %s855_s24   ;;  %p745_p0 = scmp.ge.s32.totalorder %s855_s24, 1  ;;  %s855_s24 = sphi %s899_s24, %s17_s24  }
   0x2   : > { %p289_p1 = scmp.lt.s32.totalorder %s855_s24, 5 }
   0x4   : > { %p290_p2 = pnand %p745_p0, %p289_p1 }
   0x5   : > { %p342_p3 = scmp.lt.s32.totalorder (!%p290_p2), %s741_s25, 3 }
   0x6   : > { %293 = sbr.rel (%p290_p2) target bundleno = 627 (0x273), region = 48 }
   0xb   : > { %v857_v0 = vmov 0.0   ;;  %vm858_vm0 = vmmov 0   ;;  %s963_s25 = smov (!%p342_p3, %s741_s25), 3  ;;  %vm414_vm1 = vcmask 523264   ;;  %vm626_vm2 = vcmask 58368  }
   0xc   : > { %791 = vmatprep.subr.bf16.mxu0 %v857_v0  ;;  %799 = vmatprep.mubr.msk.bf16.mxu0 %vm858_vm0, %v857_v0  ;;  %s773_s26 = sshll.u32 %s963_s25, 5  ;;  %s344_s15 = scalar_lea.vmem %s954_s0, %s963_s25 }
   0xd   : > { %803 = vmatprep.subr.bf16.mxu1 %v857_v0  ;;  %811 = vmatprep.mubr.msk.bf16.mxu1 %vm858_vm0, %v857_v0  ;;  %s349_s29 = scalar_lea.vmem %s955_s1, %s773_s26  ;;  %s357_s9 = scalar_lea.vmem %s957_s3, %s773_s26  ;;  %v374_v7 = vld [vmem:[%s344_s15] sm:$0x1] }
   0xe   : > { %v837_v1 = vld [vmem:[%s349_s29 + $0x18] sm:$0xff]   ;;  %v838_v2 = vld [vmem:[%s349_s29 + $0x10] sm:$0xff]   ;;  %v839_v4 = vld [vmem:[%s349_s29 + $0x8] sm:$0xff]   ;;  %s921_s12 = scalar_lea.vmem %s959_s5, %s773_s26  ;;  %s352_s18 = scalar_lea.vmem %s956_s2, %s963_s25 }
   0xf   : > { %792 = vmatpush3.bf16.msra.mxu0 %v837_v1  ;;  %v841_v3 = vld [vmem:[%s357_s9 + $0x18] sm:$0xff]   ;;  %v842_v5 = vld [vmem:[%s357_s9 + $0x10] sm:$0xff]   ;;  %v840_v6 = vld [vmem:[%s349_s29] sm:$0xff]   ;;  %s360_s21 = scalar_lea.vmem %s958_s4, %s963_s25  ;;  %s368_s26 = scalar_lea.vmem %s960_s6, %s963_s25 }
  0x10   : > { %793 = vmatprep.subr.bf16.mxu0 %v857_v0  ;;  %804 = vmatpush3.bf16.msra.mxu1 %v841_v3  ;;  %v843_v8 = vld [vmem:[%s357_s9 + $0x8] sm:$0xff]   ;;  %v844_v9 = vld [vmem:[%s357_s9] sm:$0xff]   ;;  %v845_v10 = vld [vmem:[%s921_s12 + $0x18] sm:$0xff]   ;;  %s752_s27 = sshll.u32 %s963_s25, 1 }
  0x11   : > { %805 = vmatprep.subr.bf16.mxu1 %v857_v0  ;;  %v846_v11 = vld [vmem:[%s921_s12 + $0x10] sm:$0xff]   ;;  %v753_v12 = vld [vmem:[%s352_s18] ss:$0 sm:$0xff]  ;;  %v847_v20 = vld [vmem:[%s921_s12 + $0x8] sm:$0xff]   ;;  %s372_s30 = scalar_lea.vmem %s961_s7, %s752_s27 }
  0x12   : > { %v848_v21 = vld [vmem:[%s921_s12] sm:$0xff]  }
  0x13   : > { %794 = vmatpush3.bf16.msra.mxu0 %v838_v2  ;;  %v759_v22 = vld [vmem:[%s360_s21] ss:$0 sm:$0xff] }
  0x14   : > { %795 = vmatprep.subr.bf16.mxu0 %v857_v0  ;;  %806 = vmatpush3.bf16.msra.mxu1 %v842_v5  ;;  %v765_v30 = vld [vmem:[%s368_s26] ss:$0 sm:$0xff] }
  0x15   : > { %807 = vmatprep.subr.bf16.mxu1 %v857_v0 }
  0x17   : > { %796 = vmatpush3.bf16.msra.mxu0 %v839_v4 }
  0x18   : > { %797 = vmatprep.subr.bf16.mxu0 %v857_v0  ;;  %808 = vmatpush3.bf16.msra.mxu1 %v843_v8 }
  0x19   : > { %809 = vmatprep.subr.bf16.mxu1 %v857_v0 }
  0x1b   : > { %798 = vmatpush3.bf16.msra.mxu0 %v840_v6 }
  0x1c   : > { %815 = vmatprep.subr.bf16.mxu0 %v857_v0  ;;  %810 = vmatpush3.bf16.msra.mxu1 %v844_v9 }
  0x1e   : > { %800 = vmatmul.mubr.msk.bf16.vlgmr.msra.gmra.mxu0 %vm414_vm1, %v374_v7 }
  0x1f   : > { %823 = vmatprep.mubr.msk.bf16.mxu0 %vm858_vm0, %v857_v0  ;;  %816 = vmatpush3.bf16.msra.mxu0 %v845_v10 }
  0x20   : > { %817 = vmatprep.subr.bf16.mxu0 %v857_v0 }
  0x23   : > { %818 = vmatpush3.bf16.msra.mxu0 %v846_v11 }
  0x24   : > { %819 = vmatprep.subr.bf16.mxu0 %v857_v0 }
  0x27   : > { %820 = vmatpush3.bf16.msra.mxu0 %v847_v20 }
  0x28   : > { %821 = vmatprep.subr.bf16.mxu0 %v857_v0 }
  0x2b   : > { %822 = vmatpush3.bf16.msra.mxu0 %v848_v21 }
  0xde   : > { %v452_v13 = vpop.f32.mrf.mxu0 }
  0xdf   : > { %v453_v14 = vadd.f32 %v753_v12, %v452_v13 }
  0xe0   : > { %v801_v15 = vpop.f32.mrf.mxu0 }
  0xe1   : > { %v458_v16 = vmax.f32 %v453_v14, 0.0 }
  0xe2   : > { %v455_v17 = vpop.f32.mrf.mxu0 }
  0xe3   : > { %v459_v18 = vpack.c.bf16 %v458_v16, %v458_v16 }
  0xe4   : > { %v802_v19 = vpop.f32.mrf.mxu0 }
  0xe5   : > { %812 = vmatmul.mubr.msk.bf16.vlgmr.msra.gmra.mxu1 %vm414_vm1, %v459_v18 }
 0x1a5   : > { %v536_v23 = vpop.f32.mrf.mxu1 }
 0x1a6   : > { %v537_v24 = vadd.f32 %v759_v22, %v536_v23 }
 0x1a7   : > { %v813_v25 = vpop.f32.mrf.mxu1 }
 0x1a8   : > { %v542_v26 = vmax.f32 %v537_v24, 0.0 }
 0x1a9   : > { %v539_v27 = vpop.f32.mrf.mxu1 }
 0x1aa   : > { %v543_v28 = vpack.c.bf16 %v542_v26, %v542_v26 }
 0x1ab   : > { %v814_v29 = vpop.f32.mrf.mxu1 }
 0x1ac   : > { %824 = vmatmul.mubr.msk.bf16.vlgmr.msra.gmra.mxu0 %vm414_vm1, %v543_v28 }
 0x26c   : > { %v620_v31 = vpop.f32.mrf.mxu0 }
 0x26d   : > { %v621_v32 = vadd.f32 %v765_v30, %v620_v31 }
 0x26e   : > { %v825_v33 = vpop.f32.mrf.mxu0 }
 0x26f   : > { %627 = vst.msk [vmem:[%s372_s30] sm:$0x3] %vm626_vm2, %v621_v32 }
 0x270   : > { %v623_v34 = vpop.f32.mrf.mxu0 }
 0x272   : > { %v826_v35 = vpop.f32.mrf.mxu0 }
 0x273 PF: > { %s17_s24 = sadd.s32 1, %s855_s24  }
 0x274   : > { %p14_p4 = scmp.ge.s32.totalorder %s17_s24, 6  }
 0x276   :  { %16 = sbr.rel (!%p14_p4) target bundleno = 1 (0x1), region = 96 }

// kernel: finetuned_sam2_forward.29
= control target key start
LH: loop header
LB: loop body
LE: loop exit
PB: predicated region body
PF: predicated region fallthrough
CT: control target
= control target key end

     0   :  { %vm86_vm0 = vcmask 130048   ;;  %vm208_vm1 = vcmask 261120   ;;  %s407_s1 = inlined_call_operand.vmem [shape: bf16[16,32], index: 1, kind: input, shape index: {}]   ;;  %s408_s0 = inlined_call_operand.vmem [shape: bf16[128,16], index: 0, kind: input, shape index: {}]   ;;  %s409_s2 = inlined_call_operand.vmem [shape: f32[1,32], index: 2, kind: input, shape index: {}]   ;;  %s410_s3 = inlined_call_operand.vmem [shape: f32[128,32], index: 3, kind: output, shape index: {}]  }
   0x1   :  { %v276_v0 = vld [vmem:[%s407_s1] sm:$0xff]   ;;  %v279_v3 = vld [vmem:[%s408_s0 + $0x8] sm:$0xff]   ;;  %v281_v5 = vld [vmem:[%s408_s0 + $0x10] sm:$0xff]  }
   0x2   :  { %v277_v1 = vld [vmem:[%s408_s0] sm:$0xff]   ;;  %256 = vmatprep.subr.bf16.mxu0 %v276_v0  ;;  %274 = vmatprep.subr.bf16.mxu1 %v276_v0  ;;  %v280_v4 = vld [vmem:[%s408_s0 + $0x28] sm:$0xff]   ;;  %v282_v6 = vld [vmem:[%s408_s0 + $0x30] sm:$0xff]  }
   0x3   :  { %v278_v2 = vld [vmem:[%s408_s0 + $0x20] sm:$0xff]   ;;  %257 = vmatpush3.bf16.msra.mxu0 %v276_v0  ;;  %275 = vmatpush3.bf16.msra.mxu1 %v276_v0  ;;  %v283_v7 = vld [vmem:[%s408_s0 + $0x18] sm:$0xff]  }
   0x4   :  { %258 = vmatprep.mubr.msk.bf16.mxu0 %vm86_vm0, %v277_v1  ;;  %266 = vmatprep.mubr.msk.bf16.mxu1 %vm86_vm0, %v278_v2  ;;  %v284_v8 = vld [vmem:[%s408_s0 + $0x38] sm:$0xff]   ;;  %v229_v9 = vld [vmem:[%s409_s2] ss:$0 sm:$0xff] }
   0x6   :  { %259 = vmatmul.mubr.msk.bf16.vlgmr.msra.gmra.mxu0 %vm86_vm0, %v279_v3  ;;  %267 = vmatmul.mubr.msk.bf16.vlgmr.msra.gmra.mxu1 %vm86_vm0, %v280_v4 }
   0x7   :  { %262 = vmatprep.mubr.msk.bf16.mxu0 %vm86_vm0, %v281_v5  ;;  %270 = vmatprep.mubr.msk.bf16.mxu1 %vm86_vm0, %v282_v6 }
   0xe   :  { %263 = vmatmul.mubr.msk.bf16.gmra.mxu0 %vm86_vm0, %v283_v7  ;;  %271 = vmatmul.mubr.msk.bf16.gmra.mxu1 %vm86_vm0, %v284_v8 }
  0xc6   :  { %v260_v10 = vpop.f32.mrf.mxu0  ;;  %v268_v11 = vpop.f32.mrf.mxu1 }
  0xc7   :  { %v154_v12 = vadd.f32 %v260_v10, %v229_v9  ;;  %v186_v13 = vadd.f32 %v268_v11, %v229_v9 }
  0xc8   :  { %v145_v14 = vpop.f32.mrf.mxu0  ;;  %v177_v15 = vpop.f32.mrf.mxu1 }
  0xc9   :  { %211 = vst.msk [vmem:[%s410_s3 + $0x10] sm:$0xff] %vm208_vm1, %v154_v12  ;;  %219 = vst.msk [vmem:[%s410_s3 + $0x50] sm:$0xff] %vm208_vm1, %v186_v13  ;;  %v146_v16 = vadd.f32 %v229_v9, %v145_v14  ;;  %v178_v17 = vadd.f32 %v229_v9, %v177_v15 }
  0xca   :  { %v261_v18 = vpop.f32.mrf.mxu0  ;;  %v269_v19 = vpop.f32.mrf.mxu1 }
  0xcb   :  { %209 = vst.msk [vmem:[%s410_s3] sm:$0xff] %vm208_vm1, %v146_v16  ;;  %217 = vst.msk [vmem:[%s410_s3 + $0x40] sm:$0xff] %vm208_vm1, %v178_v17  ;;  %v157_v20 = vadd.f32 %v261_v18, %v229_v9  ;;  %v189_v21 = vadd.f32 %v269_v19, %v229_v9 }
  0xcc   :  { %v148_v22 = vpop.f32.mrf.mxu0  ;;  %v180_v23 = vpop.f32.mrf.mxu1 }
  0xcd   :  { %212 = vst.msk [vmem:[%s410_s3 + $0x18] sm:$0xff] %vm208_vm1, %v157_v20  ;;  %220 = vst.msk [vmem:[%s410_s3 + $0x58] sm:$0xff] %vm208_vm1, %v189_v21  ;;  %v149_v24 = vadd.f32 %v229_v9, %v148_v22  ;;  %v181_v25 = vadd.f32 %v229_v9, %v180_v23 }
  0xce   :  { %v264_v26 = vpop.f32.mrf.mxu0  ;;  %v272_v27 = vpop.f32.mrf.mxu1 }
  0xcf   :  { %210 = vst.msk [vmem:[%s410_s3 + $0x8] sm:$0xff] %vm208_vm1, %v149_v24  ;;  %218 = vst.msk [vmem:[%s410_s3 + $0x48] sm:$0xff] %vm208_vm1, %v181_v25  ;;  %v170_v28 = vadd.f32 %v264_v26, %v229_v9  ;;  %v202_v29 = vadd.f32 %v272_v27, %v229_v9 }
  0xd0   :  { %v161_v30 = vpop.f32.mrf.mxu0  ;;  %v193_v31 = vpop.f32.mrf.mxu1 }
  0xd1   :  { %215 = vst.msk [vmem:[%s410_s3 + $0x30] sm:$0xff] %vm208_vm1, %v170_v28  ;;  %223 = vst.msk [vmem:[%s410_s3 + $0x70] sm:$0xff] %vm208_vm1, %v202_v29  ;;  %v162_v32 = vadd.f32 %v229_v9, %v161_v30  ;;  %v194_v33 = vadd.f32 %v229_v9, %v193_v31 }
  0xd2   :  { %v265_v34 = vpop.f32.mrf.mxu0  ;;  %v273_v35 = vpop.f32.mrf.mxu1 }
  0xd3   :  { %213 = vst.msk [vmem:[%s410_s3 + $0x20] sm:$0xff] %vm208_vm1, %v162_v32  ;;  %221 = vst.msk [vmem:[%s410_s3 + $0x60] sm:$0xff] %vm208_vm1, %v194_v33  ;;  %v173_v36 = vadd.f32 %v265_v34, %v229_v9  ;;  %v205_v37 = vadd.f32 %v273_v35, %v229_v9 }
  0xd4   :  { %v164_v38 = vpop.f32.mrf.mxu0  ;;  %v196_v39 = vpop.f32.mrf.mxu1 }
  0xd5   :  { %216 = vst.msk [vmem:[%s410_s3 + $0x38] sm:$0xff] %vm208_vm1, %v173_v36  ;;  %224 = vst.msk [vmem:[%s410_s3 + $0x78] sm:$0xff] %vm208_vm1, %v205_v37  ;;  %v165_v40 = vadd.f32 %v229_v9, %v164_v38  ;;  %v197_v41 = vadd.f32 %v229_v9, %v196_v39 }
  0xd7   :  { %214 = vst.msk [vmem:[%s410_s3 + $0x28] sm:$0xff] %vm208_vm1, %v165_v40  ;;  %222 = vst.msk [vmem:[%s410_s3 + $0x68] sm:$0xff] %vm208_vm1, %v197_v41 }

// kernel: finetuned_sam2_forward.31
= control target key start
LH: loop header
LB: loop body
LE: loop exit
PB: predicated region body
PF: predicated region fallthrough
CT: control target
= control target key end

     0   :  { %s346_s9 = smov 0   ;;  %s366_s0 = inlined_call_operand.vmem [shape: bf16[2,4,8], index: 0, kind: input, shape index: {}]   ;;  %s367_s1 = inlined_call_operand.vmem [shape: bf16[2,8,256], index: 1, kind: input, shape index: {}]   ;;  %s368_s2 = inlined_call_operand.vmem [shape: f32[2,4,256], index: 2, kind: output, shape index: {}]  }
   0x1 LB: > { %s293_s10 = sadd.s32 4294967295, %s328_s9   ;;  %p297_p0 = scmp.ge.s32.totalorder %s328_s9, 1  ;;  %s328_s9 = sphi %s346_s9, %s12_s9  }
   0x2   : > { %p121_p1 = scmp.lt.s32.totalorder %s328_s9, 3 }
   0x4   : > { %p122_p2 = pnand %p297_p0, %p121_p1 }
   0x5   : > { %p147_p3 = scmp.lt.s32.totalorder (!%p122_p2), %s293_s10, 1 }
   0x6   : > { %125 = sbr.rel (%p122_p2) target bundleno = 220 (0xdc), region = 28 }
   0xb   : > { %v330_v0 = vmov 0   ;;  %s370_s10 = smov (!%p147_p3, %s293_s10), 1  ;;  %vm173_vm0 = vcmask 1043456   ;;  %vm169_vm1 = vcmask 64512  }
   0xc   : > { %212 = vmatprep.mubr.bf16.mxu0 %v330_v0  ;;  %s309_s11 = sshll.u32 %s370_s10, 3  ;;  %s298_s12 = sshll.u32 %s370_s10, 1 }
   0xd   : > { %s155_s15 = scalar_lea.vmem %s367_s1, %s309_s11  ;;  %s150_s18 = scalar_lea.vmem %s366_s0, %s298_s12 }
   0xe   : > { %v163_v1 = vld [vmem:[%s155_s15] sm:$0xff]  ;;  %s160_s21 = scalar_lea.vmem %s368_s2, %s309_s11 }
   0xf   : > { %v304_v2 = vcombine.high %v163_v1, %v163_v1  ;;  %v303_v3 = vcombine.low %v163_v1, %v163_v1  ;;  %v162_v5 = vld [vmem:[%s150_s18] sm:$0x3] }
  0x11   : > { %305 = vmatprep.subr.msk.bf16.mxu0 %vm173_vm0, %v304_v2  ;;  %v175_v4 = vsel %vm173_vm0, %v303_v3, 0 }
  0x12   : > { %195 = vmatpush1.bf16.msra.mxu0 %v175_v4 }
  0x15   : > { %306 = vmatmul.mubr.msk.bf16.vlgmr.msra.gmra.mxu0 %vm169_vm1, %v162_v5 }
  0xd5   : > { %v214_v6 = vpop.f32.mrf.mxu0 }
  0xd7   : > { %v216_v7 = vpop.f32.mrf.mxu0 }
  0xd8   : > { %v223_v8 = vcombine.low %v214_v6, %v216_v7 }
  0xd9   : > { %v218_v9 = vpop.f32.mrf.mxu0 }
  0xda   : > { %225 = vst [vmem:[%s160_s21] sm:$0xff] %v223_v8 }
  0xdb   : > { %v219_v10 = vpop.f32.mrf.mxu0 }
  0xdc PF: > { %s12_s9 = sadd.s32 1, %s328_s9  }
  0xdd   : > { %p9_p4 = scmp.ge.s32.totalorder %s12_s9, 4  }
  0xdf   :  { %11 = sbr.rel (!%p9_p4) target bundleno = 1 (0x1), region = 61 }

</bundles_post_ra>
